<compile_context>
chip_gen: v6e
topology: v6e:2x2x1
jax: 0.10.0
libtpu: 0.0.40
codegen_flags: <defaults>
</compile_context>

<pallas_src>
import functools
from types import SimpleNamespace

import jax
import jax.numpy as jnp
from jax import lax
from jax.experimental import pallas as pl
from jax.experimental.pallas import tpu as pltpu

_EPS = 1e-12          # torch.nn.functional.normalize default eps
_LANE = 128
_SUBLANE = 8
_POOL_MATRIX_MAX_BYTES = 12 * 1024 * 1024   # MXU-pooling path only if P fits


def _round_up(x, m):
    return ((x + m - 1) // m) * m


def _cdiv(a, b):
    return -(-a // b)


# ---------------------------------------------------------------------------
# Generation-aware sizing
# ---------------------------------------------------------------------------
def _vmem_budgets():
    """(per-buffer feature-tile budget, vmem_limit_bytes)."""
    cap = None
    try:
        info = pltpu.get_tpu_info()
        cap = getattr(info, "vmem_capacity_bytes", None)
    except Exception:
        cap = None
    if cap is None:
        cap = 64 << 20                      # conservative (works everywhere)
    if cap >= (100 << 20):                  # v5e / v6e: 128 MiB physical
        return 16 << 20, 64 << 20
    return 8 << 20, 48 << 20                # v7x: 64 MiB per TensorCore


def _mxu_lane_pad():
    """Class-dim padding: 256 on 256-wide MXUs (v6e/v7x), else 128 (safe)."""
    try:
        info = pltpu.get_tpu_info()
        for attr in ("mxu_column_count", "mxu_columns", "matmul_minor_dim"):
            v = getattr(info, attr, None)
            if v:
                return 256 if int(v) >= 256 else 128
    except Exception:
        pass
    return _LANE


def _batch_tile(B, row_bytes, feat_budget):
    tb = feat_budget // max(1, row_bytes)
    tb = max(_SUBLANE, min(512, (tb // _SUBLANE) * _SUBLANE))
    b8 = _round_up(B, _SUBLANE)
    tb = min(tb, b8)
    # Guarantee >= 2 grid steps for mid/large batches so the "parallel" axis
    # actually shards across v7x's two TensorCores.
    if b8 >= 2 * _SUBLANE:
        tb = min(tb, _round_up(_cdiv(b8, 2), _SUBLANE))
    return tb


def _compiler_params(vmem_limit):
    return pltpu.CompilerParams(dimension_semantics=("parallel",),
                                vmem_limit_bytes=vmem_limit)


# ---------------------------------------------------------------------------
# Pooling matrix (kron(I_C, ones(HW,1)/HW)), bf16, cached per (C, HW)
# ---------------------------------------------------------------------------
_POOL_MATRIX_CACHE = {}


def _pool_matrix(C, HW):
    key = (C, HW)
    if key not in _POOL_MATRIX_CACHE:
        eye = jnp.eye(C, dtype=jnp.float32)
        p = jnp.repeat(eye, HW, axis=0) * (1.0 / HW)    # [C*HW, C]
        _POOL_MATRIX_CACHE[key] = p.astype(jnp.bfloat16)
    return _POOL_MATRIX_CACHE[key]


# ---------------------------------------------------------------------------
# Kernels
# ---------------------------------------------------------------------------
def _pool_fc_kernel(feat_ref, p_ref, w_ref, out_ref, *, normalize, scale):
    # feat_ref: [TB, C*HW] (input dtype), p_ref: [C*HW, C] bf16 (mean-pool),
    # w_ref: [C, Npad] bf16, out_ref: [TB, Npad] f32
    pooled = jnp.dot(feat_ref[...].astype(jnp.bfloat16), p_ref[...],
                     preferred_element_type=jnp.float32)            # [TB, C]
    if normalize:
        ss = jnp.sum(pooled * pooled, axis=-1, keepdims=True)
        # temperature folded into the per-row rsqrt factor: one pass over
        # [TB, C]; no extra pass over the [TB, Npad] logits tile.
        pooled = pooled * (scale * lax.rsqrt(jnp.maximum(ss, _EPS * _EPS)))
    logits = jnp.dot(pooled.astype(jnp.bfloat16), w_ref[...],
                     preferred_element_type=jnp.float32)            # [TB, Npad]
    if (not normalize) and scale != 1.0:
        logits = logits * scale
    out_ref[...] = logits.astype(out_ref.dtype)


def _pool_only_kernel(feat_ref, p_ref, out_ref):
    # feat_ref: [TB, C*HW], p_ref: [C*HW, C] bf16, out_ref: [TB, C]
    pooled = jnp.dot(feat_ref[...].astype(jnp.bfloat16), p_ref[...],
                     preferred_element_type=jnp.float32)
    out_ref[...] = pooled.astype(out_ref.dtype)


# Fallback (lane-sparse reduce) kernels, used only when the pooling matrix
# would be too large for VMEM (very large spatial maps).
def _pool_fc_reduce_kernel(feat_ref, w_ref, out_ref, *, inv_hw, normalize, scale):
    feat = feat_ref[...].astype(jnp.float32)                        # [TB, C, HW]
    pooled = jnp.sum(feat, axis=-1) * inv_hw
    if normalize:
        ss = jnp.sum(pooled * pooled, axis=-1, keepdims=True)
        pooled = pooled * (scale * lax.rsqrt(jnp.maximum(ss, _EPS * _EPS)))
    logits = jnp.dot(pooled.astype(jnp.bfloat16), w_ref[...],
                     preferred_element_type=jnp.float32)
    if (not normalize) and scale != 1.0:
        logits = logits * scale
    out_ref[...] = logits.astype(out_ref.dtype)


def _pool_only_reduce_kernel(feat_ref, out_ref, *, inv_hw):
    feat = feat_ref[...].astype(jnp.float32)
    out_ref[...] = (jnp.sum(feat, axis=-1) * inv_hw).astype(out_ref.dtype)


# ---------------------------------------------------------------------------
# Wrappers
# ---------------------------------------------------------------------------
def _pool_fc_call(x_nchw, w_t_padded, n_valid, *, normalize, scale):
    B, C, H, W = x_nchw.shape
    HW = H * W
    CHW = C * HW
    n_pad = w_t_padded.shape[1]
    feat_budget, vmem_limit = _vmem_budgets()
    itemsize = x_nchw.dtype.itemsize
    p_bytes = CHW * C * 2                               # bf16 pooling matrix

    if p_bytes <= _POOL_MATRIX_MAX_BYTES:
        # Lane-dense MXU-pooling path (preferred).
        feat = x_nchw.reshape(B, CHW)                   # free reshape, no pad
        tb = _batch_tile(B, CHW * itemsize, feat_budget)
        kernel = functools.partial(_pool_fc_kernel, normalize=normalize,
                                   scale=float(scale))
        cost = pl.CostEstimate(
            flops=2 * B * CHW * C + 2 * B * C * n_pad,
            transcendentals=B if normalize else 0,
            bytes_accessed=B * CHW * itemsize + p_bytes + C * n_pad * 2
                           + B * n_pad * 4)
        out = pl.pallas_call(
            kernel,
            out_shape=jax.ShapeDtypeStruct((B, n_pad), jnp.float32),
            grid=(_cdiv(B, tb),),
            in_specs=[
                pl.BlockSpec((tb, CHW), lambda i: (i, 0)),       # feat tile
                pl.BlockSpec((CHW, C), lambda i: (0, 0)),        # pool matrix
                pl.BlockSpec((C, n_pad), lambda i: (0, 0)),      # classifier W
            ],
            out_specs=pl.BlockSpec((tb, n_pad), lambda i: (i, 0)),
            compiler_params=_compiler_params(vmem_limit),
            cost_estimate=cost,
        )(feat, _pool_matrix(C, HW), w_t_padded)
        return out[:, :n_valid]

    # Fallback: lane-sparse reduce over the HW axis (large spatial maps).
    feat = x_nchw.reshape(B, C, HW)
    row_bytes = C * _round_up(HW, _LANE) * itemsize     # VMEM lane padding
    tb = _batch_tile(B, row_bytes, feat_budget)
    kernel = functools.partial(_pool_fc_reduce_kernel, inv_hw=1.0 / HW,
                               normalize=normalize, scale=float(scale))
    cost = pl.CostEstimate(
        flops=B * C * HW + 2 * B * C * n_pad,
        transcendentals=B if normalize else 0,
        bytes_accessed=B * C * HW * itemsize + C * n_pad * 2 + B * n_pad * 4)
    out = pl.pallas_call(
        kernel,
        out_shape=jax.ShapeDtypeStruct((B, n_pad), jnp.float32),
        grid=(_cdiv(B, tb),),
        in_specs=[pl.BlockSpec((tb, C, HW), lambda i: (i, 0, 0)),
                  pl.BlockSpec((C, n_pad), lambda i: (0, 0))],
        out_specs=pl.BlockSpec((tb, n_pad), lambda i: (i, 0)),
        compiler_params=_compiler_params(vmem_limit),
        cost_estimate=cost,
    )(feat, w_t_padded)
    return out[:, :n_valid]


def _pool_only_call(x_nchw):
    B, C, H, W = x_nchw.shape
    HW = H * W
    CHW = C * HW
    feat_budget, vmem_limit = _vmem_budgets()
    itemsize = x_nchw.dtype.itemsize
    p_bytes = CHW * C * 2

    if p_bytes <= _POOL_MATRIX_MAX_BYTES:
        feat = x_nchw.reshape(B, CHW)
        tb = _batch_tile(B, CHW * itemsize, feat_budget)
        cost = pl.CostEstimate(flops=2 * B * CHW * C, transcendentals=0,
                               bytes_accessed=B * CHW * itemsize + p_bytes
                                              + B * C * 4)
        return pl.pallas_call(
            _pool_only_kernel,
            out_shape=jax.ShapeDtypeStruct((B, C), jnp.float32),
            grid=(_cdiv(B, tb),),
            in_specs=[pl.BlockSpec((tb, CHW), lambda i: (i, 0)),
                      pl.BlockSpec((CHW, C), lambda i: (0, 0))],
            out_specs=pl.BlockSpec((tb, C), lambda i: (i, 0)),
            compiler_params=_compiler_params(vmem_limit),
            cost_estimate=cost,
        )(feat, _pool_matrix(C, HW))

    feat = x_nchw.reshape(B, C, HW)
    row_bytes = C * _round_up(HW, _LANE) * itemsize
    tb = _batch_tile(B, row_bytes, feat_budget)
    kernel = functools.partial(_pool_only_reduce_kernel, inv_hw=1.0 / HW)
    cost = pl.CostEstimate(flops=B * C * HW, transcendentals=0,
                           bytes_accessed=B * C * HW * itemsize + B * C * 4)
    return pl.pallas_call(
        kernel,
        out_shape=jax.ShapeDtypeStruct((B, C), jnp.float32),
        grid=(_cdiv(B, tb),),
        in_specs=[pl.BlockSpec((tb, C, HW), lambda i: (i, 0, 0))],
        out_specs=pl.BlockSpec((tb, C), lambda i: (i, 0)),
        compiler_params=_compiler_params(vmem_limit),
        cost_estimate=cost,
    )(feat)


# ---------------------------------------------------------------------------
# Weight preprocessing (done once at init / after any classifier update)
# ---------------------------------------------------------------------------
def _l2_normalize_rows(w):
    norm = jnp.linalg.norm(w, axis=-1, keepdims=True)
    return w / jnp.maximum(norm, _EPS)


def _pad_transpose(w, lane_pad):
    # [N, C] f32 -> zero-pad N to a multiple of lane_pad -> [C, Npad] bf16
    n, c = w.shape
    n_pad = _round_up(max(n, 1), lane_pad)
    if n_pad != n:
        w = jnp.pad(w, ((0, n_pad - n), (0, 0)))
    return jnp.transpose(w).astype(jnp.bfloat16)


# ---------------------------------------------------------------------------
# MYNET port
# ---------------------------------------------------------------------------
class MYNETPallas:
    """JAX/Pallas port of MYNET's forward pass (post-encoder)."""

    def __init__(self, args, mode, key):
        self.args = args
        self.mode = mode
        self.num_features = 512

        total_num_of_cls = self.get_total_num_of_cls(0)
        k1, k2, k3 = jax.random.split(key, 3)
        bound = 1.0 / (self.num_features ** 0.5)  # torch.nn.Linear default init
        self.fc_w = jax.random.uniform(
            k1, (total_num_of_cls, self.num_features), jnp.float32, -bound, bound)
        self.fc_base_w = jax.random.uniform(
            k2, (args.base_class, self.num_features), jnp.float32, -bound, bound)
        self.fc_inc_w = jax.random.uniform(
            k3, (args.way, self.num_features), jnp.float32, -bound, bound)

        self._lane_pad = _mxu_lane_pad()
        self._refresh_derived()

    def _refresh_derived(self):
        """Recompute padded / transposed / normalized bf16 weight variants.

        Must be called after any classifier-weight update (e.g. the FSCIL
        update_fc / update_fc_avg style prototype rewrites) so the 'cos'
        branch never uses stale normalized weights."""
        self.fc_n = self.fc_w.shape[0]
        self.fc_base_n = self.fc_base_w.shape[0]
        self.fc_inc_n = self.fc_inc_w.shape[0]
        self.fc_w_t = _pad_transpose(self.fc_w, self._lane_pad)
        self.fc_base_w_t = _pad_transpose(self.fc_base_w, self._lane_pad)
        self.fc_inc_w_t = _pad_transpose(self.fc_inc_w, self._lane_pad)
        self.fc_w_t_cos = _pad_transpose(_l2_normalize_rows(self.fc_w),
                                         self._lane_pad)

    def get_total_num_of_cls(self, session):
        aug_for_base = int(self.args.base_class * (self.args.base_class - 1) / 2)
        aug_for_inc = int(self.args.way * (self.args.way - 1) / 2)
        aug_num_of_cls = aug_for_base + (self.args.sessions - 1) * aug_for_inc
        return self.args.num_classes + aug_num_of_cls

    def encode(self, x_nchw):
        # TODO(synk): resnet18 backbone not applied; x_nchw is the encoder's
        # feature map. avg-pool + squeeze is fused in the Pallas kernel.
        return _pool_only_call(x_nchw)

    def forward_metric(self, x_nchw):
        if 'cos' in self.mode:
            return _pool_fc_call(x_nchw, self.fc_w_t_cos, self.fc_n,
                                 normalize=True, scale=self.args.temperature)
        return _pool_fc_call(x_nchw, self.fc_w_t, self.fc_n,
                             normalize=False, scale=1.0)

    def __call__(self, x_nchw):
        if self.mode == 'output_entropy_base':
            return _pool_fc_call(x_nchw, self.fc_base_w_t, self.fc_base_n,
                                 normalize=False, scale=1.0)
        elif self.mode == 'output_entropy_inc':
            return _pool_fc_call(x_nchw, self.fc_inc_w_t, self.fc_inc_n,
                                 normalize=False, scale=1.0)
        elif self.mode == 'encoder':
            return self.encode(x_nchw)
        else:
            return self.forward_metric(x_nchw)


# ---------------------------------------------------------------------------
# Pure-JAX f32 reference (matches the PyTorch forward post-encoder)
# ---------------------------------------------------------------------------
def _reference_forward(net, x_nchw):
    pooled = jnp.mean(x_nchw.astype(jnp.float32), axis=(2, 3))
    if net.mode == 'output_entropy_base':
        return pooled @ net.fc_base_w.T
    if net.mode == 'output_entropy_inc':
        return pooled @ net.fc_inc_w.T
    if net.mode == 'encoder':
        return pooled
    if 'cos' in net.mode:
        pn = pooled / jnp.maximum(jnp.linalg.norm(pooled, axis=-1, keepdims=True), _EPS)
        wn = net.fc_w / jnp.maximum(jnp.linalg.norm(net.fc_w, axis=-1, keepdims=True), _EPS)
        return net.args.temperature * (pn @ wn.T)
    return pooled @ net.fc_w.T


if __name__ == "__main__":
    args = SimpleNamespace(
        dataset='cifar100',
        base_class=4,
        way=2,
        sessions=3,
        num_classes=8,
        temperature=16.0,
    )
    key = jax.random.PRNGKey(0)
    k_in, k_param = jax.random.split(key)

    # encoder feature map (resnet18_cifar on 32x32 input): [B, 512, 4, 4]
    x = jax.random.normal(k_in, (2, 512, 4, 4), jnp.float32)

    ok = True
    for mode in ['ft_cos', 'ft_dot', 'output_entropy_base',
                 'output_entropy_inc', 'encoder']:
        net = MYNETPallas(args, mode, k_param)
        out = jax.block_until_ready(net(x))
        ref = _reference_forward(net, x)
        # bf16 MXU path -> loosened tolerance vs the f32 reference.
        if out.shape != ref.shape or not jnp.allclose(out, ref, atol=3e-2, rtol=3e-2):
            ok = False
            err = float(jnp.max(jnp.abs(out - ref))) if out.shape == ref.shape else -1.0
            print(f"mismatch in mode={mode} (max_abs_err={err})")

    if ok:
        print("KERNEL_OK")
</pallas_src>

<mosaic_0001>
module attributes {stable_mosaic.version = 11 : i64} {
  func.func @_pool_fc_kernel(%arg0: i32, %arg1: memref<8x8192xf32, #tpu.memory_space<vmem>>, %arg2: memref<8192x512xbf16, #tpu.memory_space<vmem>>, %arg3: memref<512x128xbf16, #tpu.memory_space<vmem>>, %arg4: memref<8x128xf32, #tpu.memory_space<vmem>>) attributes {dimension_semantics = [#tpu.dimension_semantics<parallel>], iteration_bounds = array<i64: 1>, scalar_prefetch = 0 : i64, scratch_operands = 0 : i64, tpu.core_type = #tpu.core_type<tc>, window_params = [{transform_indices = @transform_0, window_bounds = array<i64: 8, 8192>}, {pipeline_mode = #tpu.pipeline_mode<synchronous>, transform_indices = @transform_1, window_bounds = array<i64: 8192, 512>}, {pipeline_mode = #tpu.pipeline_mode<synchronous>, transform_indices = @transform_2, window_bounds = array<i64: 512, 128>}, {transform_indices = @transform_3, window_bounds = array<i64: 8, 128>}]} {
    %c0 = arith.constant 0 : index
    %c0_0 = arith.constant 0 : index
    %0 = vector.load %arg1[%c0, %c0_0] : memref<8x8192xf32, #tpu.memory_space<vmem>>, vector<8x8192xf32>
    %1 = arith.truncf %0 : vector<8x8192xf32> to vector<8x8192xbf16>
    %c0_1 = arith.constant 0 : index
    %c0_2 = arith.constant 0 : index
    %2 = vector.load %arg2[%c0_1, %c0_2] : memref<8192x512xbf16, #tpu.memory_space<vmem>>, vector<8192x512xbf16>
    %cst = arith.constant dense<0.000000e+00> : vector<8x512xf32>
    %3 = tpu.matmul %1, %2, %cst {dimension_numbers = #tpu.dot_dimension_numbers<[1], [0], [0], [1], [0, 0, 1, 1], [], []>} : vector<8x8192xbf16>, vector<8192x512xbf16>, vector<8x512xf32> -> vector<8x512xf32>
    %4 = arith.mulf %3, %3 : vector<8x512xf32>
    %cst_3 = arith.constant dense<0.000000e+00> : vector<8xf32>
    %5 = vector.multi_reduction <add>, %4, %cst_3 [1] : vector<8x512xf32> to vector<8xf32>
    %6 = vector.shape_cast %5 : vector<8xf32> to vector<8x1xf32>
    %cst_4 = arith.constant 1.000000e-24 : f32
    %7 = vector.broadcast %cst_4 : f32 to vector<8x1xf32>
    %8 = arith.maximumf %6, %7 : vector<8x1xf32>
    %9 = math.rsqrt %8 : vector<8x1xf32>
    %cst_5 = arith.constant 1.600000e+01 : f32
    %10 = vector.broadcast %cst_5 : f32 to vector<8x1xf32>
    %11 = arith.mulf %10, %9 : vector<8x1xf32>
    %12 = vector.broadcast %11 : vector<8x1xf32> to vector<8x512xf32>
    %13 = arith.mulf %3, %12 : vector<8x512xf32>
    %14 = arith.truncf %13 : vector<8x512xf32> to vector<8x512xbf16>
    %c0_6 = arith.constant 0 : index
    %c0_7 = arith.constant 0 : index
    %15 = vector.load %arg3[%c0_6, %c0_7] : memref<512x128xbf16, #tpu.memory_space<vmem>>, vector<512x128xbf16>
    %cst_8 = arith.constant dense<0.000000e+00> : vector<8x128xf32>
    %16 = tpu.matmul %14, %15, %cst_8 {dimension_numbers = #tpu.dot_dimension_numbers<[1], [0], [0], [1], [0, 0, 1, 1], [], []>} : vector<8x512xbf16>, vector<512x128xbf16>, vector<8x128xf32> -> vector<8x128xf32>
    %c0_9 = arith.constant 0 : index
    %c0_10 = arith.constant 0 : index
    %17 = vector.load %arg4[%c0_9, %c0_10] : memref<8x128xf32, #tpu.memory_space<vmem>>, vector<8x128xf32>
    tpu.vector_store %arg4[%c0_9, %c0_10], %16 {strides = array<i32>} : memref<8x128xf32, #tpu.memory_space<vmem>>, vector<8x128xf32>,
    return
  }
  func.func @transform_0(%arg0: i32) -> (i32, i32) {
    %c0_i32 = arith.constant 0 : i32
    %c0_i32_0 = arith.constant 0 : i32
    return %arg0, %c0_i32 : i32, i32
  }
  func.func @transform_1(%arg0: i32) -> (i32, i32) {
    %c0_i32 = arith.constant 0 : i32
    %c0_i32_0 = arith.constant 0 : i32
    %c0_i32_1 = arith.constant 0 : i32
    return %c0_i32, %c0_i32_0 : i32, i32
  }
  func.func @transform_2(%arg0: i32) -> (i32, i32) {
    %c0_i32 = arith.constant 0 : i32
    %c0_i32_0 = arith.constant 0 : i32
    %c0_i32_1 = arith.constant 0 : i32
    return %c0_i32, %c0_i32_0 : i32, i32
  }
  func.func @transform_3(%arg0: i32) -> (i32, i32) {
    %c0_i32 = arith.constant 0 : i32
    %c0_i32_0 = arith.constant 0 : i32
    return %arg0, %c0_i32 : i32, i32
  }
}

</mosaic_0001>

<bundles_post_ra>
// kernel: tpu_custom_call.1
= control target key start
LH: loop header
LB: loop body
LE: loop exit
PB: predicated region body
PF: predicated region fallthrough
CT: control target
= control target key end

     0   :  { %8 = vsyncpa [#allocation3], 0  ;;  %s22294_s0 = inlined_call_operand.hbm [shape: f32[2,8192], index: 0, kind: input, shape index: {}]   ;;  %s22295_s1 = inlined_call_operand.hbm [shape: bf16[8192,512], index: 1, kind: input, shape index: {}]   ;;  %s22296_s2 = inlined_call_operand.hbm [shape: bf16[512,128], index: 2, kind: input, shape index: {}]   ;;  %s22297_s3 = inlined_call_operand.hbm [shape: f32[2,128], index: 3, kind: output, shape index: {}]  }
   0x1   :  { %9 = vsyncpa [#allocation6], 0 }
   0x2   :  { %10 = vsyncpa [#allocation4], 0 }
   0x3   :  { %15 = vsyncadd [#allocation3], 6144  ;;  %s21505_s12 = smov [#allocation5]  }
   0x4   :  { %s28_s13 = sshll.u32 %s21505_s12, 4  ;;  %s29_s13 = int_to_ptr.vmem [resolvable:$true] %s28_s13 }
   0x5   :  { %s21427_s14 = scalar_lea.vmem %s29_s13, 262144  ;;  %p21432_p1 = scmp.lt.s32.totalorder %s29_s13, %s29_s13 }
   0x6   :  { %p21428_p0 = scmp.ne.s32.totalorder %s29_s13, %s21427_s14  ;;  %p21433_p2 = scmp.lt.s32.totalorder %s21427_s14, %s21427_s14 }
   0x8   :  { %p21434_p3 = por %p21433_p2, %p21432_p1 }
   0xa   :  { %p21435_p4 = pnand %p21434_p3, %p21428_p0 }
   0xc   :  { %21438 = shalt.err (!%p21435_p4)
}
   0xd   :  { %s21506_s15 = smov 256   ;;  %s21507_s16 = smov 16  }
   0xe   :  { %34 = dma.hbm_to_vmem [thread:$0]  %s22295_s1, 262144, %s29_s13, [#allocation6], %s21506_s15, %s21506_s15, %s21507_s16  }
   0xf   :  { %s21508_s19 = smov [#allocation2]  }
  0x10   :  { %s16_s20 = sshll.u32 %s21508_s19, 4  ;;  %s17_s20 = int_to_ptr.vmem [resolvable:$true] %s16_s20 }
  0x11   :  { %s21447_s21 = scalar_lea.vmem %s17_s20, 2048  ;;  %s21451_s22 = scalar_lea.vmem %s17_s20, 8192 }
  0x12   :  { %p21448_p5 = scmp.ne.s32.totalorder %s17_s20, %s21447_s21  ;;  %p21452_p6 = scmp.lt.s32.totalorder %s17_s20, %s17_s20 }
  0x13   :  { %p21453_p7 = scmp.lt.s32.totalorder %s21451_s22, %s21447_s21 }
  0x15   :  { %p21454_p8 = por %p21453_p7, %p21452_p6 }
  0x17   :  { %p21455_p9 = pnand %p21454_p8, %p21448_p5 }
  0x19   :  { %21458 = shalt.err (!%p21455_p9)
}
  0x1a   :  { %s21509_s23 = smov 2048   ;;  %s21510_s24 = smov 128  }
  0x1b   :  { %22 = dma.hbm_to_vmem [thread:$0]  %s22294_s0, 2048, %s17_s20, [#allocation3], %s21509_s23, %s21509_s23, %s21510_s24  }
  0x1c   :  { %s21511_s27 = smov [#allocation7]  }
  0x1d   :  { %s40_s28 = sshll.u32 %s21511_s27, 4  ;;  %s41_s28 = int_to_ptr.vmem [resolvable:$true] %s40_s28 }
  0x1e   :  { %s21467_s1 = scalar_lea.vmem %s41_s28, 4096  ;;  %p21472_p11 = scmp.lt.s32.totalorder %s41_s28, %s41_s28 }
  0x1f   :  { %p21468_p10 = scmp.ne.s32.totalorder %s41_s28, %s21467_s1  ;;  %p21473_p12 = scmp.lt.s32.totalorder %s21467_s1, %s21467_s1 }
  0x21   :  { %p21474_p13 = por %p21473_p12, %p21472_p11 }
  0x23   :  { %p21475_p0 = pnand %p21474_p13, %p21468_p10 }
  0x25   :  { %21478 = shalt.err (!%p21475_p0)
}
  0x26   :  { %s21512_s29 = smov 64   ;;  %s21513_s30 = smov 4  }
  0x27   :  { %46 = dma.hbm_to_vmem [thread:$0]  %s22296_s2, 4096, %s41_s28, [#allocation6], %s21512_s29, %s21512_s29, %s21513_s30  }
  0x28   :  { %21499 = dma.done.wait [#allocation3], 8192  }
  0x29   :  { %21500 = vsyncadd [#allocation3], 4294959104 }
  0x2a   :  { %21501 = dma.done.wait [#allocation6], 266240  }
  0x2b   :  { %21502 = vsyncadd [#allocation6], 4294701056  ;;  %v18313_v0 = vld [vmem:[#allocation5 + $0xe4] ss:$16 sps:$4 sm:$0xff]   ;;  %v18317_v2 = vld [vmem:[#allocation5 + $0xe0] ss:$16 sps:$4 sm:$0xff]   ;;  %v192_v40 = vlaneseq }
  0x2c   :  { %v18315_v1 = vld [vmem:[#allocation5 + $0x2e4] ss:$16 sps:$4 sm:$0xff]   ;;  %13177 = vmatprep.subr.bf16.mxu0 %v18313_v0  ;;  %v18318_v3 = vld [vmem:[#allocation5 + $0x2e0] ss:$16 sps:$4 sm:$0xff]   ;;  %v21514_v38 = vmov 1983009808  }
  0x2d   :  { %13218 = vmatprep.subr.bf16.mxu1 %v18315_v1  ;;  %v18319_v4 = vld [vmem:[#allocation5 + $0xc4] ss:$16 sps:$4 sm:$0xff]   ;;  %13178 = vmatpush1.bf16.msra.mxu0 %v18317_v2  ;;  %v18323_v6 = vld [vmem:[#allocation5 + $0xc0] ss:$16 sps:$4 sm:$0xff]   ;;  %v190_v39 = vunpack.c.l.s4 %v21514_v38  ;;  %v193_v46 = vshrl.u32 %v192_v40, 7 }
  0x2e   :  { %13219 = vmatpush1.bf16.msra.mxu1 %v18318_v3  ;;  %v18321_v5 = vld [vmem:[#allocation5 + $0x2c4] ss:$16 sps:$4 sm:$0xff]   ;;  %13179 = vmatprep.subr.bf16.mxu0 %v18319_v4  ;;  %v18324_v7 = vld [vmem:[#allocation5 + $0x2c0] ss:$16 sps:$4 sm:$0xff]  }
  0x2f   :  { %13220 = vmatprep.subr.bf16.mxu1 %v18321_v5  ;;  %v18325_v8 = vld [vmem:[#allocation5 + $0xa4] ss:$16 sps:$4 sm:$0xff]   ;;  %v18329_v10 = vld [vmem:[#allocation5 + $0xa0] ss:$16 sps:$4 sm:$0xff]   ;;  %v191_v45 = vunpack.c.0.s8 %v190_v39 }
  0x30   :  { %v18327_v9 = vld [vmem:[#allocation5 + $0x2a4] ss:$16 sps:$4 sm:$0xff]   ;;  %v18330_v11 = vld [vmem:[#allocation5 + $0x2a0] ss:$16 sps:$4 sm:$0xff]  }
  0x31   :  { %13180 = vmatpush1.bf16.msra.mxu0 %v18323_v6  ;;  %v18331_v12 = vld [vmem:[#allocation5 + $0x84] ss:$16 sps:$4 sm:$0xff]   ;;  %v18335_v14 = vld [vmem:[#allocation5 + $0x80] ss:$16 sps:$4 sm:$0xff]   ;;  %v21547_v54 = vsub.s32 %v191_v45, %v193_v46 }
  0x32   :  { %13221 = vmatpush1.bf16.msra.mxu1 %v18324_v7  ;;  %13181 = vmatprep.subr.bf16.mxu0 %v18325_v8  ;;  %v18333_v13 = vld [vmem:[#allocation5 + $0x284] ss:$16 sps:$4 sm:$0xff]   ;;  %v18336_v15 = vld [vmem:[#allocation5 + $0x280] ss:$16 sps:$4 sm:$0xff]  }
  0x33   :  { %13222 = vmatprep.subr.bf16.mxu1 %v18327_v9  ;;  %v18337_v16 = vld [vmem:[#allocation5 + $0x64] ss:$16 sps:$4 sm:$0xff]   ;;  %v18341_v18 = vld [vmem:[#allocation5 + $0x60] ss:$16 sps:$4 sm:$0xff]  }
  0x34   :  { %v18339_v17 = vld [vmem:[#allocation5 + $0x264] ss:$16 sps:$4 sm:$0xff]   ;;  %v18342_v19 = vld [vmem:[#allocation5 + $0x260] ss:$16 sps:$4 sm:$0xff]  }
  0x35   :  { %13182 = vmatpush1.bf16.msra.mxu0 %v18329_v10  ;;  %v18343_v20 = vld [vmem:[#allocation5 + $0x44] ss:$16 sps:$4 sm:$0xff]   ;;  %v18347_v22 = vld [vmem:[#allocation5 + $0x40] ss:$16 sps:$4 sm:$0xff]  }
  0x36   :  { %13223 = vmatpush1.bf16.msra.mxu1 %v18330_v11  ;;  %13183 = vmatprep.subr.bf16.mxu0 %v18331_v12  ;;  %v18345_v21 = vld [vmem:[#allocation5 + $0x244] ss:$16 sps:$4 sm:$0xff]   ;;  %v18348_v23 = vld [vmem:[#allocation5 + $0x240] ss:$16 sps:$4 sm:$0xff]  }
  0x37   :  { %13224 = vmatprep.subr.bf16.mxu1 %v18333_v13  ;;  %v18349_v24 = vld [vmem:[#allocation5 + $0x24] ss:$16 sps:$4 sm:$0xff]   ;;  %v18353_v26 = vld [vmem:[#allocation5 + $0x20] ss:$16 sps:$4 sm:$0xff]  }
  0x38   :  { %v18351_v25 = vld [vmem:[#allocation5 + $0x224] ss:$16 sps:$4 sm:$0xff]   ;;  %v18354_v27 = vld [vmem:[#allocation5 + $0x220] ss:$16 sps:$4 sm:$0xff]  }
  0x39   :  { %13184 = vmatpush1.bf16.msra.mxu0 %v18335_v14  ;;  %v18355_v28 = vld [vmem:[#allocation5 + $0x4] ss:$16 sps:$4 sm:$0xff]   ;;  %v18359_v30 = vld [vmem:[#allocation5] ss:$16 sps:$4 sm:$0xff]  }
  0x3a   :  { %13225 = vmatpush1.bf16.msra.mxu1 %v18336_v15  ;;  %13185 = vmatprep.subr.bf16.mxu0 %v18337_v16  ;;  %v18357_v29 = vld [vmem:[#allocation5 + $0x204] ss:$16 sps:$4 sm:$0xff]   ;;  %v18360_v31 = vld [vmem:[#allocation5 + $0x200] ss:$16 sps:$4 sm:$0xff]  }
  0x3b   :  { %13226 = vmatprep.subr.bf16.mxu1 %v18339_v17  ;;  %v18361_v32 = vld [vmem:[#allocation5 + $0x1e4] ss:$16 sps:$4 sm:$0xff]   ;;  %v18365_v34 = vld [vmem:[#allocation5 + $0x1e0] ss:$16 sps:$4 sm:$0xff]  }
  0x3c   :  { %v18363_v33 = vld [vmem:[#allocation5 + $0x3e4] ss:$16 sps:$4 sm:$0xff]   ;;  %v18366_v35 = vld [vmem:[#allocation5 + $0x3e0] ss:$16 sps:$4 sm:$0xff]  }
  0x3d   :  { %13186 = vmatpush1.bf16.msra.mxu0 %v18341_v18  ;;  %v18367_v36 = vld [vmem:[#allocation5 + $0x1c4] ss:$16 sps:$4 sm:$0xff]   ;;  %v18371_v41 = vld [vmem:[#allocation5 + $0x1c0] ss:$16 sps:$4 sm:$0xff]  }
  0x3e   :  { %13227 = vmatpush1.bf16.msra.mxu1 %v18342_v19  ;;  %13187 = vmatprep.subr.bf16.mxu0 %v18343_v20  ;;  %v18369_v37 = vld [vmem:[#allocation5 + $0x3c4] ss:$16 sps:$4 sm:$0xff]   ;;  %v18372_v42 = vld [vmem:[#allocation5 + $0x3c0] ss:$16 sps:$4 sm:$0xff]  }
  0x3f   :  { %13228 = vmatprep.subr.bf16.mxu1 %v18345_v21  ;;  %v18373_v43 = vld [vmem:[#allocation5 + $0x1a4] ss:$16 sps:$4 sm:$0xff]   ;;  %v18377_v47 = vld [vmem:[#allocation5 + $0x1a0] ss:$16 sps:$4 sm:$0xff]  }
  0x40   :  { %v18375_v44 = vld [vmem:[#allocation5 + $0x3a4] ss:$16 sps:$4 sm:$0xff]   ;;  %v18378_v48 = vld [vmem:[#allocation5 + $0x3a0] ss:$16 sps:$4 sm:$0xff]  }
  0x41   :  { %13188 = vmatpush1.bf16.msra.mxu0 %v18347_v22  ;;  %v18379_v49 = vld [vmem:[#allocation5 + $0x184] ss:$16 sps:$4 sm:$0xff]   ;;  %v18383_v51 = vld [vmem:[#allocation5 + $0x180] ss:$16 sps:$4 sm:$0xff]  }
  0x42   :  { %13229 = vmatpush1.bf16.msra.mxu1 %v18348_v23  ;;  %13189 = vmatprep.subr.bf16.mxu0 %v18349_v24  ;;  %v18381_v50 = vld [vmem:[#allocation5 + $0x384] ss:$16 sps:$4 sm:$0xff]   ;;  %v18384_v52 = vld [vmem:[#allocation5 + $0x380] ss:$16 sps:$4 sm:$0xff]  }
  0x43   :  { %13230 = vmatprep.subr.bf16.mxu1 %v18351_v25  ;;  %v57_v53 = vld [vmem:[#allocation2] sm:$0xff] }
  0x44   :  { %v73_v55 = vld [vmem:[#allocation2 + $0x80] sm:$0xff] }
  0x45   :  { %13190 = vmatpush1.bf16.msra.mxu0 %v18353_v26  ;;  %v89_v56 = vld [vmem:[#allocation2 + $0x100] sm:$0xff]  ;;  %v185_v59 = vcombine.low %v57_v53, %v73_v55  ;;  %v186_v61 = vcombine.high %v57_v53, %v73_v55  ;;  %v58_v55 = vld [vmem:[#allocation2 + $0x8] sm:$0xff] }
  0x46   :  { %13231 = vmatpush1.bf16.msra.mxu1 %v18354_v27  ;;  %13191 = vmatprep.subr.bf16.mxu0 %v18355_v28  ;;  %v105_v57 = vld [vmem:[#allocation2 + $0x180] sm:$0xff] }
  0x47   :  { %13232 = vmatprep.subr.bf16.mxu1 %v18357_v29  ;;  %v18385_v58 = vld [vmem:[#allocation5 + $0x164] ss:$16 sps:$4 sm:$0xff]   ;;  %v187_v60 = vcombine.low %v89_v56, %v105_v57  ;;  %v188_v63 = vcombine.high %v89_v56, %v105_v57  ;;  %v195_v0 = vrot.slane %v185_v59, %v21547_v54  ;;  %v202_v2 = vrot.slane %v186_v61, %v21547_v54  ;;  %v18389_v3 = vld [vmem:[#allocation5 + $0x160] ss:$16 sps:$4 sm:$0xff]   ;;  %v74_v56 = vld [vmem:[#allocation2 + $0x88] sm:$0xff] }
  0x48   :  { %v18387_v62 = vld [vmem:[#allocation5 + $0x364] ss:$16 sps:$4 sm:$0xff]   ;;  %v18390_v4 = vld [vmem:[#allocation5 + $0x360] ss:$16 sps:$4 sm:$0xff]   ;;  %v90_v57 = vld [vmem:[#allocation2 + $0x108] sm:$0xff] }
  0x49   :  { %13192 = vmatpush1.bf16.msra.mxu0 %v18359_v30  ;;  %v209_v1 = vrot.slane %v187_v60, %v21547_v54  ;;  %v216_v5 = vrot.slane %v188_v63, %v21547_v54  ;;  %v18391_v6 = vld [vmem:[#allocation5 + $0x144] ss:$16 sps:$4 sm:$0xff]   ;;  %v18395_v11 = vld [vmem:[#allocation5 + $0x140] ss:$16 sps:$4 sm:$0xff]   ;;  %v221_v60 = vcombine.low %v58_v55, %v74_v56 }
  0x4a   :  { %13233 = vmatpush1.bf16.msra.mxu1 %v18360_v31  ;;  %13193 = vmatprep.subr.bf16.mxu0 %v18361_v32  ;;  %v18393_v8 = vld [vmem:[#allocation5 + $0x344] ss:$16 sps:$4 sm:$0xff]   ;;  %v18396_v12 = vld [vmem:[#allocation5 + $0x340] ss:$16 sps:$4 sm:$0xff]  }
  0x4b   :  { %13234 = vmatprep.subr.bf16.mxu1 %v18363_v33  ;;  %v218_v7 = vcombine.high %v195_v0, %v209_v1  ;;  %v220_v9 = vcombine.high %v202_v2, %v216_v5  ;;  %v18397_v14 = vld [vmem:[#allocation5 + $0x124] ss:$16 sps:$4 sm:$0xff]   ;;  %v18401_v16 = vld [vmem:[#allocation5 + $0x120] ss:$16 sps:$4 sm:$0xff]   ;;  %v217_v22 = vcombine.low %v195_v0, %v209_v1  ;;  %v219_v23 = vcombine.low %v202_v2, %v216_v5 }
  0x4c   :  { %v18399_v15 = vld [vmem:[#allocation5 + $0x324] ss:$16 sps:$4 sm:$0xff]   ;;  %v18402_v17 = vld [vmem:[#allocation5 + $0x320] ss:$16 sps:$4 sm:$0xff]   ;;  %v21566_v1 = vrot.slane %v221_v60, %v21547_v54 }
  0x4d   :  { %13194 = vmatpush2.bf16.msra.mxu0 %v18365_v34  ;;  %v21553_v10 = vpack.c.bf16 %v218_v7, %v218_v7  ;;  %v21555_v13 = vpack.c.bf16 %v220_v9, %v220_v9  ;;  %v18403_v18 = vld [vmem:[#allocation5 + $0x104] ss:$16 sps:$4 sm:$0xff]   ;;  %v18407_v20 = vld [vmem:[#allocation5 + $0x100] ss:$16 sps:$4 sm:$0xff]   ;;  %v21559_v26 = vpack.c.bf16 %v217_v22, %v217_v22  ;;  %v21561_v27 = vpack.c.bf16 %v219_v23, %v219_v23 }
  0x4e   :  { %13235 = vmatpush2.bf16.msra.mxu1 %v18366_v35  ;;  %13195 = vmatprep.subr.bf16.mxu0 %v18367_v36  ;;  %v18405_v19 = vld [vmem:[#allocation5 + $0x304] ss:$16 sps:$4 sm:$0xff]   ;;  %v18408_v21 = vld [vmem:[#allocation5 + $0x300] ss:$16 sps:$4 sm:$0xff]  }
  0x4f   :  { %13236 = vmatprep.subr.bf16.mxu1 %v18369_v37  ;;  %13209 = vmatprep.mubr.bf16.mxu0 %v21553_v10  ;;  %v18411_v24 = vld [vmem:[#allocation5 + $0x4e4] ss:$16 sps:$4 sm:$0xff]   ;;  %v18409_v28 = vld [vmem:[#allocation5 + $0x4e0] ss:$16 sps:$4 sm:$0xff]  }
  0x50   :  { %13250 = vmatprep.mubr.bf16.mxu1 %v21555_v13  ;;  %v18414_v25 = vld [vmem:[#allocation5 + $0x6e4] ss:$16 sps:$4 sm:$0xff]   ;;  %v18412_v29 = vld [vmem:[#allocation5 + $0x6e0] ss:$16 sps:$4 sm:$0xff]  }
  0x51   :  { %13196 = vmatpush2.bf16.msra.mxu0 %v18371_v41  ;;  %v18417_v30 = vld [vmem:[#allocation5 + $0x4c4] ss:$16 sps:$4 sm:$0xff]   ;;  %v18415_v32 = vld [vmem:[#allocation5 + $0x4c0] ss:$16 sps:$4 sm:$0xff]  }
  0x52   :  { %13237 = vmatpush2.bf16.msra.mxu1 %v18372_v42  ;;  %13197 = vmatprep.subr.bf16.mxu0 %v18373_v43  ;;  %v18420_v31 = vld [vmem:[#allocation5 + $0x6c4] ss:$16 sps:$4 sm:$0xff]   ;;  %v18418_v33 = vld [vmem:[#allocation5 + $0x6c0] ss:$16 sps:$4 sm:$0xff]  }
  0x53   :  { %13238 = vmatprep.subr.bf16.mxu1 %v18375_v44  ;;  %v18423_v34 = vld [vmem:[#allocation5 + $0x4a4] ss:$16 sps:$4 sm:$0xff]   ;;  %v18421_v36 = vld [vmem:[#allocation5 + $0x4a0] ss:$16 sps:$4 sm:$0xff]  }
  0x54   :  { %v18426_v35 = vld [vmem:[#allocation5 + $0x6a4] ss:$16 sps:$4 sm:$0xff]   ;;  %v18424_v37 = vld [vmem:[#allocation5 + $0x6a0] ss:$16 sps:$4 sm:$0xff]  }
  0x55   :  { %13198 = vmatpush2.bf16.msra.mxu0 %v18377_v47  ;;  %v18429_v38 = vld [vmem:[#allocation5 + $0x484] ss:$16 sps:$4 sm:$0xff]   ;;  %v18427_v40 = vld [vmem:[#allocation5 + $0x480] ss:$16 sps:$4 sm:$0xff]  }
  0x56   :  { %13239 = vmatpush2.bf16.msra.mxu1 %v18378_v48  ;;  %13199 = vmatprep.subr.bf16.mxu0 %v18379_v49  ;;  %v18432_v39 = vld [vmem:[#allocation5 + $0x684] ss:$16 sps:$4 sm:$0xff]   ;;  %v18430_v41 = vld [vmem:[#allocation5 + $0x680] ss:$16 sps:$4 sm:$0xff]  }
  0x57   :  { %13240 = vmatprep.subr.bf16.mxu1 %v18381_v50  ;;  %v18435_v42 = vld [vmem:[#allocation5 + $0x464] ss:$16 sps:$4 sm:$0xff]   ;;  %v18433_v44 = vld [vmem:[#allocation5 + $0x460] ss:$16 sps:$4 sm:$0xff]  }
  0x58   :  { %v18438_v43 = vld [vmem:[#allocation5 + $0x664] ss:$16 sps:$4 sm:$0xff]   ;;  %v18436_v45 = vld [vmem:[#allocation5 + $0x660] ss:$16 sps:$4 sm:$0xff]  }
  0x59   :  { %13200 = vmatpush2.bf16.msra.mxu0 %v18383_v51  ;;  %v18441_v46 = vld [vmem:[#allocation5 + $0x444] ss:$16 sps:$4 sm:$0xff]   ;;  %v18439_v48 = vld [vmem:[#allocation5 + $0x440] ss:$16 sps:$4 sm:$0xff]  }
  0x5a   :  { %13241 = vmatpush2.bf16.msra.mxu1 %v18384_v52  ;;  %13201 = vmatprep.subr.bf16.mxu0 %v18385_v58  ;;  %v18444_v47 = vld [vmem:[#allocation5 + $0x644] ss:$16 sps:$4 sm:$0xff]   ;;  %v18442_v49 = vld [vmem:[#allocation5 + $0x640] ss:$16 sps:$4 sm:$0xff]   ;;  %v106_v58 = vld [vmem:[#allocation2 + $0x188] sm:$0xff] }
  0x5b   :  { %13242 = vmatprep.subr.bf16.mxu1 %v18387_v62  ;;  %v18447_v50 = vld [vmem:[#allocation5 + $0x424] ss:$16 sps:$4 sm:$0xff]   ;;  %v18445_v52 = vld [vmem:[#allocation5 + $0x420] ss:$16 sps:$4 sm:$0xff]   ;;  %v223_v61 = vcombine.low %v90_v57, %v106_v58  ;;  %v222_v62 = vcombine.high %v58_v55, %v74_v56  ;;  %v224_v0 = vcombine.high %v90_v57, %v106_v58 }
  0x5c   :  { %v18450_v51 = vld [vmem:[#allocation5 + $0x624] ss:$16 sps:$4 sm:$0xff]   ;;  %v18448_v53 = vld [vmem:[#allocation5 + $0x620] ss:$16 sps:$4 sm:$0xff]  }
  0x5d   :  { %13202 = vmatpush2.bf16.msra.mxu0 %v18389_v3  ;;  %v18453_v59 = vld [vmem:[#allocation5 + $0x404] ss:$16 sps:$4 sm:$0xff]   ;;  %v21569_v2 = vrot.slane %v223_v61, %v21547_v54  ;;  %v21572_v3 = vrot.slane %v222_v62, %v21547_v54  ;;  %v18454_v5 = vld [vmem:[#allocation5 + $0x600] ss:$16 sps:$4 sm:$0xff]  }
  0x5e   :  { %13243 = vmatpush2.bf16.msra.mxu1 %v18390_v4  ;;  %13203 = vmatprep.subr.bf16.mxu0 %v18391_v6  ;;  %v18456_v63 = vld [vmem:[#allocation5 + $0x604] ss:$16 sps:$4 sm:$0xff]   ;;  %v18451_v4 = vld [vmem:[#allocation5 + $0x400] ss:$16 sps:$4 sm:$0xff]   ;;  %v21575_v6 = vrot.slane %v224_v0, %v21547_v54 }
  0x5f   :  { %13244 = vmatprep.subr.bf16.mxu1 %v18393_v8  ;;  %v18459_v7 = vld [vmem:[#allocation5 + $0x5e4] ss:$16 sps:$4 sm:$0xff]   ;;  %v254_v8 = vcombine.high %v21566_v1, %v21569_v2  ;;  %v18469_v23 = vld [vmem:[#allocation5 + $0x5a0] ss:$16 sps:$4 sm:$0xff]  }
  0x60   :  { %v18462_v9 = vld [vmem:[#allocation5 + $0x7e4] ss:$16 sps:$4 sm:$0xff]   ;;  %v18508_v55 = vld [vmem:[#allocation5 + $0xae0] ss:$16 sps:$4 sm:$0xff]  }
  0x61   :  { %13204 = vmatpush2.bf16.msra.mxu0 %v18395_v11  ;;  %v256_v11 = vcombine.high %v21572_v3, %v21575_v6  ;;  %v18474_v22 = vld [vmem:[#allocation5 + $0x7a4] ss:$16 sps:$4 sm:$0xff]   ;;  %v18511_v58 = vld [vmem:[#allocation5 + $0x8c0] ss:$16 sps:$4 sm:$0xff]  }
  0x62   :  { %13245 = vmatpush2.bf16.msra.mxu1 %v18396_v12  ;;  %13205 = vmatprep.subr.bf16.mxu0 %v18397_v14  ;;  %v21581_v12 = vpack.c.bf16 %v254_v8, %v254_v8  ;;  %v18457_v14 = vld [vmem:[#allocation5 + $0x5e0] ss:$16 sps:$4 sm:$0xff]   ;;  %v18513_v56 = vld [vmem:[#allocation5 + $0x8c4] ss:$16 sps:$4 sm:$0xff]  }
  0x63   :  { %13246 = vmatprep.subr.bf16.mxu1 %v18399_v15  ;;  %v18460_v15 = vld [vmem:[#allocation5 + $0x7e0] ss:$16 sps:$4 sm:$0xff]   ;;  %v18516_v57 = vld [vmem:[#allocation5 + $0xac4] ss:$16 sps:$4 sm:$0xff]  }
  0x64   :  { %v59_v60 = vld [vmem:[#allocation2 + $0x10] sm:$0xff] }
  0x65   :  { %13206 = vmatpush2.bf16.msra.mxu0 %v18401_v16  ;;  %v21583_v16 = vpack.c.bf16 %v256_v11, %v256_v11  ;;  %v75_v61 = vld [vmem:[#allocation2 + $0x90] sm:$0xff] }
  0x66   :  { %13247 = vmatpush2.bf16.msra.mxu1 %v18402_v17  ;;  %13207 = vmatprep.subr.bf16.mxu0 %v18403_v18  ;;  %v18465_v17 = vld [vmem:[#allocation5 + $0x5c4] ss:$16 sps:$4 sm:$0xff]   ;;  %v18520_v11 = vld [vmem:[#allocation5 + $0xaa0] ss:$16 sps:$4 sm:$0xff]  }
  0x67   :  { %13248 = vmatprep.subr.bf16.mxu1 %v18405_v19  ;;  %v18468_v18 = vld [vmem:[#allocation5 + $0x7c4] ss:$16 sps:$4 sm:$0xff]   ;;  %v18463_v19 = vld [vmem:[#allocation5 + $0x5c0] ss:$16 sps:$4 sm:$0xff]  }
  0x68   :  { %v91_v62 = vld [vmem:[#allocation2 + $0x110] sm:$0xff] }
  0x69   :  { %13208 = vmatpush2.bf16.msra.mxu0 %v18407_v20  ;;  %v18466_v20 = vld [vmem:[#allocation5 + $0x7c0] ss:$16 sps:$4 sm:$0xff]   ;;  %v18519_v0 = vld [vmem:[#allocation5 + $0x8a4] ss:$16 sps:$4 sm:$0xff]  }
  0x6a   :  { %13249 = vmatpush2.bf16.msra.mxu1 %v18408_v21  ;;  %13259 = vmatprep.subr.bf16.mxu0 %v18411_v24  ;;  %v18471_v21 = vld [vmem:[#allocation5 + $0x5a4] ss:$16 sps:$4 sm:$0xff]   ;;  %v18472_v24 = vld [vmem:[#allocation5 + $0x7a0] ss:$16 sps:$4 sm:$0xff]  }
  0x6b   :  { %13300 = vmatprep.subr.bf16.mxu1 %v18414_v25  ;;  %v18477_v25 = vld [vmem:[#allocation5 + $0x584] ss:$16 sps:$4 sm:$0xff]  }
  0x6c   :  { %13210 = vmatmul.mubr.bf16.vlgmr.msra.gmra.mxu0 %v21559_v26 }
  0x6d   :  { %13251 = vmatmul.mubr.bf16.vlgmr.msra.gmra.mxu1 %v21561_v27  ;;  %13260 = vmatpush1.bf16.msra.mxu0 %v18409_v28  ;;  %v18480_v28 = vld [vmem:[#allocation5 + $0x784] ss:$16 sps:$4 sm:$0xff]  }
  0x6e   :  { %13301 = vmatpush1.bf16.msra.mxu1 %v18412_v29  ;;  %13261 = vmatprep.subr.bf16.mxu0 %v18417_v30  ;;  %v18475_v29 = vld [vmem:[#allocation5 + $0x580] ss:$16 sps:$4 sm:$0xff]  }
  0x6f   :  { %13302 = vmatprep.subr.bf16.mxu1 %v18420_v31  ;;  %13291 = vmatprep.mubr.bf16.mxu0 %v21581_v12  ;;  %v18478_v30 = vld [vmem:[#allocation5 + $0x780] ss:$16 sps:$4 sm:$0xff]   ;;  %v18483_v31 = vld [vmem:[#allocation5 + $0x564] ss:$16 sps:$4 sm:$0xff]  }
  0x70   :  { %13332 = vmatprep.mubr.bf16.mxu1 %v21583_v16 }
  0x71   :  { %13262 = vmatpush1.bf16.msra.mxu0 %v18415_v32  ;;  %v18486_v32 = vld [vmem:[#allocation5 + $0x764] ss:$16 sps:$4 sm:$0xff]  }
  0x72   :  { %13303 = vmatpush1.bf16.msra.mxu1 %v18418_v33  ;;  %13263 = vmatprep.subr.bf16.mxu0 %v18423_v34  ;;  %v18481_v33 = vld [vmem:[#allocation5 + $0x560] ss:$16 sps:$4 sm:$0xff]  }
  0x73   :  { %13304 = vmatprep.subr.bf16.mxu1 %v18426_v35  ;;  %v18484_v34 = vld [vmem:[#allocation5 + $0x760] ss:$16 sps:$4 sm:$0xff]   ;;  %v18489_v35 = vld [vmem:[#allocation5 + $0x544] ss:$16 sps:$4 sm:$0xff]  }
  0x75   :  { %13264 = vmatpush1.bf16.msra.mxu0 %v18421_v36  ;;  %v18492_v36 = vld [vmem:[#allocation5 + $0x744] ss:$16 sps:$4 sm:$0xff]  }
  0x76   :  { %13305 = vmatpush1.bf16.msra.mxu1 %v18424_v37  ;;  %13265 = vmatprep.subr.bf16.mxu0 %v18429_v38  ;;  %v18487_v37 = vld [vmem:[#allocation5 + $0x540] ss:$16 sps:$4 sm:$0xff]  }
  0x77   :  { %13306 = vmatprep.subr.bf16.mxu1 %v18432_v39  ;;  %v18490_v38 = vld [vmem:[#allocation5 + $0x740] ss:$16 sps:$4 sm:$0xff]   ;;  %v18495_v39 = vld [vmem:[#allocation5 + $0x524] ss:$16 sps:$4 sm:$0xff]  }
  0x79   :  { %13266 = vmatpush1.bf16.msra.mxu0 %v18427_v40  ;;  %v18498_v40 = vld [vmem:[#allocation5 + $0x724] ss:$16 sps:$4 sm:$0xff]  }
  0x7a   :  { %13307 = vmatpush1.bf16.msra.mxu1 %v18430_v41  ;;  %13267 = vmatprep.subr.bf16.mxu0 %v18435_v42  ;;  %v18493_v41 = vld [vmem:[#allocation5 + $0x520] ss:$16 sps:$4 sm:$0xff]  }
  0x7b   :  { %13308 = vmatprep.subr.bf16.mxu1 %v18438_v43  ;;  %v18496_v42 = vld [vmem:[#allocation5 + $0x720] ss:$16 sps:$4 sm:$0xff]   ;;  %v18501_v43 = vld [vmem:[#allocation5 + $0x504] ss:$16 sps:$4 sm:$0xff]  }
  0x7d   :  { %13268 = vmatpush1.bf16.msra.mxu0 %v18433_v44  ;;  %v18504_v44 = vld [vmem:[#allocation5 + $0x704] ss:$16 sps:$4 sm:$0xff]  }
  0x7e   :  { %13309 = vmatpush1.bf16.msra.mxu1 %v18436_v45  ;;  %13269 = vmatprep.subr.bf16.mxu0 %v18441_v46  ;;  %v18499_v45 = vld [vmem:[#allocation5 + $0x500] ss:$16 sps:$4 sm:$0xff]  }
  0x7f   :  { %13310 = vmatprep.subr.bf16.mxu1 %v18444_v47  ;;  %v18502_v46 = vld [vmem:[#allocation5 + $0x700] ss:$16 sps:$4 sm:$0xff]   ;;  %v253_v47 = vcombine.low %v21566_v1, %v21569_v2  ;;  %v257_v1 = vcombine.low %v59_v60, %v75_v61 }
  0x81   :  { %13270 = vmatpush1.bf16.msra.mxu0 %v18439_v48  ;;  %v255_v48 = vcombine.low %v21572_v3, %v21575_v6  ;;  %v258_v3 = vcombine.high %v59_v60, %v75_v61  ;;  %v21598_v6 = vrot.slane %v257_v1, %v21547_v54  ;;  %v18574_v60 = vld [vmem:[#allocation5 + $0xb80] ss:$16 sps:$4 sm:$0xff]   ;;  %v18579_v61 = vld [vmem:[#allocation5 + $0x964] ss:$16 sps:$4 sm:$0xff]  }
  0x82   :  { %13311 = vmatpush1.bf16.msra.mxu1 %v18442_v49  ;;  %13271 = vmatprep.subr.bf16.mxu0 %v18447_v50  ;;  %v18507_v49 = vld [vmem:[#allocation5 + $0x8e4] ss:$16 sps:$4 sm:$0xff]  }
  0x83   :  { %13312 = vmatprep.subr.bf16.mxu1 %v18450_v51  ;;  %v18510_v50 = vld [vmem:[#allocation5 + $0xae4] ss:$16 sps:$4 sm:$0xff]   ;;  %v21591_v51 = vpack.c.bf16 %v253_v47, %v253_v47  ;;  %v21604_v8 = vrot.slane %v258_v3, %v21547_v54  ;;  %v18583_v3 = vld [vmem:[#allocation5 + $0x940] ss:$16 sps:$4 sm:$0xff]  }
  0x84   :  { %v18564_v47 = vld [vmem:[#allocation5 + $0xbc4] ss:$16 sps:$4 sm:$0xff]  }
  0x85   :  { %13272 = vmatpush1.bf16.msra.mxu0 %v18445_v52  ;;  %v21593_v52 = vpack.c.bf16 %v255_v48, %v255_v48  ;;  %v18559_v48 = vld [vmem:[#allocation5 + $0x9c0] ss:$16 sps:$4 sm:$0xff]   ;;  %v18585_v1 = vld [vmem:[#allocation5 + $0x944] ss:$16 sps:$4 sm:$0xff]  }
  0x86   :  { %13313 = vmatpush1.bf16.msra.mxu1 %v18448_v53  ;;  %13273 = vmatprep.subr.bf16.mxu0 %v18453_v59  ;;  %v18505_v53 = vld [vmem:[#allocation5 + $0x8e0] ss:$16 sps:$4 sm:$0xff]  }
  0x87   :  { %13314 = vmatprep.subr.bf16.mxu1 %v18456_v63  ;;  %v18514_v59 = vld [vmem:[#allocation5 + $0xac0] ss:$16 sps:$4 sm:$0xff]  }
  0x88   :  { %v107_v63 = vld [vmem:[#allocation2 + $0x190] sm:$0xff] }
  0x89   :  { %13274 = vmatpush1.bf16.msra.mxu0 %v18451_v4  ;;  %v259_v2 = vcombine.low %v91_v62, %v107_v63  ;;  %v18522_v4 = vld [vmem:[#allocation5 + $0xaa4] ss:$16 sps:$4 sm:$0xff]  }
  0x8a   :  { %13315 = vmatpush1.bf16.msra.mxu1 %v18454_v5  ;;  %13275 = vmatprep.subr.bf16.mxu0 %v18459_v7  ;;  %v260_v5 = vcombine.high %v91_v62, %v107_v63  ;;  %v18582_v62 = vld [vmem:[#allocation5 + $0xb64] ss:$16 sps:$4 sm:$0xff]   ;;  %v18577_v63 = vld [vmem:[#allocation5 + $0x960] ss:$16 sps:$4 sm:$0xff]  }
  0x8b   :  { %13316 = vmatprep.subr.bf16.mxu1 %v18462_v9  ;;  %v21601_v7 = vrot.slane %v259_v2, %v21547_v54  ;;  %v18517_v9 = vld [vmem:[#allocation5 + $0x8a0] ss:$16 sps:$4 sm:$0xff]   ;;  %v18588_v2 = vld [vmem:[#allocation5 + $0xb44] ss:$16 sps:$4 sm:$0xff]  }
  0x8d   :  { %13276 = vmatpush2.bf16.msra.mxu0 %v18457_v14  ;;  %v21607_v14 = vrot.slane %v260_v5, %v21547_v54  ;;  %v60_v5 = vld [vmem:[#allocation2 + $0x18] sm:$0xff] }
  0x8e   :  { %13317 = vmatpush2.bf16.msra.mxu1 %v18460_v15  ;;  %13277 = vmatprep.subr.bf16.mxu0 %v18465_v17  ;;  %v18525_v15 = vld [vmem:[#allocation5 + $0x884] ss:$16 sps:$4 sm:$0xff]   ;;  %v290_v17 = vcombine.high %v21598_v6, %v21601_v7 }
  0x8f   :  { %13318 = vmatprep.subr.bf16.mxu1 %v18468_v18  ;;  %v18528_v18 = vld [vmem:[#allocation5 + $0xa84] ss:$16 sps:$4 sm:$0xff]  }
  0x91   :  { %13278 = vmatpush2.bf16.msra.mxu0 %v18463_v19  ;;  %v292_v19 = vcombine.high %v21604_v8, %v21607_v14 }
  0x92   :  { %13319 = vmatpush2.bf16.msra.mxu1 %v18466_v20  ;;  %13279 = vmatprep.subr.bf16.mxu0 %v18471_v21  ;;  %v21613_v20 = vpack.c.bf16 %v290_v17, %v290_v17  ;;  %v18523_v21 = vld [vmem:[#allocation5 + $0x880] ss:$16 sps:$4 sm:$0xff]   ;;  %v18591_v17 = vld [vmem:[#allocation5 + $0x924] ss:$16 sps:$4 sm:$0xff]  }
  0x93   :  { %13320 = vmatprep.subr.bf16.mxu1 %v18474_v22  ;;  %v18526_v22 = vld [vmem:[#allocation5 + $0xa80] ss:$16 sps:$4 sm:$0xff]  }
  0x95   :  { %13280 = vmatpush2.bf16.msra.mxu0 %v18469_v23  ;;  %v21615_v23 = vpack.c.bf16 %v292_v19, %v292_v19 }
  0x96   :  { %13321 = vmatpush2.bf16.msra.mxu1 %v18472_v24  ;;  %13281 = vmatprep.subr.bf16.mxu0 %v18477_v25  ;;  %v18531_v24 = vld [vmem:[#allocation5 + $0x864] ss:$16 sps:$4 sm:$0xff]  }
  0x97   :  { %13322 = vmatprep.subr.bf16.mxu1 %v18480_v28  ;;  %v18534_v25 = vld [vmem:[#allocation5 + $0xa64] ss:$16 sps:$4 sm:$0xff]   ;;  %v18529_v28 = vld [vmem:[#allocation5 + $0x860] ss:$16 sps:$4 sm:$0xff]  }
  0x99   :  { %13282 = vmatpush2.bf16.msra.mxu0 %v18475_v29  ;;  %v18532_v29 = vld [vmem:[#allocation5 + $0xa60] ss:$16 sps:$4 sm:$0xff]  }
  0x9a   :  { %13323 = vmatpush2.bf16.msra.mxu1 %v18478_v30  ;;  %13283 = vmatprep.subr.bf16.mxu0 %v18483_v31  ;;  %v18537_v30 = vld [vmem:[#allocation5 + $0x844] ss:$16 sps:$4 sm:$0xff]  }
  0x9b   :  { %13324 = vmatprep.subr.bf16.mxu1 %v18486_v32  ;;  %v18540_v31 = vld [vmem:[#allocation5 + $0xa44] ss:$16 sps:$4 sm:$0xff]   ;;  %v18535_v32 = vld [vmem:[#allocation5 + $0x840] ss:$16 sps:$4 sm:$0xff]  }
  0x9d   :  { %13284 = vmatpush2.bf16.msra.mxu0 %v18481_v33  ;;  %v18538_v33 = vld [vmem:[#allocation5 + $0xa40] ss:$16 sps:$4 sm:$0xff]  }
  0x9e   :  { %13325 = vmatpush2.bf16.msra.mxu1 %v18484_v34  ;;  %13285 = vmatprep.subr.bf16.mxu0 %v18489_v35  ;;  %v18543_v34 = vld [vmem:[#allocation5 + $0x824] ss:$16 sps:$4 sm:$0xff]  }
  0x9f   :  { %13326 = vmatprep.subr.bf16.mxu1 %v18492_v36  ;;  %v18546_v35 = vld [vmem:[#allocation5 + $0xa24] ss:$16 sps:$4 sm:$0xff]   ;;  %v18541_v36 = vld [vmem:[#allocation5 + $0x820] ss:$16 sps:$4 sm:$0xff]  }
  0xa1   :  { %13286 = vmatpush2.bf16.msra.mxu0 %v18487_v37  ;;  %v18544_v37 = vld [vmem:[#allocation5 + $0xa20] ss:$16 sps:$4 sm:$0xff]  }
  0xa2   :  { %13327 = vmatpush2.bf16.msra.mxu1 %v18490_v38  ;;  %13287 = vmatprep.subr.bf16.mxu0 %v18495_v39  ;;  %v18549_v38 = vld [vmem:[#allocation5 + $0x804] ss:$16 sps:$4 sm:$0xff]  }
  0xa3   :  { %13328 = vmatprep.subr.bf16.mxu1 %v18498_v40  ;;  %v18552_v39 = vld [vmem:[#allocation5 + $0xa04] ss:$16 sps:$4 sm:$0xff]   ;;  %v18547_v40 = vld [vmem:[#allocation5 + $0x800] ss:$16 sps:$4 sm:$0xff]  }
  0xa5   :  { %13288 = vmatpush2.bf16.msra.mxu0 %v18493_v41  ;;  %v18550_v41 = vld [vmem:[#allocation5 + $0xa00] ss:$16 sps:$4 sm:$0xff]  }
  0xa6   :  { %13329 = vmatpush2.bf16.msra.mxu1 %v18496_v42  ;;  %13289 = vmatprep.subr.bf16.mxu0 %v18501_v43  ;;  %v18555_v42 = vld [vmem:[#allocation5 + $0x9e4] ss:$16 sps:$4 sm:$0xff]  }
  0xa7   :  { %13330 = vmatprep.subr.bf16.mxu1 %v18504_v44  ;;  %v18558_v43 = vld [vmem:[#allocation5 + $0xbe4] ss:$16 sps:$4 sm:$0xff]   ;;  %v18553_v44 = vld [vmem:[#allocation5 + $0x9e0] ss:$16 sps:$4 sm:$0xff]  }
  0xa9   :  { %13290 = vmatpush2.bf16.msra.mxu0 %v18499_v45  ;;  %v18556_v45 = vld [vmem:[#allocation5 + $0xbe0] ss:$16 sps:$4 sm:$0xff]  }
  0xaa   :  { %13331 = vmatpush2.bf16.msra.mxu1 %v18502_v46  ;;  %13341 = vmatprep.subr.bf16.mxu0 %v18507_v49  ;;  %v18561_v46 = vld [vmem:[#allocation5 + $0x9c4] ss:$16 sps:$4 sm:$0xff]   ;;  %v18562_v49 = vld [vmem:[#allocation5 + $0xbc0] ss:$16 sps:$4 sm:$0xff]  }
  0xab   :  { %13382 = vmatprep.subr.bf16.mxu1 %v18510_v50  ;;  %v18567_v50 = vld [vmem:[#allocation5 + $0x9a4] ss:$16 sps:$4 sm:$0xff]  }
  0xac   :  { %13292 = vmatmul.mubr.bf16.vlgmr.msra.gmra.mxu0 %v21591_v51 }
  0xad   :  { %13333 = vmatmul.mubr.bf16.vlgmr.msra.gmra.mxu1 %v21593_v52  ;;  %13342 = vmatpush1.bf16.msra.mxu0 %v18505_v53  ;;  %v18570_v53 = vld [vmem:[#allocation5 + $0xba4] ss:$16 sps:$4 sm:$0xff]  }
  0xae   :  { %13383 = vmatpush1.bf16.msra.mxu1 %v18508_v55  ;;  %13343 = vmatprep.subr.bf16.mxu0 %v18513_v56  ;;  %v18565_v55 = vld [vmem:[#allocation5 + $0x9a0] ss:$16 sps:$4 sm:$0xff]  }
  0xaf   :  { %13384 = vmatprep.subr.bf16.mxu1 %v18516_v57  ;;  %13373 = vmatprep.mubr.bf16.mxu0 %v21613_v20  ;;  %v18568_v56 = vld [vmem:[#allocation5 + $0xba0] ss:$16 sps:$4 sm:$0xff]   ;;  %v18573_v57 = vld [vmem:[#allocation5 + $0x984] ss:$16 sps:$4 sm:$0xff]  }
  0xb0   :  { %13414 = vmatprep.mubr.bf16.mxu1 %v21615_v23 }
  0xb1   :  { %13344 = vmatpush1.bf16.msra.mxu0 %v18511_v58  ;;  %v18576_v58 = vld [vmem:[#allocation5 + $0xb84] ss:$16 sps:$4 sm:$0xff]  }
  0xb2   :  { %13385 = vmatpush1.bf16.msra.mxu1 %v18514_v59  ;;  %13345 = vmatprep.subr.bf16.mxu0 %v18519_v0  ;;  %v18571_v59 = vld [vmem:[#allocation5 + $0x980] ss:$16 sps:$4 sm:$0xff]  }
  0xb3   :  { %13386 = vmatprep.subr.bf16.mxu1 %v18522_v4  ;;  %v18580_v0 = vld [vmem:[#allocation5 + $0xb60] ss:$16 sps:$4 sm:$0xff]  }
  0xb4   :  { %v18586_v4 = vld [vmem:[#allocation5 + $0xb40] ss:$16 sps:$4 sm:$0xff]  }
  0xb5   :  { %13346 = vmatpush1.bf16.msra.mxu0 %v18517_v9  ;;  %v76_v9 = vld [vmem:[#allocation2 + $0x98] sm:$0xff] }
  0xb6   :  { %13387 = vmatpush1.bf16.msra.mxu1 %v18520_v11  ;;  %13347 = vmatprep.subr.bf16.mxu0 %v18525_v15  ;;  %v92_v11 = vld [vmem:[#allocation2 + $0x118] sm:$0xff]  ;;  %v293_v19 = vcombine.low %v60_v5, %v76_v9 }
  0xb7   :  { %13388 = vmatprep.subr.bf16.mxu1 %v18528_v18  ;;  %v108_v15 = vld [vmem:[#allocation2 + $0x198] sm:$0xff]  ;;  %v18594_v18 = vld [vmem:[#allocation5 + $0xb24] ss:$16 sps:$4 sm:$0xff]  }
  0xb9   :  { %13348 = vmatpush1.bf16.msra.mxu0 %v18523_v21  ;;  %v295_v21 = vcombine.low %v92_v11, %v108_v15 }
  0xba   :  { %13389 = vmatpush1.bf16.msra.mxu1 %v18526_v22  ;;  %13349 = vmatprep.subr.bf16.mxu0 %v18531_v24  ;;  %v294_v22 = vcombine.high %v60_v5, %v76_v9  ;;  %v296_v24 = vcombine.high %v92_v11, %v108_v15  ;;  %v18642_v5 = vld [vmem:[#allocation5 + $0xe24] ss:$16 sps:$4 sm:$0xff]   ;;  %v18637_v9 = vld [vmem:[#allocation5 + $0xc20] ss:$16 sps:$4 sm:$0xff]  }
  0xbb   :  { %13390 = vmatprep.subr.bf16.mxu1 %v18534_v25  ;;  %v18589_v25 = vld [vmem:[#allocation5 + $0x920] ss:$16 sps:$4 sm:$0xff]   ;;  %v18645_v15 = vld [vmem:[#allocation5 + $0xc04] ss:$16 sps:$4 sm:$0xff]  }
  0xbc   :  { %v18640_v11 = vld [vmem:[#allocation5 + $0xe20] ss:$16 sps:$4 sm:$0xff]  }
  0xbd   :  { %13350 = vmatpush1.bf16.msra.mxu0 %v18529_v28  ;;  %v18592_v28 = vld [vmem:[#allocation5 + $0xb20] ss:$16 sps:$4 sm:$0xff]  }
  0xbe   :  { %13391 = vmatpush1.bf16.msra.mxu1 %v18532_v29  ;;  %13351 = vmatprep.subr.bf16.mxu0 %v18537_v30  ;;  %v18597_v29 = vld [vmem:[#allocation5 + $0x904] ss:$16 sps:$4 sm:$0xff]  }
  0xbf   :  { %13392 = vmatprep.subr.bf16.mxu1 %v18540_v31  ;;  %v18600_v30 = vld [vmem:[#allocation5 + $0xb04] ss:$16 sps:$4 sm:$0xff]   ;;  %v21620_v31 = vrot.slane %v293_v19, %v21547_v54  ;;  %v18646_v19 = vld [vmem:[#allocation5 + $0xe00] ss:$16 sps:$4 sm:$0xff]  }
  0xc1   :  { %13352 = vmatpush1.bf16.msra.mxu0 %v18535_v32  ;;  %v21623_v32 = vrot.slane %v295_v21, %v21547_v54  ;;  %v18651_v21 = vld [vmem:[#allocation5 + $0xde4] ss:$16 sps:$4 sm:$0xff]  }
  0xc2   :  { %13393 = vmatpush1.bf16.msra.mxu1 %v18538_v33  ;;  %13353 = vmatprep.subr.bf16.mxu0 %v18543_v34  ;;  %v21626_v33 = vrot.slane %v294_v22, %v21547_v54  ;;  %v21629_v34 = vrot.slane %v296_v24, %v21547_v54  ;;  %v18654_v22 = vld [vmem:[#allocation5 + $0xfe4] ss:$16 sps:$4 sm:$0xff]   ;;  %v18649_v24 = vld [vmem:[#allocation5 + $0xde0] ss:$16 sps:$4 sm:$0xff]  }
  0xc3   :  { %13394 = vmatprep.subr.bf16.mxu1 %v18546_v35  ;;  %v18595_v35 = vld [vmem:[#allocation5 + $0x900] ss:$16 sps:$4 sm:$0xff]  }
  0xc5   :  { %13354 = vmatpush1.bf16.msra.mxu0 %v18541_v36  ;;  %v18598_v36 = vld [vmem:[#allocation5 + $0xb00] ss:$16 sps:$4 sm:$0xff]  }
  0xc6   :  { %13395 = vmatpush1.bf16.msra.mxu1 %v18544_v37  ;;  %13355 = vmatprep.subr.bf16.mxu0 %v18549_v38  ;;  %v289_v37 = vcombine.low %v21598_v6, %v21601_v7  ;;  %v291_v38 = vcombine.low %v21604_v8, %v21607_v14  ;;  %v18601_v6 = vld [vmem:[#allocation5 + $0xce0] ss:$16 sps:$4 sm:$0xff]   ;;  %v18609_v8 = vld [vmem:[#allocation5 + $0xcc4] ss:$16 sps:$4 sm:$0xff]  }
  0xc7   :  { %13396 = vmatprep.subr.bf16.mxu1 %v18552_v39  ;;  %v18603_v39 = vld [vmem:[#allocation5 + $0xce4] ss:$16 sps:$4 sm:$0xff]   ;;  %v18604_v7 = vld [vmem:[#allocation5 + $0xee0] ss:$16 sps:$4 sm:$0xff]  }
  0xc8   :  { %v18612_v14 = vld [vmem:[#allocation5 + $0xec4] ss:$16 sps:$4 sm:$0xff]  }
  0xc9   :  { %13356 = vmatpush1.bf16.msra.mxu0 %v18547_v40  ;;  %v18606_v40 = vld [vmem:[#allocation5 + $0xee4] ss:$16 sps:$4 sm:$0xff]  }
  0xca   :  { %13397 = vmatpush1.bf16.msra.mxu1 %v18550_v41  ;;  %13357 = vmatprep.subr.bf16.mxu0 %v18555_v42  ;;  %v326_v41 = vcombine.high %v21620_v31, %v21623_v32  ;;  %v328_v42 = vcombine.high %v21626_v33, %v21629_v34 }
  0xcb   :  { %13398 = vmatprep.subr.bf16.mxu1 %v18558_v43  ;;  %v21639_v43 = vpack.c.bf16 %v289_v37, %v289_v37  ;;  %v18666_v37 = vld [vmem:[#allocation5 + $0xfa4] ss:$16 sps:$4 sm:$0xff]  }
  0xcd   :  { %13358 = vmatpush2.bf16.msra.mxu0 %v18553_v44  ;;  %v21641_v44 = vpack.c.bf16 %v291_v38, %v291_v38  ;;  %v18661_v38 = vld [vmem:[#allocation5 + $0xda0] ss:$16 sps:$4 sm:$0xff]  }
  0xce   :  { %13399 = vmatpush2.bf16.msra.mxu1 %v18556_v45  ;;  %13359 = vmatprep.subr.bf16.mxu0 %v18561_v46  ;;  %v21643_v45 = vpack.c.bf16 %v326_v41, %v326_v41  ;;  %v21645_v46 = vpack.c.bf16 %v328_v42, %v328_v42  ;;  %v18672_v41 = vld [vmem:[#allocation5 + $0xf84] ss:$16 sps:$4 sm:$0xff]   ;;  %v18667_v42 = vld [vmem:[#allocation5 + $0xd80] ss:$16 sps:$4 sm:$0xff]  }
  0xcf   :  { %13400 = vmatprep.subr.bf16.mxu1 %v18564_v47  ;;  %v18607_v47 = vld [vmem:[#allocation5 + $0xcc0] ss:$16 sps:$4 sm:$0xff]  }
  0xd1   :  { %13360 = vmatpush2.bf16.msra.mxu0 %v18559_v48  ;;  %v18610_v48 = vld [vmem:[#allocation5 + $0xec0] ss:$16 sps:$4 sm:$0xff]  }
  0xd2   :  { %13401 = vmatpush2.bf16.msra.mxu1 %v18562_v49  ;;  %13361 = vmatprep.subr.bf16.mxu0 %v18567_v50  ;;  %v18615_v49 = vld [vmem:[#allocation5 + $0xca4] ss:$16 sps:$4 sm:$0xff]  }
  0xd3   :  { %13402 = vmatprep.subr.bf16.mxu1 %v18570_v53  ;;  %v18618_v50 = vld [vmem:[#allocation5 + $0xea4] ss:$16 sps:$4 sm:$0xff]   ;;  %v18613_v53 = vld [vmem:[#allocation5 + $0xca0] ss:$16 sps:$4 sm:$0xff]  }
  0xd5   :  { %13362 = vmatpush2.bf16.msra.mxu0 %v18565_v55  ;;  %v18616_v55 = vld [vmem:[#allocation5 + $0xea0] ss:$16 sps:$4 sm:$0xff]  }
  0xd6   :  { %13403 = vmatpush2.bf16.msra.mxu1 %v18568_v56  ;;  %13363 = vmatprep.subr.bf16.mxu0 %v18573_v57  ;;  %v18621_v56 = vld [vmem:[#allocation5 + $0xc84] ss:$16 sps:$4 sm:$0xff]  }
  0xd7   :  { %13404 = vmatprep.subr.bf16.mxu1 %v18576_v58  ;;  %v18624_v57 = vld [vmem:[#allocation5 + $0xe84] ss:$16 sps:$4 sm:$0xff]   ;;  %v18619_v58 = vld [vmem:[#allocation5 + $0xc80] ss:$16 sps:$4 sm:$0xff]  }
  0xd9   :  { %13364 = vmatpush2.bf16.msra.mxu0 %v18571_v59  ;;  %v18622_v59 = vld [vmem:[#allocation5 + $0xe80] ss:$16 sps:$4 sm:$0xff]  }
  0xda   :  { %13405 = vmatpush2.bf16.msra.mxu1 %v18574_v60  ;;  %13365 = vmatprep.subr.bf16.mxu0 %v18579_v61  ;;  %v18627_v60 = vld [vmem:[#allocation5 + $0xc64] ss:$16 sps:$4 sm:$0xff]  }
  0xdb   :  { %13406 = vmatprep.subr.bf16.mxu1 %v18582_v62  ;;  %v18630_v61 = vld [vmem:[#allocation5 + $0xe64] ss:$16 sps:$4 sm:$0xff]   ;;  %v18625_v62 = vld [vmem:[#allocation5 + $0xc60] ss:$16 sps:$4 sm:$0xff]  }
  0xdd   :  { %13366 = vmatpush2.bf16.msra.mxu0 %v18577_v63  ;;  %v18628_v63 = vld [vmem:[#allocation5 + $0xe60] ss:$16 sps:$4 sm:$0xff]  }
  0xde   :  { %13407 = vmatpush2.bf16.msra.mxu1 %v18580_v0  ;;  %13367 = vmatprep.subr.bf16.mxu0 %v18585_v1  ;;  %v18633_v0 = vld [vmem:[#allocation5 + $0xc44] ss:$16 sps:$4 sm:$0xff]  }
  0xdf   :  { %13408 = vmatprep.subr.bf16.mxu1 %v18588_v2  ;;  %v18636_v1 = vld [vmem:[#allocation5 + $0xe44] ss:$16 sps:$4 sm:$0xff]   ;;  %v18631_v2 = vld [vmem:[#allocation5 + $0xc40] ss:$16 sps:$4 sm:$0xff]  }
  0xe1   :  { %13368 = vmatpush2.bf16.msra.mxu0 %v18583_v3  ;;  %v18634_v3 = vld [vmem:[#allocation5 + $0xe40] ss:$16 sps:$4 sm:$0xff]  }
  0xe2   :  { %13409 = vmatpush2.bf16.msra.mxu1 %v18586_v4  ;;  %13369 = vmatprep.subr.bf16.mxu0 %v18591_v17  ;;  %v18639_v4 = vld [vmem:[#allocation5 + $0xc24] ss:$16 sps:$4 sm:$0xff]  }
  0xe3   :  { %13410 = vmatprep.subr.bf16.mxu1 %v18594_v18  ;;  %v18648_v17 = vld [vmem:[#allocation5 + $0xe04] ss:$16 sps:$4 sm:$0xff]   ;;  %v18643_v18 = vld [vmem:[#allocation5 + $0xc00] ss:$16 sps:$4 sm:$0xff]  }
  0xe5   :  { %13370 = vmatpush2.bf16.msra.mxu0 %v18589_v25  ;;  %v18652_v25 = vld [vmem:[#allocation5 + $0xfe0] ss:$16 sps:$4 sm:$0xff]  }
  0xe6   :  { %13411 = vmatpush2.bf16.msra.mxu1 %v18592_v28  ;;  %13371 = vmatprep.subr.bf16.mxu0 %v18597_v29  ;;  %v18657_v28 = vld [vmem:[#allocation5 + $0xdc4] ss:$16 sps:$4 sm:$0xff]  }
  0xe7   :  { %13412 = vmatprep.subr.bf16.mxu1 %v18600_v30  ;;  %v18660_v29 = vld [vmem:[#allocation5 + $0xfc4] ss:$16 sps:$4 sm:$0xff]   ;;  %v18655_v30 = vld [vmem:[#allocation5 + $0xdc0] ss:$16 sps:$4 sm:$0xff]  }
  0xe9   :  { %13372 = vmatpush2.bf16.msra.mxu0 %v18595_v35  ;;  %v18658_v35 = vld [vmem:[#allocation5 + $0xfc0] ss:$16 sps:$4 sm:$0xff]  }
  0xea   :  { %13413 = vmatpush2.bf16.msra.mxu1 %v18598_v36  ;;  %13423 = vmatprep.subr.bf16.mxu0 %v18603_v39  ;;  %v18663_v36 = vld [vmem:[#allocation5 + $0xda4] ss:$16 sps:$4 sm:$0xff]   ;;  %v18664_v39 = vld [vmem:[#allocation5 + $0xfa0] ss:$16 sps:$4 sm:$0xff]  }
  0xeb   :  { %13464 = vmatprep.subr.bf16.mxu1 %v18606_v40  ;;  %v18669_v40 = vld [vmem:[#allocation5 + $0xd84] ss:$16 sps:$4 sm:$0xff]  }
  0xec   :  { %13374 = vmatmul.mubr.bf16.vlgmr.msra.gmra.mxu0 %v21639_v43 }
  0xed   :  { %13415 = vmatmul.mubr.bf16.vlgmr.msra.gmra.mxu1 %v21641_v44  ;;  %13424 = vmatpush1.bf16.msra.mxu0 %v18601_v6  ;;  %v18670_v6 = vld [vmem:[#allocation5 + $0xf80] ss:$16 sps:$4 sm:$0xff]  }
  0xee   :  { %13465 = vmatpush1.bf16.msra.mxu1 %v18604_v7  ;;  %13425 = vmatprep.subr.bf16.mxu0 %v18609_v8  ;;  %v18675_v7 = vld [vmem:[#allocation5 + $0xd64] ss:$16 sps:$4 sm:$0xff]  }
  0xef   :  { %13466 = vmatprep.subr.bf16.mxu1 %v18612_v14  ;;  %13455 = vmatprep.mubr.bf16.mxu0 %v21643_v45  ;;  %v18678_v8 = vld [vmem:[#allocation5 + $0xf64] ss:$16 sps:$4 sm:$0xff]   ;;  %v18673_v14 = vld [vmem:[#allocation5 + $0xd60] ss:$16 sps:$4 sm:$0xff]  }
  0xf0   :  { %13496 = vmatprep.mubr.bf16.mxu1 %v21645_v46 }
  0xf1   :  { %13426 = vmatpush1.bf16.msra.mxu0 %v18607_v47  ;;  %v18676_v47 = vld [vmem:[#allocation5 + $0xf60] ss:$16 sps:$4 sm:$0xff]  }
  0xf2   :  { %13467 = vmatpush1.bf16.msra.mxu1 %v18610_v48  ;;  %13427 = vmatprep.subr.bf16.mxu0 %v18615_v49  ;;  %v18681_v48 = vld [vmem:[#allocation5 + $0xd44] ss:$16 sps:$4 sm:$0xff]  }
  0xf3   :  { %13468 = vmatprep.subr.bf16.mxu1 %v18618_v50  ;;  %v18684_v49 = vld [vmem:[#allocation5 + $0xf44] ss:$16 sps:$4 sm:$0xff]   ;;  %v18679_v50 = vld [vmem:[#allocation5 + $0xd40] ss:$16 sps:$4 sm:$0xff]  }
  0xf5   :  { %13428 = vmatpush1.bf16.msra.mxu0 %v18613_v53  ;;  %v18682_v53 = vld [vmem:[#allocation5 + $0xf40] ss:$16 sps:$4 sm:$0xff]  }
  0xf6   :  { %13469 = vmatpush1.bf16.msra.mxu1 %v18616_v55  ;;  %13429 = vmatprep.subr.bf16.mxu0 %v18621_v56  ;;  %v61_v55 = vld [vmem:[#allocation2 + $0x20] sm:$0xff] }
  0xf7   :  { %13470 = vmatprep.subr.bf16.mxu1 %v18624_v57  ;;  %v77_v56 = vld [vmem:[#allocation2 + $0xa0] sm:$0xff] }
  0xf8   :  { %v93_v57 = vld [vmem:[#allocation2 + $0x120] sm:$0xff] }
  0xf9   :  { %13430 = vmatpush1.bf16.msra.mxu0 %v18619_v58  ;;  %v109_v58 = vld [vmem:[#allocation2 + $0x1a0] sm:$0xff] }
  0xfa   :  { %13471 = vmatpush1.bf16.msra.mxu1 %v18622_v59  ;;  %13431 = vmatprep.subr.bf16.mxu0 %v18627_v60  ;;  %v18687_v59 = vld [vmem:[#allocation5 + $0xd24] ss:$16 sps:$4 sm:$0xff]  }
  0xfb   :  { %13472 = vmatprep.subr.bf16.mxu1 %v18630_v61  ;;  %v18690_v60 = vld [vmem:[#allocation5 + $0xf24] ss:$16 sps:$4 sm:$0xff]   ;;  %v329_v61 = vcombine.low %v61_v55, %v77_v56 }
  0xfd   :  { %13432 = vmatpush1.bf16.msra.mxu0 %v18625_v62  ;;  %v331_v62 = vcombine.low %v93_v57, %v109_v58 }
  0xfe   :  { %13473 = vmatpush1.bf16.msra.mxu1 %v18628_v63  ;;  %13433 = vmatprep.subr.bf16.mxu0 %v18633_v0  ;;  %v330_v63 = vcombine.high %v61_v55, %v77_v56  ;;  %v332_v0 = vcombine.high %v93_v57, %v109_v58  ;;  %v18720_v57 = vld [vmem:[#allocation5 + $0x1284] ss:$16 sps:$4 sm:$0xff]   ;;  %v18715_v58 = vld [vmem:[#allocation5 + $0x1080] ss:$16 sps:$4 sm:$0xff]  }
  0xff   :  { %13474 = vmatprep.subr.bf16.mxu1 %v18636_v1  ;;  %v18685_v1 = vld [vmem:[#allocation5 + $0xd20] ss:$16 sps:$4 sm:$0xff]  }
 0x101   :  { %13434 = vmatpush1.bf16.msra.mxu0 %v18631_v2  ;;  %v18688_v2 = vld [vmem:[#allocation5 + $0xf20] ss:$16 sps:$4 sm:$0xff]  }
 0x102   :  { %13475 = vmatpush1.bf16.msra.mxu1 %v18634_v3  ;;  %13435 = vmatprep.subr.bf16.mxu0 %v18639_v4  ;;  %v18693_v3 = vld [vmem:[#allocation5 + $0xd04] ss:$16 sps:$4 sm:$0xff]  }
 0x103   :  { %13476 = vmatprep.subr.bf16.mxu1 %v18642_v5  ;;  %v18696_v4 = vld [vmem:[#allocation5 + $0xf04] ss:$16 sps:$4 sm:$0xff]   ;;  %v21652_v5 = vrot.slane %v329_v61, %v21547_v54 }
 0x104   :  { %v18726_v61 = vld [vmem:[#allocation5 + $0x1264] ss:$16 sps:$4 sm:$0xff]  }
 0x105   :  { %13436 = vmatpush1.bf16.msra.mxu0 %v18637_v9  ;;  %v21655_v9 = vrot.slane %v331_v62, %v21547_v54  ;;  %v18721_v62 = vld [vmem:[#allocation5 + $0x1060] ss:$16 sps:$4 sm:$0xff]  }
 0x106   :  { %13477 = vmatpush1.bf16.msra.mxu1 %v18640_v11  ;;  %13437 = vmatprep.subr.bf16.mxu0 %v18645_v15  ;;  %v21658_v11 = vrot.slane %v330_v63, %v21547_v54  ;;  %v21661_v15 = vrot.slane %v332_v0, %v21547_v54  ;;  %v18724_v63 = vld [vmem:[#allocation5 + $0x1260] ss:$16 sps:$4 sm:$0xff]   ;;  %v18729_v0 = vld [vmem:[#allocation5 + $0x1044] ss:$16 sps:$4 sm:$0xff]  }
 0x107   :  { %13478 = vmatprep.subr.bf16.mxu1 %v18648_v17  ;;  %v18691_v17 = vld [vmem:[#allocation5 + $0xd00] ss:$16 sps:$4 sm:$0xff]  }
 0x109   :  { %13438 = vmatpush1.bf16.msra.mxu0 %v18643_v18  ;;  %v18694_v18 = vld [vmem:[#allocation5 + $0xf00] ss:$16 sps:$4 sm:$0xff]  }
 0x10a   :  { %13479 = vmatpush1.bf16.msra.mxu1 %v18646_v19  ;;  %13439 = vmatprep.subr.bf16.mxu0 %v18651_v21  ;;  %v325_v19 = vcombine.low %v21620_v31, %v21623_v32  ;;  %v327_v21 = vcombine.low %v21626_v33, %v21629_v34  ;;  %v18697_v31 = vld [vmem:[#allocation5 + $0x10e0] ss:$16 sps:$4 sm:$0xff]   ;;  %v18705_v33 = vld [vmem:[#allocation5 + $0x10c4] ss:$16 sps:$4 sm:$0xff]  }
 0x10b   :  { %13480 = vmatprep.subr.bf16.mxu1 %v18654_v22  ;;  %v18699_v22 = vld [vmem:[#allocation5 + $0x10e4] ss:$16 sps:$4 sm:$0xff]   ;;  %v18700_v32 = vld [vmem:[#allocation5 + $0x12e0] ss:$16 sps:$4 sm:$0xff]  }
 0x10c   :  { %v18708_v34 = vld [vmem:[#allocation5 + $0x12c4] ss:$16 sps:$4 sm:$0xff]  }
 0x10d   :  { %13440 = vmatpush2.bf16.msra.mxu0 %v18649_v24  ;;  %v18702_v24 = vld [vmem:[#allocation5 + $0x12e4] ss:$16 sps:$4 sm:$0xff]  }
 0x10e   :  { %13481 = vmatpush2.bf16.msra.mxu1 %v18652_v25  ;;  %13441 = vmatprep.subr.bf16.mxu0 %v18657_v28  ;;  %v362_v25 = vcombine.high %v21652_v5, %v21655_v9  ;;  %v364_v28 = vcombine.high %v21658_v11, %v21661_v15 }
 0x10f   :  { %13482 = vmatprep.subr.bf16.mxu1 %v18660_v29  ;;  %v21671_v29 = vpack.c.bf16 %v325_v19, %v325_v19  ;;  %v18736_v19 = vld [vmem:[#allocation5 + $0x1220] ss:$16 sps:$4 sm:$0xff]  }
 0x111   :  { %13442 = vmatpush2.bf16.msra.mxu0 %v18655_v30  ;;  %v21673_v30 = vpack.c.bf16 %v327_v21, %v327_v21  ;;  %v18741_v21 = vld [vmem:[#allocation5 + $0x1004] ss:$16 sps:$4 sm:$0xff]  }
 0x112   :  { %13483 = vmatpush2.bf16.msra.mxu1 %v18658_v35  ;;  %13443 = vmatprep.subr.bf16.mxu0 %v18663_v36  ;;  %v21675_v35 = vpack.c.bf16 %v362_v25, %v362_v25  ;;  %v21677_v36 = vpack.c.bf16 %v364_v28, %v364_v28  ;;  %v18742_v25 = vld [vmem:[#allocation5 + $0x1200] ss:$16 sps:$4 sm:$0xff]   ;;  %v18747_v28 = vld [vmem:[#allocation5 + $0x11e4] ss:$16 sps:$4 sm:$0xff]  }
 0x113   :  { %13484 = vmatprep.subr.bf16.mxu1 %v18666_v37 }
 0x115   :  { %13444 = vmatpush2.bf16.msra.mxu0 %v18661_v38 }
 0x116   :  { %13485 = vmatpush2.bf16.msra.mxu1 %v18664_v39  ;;  %13445 = vmatprep.subr.bf16.mxu0 %v18669_v40  ;;  %v18703_v39 = vld [vmem:[#allocation5 + $0x10c0] ss:$16 sps:$4 sm:$0xff]  }
 0x117   :  { %13486 = vmatprep.subr.bf16.mxu1 %v18672_v41  ;;  %v18706_v40 = vld [vmem:[#allocation5 + $0x12c0] ss:$16 sps:$4 sm:$0xff]  }
 0x119   :  { %13446 = vmatpush2.bf16.msra.mxu0 %v18667_v42  ;;  %v18711_v42 = vld [vmem:[#allocation5 + $0x10a4] ss:$16 sps:$4 sm:$0xff]  }
 0x11a   :  { %13487 = vmatpush2.bf16.msra.mxu1 %v18670_v6  ;;  %13447 = vmatprep.subr.bf16.mxu0 %v18675_v7 }
 0x11b   :  { %13488 = vmatprep.subr.bf16.mxu1 %v18678_v8  ;;  %v18714_v8 = vld [vmem:[#allocation5 + $0x12a4] ss:$16 sps:$4 sm:$0xff]  }
 0x11d   :  { %13448 = vmatpush2.bf16.msra.mxu0 %v18673_v14 }
 0x11e   :  { %13489 = vmatpush2.bf16.msra.mxu1 %v18676_v47  ;;  %13449 = vmatprep.subr.bf16.mxu0 %v18681_v48 }
 0x11f   :  { %13490 = vmatprep.subr.bf16.mxu1 %v18684_v49  ;;  %v18709_v49 = vld [vmem:[#allocation5 + $0x10a0] ss:$16 sps:$4 sm:$0xff]  }
 0x121   :  { %13450 = vmatpush2.bf16.msra.mxu0 %v18679_v50  ;;  %v18712_v50 = vld [vmem:[#allocation5 + $0x12a0] ss:$16 sps:$4 sm:$0xff]  }
 0x122   :  { %13491 = vmatpush2.bf16.msra.mxu1 %v18682_v53  ;;  %13451 = vmatprep.subr.bf16.mxu0 %v18687_v59  ;;  %v18717_v53 = vld [vmem:[#allocation5 + $0x1084] ss:$16 sps:$4 sm:$0xff]   ;;  %v18718_v59 = vld [vmem:[#allocation5 + $0x1280] ss:$16 sps:$4 sm:$0xff]  }
 0x123   :  { %13492 = vmatprep.subr.bf16.mxu1 %v18690_v60  ;;  %v18723_v60 = vld [vmem:[#allocation5 + $0x1064] ss:$16 sps:$4 sm:$0xff]  }
 0x125   :  { %13452 = vmatpush2.bf16.msra.mxu0 %v18685_v1  ;;  %v18732_v1 = vld [vmem:[#allocation5 + $0x1244] ss:$16 sps:$4 sm:$0xff]  }
 0x126   :  { %13493 = vmatpush2.bf16.msra.mxu1 %v18688_v2  ;;  %13453 = vmatprep.subr.bf16.mxu0 %v18693_v3  ;;  %v18727_v2 = vld [vmem:[#allocation5 + $0x1040] ss:$16 sps:$4 sm:$0xff]  }
 0x127   :  { %13494 = vmatprep.subr.bf16.mxu1 %v18696_v4  ;;  %v18730_v3 = vld [vmem:[#allocation5 + $0x1240] ss:$16 sps:$4 sm:$0xff]   ;;  %v18735_v4 = vld [vmem:[#allocation5 + $0x1024] ss:$16 sps:$4 sm:$0xff]  }
 0x129   :  { %13454 = vmatpush2.bf16.msra.mxu0 %v18691_v17  ;;  %v18738_v17 = vld [vmem:[#allocation5 + $0x1224] ss:$16 sps:$4 sm:$0xff]  }
 0x12a   :  { %13495 = vmatpush2.bf16.msra.mxu1 %v18694_v18  ;;  %13505 = vmatprep.subr.bf16.mxu0 %v18699_v22  ;;  %v18733_v18 = vld [vmem:[#allocation5 + $0x1020] ss:$16 sps:$4 sm:$0xff]   ;;  %v18744_v22 = vld [vmem:[#allocation5 + $0x1204] ss:$16 sps:$4 sm:$0xff]  }
 0x12b   :  { %13546 = vmatprep.subr.bf16.mxu1 %v18702_v24  ;;  %v18739_v24 = vld [vmem:[#allocation5 + $0x1000] ss:$16 sps:$4 sm:$0xff]  }
 0x12c   :  { %v13211_v37 = vpop.f32.mrf.mxu0  ;;  %13456 = vmatmul.mubr.bf16.vlgmr.msra.gmra.mxu0 %v21671_v29 }
 0x12d   :  { %v13252_v38 = vpop.f32.mrf.mxu1  ;;  %13497 = vmatmul.mubr.bf16.vlgmr.msra.gmra.mxu1 %v21673_v30  ;;  %13506 = vmatpush1.bf16.msra.mxu0 %v18697_v31  ;;  %v18750_v31 = vld [vmem:[#allocation5 + $0x13e4] ss:$16 sps:$4 sm:$0xff]  }
 0x12e   :  { %v21681_v41 = vadd.f32 %v13252_v38, %v13211_v37  ;;  %13547 = vmatpush1.bf16.msra.mxu1 %v18700_v32  ;;  %v13213_v6 = vpop.f32.mrf.mxu0  ;;  %13507 = vmatprep.subr.bf16.mxu0 %v18705_v33  ;;  %v18745_v32 = vld [vmem:[#allocation5 + $0x11e0] ss:$16 sps:$4 sm:$0xff]   ;;  %v18756_v37 = vld [vmem:[#allocation5 + $0x13c4] ss:$16 sps:$4 sm:$0xff]  }
 0x12f   :  { %v13254_v7 = vpop.f32.mrf.mxu1  ;;  %13548 = vmatprep.subr.bf16.mxu1 %v18708_v34  ;;  %13537 = vmatprep.mubr.bf16.mxu0 %v21675_v35  ;;  %v18748_v33 = vld [vmem:[#allocation5 + $0x13e0] ss:$16 sps:$4 sm:$0xff]   ;;  %v18753_v34 = vld [vmem:[#allocation5 + $0x11c4] ss:$16 sps:$4 sm:$0xff]  }
 0x130   :  { %v21683_v14 = vadd.f32 %v13254_v7, %v13213_v6  ;;  %13578 = vmatprep.mubr.bf16.mxu1 %v21677_v36  ;;  %v13215_v47 = vpop.f32.mrf.mxu0  ;;  %v18751_v38 = vld [vmem:[#allocation5 + $0x11c0] ss:$16 sps:$4 sm:$0xff]  }
 0x131   :  { %v13256_v48 = vpop.f32.mrf.mxu1  ;;  %13508 = vmatpush1.bf16.msra.mxu0 %v18703_v39  ;;  %v18754_v39 = vld [vmem:[#allocation5 + $0x13c0] ss:$16 sps:$4 sm:$0xff]   ;;  %v18768_v47 = vld [vmem:[#allocation5 + $0x1384] ss:$16 sps:$4 sm:$0xff]  }
 0x132   :  { %13549 = vmatpush1.bf16.msra.mxu1 %v18706_v40  ;;  %v13216_v55 = vpop.f32.mrf.mxu0  ;;  %13509 = vmatprep.subr.bf16.mxu0 %v18711_v42  ;;  %v18759_v40 = vld [vmem:[#allocation5 + $0x11a4] ss:$16 sps:$4 sm:$0xff]   ;;  %v18757_v6 = vld [vmem:[#allocation5 + $0x11a0] ss:$16 sps:$4 sm:$0xff]  }
 0x133   :  { %v13257_v56 = vpop.f32.mrf.mxu1  ;;  %13550 = vmatprep.subr.bf16.mxu1 %v18714_v8  ;;  %v18762_v42 = vld [vmem:[#allocation5 + $0x13a4] ss:$16 sps:$4 sm:$0xff]   ;;  %v18760_v7 = vld [vmem:[#allocation5 + $0x13a0] ss:$16 sps:$4 sm:$0xff]  }
 0x134   :  { %v18765_v8 = vld [vmem:[#allocation5 + $0x1184] ss:$16 sps:$4 sm:$0xff]   ;;  %v18763_v48 = vld [vmem:[#allocation5 + $0x1180] ss:$16 sps:$4 sm:$0xff]  }
 0x135   :  { %13510 = vmatpush1.bf16.msra.mxu0 %v18709_v49  ;;  %v18766_v49 = vld [vmem:[#allocation5 + $0x1380] ss:$16 sps:$4 sm:$0xff]  }
 0x136   :  { %13551 = vmatpush1.bf16.msra.mxu1 %v18712_v50  ;;  %13511 = vmatprep.subr.bf16.mxu0 %v18717_v53  ;;  %v18771_v50 = vld [vmem:[#allocation5 + $0x1164] ss:$16 sps:$4 sm:$0xff]   ;;  %v18769_v55 = vld [vmem:[#allocation5 + $0x1160] ss:$16 sps:$4 sm:$0xff]  }
 0x137   :  { %13552 = vmatprep.subr.bf16.mxu1 %v18720_v57  ;;  %v18774_v53 = vld [vmem:[#allocation5 + $0x1364] ss:$16 sps:$4 sm:$0xff]   ;;  %v18772_v56 = vld [vmem:[#allocation5 + $0x1360] ss:$16 sps:$4 sm:$0xff]  }
 0x138   :  { %v18777_v57 = vld [vmem:[#allocation5 + $0x1144] ss:$16 sps:$4 sm:$0xff]  }
 0x139   :  { %13512 = vmatpush1.bf16.msra.mxu0 %v18715_v58  ;;  %v18780_v58 = vld [vmem:[#allocation5 + $0x1344] ss:$16 sps:$4 sm:$0xff]  }
 0x13a   :  { %13553 = vmatpush1.bf16.msra.mxu1 %v18718_v59  ;;  %13513 = vmatprep.subr.bf16.mxu0 %v18723_v60  ;;  %v62_v59 = vld [vmem:[#allocation2 + $0x28] sm:$0xff] }
 0x13b   :  { %13554 = vmatprep.subr.bf16.mxu1 %v18726_v61  ;;  %v78_v60 = vld [vmem:[#allocation2 + $0xa8] sm:$0xff] }
 0x13c   :  { %v94_v61 = vld [vmem:[#allocation2 + $0x128] sm:$0xff] }
 0x13d   :  { %13514 = vmatpush1.bf16.msra.mxu0 %v18721_v62  ;;  %v110_v62 = vld [vmem:[#allocation2 + $0x1a8] sm:$0xff] }
 0x13e   :  { %13555 = vmatpush1.bf16.msra.mxu1 %v18724_v63  ;;  %13515 = vmatprep.subr.bf16.mxu0 %v18729_v0  ;;  %v18775_v63 = vld [vmem:[#allocation5 + $0x1140] ss:$16 sps:$4 sm:$0xff]  }
 0x13f   :  { %13556 = vmatprep.subr.bf16.mxu1 %v18732_v1  ;;  %v18778_v0 = vld [vmem:[#allocation5 + $0x1340] ss:$16 sps:$4 sm:$0xff]   ;;  %v18783_v1 = vld [vmem:[#allocation5 + $0x1124] ss:$16 sps:$4 sm:$0xff]  }
 0x141   :  { %13516 = vmatpush1.bf16.msra.mxu0 %v18727_v2  ;;  %v18786_v2 = vld [vmem:[#allocation5 + $0x1324] ss:$16 sps:$4 sm:$0xff]  }
 0x142   :  { %13557 = vmatpush1.bf16.msra.mxu1 %v18730_v3  ;;  %13517 = vmatprep.subr.bf16.mxu0 %v18735_v4  ;;  %v365_v3 = vcombine.low %v62_v59, %v78_v60  ;;  %v367_v4 = vcombine.low %v94_v61, %v110_v62 }
 0x143   :  { %13558 = vmatprep.subr.bf16.mxu1 %v18738_v17  ;;  %v366_v17 = vcombine.high %v62_v59, %v78_v60  ;;  %v18807_v59 = vld [vmem:[#allocation5 + $0x14a4] ss:$16 sps:$4 sm:$0xff]  }
 0x144   :  { %v18810_v60 = vld [vmem:[#allocation5 + $0x16a4] ss:$16 sps:$4 sm:$0xff]  }
 0x145   :  { %13518 = vmatpush1.bf16.msra.mxu0 %v18733_v18  ;;  %v368_v18 = vcombine.high %v94_v61, %v110_v62 }
 0x146   :  { %13559 = vmatpush1.bf16.msra.mxu1 %v18736_v19  ;;  %13519 = vmatprep.subr.bf16.mxu0 %v18741_v21  ;;  %v18781_v19 = vld [vmem:[#allocation5 + $0x1120] ss:$16 sps:$4 sm:$0xff]  }
 0x147   :  { %13560 = vmatprep.subr.bf16.mxu1 %v18744_v22  ;;  %v18784_v21 = vld [vmem:[#allocation5 + $0x1320] ss:$16 sps:$4 sm:$0xff]   ;;  %v18789_v22 = vld [vmem:[#allocation5 + $0x1104] ss:$16 sps:$4 sm:$0xff]  }
 0x149   :  { %13520 = vmatpush1.bf16.msra.mxu0 %v18739_v24  ;;  %v18792_v24 = vld [vmem:[#allocation5 + $0x1304] ss:$16 sps:$4 sm:$0xff]  }
 0x14a   :  { %13561 = vmatpush1.bf16.msra.mxu1 %v18742_v25  ;;  %13521 = vmatprep.subr.bf16.mxu0 %v18747_v28  ;;  %v21688_v25 = vrot.slane %v365_v3, %v21547_v54  ;;  %v21691_v28 = vrot.slane %v367_v4, %v21547_v54 }
 0x14b   :  { %13562 = vmatprep.subr.bf16.mxu1 %v18750_v31  ;;  %v21694_v31 = vrot.slane %v366_v17, %v21547_v54  ;;  %v18813_v17 = vld [vmem:[#allocation5 + $0x1484] ss:$16 sps:$4 sm:$0xff]  }
 0x14d   :  { %13522 = vmatpush2.bf16.msra.mxu0 %v18745_v32  ;;  %v21697_v32 = vrot.slane %v368_v18, %v21547_v54  ;;  %v18816_v18 = vld [vmem:[#allocation5 + $0x1684] ss:$16 sps:$4 sm:$0xff]  }
 0x14e   :  { %13563 = vmatpush2.bf16.msra.mxu1 %v18748_v33  ;;  %13523 = vmatprep.subr.bf16.mxu0 %v18753_v34  ;;  %v361_v33 = vcombine.low %v21652_v5, %v21655_v9  ;;  %v363_v34 = vcombine.low %v21658_v11, %v21661_v15  ;;  %v18801_v11 = vld [vmem:[#allocation5 + $0x14c4] ss:$16 sps:$4 sm:$0xff]  }
 0x14f   :  { %13564 = vmatprep.subr.bf16.mxu1 %v18756_v37  ;;  %v18787_v37 = vld [vmem:[#allocation5 + $0x1100] ss:$16 sps:$4 sm:$0xff]   ;;  %v18804_v15 = vld [vmem:[#allocation5 + $0x16c4] ss:$16 sps:$4 sm:$0xff]  }
 0x150   :  { %v21707_v5 = vpack.c.bf16 %v361_v33, %v361_v33  ;;  %v21709_v9 = vpack.c.bf16 %v363_v34, %v363_v34  ;;  %v18820_v33 = vld [vmem:[#allocation5 + $0x1660] ss:$16 sps:$4 sm:$0xff]   ;;  %v18825_v34 = vld [vmem:[#allocation5 + $0x1444] ss:$16 sps:$4 sm:$0xff]  }
 0x151   :  { %13524 = vmatpush2.bf16.msra.mxu0 %v18751_v38  ;;  %v18790_v38 = vld [vmem:[#allocation5 + $0x1300] ss:$16 sps:$4 sm:$0xff]  }
 0x152   :  { %13565 = vmatpush2.bf16.msra.mxu1 %v18754_v39  ;;  %13525 = vmatprep.subr.bf16.mxu0 %v18759_v40  ;;  %v18795_v39 = vld [vmem:[#allocation5 + $0x14e4] ss:$16 sps:$4 sm:$0xff]  }
 0x153   :  { %13566 = vmatprep.subr.bf16.mxu1 %v18762_v42  ;;  %v18798_v40 = vld [vmem:[#allocation5 + $0x16e4] ss:$16 sps:$4 sm:$0xff]   ;;  %v18793_v42 = vld [vmem:[#allocation5 + $0x14e0] ss:$16 sps:$4 sm:$0xff]  }
 0x155   :  { %13526 = vmatpush2.bf16.msra.mxu0 %v18757_v6  ;;  %v18796_v6 = vld [vmem:[#allocation5 + $0x16e0] ss:$16 sps:$4 sm:$0xff]  }
 0x156   :  { %13567 = vmatpush2.bf16.msra.mxu1 %v18760_v7  ;;  %13527 = vmatprep.subr.bf16.mxu0 %v18765_v8  ;;  %v398_v7 = vcombine.high %v21688_v25, %v21691_v28  ;;  %v400_v8 = vcombine.high %v21694_v31, %v21697_v32 }
 0x157   :  { %13568 = vmatprep.subr.bf16.mxu1 %v18768_v47  ;;  %v18799_v47 = vld [vmem:[#allocation5 + $0x14c0] ss:$16 sps:$4 sm:$0xff]  }
 0x159   :  { %13528 = vmatpush2.bf16.msra.mxu0 %v18763_v48  ;;  %v18802_v48 = vld [vmem:[#allocation5 + $0x16c0] ss:$16 sps:$4 sm:$0xff]  }
 0x15a   :  { %13569 = vmatpush2.bf16.msra.mxu1 %v18766_v49  ;;  %13529 = vmatprep.subr.bf16.mxu0 %v18771_v50  ;;  %v21711_v49 = vpack.c.bf16 %v398_v7, %v398_v7  ;;  %v21713_v50 = vpack.c.bf16 %v400_v8, %v400_v8  ;;  %v18832_v7 = vld [vmem:[#allocation5 + $0x1620] ss:$16 sps:$4 sm:$0xff]   ;;  %v18837_v8 = vld [vmem:[#allocation5 + $0x1404] ss:$16 sps:$4 sm:$0xff]  }
 0x15b   :  { %13570 = vmatprep.subr.bf16.mxu1 %v18774_v53 }
 0x15d   :  { %13530 = vmatpush2.bf16.msra.mxu0 %v18769_v55 }
 0x15e   :  { %13571 = vmatpush2.bf16.msra.mxu1 %v18772_v56  ;;  %13531 = vmatprep.subr.bf16.mxu0 %v18777_v57 }
 0x15f   :  { %13572 = vmatprep.subr.bf16.mxu1 %v18780_v58 }
 0x161   :  { %13532 = vmatpush2.bf16.msra.mxu0 %v18775_v63  ;;  %v18805_v63 = vld [vmem:[#allocation5 + $0x14a0] ss:$16 sps:$4 sm:$0xff]  }
 0x162   :  { %13573 = vmatpush2.bf16.msra.mxu1 %v18778_v0  ;;  %13533 = vmatprep.subr.bf16.mxu0 %v18783_v1  ;;  %v18808_v0 = vld [vmem:[#allocation5 + $0x16a0] ss:$16 sps:$4 sm:$0xff]  }
 0x163   :  { %13574 = vmatprep.subr.bf16.mxu1 %v18786_v2 }
 0x165   :  { %13534 = vmatpush2.bf16.msra.mxu0 %v18781_v19  ;;  %v18814_v19 = vld [vmem:[#allocation5 + $0x1680] ss:$16 sps:$4 sm:$0xff]  }
 0x166   :  { %13575 = vmatpush2.bf16.msra.mxu1 %v18784_v21  ;;  %13535 = vmatprep.subr.bf16.mxu0 %v18789_v22  ;;  %v18819_v21 = vld [vmem:[#allocation5 + $0x1464] ss:$16 sps:$4 sm:$0xff]  }
 0x167   :  { %13576 = vmatprep.subr.bf16.mxu1 %v18792_v24  ;;  %v18822_v22 = vld [vmem:[#allocation5 + $0x1664] ss:$16 sps:$4 sm:$0xff]   ;;  %v18817_v24 = vld [vmem:[#allocation5 + $0x1460] ss:$16 sps:$4 sm:$0xff]  }
 0x169   :  { %13536 = vmatpush2.bf16.msra.mxu0 %v18787_v37  ;;  %v18828_v37 = vld [vmem:[#allocation5 + $0x1644] ss:$16 sps:$4 sm:$0xff]  }
 0x16a   :  { %13577 = vmatpush2.bf16.msra.mxu1 %v18790_v38  ;;  %13587 = vmatprep.subr.bf16.mxu0 %v18795_v39  ;;  %v18823_v38 = vld [vmem:[#allocation5 + $0x1440] ss:$16 sps:$4 sm:$0xff]  }
 0x16b   :  { %13628 = vmatprep.subr.bf16.mxu1 %v18798_v40  ;;  %v18826_v39 = vld [vmem:[#allocation5 + $0x1640] ss:$16 sps:$4 sm:$0xff]   ;;  %v18831_v40 = vld [vmem:[#allocation5 + $0x1424] ss:$16 sps:$4 sm:$0xff]  }
 0x16c   :  { %v13293_v53 = vpop.f32.mrf.mxu0  ;;  %13538 = vmatmul.mubr.bf16.vlgmr.msra.gmra.mxu0 %v21707_v5 }
 0x16d   :  { %v13334_v55 = vpop.f32.mrf.mxu1  ;;  %13579 = vmatmul.mubr.bf16.vlgmr.msra.gmra.mxu1 %v21709_v9  ;;  %v13294_v56 = vadd.f32 %v13293_v53, %v21681_v41  ;;  %13588 = vmatpush1.bf16.msra.mxu0 %v18793_v42  ;;  %v18834_v42 = vld [vmem:[#allocation5 + $0x1624] ss:$16 sps:$4 sm:$0xff]  }
 0x16e   :  { %13629 = vmatpush1.bf16.msra.mxu1 %v18796_v6  ;;  %v13295_v57 = vpop.f32.mrf.mxu0  ;;  %13589 = vmatprep.subr.bf16.mxu0 %v18801_v11  ;;  %v18829_v6 = vld [vmem:[#allocation5 + $0x1420] ss:$16 sps:$4 sm:$0xff]   ;;  %v18840_v11 = vld [vmem:[#allocation5 + $0x1604] ss:$16 sps:$4 sm:$0xff]  }
 0x16f   :  { %v13336_v58 = vpop.f32.mrf.mxu1  ;;  %13630 = vmatprep.subr.bf16.mxu1 %v18804_v15  ;;  %v21718_v61 = vadd.f32 %v13334_v55, %v13294_v56  ;;  %v13296_v62 = vadd.f32 %v13295_v57, %v21683_v14  ;;  %13619 = vmatprep.mubr.bf16.mxu0 %v21711_v49  ;;  %v18811_v14 = vld [vmem:[#allocation5 + $0x1480] ss:$16 sps:$4 sm:$0xff]   ;;  %v18846_v53 = vld [vmem:[#allocation5 + $0x17e4] ss:$16 sps:$4 sm:$0xff]  }
 0x170   :  { %13660 = vmatprep.mubr.bf16.mxu1 %v21713_v50  ;;  %v13297_v1 = vpop.f32.mrf.mxu0  ;;  %v18835_v15 = vld [vmem:[#allocation5 + $0x1400] ss:$16 sps:$4 sm:$0xff]   ;;  %v18849_v57 = vld [vmem:[#allocation5 + $0x15c4] ss:$16 sps:$4 sm:$0xff]  }
 0x171   :  { %v13338_v41 = vpop.f32.mrf.mxu1  ;;  %v21723_v2 = vadd.f32 %v13336_v58, %v13296_v62  ;;  %13590 = vmatpush1.bf16.msra.mxu0 %v18799_v47  ;;  %v18838_v47 = vld [vmem:[#allocation5 + $0x1600] ss:$16 sps:$4 sm:$0xff]   ;;  %v18852_v58 = vld [vmem:[#allocation5 + $0x17c4] ss:$16 sps:$4 sm:$0xff]  }
 0x172   :  { %13631 = vmatpush1.bf16.msra.mxu1 %v18802_v48  ;;  %v13298_v3 = vpop.f32.mrf.mxu0  ;;  %13591 = vmatprep.subr.bf16.mxu0 %v18807_v59  ;;  %v18843_v48 = vld [vmem:[#allocation5 + $0x15e4] ss:$16 sps:$4 sm:$0xff]   ;;  %v18841_v55 = vld [vmem:[#allocation5 + $0x15e0] ss:$16 sps:$4 sm:$0xff]  }
 0x173   :  { %v13339_v4 = vpop.f32.mrf.mxu1  ;;  %13632 = vmatprep.subr.bf16.mxu1 %v18810_v60  ;;  %v18844_v56 = vld [vmem:[#allocation5 + $0x17e0] ss:$16 sps:$4 sm:$0xff]   ;;  %v18855_v62 = vld [vmem:[#allocation5 + $0x15a4] ss:$16 sps:$4 sm:$0xff]  }
 0x174   :  { %v18847_v59 = vld [vmem:[#allocation5 + $0x15c0] ss:$16 sps:$4 sm:$0xff]   ;;  %v18861_v41 = vld [vmem:[#allocation5 + $0x1584] ss:$16 sps:$4 sm:$0xff]  }
 0x175   :  { %13592 = vmatpush1.bf16.msra.mxu0 %v18805_v63  ;;  %v18850_v60 = vld [vmem:[#allocation5 + $0x17c0] ss:$16 sps:$4 sm:$0xff]   ;;  %v18858_v63 = vld [vmem:[#allocation5 + $0x17a4] ss:$16 sps:$4 sm:$0xff]  }
 0x176   :  { %13633 = vmatpush1.bf16.msra.mxu1 %v18808_v0  ;;  %13593 = vmatprep.subr.bf16.mxu0 %v18813_v17  ;;  %v18853_v0 = vld [vmem:[#allocation5 + $0x15a0] ss:$16 sps:$4 sm:$0xff]   ;;  %v18864_v3 = vld [vmem:[#allocation5 + $0x1784] ss:$16 sps:$4 sm:$0xff]  }
 0x177   :  { %13634 = vmatprep.subr.bf16.mxu1 %v18816_v18  ;;  %v18856_v1 = vld [vmem:[#allocation5 + $0x17a0] ss:$16 sps:$4 sm:$0xff]   ;;  %v18867_v18 = vld [vmem:[#allocation5 + $0x1564] ss:$16 sps:$4 sm:$0xff]  }
 0x178   :  { %v18859_v4 = vld [vmem:[#allocation5 + $0x1580] ss:$16 sps:$4 sm:$0xff]  }
 0x179   :  { %13594 = vmatpush1.bf16.msra.mxu0 %v18811_v14  ;;  %v18862_v17 = vld [vmem:[#allocation5 + $0x1780] ss:$16 sps:$4 sm:$0xff]   ;;  %v18870_v14 = vld [vmem:[#allocation5 + $0x1764] ss:$16 sps:$4 sm:$0xff]  }
 0x17a   :  { %13635 = vmatpush1.bf16.msra.mxu1 %v18814_v19  ;;  %13595 = vmatprep.subr.bf16.mxu0 %v18819_v21  ;;  %v18865_v19 = vld [vmem:[#allocation5 + $0x1560] ss:$16 sps:$4 sm:$0xff]  }
 0x17b   :  { %13636 = vmatprep.subr.bf16.mxu1 %v18822_v22  ;;  %v18868_v21 = vld [vmem:[#allocation5 + $0x1760] ss:$16 sps:$4 sm:$0xff]   ;;  %v18873_v22 = vld [vmem:[#allocation5 + $0x1544] ss:$16 sps:$4 sm:$0xff]  }
 0x17d   :  { %13596 = vmatpush1.bf16.msra.mxu0 %v18817_v24  ;;  %v18876_v24 = vld [vmem:[#allocation5 + $0x1744] ss:$16 sps:$4 sm:$0xff]  }
 0x17e   :  { %13637 = vmatpush1.bf16.msra.mxu1 %v18820_v33  ;;  %13597 = vmatprep.subr.bf16.mxu0 %v18825_v34  ;;  %v63_v33 = vld [vmem:[#allocation2 + $0x30] sm:$0xff] }
 0x17f   :  { %13638 = vmatprep.subr.bf16.mxu1 %v18828_v37  ;;  %v79_v34 = vld [vmem:[#allocation2 + $0xb0] sm:$0xff] }
 0x180   :  { %v95_v37 = vld [vmem:[#allocation2 + $0x130] sm:$0xff] }
 0x181   :  { %13598 = vmatpush1.bf16.msra.mxu0 %v18823_v38  ;;  %v111_v38 = vld [vmem:[#allocation2 + $0x1b0] sm:$0xff] }
 0x182   :  { %13639 = vmatpush1.bf16.msra.mxu1 %v18826_v39  ;;  %13599 = vmatprep.subr.bf16.mxu0 %v18831_v40  ;;  %v18871_v39 = vld [vmem:[#allocation5 + $0x1540] ss:$16 sps:$4 sm:$0xff]  }
 0x183   :  { %13640 = vmatprep.subr.bf16.mxu1 %v18834_v42  ;;  %v18874_v40 = vld [vmem:[#allocation5 + $0x1740] ss:$16 sps:$4 sm:$0xff]   ;;  %v18879_v42 = vld [vmem:[#allocation5 + $0x1524] ss:$16 sps:$4 sm:$0xff]  }
 0x185   :  { %13600 = vmatpush1.bf16.msra.mxu0 %v18829_v6  ;;  %v18882_v6 = vld [vmem:[#allocation5 + $0x1724] ss:$16 sps:$4 sm:$0xff]  }
 0x186   :  { %13641 = vmatpush1.bf16.msra.mxu1 %v18832_v7  ;;  %13601 = vmatprep.subr.bf16.mxu0 %v18837_v8  ;;  %v401_v7 = vcombine.low %v63_v33, %v79_v34  ;;  %v403_v8 = vcombine.low %v95_v37, %v111_v38 }
 0x187   :  { %13642 = vmatprep.subr.bf16.mxu1 %v18840_v11  ;;  %v402_v11 = vcombine.high %v63_v33, %v79_v34 }
 0x189   :  { %13602 = vmatpush1.bf16.msra.mxu0 %v18835_v15  ;;  %v404_v15 = vcombine.high %v95_v37, %v111_v38 }
 0x18a   :  { %13643 = vmatpush1.bf16.msra.mxu1 %v18838_v47  ;;  %13603 = vmatprep.subr.bf16.mxu0 %v18843_v48  ;;  %v18877_v47 = vld [vmem:[#allocation5 + $0x1520] ss:$16 sps:$4 sm:$0xff]  }
 0x18b   :  { %13644 = vmatprep.subr.bf16.mxu1 %v18846_v53  ;;  %v18880_v48 = vld [vmem:[#allocation5 + $0x1720] ss:$16 sps:$4 sm:$0xff]   ;;  %v18885_v53 = vld [vmem:[#allocation5 + $0x1504] ss:$16 sps:$4 sm:$0xff]  }
 0x18d   :  { %13604 = vmatpush2.bf16.msra.mxu0 %v18841_v55  ;;  %v18888_v55 = vld [vmem:[#allocation5 + $0x1704] ss:$16 sps:$4 sm:$0xff]  }
 0x18e   :  { %13645 = vmatpush2.bf16.msra.mxu1 %v18844_v56  ;;  %13605 = vmatprep.subr.bf16.mxu0 %v18849_v57  ;;  %v21726_v56 = vrot.slane %v401_v7, %v21547_v54  ;;  %v21729_v57 = vrot.slane %v403_v8, %v21547_v54  ;;  %v18901_v7 = vld [vmem:[#allocation5 + $0x18a0] ss:$16 sps:$4 sm:$0xff]  }
 0x18f   :  { %13646 = vmatprep.subr.bf16.mxu1 %v18852_v58  ;;  %v21732_v58 = vrot.slane %v402_v11, %v21547_v54  ;;  %v18904_v8 = vld [vmem:[#allocation5 + $0x1aa0] ss:$16 sps:$4 sm:$0xff]  }
 0x191   :  { %13606 = vmatpush2.bf16.msra.mxu0 %v18847_v59  ;;  %v21735_v59 = vrot.slane %v404_v15, %v21547_v54 }
 0x192   :  { %13647 = vmatpush2.bf16.msra.mxu1 %v18850_v60  ;;  %13607 = vmatprep.subr.bf16.mxu0 %v18855_v62  ;;  %v397_v60 = vcombine.low %v21688_v25, %v21691_v28  ;;  %v399_v62 = vcombine.low %v21694_v31, %v21697_v32  ;;  %v18897_v31 = vld [vmem:[#allocation5 + $0x18c4] ss:$16 sps:$4 sm:$0xff]  }
 0x193   :  { %13648 = vmatprep.subr.bf16.mxu1 %v18858_v63  ;;  %v18883_v63 = vld [vmem:[#allocation5 + $0x1500] ss:$16 sps:$4 sm:$0xff]   ;;  %v18900_v32 = vld [vmem:[#allocation5 + $0x1ac4] ss:$16 sps:$4 sm:$0xff]  }
 0x194   :  { %v21745_v25 = vpack.c.bf16 %v397_v60, %v397_v60  ;;  %v21747_v28 = vpack.c.bf16 %v399_v62, %v399_v62  ;;  %v18910_v60 = vld [vmem:[#allocation5 + $0x1a80] ss:$16 sps:$4 sm:$0xff]   ;;  %v18915_v62 = vld [vmem:[#allocation5 + $0x1864] ss:$16 sps:$4 sm:$0xff]  }
 0x195   :  { %13608 = vmatpush2.bf16.msra.mxu0 %v18853_v0  ;;  %v18886_v0 = vld [vmem:[#allocation5 + $0x1700] ss:$16 sps:$4 sm:$0xff]  }
 0x196   :  { %13649 = vmatpush2.bf16.msra.mxu1 %v18856_v1  ;;  %13609 = vmatprep.subr.bf16.mxu0 %v18861_v41  ;;  %v18891_v1 = vld [vmem:[#allocation5 + $0x18e4] ss:$16 sps:$4 sm:$0xff]  }
 0x197   :  { %13650 = vmatprep.subr.bf16.mxu1 %v18864_v3  ;;  %v18894_v41 = vld [vmem:[#allocation5 + $0x1ae4] ss:$16 sps:$4 sm:$0xff]   ;;  %v18889_v3 = vld [vmem:[#allocation5 + $0x18e0] ss:$16 sps:$4 sm:$0xff]  }
 0x199   :  { %13610 = vmatpush2.bf16.msra.mxu0 %v18859_v4  ;;  %v18892_v4 = vld [vmem:[#allocation5 + $0x1ae0] ss:$16 sps:$4 sm:$0xff]  }
 0x19a   :  { %13651 = vmatpush2.bf16.msra.mxu1 %v18862_v17  ;;  %13611 = vmatprep.subr.bf16.mxu0 %v18867_v18  ;;  %v434_v17 = vcombine.high %v21726_v56, %v21729_v57  ;;  %v436_v18 = vcombine.high %v21732_v58, %v21735_v59 }
 0x19b   :  { %13652 = vmatprep.subr.bf16.mxu1 %v18870_v14  ;;  %v18895_v14 = vld [vmem:[#allocation5 + $0x18c0] ss:$16 sps:$4 sm:$0xff]  }
 0x19d   :  { %13612 = vmatpush2.bf16.msra.mxu0 %v18865_v19  ;;  %v18898_v19 = vld [vmem:[#allocation5 + $0x1ac0] ss:$16 sps:$4 sm:$0xff]  }
 0x19e   :  { %13653 = vmatpush2.bf16.msra.mxu1 %v18868_v21  ;;  %13613 = vmatprep.subr.bf16.mxu0 %v18873_v22  ;;  %v21749_v21 = vpack.c.bf16 %v434_v17, %v434_v17  ;;  %v21751_v22 = vpack.c.bf16 %v436_v18, %v436_v18  ;;  %v18922_v17 = vld [vmem:[#allocation5 + $0x1a40] ss:$16 sps:$4 sm:$0xff]   ;;  %v18927_v18 = vld [vmem:[#allocation5 + $0x1824] ss:$16 sps:$4 sm:$0xff]  }
 0x19f   :  { %13654 = vmatprep.subr.bf16.mxu1 %v18876_v24 }
 0x1a1   :  { %13614 = vmatpush2.bf16.msra.mxu0 %v18871_v39  ;;  %v18903_v39 = vld [vmem:[#allocation5 + $0x18a4] ss:$16 sps:$4 sm:$0xff]  }
 0x1a2   :  { %13655 = vmatpush2.bf16.msra.mxu1 %v18874_v40  ;;  %13615 = vmatprep.subr.bf16.mxu0 %v18879_v42  ;;  %v18906_v40 = vld [vmem:[#allocation5 + $0x1aa4] ss:$16 sps:$4 sm:$0xff]  }
 0x1a3   :  { %13656 = vmatprep.subr.bf16.mxu1 %v18882_v6 }
 0x1a5   :  { %13616 = vmatpush2.bf16.msra.mxu0 %v18877_v47 }
 0x1a6   :  { %13657 = vmatpush2.bf16.msra.mxu1 %v18880_v48  ;;  %13617 = vmatprep.subr.bf16.mxu0 %v18885_v53  ;;  %v18909_v53 = vld [vmem:[#allocation5 + $0x1884] ss:$16 sps:$4 sm:$0xff]  }
 0x1a7   :  { %13658 = vmatprep.subr.bf16.mxu1 %v18888_v55  ;;  %v18912_v55 = vld [vmem:[#allocation5 + $0x1a84] ss:$16 sps:$4 sm:$0xff]  }
 0x1a9   :  { %13618 = vmatpush2.bf16.msra.mxu0 %v18883_v63  ;;  %v18918_v63 = vld [vmem:[#allocation5 + $0x1a64] ss:$16 sps:$4 sm:$0xff]  }
 0x1aa   :  { %13659 = vmatpush2.bf16.msra.mxu1 %v18886_v0  ;;  %13669 = vmatprep.subr.bf16.mxu0 %v18891_v1  ;;  %v18913_v0 = vld [vmem:[#allocation5 + $0x1860] ss:$16 sps:$4 sm:$0xff]  }
 0x1ab   :  { %13710 = vmatprep.subr.bf16.mxu1 %v18894_v41  ;;  %v18916_v1 = vld [vmem:[#allocation5 + $0x1a60] ss:$16 sps:$4 sm:$0xff]   ;;  %v18921_v41 = vld [vmem:[#allocation5 + $0x1844] ss:$16 sps:$4 sm:$0xff]  }
 0x1ac   :  { %v13375_v24 = vpop.f32.mrf.mxu0  ;;  %13620 = vmatmul.mubr.bf16.vlgmr.msra.gmra.mxu0 %v21745_v25 }
 0x1ad   :  { %v13416_v33 = vpop.f32.mrf.mxu1  ;;  %13661 = vmatmul.mubr.bf16.vlgmr.msra.gmra.mxu1 %v21747_v28  ;;  %v13376_v34 = vadd.f32 %v13375_v24, %v21718_v61  ;;  %13670 = vmatpush1.bf16.msra.mxu0 %v18889_v3  ;;  %v18924_v3 = vld [vmem:[#allocation5 + $0x1a44] ss:$16 sps:$4 sm:$0xff]  }
 0x1ae   :  { %13711 = vmatpush1.bf16.msra.mxu1 %v18892_v4  ;;  %v13377_v37 = vpop.f32.mrf.mxu0  ;;  %13671 = vmatprep.subr.bf16.mxu0 %v18897_v31  ;;  %v18919_v4 = vld [vmem:[#allocation5 + $0x1840] ss:$16 sps:$4 sm:$0xff]   ;;  %v18930_v31 = vld [vmem:[#allocation5 + $0x1a24] ss:$16 sps:$4 sm:$0xff]  }
 0x1af   :  { %v13418_v38 = vpop.f32.mrf.mxu1  ;;  %13712 = vmatprep.subr.bf16.mxu1 %v18900_v32  ;;  %v21756_v42 = vadd.f32 %v13416_v33, %v13376_v34  ;;  %v13378_v6 = vadd.f32 %v13377_v37, %v21723_v2  ;;  %13701 = vmatprep.mubr.bf16.mxu0 %v21749_v21  ;;  %v18907_v2 = vld [vmem:[#allocation5 + $0x1880] ss:$16 sps:$4 sm:$0xff]   ;;  %v18936_v24 = vld [vmem:[#allocation5 + $0x1a04] ss:$16 sps:$4 sm:$0xff]  }
 0x1b0   :  { %13742 = vmatprep.mubr.bf16.mxu1 %v21751_v22  ;;  %v13379_v11 = vpop.f32.mrf.mxu0  ;;  %v18925_v32 = vld [vmem:[#allocation5 + $0x1820] ss:$16 sps:$4 sm:$0xff]   ;;  %v18939_v37 = vld [vmem:[#allocation5 + $0x19e4] ss:$16 sps:$4 sm:$0xff]  }
 0x1b1   :  { %v13420_v61 = vpop.f32.mrf.mxu1  ;;  %v21761_v15 = vadd.f32 %v13418_v38, %v13378_v6  ;;  %13672 = vmatpush1.bf16.msra.mxu0 %v18895_v14  ;;  %v18928_v14 = vld [vmem:[#allocation5 + $0x1a20] ss:$16 sps:$4 sm:$0xff]   ;;  %v18942_v38 = vld [vmem:[#allocation5 + $0x1be4] ss:$16 sps:$4 sm:$0xff]  }
 0x1b2   :  { %13713 = vmatpush1.bf16.msra.mxu1 %v18898_v19  ;;  %v13380_v47 = vpop.f32.mrf.mxu0  ;;  %13673 = vmatprep.subr.bf16.mxu0 %v18903_v39  ;;  %v18933_v19 = vld [vmem:[#allocation5 + $0x1804] ss:$16 sps:$4 sm:$0xff]   ;;  %v18931_v33 = vld [vmem:[#allocation5 + $0x1800] ss:$16 sps:$4 sm:$0xff]  }
 0x1b3   :  { %v13421_v48 = vpop.f32.mrf.mxu1  ;;  %13714 = vmatprep.subr.bf16.mxu1 %v18906_v40  ;;  %v18934_v34 = vld [vmem:[#allocation5 + $0x1a00] ss:$16 sps:$4 sm:$0xff]   ;;  %v18945_v6 = vld [vmem:[#allocation5 + $0x19c4] ss:$16 sps:$4 sm:$0xff]  }
 0x1b4   :  { %v18937_v39 = vld [vmem:[#allocation5 + $0x19e0] ss:$16 sps:$4 sm:$0xff]   ;;  %v18951_v61 = vld [vmem:[#allocation5 + $0x19a4] ss:$16 sps:$4 sm:$0xff]  }
 0x1b5   :  { %13674 = vmatpush1.bf16.msra.mxu0 %v18901_v7  ;;  %v18940_v40 = vld [vmem:[#allocation5 + $0x1be0] ss:$16 sps:$4 sm:$0xff]   ;;  %v18948_v7 = vld [vmem:[#allocation5 + $0x1bc4] ss:$16 sps:$4 sm:$0xff]  }
 0x1b6   :  { %13715 = vmatpush1.bf16.msra.mxu1 %v18904_v8  ;;  %13675 = vmatprep.subr.bf16.mxu0 %v18909_v53  ;;  %v18943_v8 = vld [vmem:[#allocation5 + $0x19c0] ss:$16 sps:$4 sm:$0xff]   ;;  %v18954_v47 = vld [vmem:[#allocation5 + $0x1ba4] ss:$16 sps:$4 sm:$0xff]  }
 0x1b7   :  { %13716 = vmatprep.subr.bf16.mxu1 %v18912_v55  ;;  %v18946_v11 = vld [vmem:[#allocation5 + $0x1bc0] ss:$16 sps:$4 sm:$0xff]   ;;  %v18957_v55 = vld [vmem:[#allocation5 + $0x1984] ss:$16 sps:$4 sm:$0xff]  }
 0x1b8   :  { %v18949_v48 = vld [vmem:[#allocation5 + $0x19a0] ss:$16 sps:$4 sm:$0xff]  }
 0x1b9   :  { %13676 = vmatpush1.bf16.msra.mxu0 %v18907_v2  ;;  %v18952_v53 = vld [vmem:[#allocation5 + $0x1ba0] ss:$16 sps:$4 sm:$0xff]   ;;  %v18960_v2 = vld [vmem:[#allocation5 + $0x1b84] ss:$16 sps:$4 sm:$0xff]  }
 0x1ba   :  { %13717 = vmatpush1.bf16.msra.mxu1 %v18910_v60  ;;  %13677 = vmatprep.subr.bf16.mxu0 %v18915_v62  ;;  %v18955_v60 = vld [vmem:[#allocation5 + $0x1980] ss:$16 sps:$4 sm:$0xff]  }
 0x1bb   :  { %13718 = vmatprep.subr.bf16.mxu1 %v18918_v63  ;;  %v18958_v62 = vld [vmem:[#allocation5 + $0x1b80] ss:$16 sps:$4 sm:$0xff]   ;;  %v18963_v63 = vld [vmem:[#allocation5 + $0x1964] ss:$16 sps:$4 sm:$0xff]  }
 0x1bd   :  { %13678 = vmatpush1.bf16.msra.mxu0 %v18913_v0  ;;  %v18966_v0 = vld [vmem:[#allocation5 + $0x1b64] ss:$16 sps:$4 sm:$0xff]  }
 0x1be   :  { %13719 = vmatpush1.bf16.msra.mxu1 %v18916_v1  ;;  %13679 = vmatprep.subr.bf16.mxu0 %v18921_v41  ;;  %v18961_v1 = vld [vmem:[#allocation5 + $0x1960] ss:$16 sps:$4 sm:$0xff]  }
 0x1bf   :  { %13720 = vmatprep.subr.bf16.mxu1 %v18924_v3  ;;  %v18964_v41 = vld [vmem:[#allocation5 + $0x1b60] ss:$16 sps:$4 sm:$0xff]   ;;  %v18969_v3 = vld [vmem:[#allocation5 + $0x1944] ss:$16 sps:$4 sm:$0xff]  }
 0x1c1   :  { %13680 = vmatpush1.bf16.msra.mxu0 %v18919_v4  ;;  %v18972_v4 = vld [vmem:[#allocation5 + $0x1b44] ss:$16 sps:$4 sm:$0xff]  }
 0x1c2   :  { %13721 = vmatpush1.bf16.msra.mxu1 %v18922_v17  ;;  %13681 = vmatprep.subr.bf16.mxu0 %v18927_v18  ;;  %v64_v17 = vld [vmem:[#allocation2 + $0x38] sm:$0xff] }
 0x1c3   :  { %13722 = vmatprep.subr.bf16.mxu1 %v18930_v31  ;;  %v80_v18 = vld [vmem:[#allocation2 + $0xb8] sm:$0xff] }
 0x1c4   :  { %v96_v31 = vld [vmem:[#allocation2 + $0x138] sm:$0xff] }
 0x1c5   :  { %13682 = vmatpush1.bf16.msra.mxu0 %v18925_v32  ;;  %v112_v32 = vld [vmem:[#allocation2 + $0x1b8] sm:$0xff] }
 0x1c6   :  { %13723 = vmatpush1.bf16.msra.mxu1 %v18928_v14  ;;  %13683 = vmatprep.subr.bf16.mxu0 %v18933_v19  ;;  %v18967_v14 = vld [vmem:[#allocation5 + $0x1940] ss:$16 sps:$4 sm:$0xff]  }
 0x1c7   :  { %13724 = vmatprep.subr.bf16.mxu1 %v18936_v24  ;;  %v18970_v19 = vld [vmem:[#allocation5 + $0x1b40] ss:$16 sps:$4 sm:$0xff]   ;;  %v18975_v24 = vld [vmem:[#allocation5 + $0x1924] ss:$16 sps:$4 sm:$0xff]  }
 0x1c9   :  { %13684 = vmatpush1.bf16.msra.mxu0 %v18931_v33  ;;  %v18978_v33 = vld [vmem:[#allocation5 + $0x1b24] ss:$16 sps:$4 sm:$0xff]  }
 0x1ca   :  { %13725 = vmatpush1.bf16.msra.mxu1 %v18934_v34  ;;  %13685 = vmatprep.subr.bf16.mxu0 %v18939_v37  ;;  %v437_v34 = vcombine.low %v64_v17, %v80_v18  ;;  %v439_v37 = vcombine.low %v96_v31, %v112_v32 }
 0x1cb   :  { %13726 = vmatprep.subr.bf16.mxu1 %v18942_v38  ;;  %v438_v38 = vcombine.high %v64_v17, %v80_v18  ;;  %v18994_v17 = vld [vmem:[#allocation5 + $0x1ec0] ss:$16 sps:$4 sm:$0xff]  }
 0x1cd   :  { %13686 = vmatpush2.bf16.msra.mxu0 %v18937_v39  ;;  %v440_v39 = vcombine.high %v96_v31, %v112_v32 }
 0x1ce   :  { %13727 = vmatpush2.bf16.msra.mxu1 %v18940_v40  ;;  %13687 = vmatprep.subr.bf16.mxu0 %v18945_v6  ;;  %v18973_v40 = vld [vmem:[#allocation5 + $0x1920] ss:$16 sps:$4 sm:$0xff]  }
 0x1cf   :  { %13728 = vmatprep.subr.bf16.mxu1 %v18948_v7  ;;  %v18976_v6 = vld [vmem:[#allocation5 + $0x1b20] ss:$16 sps:$4 sm:$0xff]   ;;  %v18981_v7 = vld [vmem:[#allocation5 + $0x1904] ss:$16 sps:$4 sm:$0xff]  }
 0x1d1   :  { %13688 = vmatpush2.bf16.msra.mxu0 %v18943_v8  ;;  %v18984_v8 = vld [vmem:[#allocation5 + $0x1b04] ss:$16 sps:$4 sm:$0xff]  }
 0x1d2   :  { %13729 = vmatpush2.bf16.msra.mxu1 %v18946_v11  ;;  %13689 = vmatprep.subr.bf16.mxu0 %v18951_v61  ;;  %v21764_v11 = vrot.slane %v437_v34, %v21547_v54  ;;  %v21767_v61 = vrot.slane %v439_v37, %v21547_v54  ;;  %v18999_v34 = vld [vmem:[#allocation5 + $0x1ca4] ss:$16 sps:$4 sm:$0xff]  }
 0x1d3   :  { %13730 = vmatprep.subr.bf16.mxu1 %v18954_v47  ;;  %v21770_v47 = vrot.slane %v438_v38, %v21547_v54  ;;  %v19002_v37 = vld [vmem:[#allocation5 + $0x1ea4] ss:$16 sps:$4 sm:$0xff]  }
 0x1d5   :  { %13690 = vmatpush2.bf16.msra.mxu0 %v18949_v48  ;;  %v21773_v48 = vrot.slane %v440_v39, %v21547_v54 }
 0x1d6   :  { %13731 = vmatpush2.bf16.msra.mxu1 %v18952_v53  ;;  %13691 = vmatprep.subr.bf16.mxu0 %v18957_v55  ;;  %v433_v53 = vcombine.low %v21726_v56, %v21729_v57  ;;  %v435_v55 = vcombine.low %v21732_v58, %v21735_v59  ;;  %v18993_v58 = vld [vmem:[#allocation5 + $0x1cc4] ss:$16 sps:$4 sm:$0xff]  }
 0x1d7   :  { %13732 = vmatprep.subr.bf16.mxu1 %v18960_v2  ;;  %v18979_v2 = vld [vmem:[#allocation5 + $0x1900] ss:$16 sps:$4 sm:$0xff]   ;;  %v18996_v59 = vld [vmem:[#allocation5 + $0x1ec4] ss:$16 sps:$4 sm:$0xff]  }
 0x1d8   :  { %v21783_v56 = vpack.c.bf16 %v433_v53, %v433_v53  ;;  %v21785_v57 = vpack.c.bf16 %v435_v55, %v435_v55 }
 0x1d9   :  { %13692 = vmatpush2.bf16.msra.mxu0 %v18955_v60  ;;  %v18982_v60 = vld [vmem:[#allocation5 + $0x1b00] ss:$16 sps:$4 sm:$0xff]  }
 0x1da   :  { %13733 = vmatpush2.bf16.msra.mxu1 %v18958_v62  ;;  %13693 = vmatprep.subr.bf16.mxu0 %v18963_v63  ;;  %v18987_v62 = vld [vmem:[#allocation5 + $0x1ce4] ss:$16 sps:$4 sm:$0xff]  }
 0x1db   :  { %13734 = vmatprep.subr.bf16.mxu1 %v18966_v0  ;;  %v18990_v63 = vld [vmem:[#allocation5 + $0x1ee4] ss:$16 sps:$4 sm:$0xff]   ;;  %v18985_v0 = vld [vmem:[#allocation5 + $0x1ce0] ss:$16 sps:$4 sm:$0xff]  }
 0x1dd   :  { %13694 = vmatpush2.bf16.msra.mxu0 %v18961_v1  ;;  %v18988_v1 = vld [vmem:[#allocation5 + $0x1ee0] ss:$16 sps:$4 sm:$0xff]  }
 0x1de   :  { %13735 = vmatpush2.bf16.msra.mxu1 %v18964_v41  ;;  %13695 = vmatprep.subr.bf16.mxu0 %v18969_v3  ;;  %v470_v41 = vcombine.high %v21764_v11, %v21767_v61  ;;  %v472_v3 = vcombine.high %v21770_v47, %v21773_v48 }
 0x1df   :  { %13736 = vmatprep.subr.bf16.mxu1 %v18972_v4  ;;  %v18991_v4 = vld [vmem:[#allocation5 + $0x1cc0] ss:$16 sps:$4 sm:$0xff]  }
 0x1e0   :  { %v21787_v18 = vpack.c.bf16 %v470_v41, %v470_v41  ;;  %v21789_v31 = vpack.c.bf16 %v472_v3, %v472_v3  ;;  %v19012_v41 = vld [vmem:[#allocation5 + $0x1e60] ss:$16 sps:$4 sm:$0xff]   ;;  %v19017_v3 = vld [vmem:[#allocation5 + $0x1c44] ss:$16 sps:$4 sm:$0xff]  }
 0x1e1   :  { %13696 = vmatpush2.bf16.msra.mxu0 %v18967_v14 }
 0x1e2   :  { %13737 = vmatpush2.bf16.msra.mxu1 %v18970_v19  ;;  %13697 = vmatprep.subr.bf16.mxu0 %v18975_v24 }
 0x1e3   :  { %13738 = vmatprep.subr.bf16.mxu1 %v18978_v33 }
 0x1e5   :  { %13698 = vmatpush2.bf16.msra.mxu0 %v18973_v40  ;;  %v18997_v40 = vld [vmem:[#allocation5 + $0x1ca0] ss:$16 sps:$4 sm:$0xff]  }
 0x1e6   :  { %13739 = vmatpush2.bf16.msra.mxu1 %v18976_v6  ;;  %13699 = vmatprep.subr.bf16.mxu0 %v18981_v7  ;;  %v19000_v6 = vld [vmem:[#allocation5 + $0x1ea0] ss:$16 sps:$4 sm:$0xff]  }
 0x1e7   :  { %13740 = vmatprep.subr.bf16.mxu1 %v18984_v8 }
 0x1e9   :  { %13700 = vmatpush2.bf16.msra.mxu0 %v18979_v2  ;;  %v19005_v2 = vld [vmem:[#allocation5 + $0x1c84] ss:$16 sps:$4 sm:$0xff]  }
 0x1ea   :  { %13741 = vmatpush2.bf16.msra.mxu1 %v18982_v60  ;;  %13751 = vmatprep.subr.bf16.mxu0 %v18987_v62  ;;  %v19008_v60 = vld [vmem:[#allocation5 + $0x1e84] ss:$16 sps:$4 sm:$0xff]   ;;  %v19006_v62 = vld [vmem:[#allocation5 + $0x1e80] ss:$16 sps:$4 sm:$0xff]  }
 0x1eb   :  { %13792 = vmatprep.subr.bf16.mxu1 %v18990_v63  ;;  %v19011_v63 = vld [vmem:[#allocation5 + $0x1c64] ss:$16 sps:$4 sm:$0xff]  }
 0x1ec   :  { %v13457_v32 = vpop.f32.mrf.mxu0  ;;  %13702 = vmatmul.mubr.bf16.vlgmr.msra.gmra.mxu0 %v21783_v56 }
 0x1ed   :  { %v13498_v14 = vpop.f32.mrf.mxu1  ;;  %13743 = vmatmul.mubr.bf16.vlgmr.msra.gmra.mxu1 %v21785_v57  ;;  %v13458_v19 = vadd.f32 %v13457_v32, %v21756_v42  ;;  %13752 = vmatpush1.bf16.msra.mxu0 %v18985_v0  ;;  %v19014_v0 = vld [vmem:[#allocation5 + $0x1e64] ss:$16 sps:$4 sm:$0xff]  }
 0x1ee   :  { %13793 = vmatpush1.bf16.msra.mxu1 %v18988_v1  ;;  %v13459_v24 = vpop.f32.mrf.mxu0  ;;  %13753 = vmatprep.subr.bf16.mxu0 %v18993_v58  ;;  %v19009_v1 = vld [vmem:[#allocation5 + $0x1c60] ss:$16 sps:$4 sm:$0xff]   ;;  %v19020_v58 = vld [vmem:[#allocation5 + $0x1e44] ss:$16 sps:$4 sm:$0xff]  }
 0x1ef   :  { %v13500_v33 = vpop.f32.mrf.mxu1  ;;  %13794 = vmatprep.subr.bf16.mxu1 %v18996_v59  ;;  %v21794_v38 = vadd.f32 %v13498_v14, %v13458_v19  ;;  %v13460_v39 = vadd.f32 %v13459_v24, %v21761_v15  ;;  %13783 = vmatprep.mubr.bf16.mxu0 %v21787_v18  ;;  %v19003_v15 = vld [vmem:[#allocation5 + $0x1c80] ss:$16 sps:$4 sm:$0xff]   ;;  %v19026_v32 = vld [vmem:[#allocation5 + $0x1e24] ss:$16 sps:$4 sm:$0xff]  }
 0x1f0   :  { %13824 = vmatprep.mubr.bf16.mxu1 %v21789_v31  ;;  %v13461_v7 = vpop.f32.mrf.mxu0  ;;  %v19015_v59 = vld [vmem:[#allocation5 + $0x1c40] ss:$16 sps:$4 sm:$0xff]   ;;  %v19029_v24 = vld [vmem:[#allocation5 + $0x1c04] ss:$16 sps:$4 sm:$0xff]  }
 0x1f1   :  { %v13502_v42 = vpop.f32.mrf.mxu1  ;;  %v21799_v8 = vadd.f32 %v13500_v33, %v13460_v39  ;;  %13754 = vmatpush1.bf16.msra.mxu0 %v18991_v4  ;;  %v19018_v4 = vld [vmem:[#allocation5 + $0x1e40] ss:$16 sps:$4 sm:$0xff]   ;;  %v19032_v33 = vld [vmem:[#allocation5 + $0x1e04] ss:$16 sps:$4 sm:$0xff]  }
 0x1f2   :  { %13795 = vmatpush1.bf16.msra.mxu1 %v18994_v17  ;;  %v13462_v53 = vpop.f32.mrf.mxu0  ;;  %13755 = vmatprep.subr.bf16.mxu0 %v18999_v34  ;;  %v19023_v17 = vld [vmem:[#allocation5 + $0x1c24] ss:$16 sps:$4 sm:$0xff]   ;;  %v19021_v14 = vld [vmem:[#allocation5 + $0x1c20] ss:$16 sps:$4 sm:$0xff]  }
 0x1f3   :  { %v13503_v55 = vpop.f32.mrf.mxu1  ;;  %13796 = vmatprep.subr.bf16.mxu1 %v19002_v37  ;;  %v19024_v19 = vld [vmem:[#allocation5 + $0x1e20] ss:$16 sps:$4 sm:$0xff]   ;;  %v19035_v39 = vld [vmem:[#allocation5 + $0x1de4] ss:$16 sps:$4 sm:$0xff]  }
 0x1f4   :  { %v19027_v34 = vld [vmem:[#allocation5 + $0x1c00] ss:$16 sps:$4 sm:$0xff]   ;;  %v19041_v42 = vld [vmem:[#allocation5 + $0x1dc4] ss:$16 sps:$4 sm:$0xff]  }
 0x1f5   :  { %13756 = vmatpush1.bf16.msra.mxu0 %v18997_v40  ;;  %v19030_v37 = vld [vmem:[#allocation5 + $0x1e00] ss:$16 sps:$4 sm:$0xff]   ;;  %v19038_v40 = vld [vmem:[#allocation5 + $0x1fe4] ss:$16 sps:$4 sm:$0xff]  }
 0x1f6   :  { %13797 = vmatpush1.bf16.msra.mxu1 %v19000_v6  ;;  %13757 = vmatprep.subr.bf16.mxu0 %v19005_v2  ;;  %v19033_v6 = vld [vmem:[#allocation5 + $0x1de0] ss:$16 sps:$4 sm:$0xff]   ;;  %v19044_v53 = vld [vmem:[#allocation5 + $0x1fc4] ss:$16 sps:$4 sm:$0xff]  }
 0x1f7   :  { %13798 = vmatprep.subr.bf16.mxu1 %v19008_v60  ;;  %v19036_v7 = vld [vmem:[#allocation5 + $0x1fe0] ss:$16 sps:$4 sm:$0xff]   ;;  %v19047_v60 = vld [vmem:[#allocation5 + $0x1da4] ss:$16 sps:$4 sm:$0xff]  }
 0x1f8   :  { %v19039_v55 = vld [vmem:[#allocation5 + $0x1dc0] ss:$16 sps:$4 sm:$0xff]  }
 0x1f9   :  { %13758 = vmatpush1.bf16.msra.mxu0 %v19003_v15  ;;  %v19042_v2 = vld [vmem:[#allocation5 + $0x1fc0] ss:$16 sps:$4 sm:$0xff]   ;;  %v19050_v15 = vld [vmem:[#allocation5 + $0x1fa4] ss:$16 sps:$4 sm:$0xff]  }
 0x1fa   :  { %13799 = vmatpush1.bf16.msra.mxu1 %v19006_v62  ;;  %13759 = vmatprep.subr.bf16.mxu0 %v19011_v63  ;;  %v19045_v62 = vld [vmem:[#allocation5 + $0x1da0] ss:$16 sps:$4 sm:$0xff]  }
 0x1fb   :  { %13800 = vmatprep.subr.bf16.mxu1 %v19014_v0  ;;  %v19048_v63 = vld [vmem:[#allocation5 + $0x1fa0] ss:$16 sps:$4 sm:$0xff]   ;;  %v19053_v0 = vld [vmem:[#allocation5 + $0x1d84] ss:$16 sps:$4 sm:$0xff]  }
 0x1fd   :  { %13760 = vmatpush1.bf16.msra.mxu0 %v19009_v1  ;;  %v19056_v1 = vld [vmem:[#allocation5 + $0x1f84] ss:$16 sps:$4 sm:$0xff]  }
 0x1fe   :  { %13801 = vmatpush1.bf16.msra.mxu1 %v19012_v41  ;;  %13761 = vmatprep.subr.bf16.mxu0 %v19017_v3  ;;  %v19051_v41 = vld [vmem:[#allocation5 + $0x1d80] ss:$16 sps:$4 sm:$0xff]  }
 0x1ff   :  { %13802 = vmatprep.subr.bf16.mxu1 %v19020_v58  ;;  %v19054_v3 = vld [vmem:[#allocation5 + $0x1f80] ss:$16 sps:$4 sm:$0xff]   ;;  %v19059_v58 = vld [vmem:[#allocation5 + $0x1d64] ss:$16 sps:$4 sm:$0xff]  }
 0x201   :  { %13762 = vmatpush1.bf16.msra.mxu0 %v19015_v59  ;;  %v19062_v59 = vld [vmem:[#allocation5 + $0x1f64] ss:$16 sps:$4 sm:$0xff]  }
 0x202   :  { %13803 = vmatpush1.bf16.msra.mxu1 %v19018_v4  ;;  %13763 = vmatprep.subr.bf16.mxu0 %v19023_v17  ;;  %v19057_v4 = vld [vmem:[#allocation5 + $0x1d60] ss:$16 sps:$4 sm:$0xff]  }
 0x203   :  { %13804 = vmatprep.subr.bf16.mxu1 %v19026_v32  ;;  %v19060_v17 = vld [vmem:[#allocation5 + $0x1f60] ss:$16 sps:$4 sm:$0xff]   ;;  %v19065_v32 = vld [vmem:[#allocation5 + $0x1d44] ss:$16 sps:$4 sm:$0xff]  }
 0x205   :  { %13764 = vmatpush1.bf16.msra.mxu0 %v19021_v14  ;;  %v19068_v14 = vld [vmem:[#allocation5 + $0x1f44] ss:$16 sps:$4 sm:$0xff]  }
 0x206   :  { %13805 = vmatpush1.bf16.msra.mxu1 %v19024_v19  ;;  %13765 = vmatprep.subr.bf16.mxu0 %v19029_v24  ;;  %v65_v19 = vld [vmem:[#allocation2 + $0x40] sm:$0xff] }
 0x207   :  { %13806 = vmatprep.subr.bf16.mxu1 %v19032_v33  ;;  %v81_v24 = vld [vmem:[#allocation2 + $0xc0] sm:$0xff] }
 0x208   :  { %v97_v33 = vld [vmem:[#allocation2 + $0x140] sm:$0xff] }
 0x209   :  { %13766 = vmatpush1.bf16.msra.mxu0 %v19027_v34  ;;  %v113_v34 = vld [vmem:[#allocation2 + $0x1c0] sm:$0xff] }
 0x20a   :  { %13807 = vmatpush1.bf16.msra.mxu1 %v19030_v37  ;;  %13767 = vmatprep.subr.bf16.mxu0 %v19035_v39  ;;  %v19063_v37 = vld [vmem:[#allocation5 + $0x1d40] ss:$16 sps:$4 sm:$0xff]  }
 0x20b   :  { %13808 = vmatprep.subr.bf16.mxu1 %v19038_v40  ;;  %v19066_v39 = vld [vmem:[#allocation5 + $0x1f40] ss:$16 sps:$4 sm:$0xff]   ;;  %v19071_v40 = vld [vmem:[#allocation5 + $0x1d24] ss:$16 sps:$4 sm:$0xff]  }
 0x20d   :  { %13768 = vmatpush2.bf16.msra.mxu0 %v19033_v6  ;;  %v19074_v6 = vld [vmem:[#allocation5 + $0x1f24] ss:$16 sps:$4 sm:$0xff]  }
 0x20e   :  { %13809 = vmatpush2.bf16.msra.mxu1 %v19036_v7  ;;  %13769 = vmatprep.subr.bf16.mxu0 %v19041_v42  ;;  %v473_v7 = vcombine.low %v65_v19, %v81_v24  ;;  %v475_v42 = vcombine.low %v97_v33, %v113_v34 }
 0x20f   :  { %13810 = vmatprep.subr.bf16.mxu1 %v19044_v53  ;;  %v474_v53 = vcombine.high %v65_v19, %v81_v24  ;;  %v19084_v19 = vld [vmem:[#allocation5 + $0x22e0] ss:$16 sps:$4 sm:$0xff]  }
 0x211   :  { %13770 = vmatpush2.bf16.msra.mxu0 %v19039_v55  ;;  %v476_v55 = vcombine.high %v97_v33, %v113_v34  ;;  %v19087_v34 = vld [vmem:[#allocation5 + $0x20c0] ss:$16 sps:$4 sm:$0xff]  }
 0x212   :  { %13811 = vmatpush2.bf16.msra.mxu1 %v19042_v2  ;;  %13771 = vmatprep.subr.bf16.mxu0 %v19047_v60  ;;  %v19069_v2 = vld [vmem:[#allocation5 + $0x1d20] ss:$16 sps:$4 sm:$0xff]  }
 0x213   :  { %13812 = vmatprep.subr.bf16.mxu1 %v19050_v15  ;;  %v19072_v60 = vld [vmem:[#allocation5 + $0x1f20] ss:$16 sps:$4 sm:$0xff]   ;;  %v19077_v15 = vld [vmem:[#allocation5 + $0x1d04] ss:$16 sps:$4 sm:$0xff]  }
 0x215   :  { %13772 = vmatpush2.bf16.msra.mxu0 %v19045_v62  ;;  %v19080_v62 = vld [vmem:[#allocation5 + $0x1f04] ss:$16 sps:$4 sm:$0xff]  }
 0x216   :  { %13813 = vmatpush2.bf16.msra.mxu1 %v19048_v63  ;;  %13773 = vmatprep.subr.bf16.mxu0 %v19053_v0  ;;  %v21802_v63 = vrot.slane %v473_v7, %v21547_v54  ;;  %v21805_v0 = vrot.slane %v475_v42, %v21547_v54 }
 0x217   :  { %13814 = vmatprep.subr.bf16.mxu1 %v19056_v1  ;;  %v21808_v1 = vrot.slane %v474_v53, %v21547_v54 }
 0x218   :  { %v506_v24 = vcombine.high %v21802_v63, %v21805_v0 }
 0x219   :  { %13774 = vmatpush2.bf16.msra.mxu0 %v19051_v41  ;;  %v21811_v41 = vrot.slane %v476_v55, %v21547_v54 }
 0x21a   :  { %13815 = vmatpush2.bf16.msra.mxu1 %v19054_v3  ;;  %13775 = vmatprep.subr.bf16.mxu0 %v19059_v58  ;;  %v469_v3 = vcombine.low %v21764_v11, %v21767_v61  ;;  %v471_v58 = vcombine.low %v21770_v47, %v21773_v48  ;;  %v19089_v47 = vld [vmem:[#allocation5 + $0x20c4] ss:$16 sps:$4 sm:$0xff]  }
 0x21b   :  { %13816 = vmatprep.subr.bf16.mxu1 %v19062_v59  ;;  %v19075_v59 = vld [vmem:[#allocation5 + $0x1d00] ss:$16 sps:$4 sm:$0xff]   ;;  %v508_v33 = vcombine.high %v21808_v1, %v21811_v41  ;;  %v19092_v48 = vld [vmem:[#allocation5 + $0x22c4] ss:$16 sps:$4 sm:$0xff]  }
 0x21c   :  { %v21821_v11 = vpack.c.bf16 %v469_v3, %v469_v3  ;;  %v21823_v61 = vpack.c.bf16 %v471_v58, %v471_v58  ;;  %v19093_v3 = vld [vmem:[#allocation5 + $0x20a0] ss:$16 sps:$4 sm:$0xff]  }
 0x21d   :  { %13776 = vmatpush2.bf16.msra.mxu0 %v19057_v4  ;;  %v19078_v4 = vld [vmem:[#allocation5 + $0x1f00] ss:$16 sps:$4 sm:$0xff]  }
 0x21e   :  { %13817 = vmatpush2.bf16.msra.mxu1 %v19060_v17  ;;  %13777 = vmatprep.subr.bf16.mxu0 %v19065_v32  ;;  %v19083_v17 = vld [vmem:[#allocation5 + $0x20e4] ss:$16 sps:$4 sm:$0xff]   ;;  %v19096_v58 = vld [vmem:[#allocation5 + $0x22a0] ss:$16 sps:$4 sm:$0xff]  }
 0x21f   :  { %13818 = vmatprep.subr.bf16.mxu1 %v19068_v14  ;;  %v19086_v32 = vld [vmem:[#allocation5 + $0x22e4] ss:$16 sps:$4 sm:$0xff]   ;;  %v19081_v14 = vld [vmem:[#allocation5 + $0x20e0] ss:$16 sps:$4 sm:$0xff]  }
 0x221   :  { %13778 = vmatpush2.bf16.msra.mxu0 %v19063_v37  ;;  %v19090_v37 = vld [vmem:[#allocation5 + $0x22c0] ss:$16 sps:$4 sm:$0xff]  }
 0x222   :  { %13819 = vmatpush2.bf16.msra.mxu1 %v19066_v39  ;;  %13779 = vmatprep.subr.bf16.mxu0 %v19071_v40  ;;  %v21825_v39 = vpack.c.bf16 %v506_v24, %v506_v24  ;;  %v21827_v40 = vpack.c.bf16 %v508_v33, %v508_v33  ;;  %v19102_v24 = vld [vmem:[#allocation5 + $0x2280] ss:$16 sps:$4 sm:$0xff]   ;;  %v19107_v33 = vld [vmem:[#allocation5 + $0x2064] ss:$16 sps:$4 sm:$0xff]  }
 0x223   :  { %13820 = vmatprep.subr.bf16.mxu1 %v19074_v6 }
 0x225   :  { %13780 = vmatpush2.bf16.msra.mxu0 %v19069_v2  ;;  %v19095_v2 = vld [vmem:[#allocation5 + $0x20a4] ss:$16 sps:$4 sm:$0xff]  }
 0x226   :  { %13821 = vmatpush2.bf16.msra.mxu1 %v19072_v60  ;;  %13781 = vmatprep.subr.bf16.mxu0 %v19077_v15  ;;  %v19098_v60 = vld [vmem:[#allocation5 + $0x22a4] ss:$16 sps:$4 sm:$0xff]  }
 0x227   :  { %13822 = vmatprep.subr.bf16.mxu1 %v19080_v62 }
 0x229   :  { %13782 = vmatpush2.bf16.msra.mxu0 %v19075_v59 }
 0x22a   :  { %13823 = vmatpush2.bf16.msra.mxu1 %v19078_v4  ;;  %13833 = vmatprep.subr.bf16.mxu0 %v19083_v17 }
 0x22b   :  { %13874 = vmatprep.subr.bf16.mxu1 %v19086_v32 }
 0x22c   :  { %v13539_v6 = vpop.f32.mrf.mxu0  ;;  %13784 = vmatmul.mubr.bf16.vlgmr.msra.gmra.mxu0 %v21821_v11 }
 0x22d   :  { %v13580_v7 = vpop.f32.mrf.mxu1  ;;  %13825 = vmatmul.mubr.bf16.vlgmr.msra.gmra.mxu1 %v21823_v61  ;;  %v13540_v42 = vadd.f32 %v13539_v6, %v21794_v38  ;;  %13834 = vmatpush1.bf16.msra.mxu0 %v19081_v14  ;;  %v19101_v14 = vld [vmem:[#allocation5 + $0x2084] ss:$16 sps:$4 sm:$0xff]   ;;  %v19108_v6 = vld [vmem:[#allocation5 + $0x2260] ss:$16 sps:$4 sm:$0xff]  }
 0x22e   :  { %13875 = vmatpush1.bf16.msra.mxu1 %v19084_v19  ;;  %v13541_v53 = vpop.f32.mrf.mxu0  ;;  %13835 = vmatprep.subr.bf16.mxu0 %v19089_v47  ;;  %v19104_v19 = vld [vmem:[#allocation5 + $0x2284] ss:$16 sps:$4 sm:$0xff]  }
 0x22f   :  { %v13582_v55 = vpop.f32.mrf.mxu1  ;;  %13876 = vmatprep.subr.bf16.mxu1 %v19092_v48  ;;  %v21832_v15 = vadd.f32 %v13580_v7, %v13540_v42  ;;  %v13542_v62 = vadd.f32 %v13541_v53, %v21799_v8  ;;  %13865 = vmatprep.mubr.bf16.mxu0 %v21825_v39  ;;  %v19099_v8 = vld [vmem:[#allocation5 + $0x2080] ss:$16 sps:$4 sm:$0xff]   ;;  %v19110_v47 = vld [vmem:[#allocation5 + $0x2264] ss:$16 sps:$4 sm:$0xff]  }
 0x230   :  { %13906 = vmatprep.mubr.bf16.mxu1 %v21827_v40  ;;  %v13543_v59 = vpop.f32.mrf.mxu0  ;;  %v19105_v48 = vld [vmem:[#allocation5 + $0x2060] ss:$16 sps:$4 sm:$0xff]   ;;  %v19119_v53 = vld [vmem:[#allocation5 + $0x2024] ss:$16 sps:$4 sm:$0xff]  }
 0x231   :  { %v13584_v38 = vpop.f32.mrf.mxu1  ;;  %v21837_v4 = vadd.f32 %v13582_v55, %v13542_v62  ;;  %13836 = vmatpush1.bf16.msra.mxu0 %v19087_v34  ;;  %v19113_v34 = vld [vmem:[#allocation5 + $0x2044] ss:$16 sps:$4 sm:$0xff]   ;;  %v19111_v7 = vld [vmem:[#allocation5 + $0x2040] ss:$16 sps:$4 sm:$0xff]  }
 0x232   :  { %13877 = vmatpush1.bf16.msra.mxu1 %v19090_v37  ;;  %v13544_v17 = vpop.f32.mrf.mxu0  ;;  %13837 = vmatprep.subr.bf16.mxu0 %v19095_v2  ;;  %v19116_v37 = vld [vmem:[#allocation5 + $0x2244] ss:$16 sps:$4 sm:$0xff]   ;;  %v19114_v42 = vld [vmem:[#allocation5 + $0x2240] ss:$16 sps:$4 sm:$0xff]  }
 0x233   :  { %v13585_v32 = vpop.f32.mrf.mxu1  ;;  %13878 = vmatprep.subr.bf16.mxu1 %v19098_v60  ;;  %v19122_v55 = vld [vmem:[#allocation5 + $0x2224] ss:$16 sps:$4 sm:$0xff]   ;;  %v19117_v2 = vld [vmem:[#allocation5 + $0x2020] ss:$16 sps:$4 sm:$0xff]  }
 0x234   :  { %v19120_v60 = vld [vmem:[#allocation5 + $0x2220] ss:$16 sps:$4 sm:$0xff]   ;;  %v19125_v62 = vld [vmem:[#allocation5 + $0x2004] ss:$16 sps:$4 sm:$0xff]  }
 0x235   :  { %13838 = vmatpush1.bf16.msra.mxu0 %v19093_v3  ;;  %v19128_v3 = vld [vmem:[#allocation5 + $0x2204] ss:$16 sps:$4 sm:$0xff]   ;;  %v19126_v59 = vld [vmem:[#allocation5 + $0x2200] ss:$16 sps:$4 sm:$0xff]  }
 0x236   :  { %13879 = vmatpush1.bf16.msra.mxu1 %v19096_v58  ;;  %13839 = vmatprep.subr.bf16.mxu0 %v19101_v14  ;;  %v19123_v58 = vld [vmem:[#allocation5 + $0x2000] ss:$16 sps:$4 sm:$0xff]   ;;  %v19131_v38 = vld [vmem:[#allocation5 + $0x21e4] ss:$16 sps:$4 sm:$0xff]  }
 0x237   :  { %13880 = vmatprep.subr.bf16.mxu1 %v19104_v19  ;;  %v19134_v17 = vld [vmem:[#allocation5 + $0x23e4] ss:$16 sps:$4 sm:$0xff]   ;;  %v19129_v32 = vld [vmem:[#allocation5 + $0x21e0] ss:$16 sps:$4 sm:$0xff]  }
 0x238   :  { %v19132_v14 = vld [vmem:[#allocation5 + $0x23e0] ss:$16 sps:$4 sm:$0xff]   ;;  %v19137_v19 = vld [vmem:[#allocation5 + $0x21c4] ss:$16 sps:$4 sm:$0xff]  }
 0x239   :  { %13840 = vmatpush1.bf16.msra.mxu0 %v19099_v8  ;;  %v19140_v8 = vld [vmem:[#allocation5 + $0x23c4] ss:$16 sps:$4 sm:$0xff]  }
 0x23a   :  { %13881 = vmatpush1.bf16.msra.mxu1 %v19102_v24  ;;  %13841 = vmatprep.subr.bf16.mxu0 %v19107_v33  ;;  %v19135_v24 = vld [vmem:[#allocation5 + $0x21c0] ss:$16 sps:$4 sm:$0xff]  }
 0x23b   :  { %13882 = vmatprep.subr.bf16.mxu1 %v19110_v47  ;;  %v19138_v33 = vld [vmem:[#allocation5 + $0x23c0] ss:$16 sps:$4 sm:$0xff]   ;;  %v19143_v47 = vld [vmem:[#allocation5 + $0x21a4] ss:$16 sps:$4 sm:$0xff]  }
 0x23d   :  { %13842 = vmatpush1.bf16.msra.mxu0 %v19105_v48  ;;  %v19146_v48 = vld [vmem:[#allocation5 + $0x23a4] ss:$16 sps:$4 sm:$0xff]  }
 0x23e   :  { %13883 = vmatpush1.bf16.msra.mxu1 %v19108_v6  ;;  %13843 = vmatprep.subr.bf16.mxu0 %v19113_v34  ;;  %v19141_v6 = vld [vmem:[#allocation5 + $0x21a0] ss:$16 sps:$4 sm:$0xff]  }
 0x23f   :  { %13884 = vmatprep.subr.bf16.mxu1 %v19116_v37  ;;  %v19144_v34 = vld [vmem:[#allocation5 + $0x23a0] ss:$16 sps:$4 sm:$0xff]   ;;  %v19149_v37 = vld [vmem:[#allocation5 + $0x2184] ss:$16 sps:$4 sm:$0xff]  }
 0x241   :  { %13844 = vmatpush1.bf16.msra.mxu0 %v19111_v7  ;;  %v19152_v7 = vld [vmem:[#allocation5 + $0x2384] ss:$16 sps:$4 sm:$0xff]  }
 0x242   :  { %13885 = vmatpush1.bf16.msra.mxu1 %v19114_v42  ;;  %13845 = vmatprep.subr.bf16.mxu0 %v19119_v53  ;;  %v19147_v42 = vld [vmem:[#allocation5 + $0x2180] ss:$16 sps:$4 sm:$0xff]  }
 0x243   :  { %13886 = vmatprep.subr.bf16.mxu1 %v19122_v55  ;;  %v19150_v53 = vld [vmem:[#allocation5 + $0x2380] ss:$16 sps:$4 sm:$0xff]   ;;  %v19155_v55 = vld [vmem:[#allocation5 + $0x2164] ss:$16 sps:$4 sm:$0xff]  }
 0x245   :  { %13846 = vmatpush1.bf16.msra.mxu0 %v19117_v2  ;;  %v19158_v2 = vld [vmem:[#allocation5 + $0x2364] ss:$16 sps:$4 sm:$0xff]  }
 0x246   :  { %13887 = vmatpush1.bf16.msra.mxu1 %v19120_v60  ;;  %13847 = vmatprep.subr.bf16.mxu0 %v19125_v62  ;;  %v19153_v60 = vld [vmem:[#allocation5 + $0x2160] ss:$16 sps:$4 sm:$0xff]  }
 0x247   :  { %13888 = vmatprep.subr.bf16.mxu1 %v19128_v3  ;;  %v19156_v62 = vld [vmem:[#allocation5 + $0x2360] ss:$16 sps:$4 sm:$0xff]   ;;  %v19161_v3 = vld [vmem:[#allocation5 + $0x2144] ss:$16 sps:$4 sm:$0xff]  }
 0x249   :  { %13848 = vmatpush1.bf16.msra.mxu0 %v19123_v58  ;;  %v19164_v58 = vld [vmem:[#allocation5 + $0x2344] ss:$16 sps:$4 sm:$0xff]  }
 0x24a   :  { %13889 = vmatpush1.bf16.msra.mxu1 %v19126_v59  ;;  %13849 = vmatprep.subr.bf16.mxu0 %v19131_v38  ;;  %v66_v59 = vld [vmem:[#allocation2 + $0x48] sm:$0xff] }
 0x24b   :  { %13890 = vmatprep.subr.bf16.mxu1 %v19134_v17  ;;  %v82_v38 = vld [vmem:[#allocation2 + $0xc8] sm:$0xff] }
 0x24c   :  { %v98_v17 = vld [vmem:[#allocation2 + $0x148] sm:$0xff] }
 0x24d   :  { %13850 = vmatpush2.bf16.msra.mxu0 %v19129_v32  ;;  %v114_v32 = vld [vmem:[#allocation2 + $0x1c8] sm:$0xff] }
 0x24e   :  { %13891 = vmatpush2.bf16.msra.mxu1 %v19132_v14  ;;  %13851 = vmatprep.subr.bf16.mxu0 %v19137_v19  ;;  %v19159_v14 = vld [vmem:[#allocation5 + $0x2140] ss:$16 sps:$4 sm:$0xff]  }
 0x24f   :  { %13892 = vmatprep.subr.bf16.mxu1 %v19140_v8  ;;  %v19162_v19 = vld [vmem:[#allocation5 + $0x2340] ss:$16 sps:$4 sm:$0xff]   ;;  %v19167_v8 = vld [vmem:[#allocation5 + $0x2124] ss:$16 sps:$4 sm:$0xff]  }
 0x251   :  { %13852 = vmatpush2.bf16.msra.mxu0 %v19135_v24  ;;  %v19170_v24 = vld [vmem:[#allocation5 + $0x2324] ss:$16 sps:$4 sm:$0xff]  }
 0x252   :  { %13893 = vmatpush2.bf16.msra.mxu1 %v19138_v33  ;;  %13853 = vmatprep.subr.bf16.mxu0 %v19143_v47  ;;  %v509_v33 = vcombine.low %v66_v59, %v82_v38  ;;  %v511_v47 = vcombine.low %v98_v17, %v114_v32 }
 0x253   :  { %13894 = vmatprep.subr.bf16.mxu1 %v19146_v48  ;;  %v510_v48 = vcombine.high %v66_v59, %v82_v38  ;;  %v19174_v59 = vld [vmem:[#allocation5 + $0x2300] ss:$16 sps:$4 sm:$0xff]   ;;  %v19179_v38 = vld [vmem:[#allocation5 + $0x24e4] ss:$16 sps:$4 sm:$0xff]  }
 0x255   :  { %13854 = vmatpush2.bf16.msra.mxu0 %v19141_v6  ;;  %v512_v6 = vcombine.high %v98_v17, %v114_v32  ;;  %v19182_v17 = vld [vmem:[#allocation5 + $0x26e4] ss:$16 sps:$4 sm:$0xff]   ;;  %v19177_v32 = vld [vmem:[#allocation5 + $0x24e0] ss:$16 sps:$4 sm:$0xff]  }
 0x256   :  { %13895 = vmatpush2.bf16.msra.mxu1 %v19144_v34  ;;  %13855 = vmatprep.subr.bf16.mxu0 %v19149_v37  ;;  %v19165_v34 = vld [vmem:[#allocation5 + $0x2120] ss:$16 sps:$4 sm:$0xff]  }
 0x257   :  { %13896 = vmatprep.subr.bf16.mxu1 %v19152_v7  ;;  %v19168_v37 = vld [vmem:[#allocation5 + $0x2320] ss:$16 sps:$4 sm:$0xff]   ;;  %v19173_v7 = vld [vmem:[#allocation5 + $0x2104] ss:$16 sps:$4 sm:$0xff]  }
 0x259   :  { %13856 = vmatpush2.bf16.msra.mxu0 %v19147_v42  ;;  %v19176_v42 = vld [vmem:[#allocation5 + $0x2304] ss:$16 sps:$4 sm:$0xff]  }
 0x25a   :  { %13897 = vmatpush2.bf16.msra.mxu1 %v19150_v53  ;;  %13857 = vmatprep.subr.bf16.mxu0 %v19155_v55  ;;  %v21840_v53 = vrot.slane %v509_v33, %v21547_v54  ;;  %v21843_v55 = vrot.slane %v511_v47, %v21547_v54  ;;  %v19186_v33 = vld [vmem:[#allocation5 + $0x26c0] ss:$16 sps:$4 sm:$0xff]  }
 0x25b   :  { %13898 = vmatprep.subr.bf16.mxu1 %v19158_v2  ;;  %v21846_v2 = vrot.slane %v510_v48, %v21547_v54 }
 0x25d   :  { %13858 = vmatpush2.bf16.msra.mxu0 %v19153_v60  ;;  %v21849_v60 = vrot.slane %v512_v6, %v21547_v54 }
 0x25e   :  { %13899 = vmatpush2.bf16.msra.mxu1 %v19156_v62  ;;  %13859 = vmatprep.subr.bf16.mxu0 %v19161_v3  ;;  %v505_v62 = vcombine.low %v21802_v63, %v21805_v0  ;;  %v507_v3 = vcombine.low %v21808_v1, %v21811_v41  ;;  %v19185_v1 = vld [vmem:[#allocation5 + $0x24c4] ss:$16 sps:$4 sm:$0xff]  }
 0x25f   :  { %13900 = vmatprep.subr.bf16.mxu1 %v19164_v58  ;;  %v19171_v58 = vld [vmem:[#allocation5 + $0x2100] ss:$16 sps:$4 sm:$0xff]   ;;  %v19188_v41 = vld [vmem:[#allocation5 + $0x26c4] ss:$16 sps:$4 sm:$0xff]  }
 0x260   :  { %v21859_v63 = vpack.c.bf16 %v505_v62, %v505_v62  ;;  %v21861_v0 = vpack.c.bf16 %v507_v3, %v507_v3  ;;  %v19191_v62 = vld [vmem:[#allocation5 + $0x24a4] ss:$16 sps:$4 sm:$0xff]  }
 0x261   :  { %13860 = vmatpush2.bf16.msra.mxu0 %v19159_v14  ;;  %v19180_v14 = vld [vmem:[#allocation5 + $0x26e0] ss:$16 sps:$4 sm:$0xff]   ;;  %v19194_v3 = vld [vmem:[#allocation5 + $0x26a4] ss:$16 sps:$4 sm:$0xff]  }
 0x262   :  { %13901 = vmatpush2.bf16.msra.mxu1 %v19162_v19  ;;  %13861 = vmatprep.subr.bf16.mxu0 %v19167_v8  ;;  %v542_v19 = vcombine.high %v21840_v53, %v21843_v55  ;;  %v544_v8 = vcombine.high %v21846_v2, %v21849_v60 }
 0x263   :  { %13902 = vmatprep.subr.bf16.mxu1 %v19170_v24  ;;  %v19183_v24 = vld [vmem:[#allocation5 + $0x24c0] ss:$16 sps:$4 sm:$0xff]  }
 0x264   :  { %v21863_v47 = vpack.c.bf16 %v542_v19, %v542_v19  ;;  %v21865_v48 = vpack.c.bf16 %v544_v8, %v544_v8 }
 0x265   :  { %13862 = vmatpush2.bf16.msra.mxu0 %v19165_v34 }
 0x266   :  { %13903 = vmatpush2.bf16.msra.mxu1 %v19168_v37  ;;  %13863 = vmatprep.subr.bf16.mxu0 %v19173_v7  ;;  %22320 = vst [vmem:[#allocation12_spill] sm:$0xff] %v21863_v47  ;;  %22321 = vst [vmem:[#allocation13_spill] sm:$0xff] %v21865_v48 }
 0x267   :  { %13904 = vmatprep.subr.bf16.mxu1 %v19176_v42 }
 0x269   :  { %13864 = vmatpush2.bf16.msra.mxu0 %v19171_v58 }
 0x26a   :  { %13905 = vmatpush2.bf16.msra.mxu1 %v19174_v59  ;;  %13915 = vmatprep.subr.bf16.mxu0 %v19179_v38  ;;  %v19189_v38 = vld [vmem:[#allocation5 + $0x24a0] ss:$16 sps:$4 sm:$0xff]  }
 0x26b   :  { %13956 = vmatprep.subr.bf16.mxu1 %v19182_v17  ;;  %v19192_v17 = vld [vmem:[#allocation5 + $0x26a0] ss:$16 sps:$4 sm:$0xff]  }
 0x26c   :  { %v13621_v6 = vpop.f32.mrf.mxu0  ;;  %13866 = vmatmul.mubr.bf16.vlgmr.msra.gmra.mxu0 %v21859_v63 }
 0x26d   :  { %v13662_v34 = vpop.f32.mrf.mxu1  ;;  %13907 = vmatmul.mubr.bf16.vlgmr.msra.gmra.mxu1 %v21861_v0  ;;  %v13622_v37 = vadd.f32 %v13621_v6, %v21832_v15  ;;  %13916 = vmatpush1.bf16.msra.mxu0 %v19177_v32  ;;  %v19198_v6 = vld [vmem:[#allocation5 + $0x2680] ss:$16 sps:$4 sm:$0xff]  }
 0x26e   :  { %13957 = vmatpush1.bf16.msra.mxu1 %v19180_v14  ;;  %v13623_v7 = vpop.f32.mrf.mxu0  ;;  %13917 = vmatprep.subr.bf16.mxu0 %v19185_v1  ;;  %v19197_v1 = vld [vmem:[#allocation5 + $0x2484] ss:$16 sps:$4 sm:$0xff]  }
 0x26f   :  { %v13664_v42 = vpop.f32.mrf.mxu1  ;;  %13958 = vmatprep.subr.bf16.mxu1 %v19188_v41  ;;  %v21870_v58 = vadd.f32 %v13662_v34, %v13622_v37  ;;  %v13624_v59 = vadd.f32 %v13623_v7, %v21837_v4  ;;  %13947 = vmatprep.mubr.bf16.mxu0 %v21863_v47  ;;  %v19200_v41 = vld [vmem:[#allocation5 + $0x2684] ss:$16 sps:$4 sm:$0xff]   ;;  %v19195_v4 = vld [vmem:[#allocation5 + $0x2480] ss:$16 sps:$4 sm:$0xff]  }
 0x270   :  { %13988 = vmatprep.mubr.bf16.mxu1 %v21865_v48  ;;  %v13625_v19 = vpop.f32.mrf.mxu0  ;;  %v19203_v34 = vld [vmem:[#allocation5 + $0x2464] ss:$16 sps:$4 sm:$0xff]   ;;  %v19201_v7 = vld [vmem:[#allocation5 + $0x2460] ss:$16 sps:$4 sm:$0xff]  }
 0x271   :  { %v13666_v15 = vpop.f32.mrf.mxu1  ;;  %v21875_v32 = vadd.f32 %v13664_v42, %v13624_v59  ;;  %13918 = vmatpush1.bf16.msra.mxu0 %v19183_v24  ;;  %v19206_v37 = vld [vmem:[#allocation5 + $0x2664] ss:$16 sps:$4 sm:$0xff]   ;;  %v19204_v42 = vld [vmem:[#allocation5 + $0x2660] ss:$16 sps:$4 sm:$0xff]  }
 0x272   :  { %13959 = vmatpush1.bf16.msra.mxu1 %v19186_v33  ;;  %v13626_v14 = vpop.f32.mrf.mxu0  ;;  %13919 = vmatprep.subr.bf16.mxu0 %v19191_v62  ;;  %v19209_v24 = vld [vmem:[#allocation5 + $0x2444] ss:$16 sps:$4 sm:$0xff]   ;;  %v19207_v62 = vld [vmem:[#allocation5 + $0x2440] ss:$16 sps:$4 sm:$0xff]  }
 0x273   :  { %v13667_v8 = vpop.f32.mrf.mxu1  ;;  %13960 = vmatprep.subr.bf16.mxu1 %v19194_v3  ;;  %v19212_v33 = vld [vmem:[#allocation5 + $0x2644] ss:$16 sps:$4 sm:$0xff]   ;;  %v19210_v3 = vld [vmem:[#allocation5 + $0x2640] ss:$16 sps:$4 sm:$0xff]  }
 0x274   :  { %v19215_v59 = vld [vmem:[#allocation5 + $0x2424] ss:$16 sps:$4 sm:$0xff]   ;;  %v19216_v19 = vld [vmem:[#allocation5 + $0x2620] ss:$16 sps:$4 sm:$0xff]  }
 0x275   :  { %13920 = vmatpush1.bf16.msra.mxu0 %v19189_v38  ;;  %v19218_v38 = vld [vmem:[#allocation5 + $0x2624] ss:$16 sps:$4 sm:$0xff]   ;;  %v19219_v8 = vld [vmem:[#allocation5 + $0x2400] ss:$16 sps:$4 sm:$0xff]  }
 0x276   :  { %13961 = vmatpush1.bf16.msra.mxu1 %v19192_v17  ;;  %13921 = vmatprep.subr.bf16.mxu0 %v19197_v1  ;;  %v19213_v17 = vld [vmem:[#allocation5 + $0x2420] ss:$16 sps:$4 sm:$0xff]   ;;  %v19221_v15 = vld [vmem:[#allocation5 + $0x2404] ss:$16 sps:$4 sm:$0xff]  }
 0x277   :  { %13962 = vmatprep.subr.bf16.mxu1 %v19200_v41  ;;  %v19224_v14 = vld [vmem:[#allocation5 + $0x2604] ss:$16 sps:$4 sm:$0xff]   ;;  %v19222_v1 = vld [vmem:[#allocation5 + $0x2600] ss:$16 sps:$4 sm:$0xff]  }
 0x278   :  { %v19227_v41 = vld [vmem:[#allocation5 + $0x25e4] ss:$16 sps:$4 sm:$0xff]   ;;  %v19288_v47 = vld [vmem:[#allocation5 + $0x2aa0] ss:$16 sps:$4 sm:$0xff]  }
 0x279   :  { %13922 = vmatpush1.bf16.msra.mxu0 %v19195_v4  ;;  %v19230_v4 = vld [vmem:[#allocation5 + $0x27e4] ss:$16 sps:$4 sm:$0xff]  }
 0x27a   :  { %13963 = vmatpush1.bf16.msra.mxu1 %v19198_v6  ;;  %13923 = vmatprep.subr.bf16.mxu0 %v19203_v34  ;;  %v19225_v6 = vld [vmem:[#allocation5 + $0x25e0] ss:$16 sps:$4 sm:$0xff]   ;;  %v19272_v48 = vld [vmem:[#allocation5 + $0x2704] ss:$16 sps:$4 sm:$0xff]  }
 0x27b   :  { %13964 = vmatprep.subr.bf16.mxu1 %v19206_v37  ;;  %v19228_v34 = vld [vmem:[#allocation5 + $0x27e0] ss:$16 sps:$4 sm:$0xff]   ;;  %v19233_v37 = vld [vmem:[#allocation5 + $0x25c4] ss:$16 sps:$4 sm:$0xff]  }
 0x27d   :  { %13924 = vmatpush1.bf16.msra.mxu0 %v19201_v7  ;;  %v19236_v7 = vld [vmem:[#allocation5 + $0x27c4] ss:$16 sps:$4 sm:$0xff]  }
 0x27e   :  { %13965 = vmatpush1.bf16.msra.mxu1 %v19204_v42  ;;  %13925 = vmatprep.subr.bf16.mxu0 %v19209_v24  ;;  %v19231_v42 = vld [vmem:[#allocation5 + $0x25c0] ss:$16 sps:$4 sm:$0xff]  }
 0x27f   :  { %13966 = vmatprep.subr.bf16.mxu1 %v19212_v33  ;;  %v19234_v24 = vld [vmem:[#allocation5 + $0x27c0] ss:$16 sps:$4 sm:$0xff]   ;;  %v19239_v33 = vld [vmem:[#allocation5 + $0x25a4] ss:$16 sps:$4 sm:$0xff]  }
 0x281   :  { %13926 = vmatpush1.bf16.msra.mxu0 %v19207_v62  ;;  %v19242_v62 = vld [vmem:[#allocation5 + $0x27a4] ss:$16 sps:$4 sm:$0xff]  }
 0x282   :  { %13967 = vmatpush1.bf16.msra.mxu1 %v19210_v3  ;;  %13927 = vmatprep.subr.bf16.mxu0 %v19215_v59  ;;  %v19237_v3 = vld [vmem:[#allocation5 + $0x25a0] ss:$16 sps:$4 sm:$0xff]  }
 0x283   :  { %13968 = vmatprep.subr.bf16.mxu1 %v19218_v38  ;;  %v19240_v59 = vld [vmem:[#allocation5 + $0x27a0] ss:$16 sps:$4 sm:$0xff]   ;;  %v19245_v38 = vld [vmem:[#allocation5 + $0x2584] ss:$16 sps:$4 sm:$0xff]  }
 0x285   :  { %13928 = vmatpush1.bf16.msra.mxu0 %v19213_v17  ;;  %v19248_v17 = vld [vmem:[#allocation5 + $0x2784] ss:$16 sps:$4 sm:$0xff]  }
 0x286   :  { %13969 = vmatpush1.bf16.msra.mxu1 %v19216_v19  ;;  %13929 = vmatprep.subr.bf16.mxu0 %v19221_v15  ;;  %v19243_v19 = vld [vmem:[#allocation5 + $0x2580] ss:$16 sps:$4 sm:$0xff]  }
 0x287   :  { %13970 = vmatprep.subr.bf16.mxu1 %v19224_v14  ;;  %v19246_v15 = vld [vmem:[#allocation5 + $0x2780] ss:$16 sps:$4 sm:$0xff]   ;;  %v19251_v14 = vld [vmem:[#allocation5 + $0x2564] ss:$16 sps:$4 sm:$0xff]  }
 0x289   :  { %13930 = vmatpush1.bf16.msra.mxu0 %v19219_v8  ;;  %v19254_v8 = vld [vmem:[#allocation5 + $0x2764] ss:$16 sps:$4 sm:$0xff]  }
 0x28a   :  { %13971 = vmatpush1.bf16.msra.mxu1 %v19222_v1  ;;  %13931 = vmatprep.subr.bf16.mxu0 %v19227_v41  ;;  %v19249_v1 = vld [vmem:[#allocation5 + $0x2560] ss:$16 sps:$4 sm:$0xff]  }
 0x28b   :  { %13972 = vmatprep.subr.bf16.mxu1 %v19230_v4  ;;  %v19252_v41 = vld [vmem:[#allocation5 + $0x2760] ss:$16 sps:$4 sm:$0xff]   ;;  %v19257_v4 = vld [vmem:[#allocation5 + $0x2544] ss:$16 sps:$4 sm:$0xff]  }
 0x28d   :  { %13932 = vmatpush2.bf16.msra.mxu0 %v19225_v6  ;;  %v19260_v6 = vld [vmem:[#allocation5 + $0x2744] ss:$16 sps:$4 sm:$0xff]  }
 0x28e   :  { %13973 = vmatpush2.bf16.msra.mxu1 %v19228_v34  ;;  %13933 = vmatprep.subr.bf16.mxu0 %v19233_v37  ;;  %v67_v34 = vld [vmem:[#allocation2 + $0x50] sm:$0xff] }
 0x28f   :  { %13974 = vmatprep.subr.bf16.mxu1 %v19236_v7  ;;  %v83_v37 = vld [vmem:[#allocation2 + $0xd0] sm:$0xff] }
 0x290   :  { %v99_v7 = vld [vmem:[#allocation2 + $0x150] sm:$0xff] }
 0x291   :  { %13934 = vmatpush2.bf16.msra.mxu0 %v19231_v42  ;;  %v115_v42 = vld [vmem:[#allocation2 + $0x1d0] sm:$0xff] }
 0x292   :  { %13975 = vmatpush2.bf16.msra.mxu1 %v19234_v24  ;;  %13935 = vmatprep.subr.bf16.mxu0 %v19239_v33  ;;  %v19255_v24 = vld [vmem:[#allocation5 + $0x2540] ss:$16 sps:$4 sm:$0xff]  }
 0x293   :  { %13976 = vmatprep.subr.bf16.mxu1 %v19242_v62  ;;  %v19258_v33 = vld [vmem:[#allocation5 + $0x2740] ss:$16 sps:$4 sm:$0xff]   ;;  %v19263_v62 = vld [vmem:[#allocation5 + $0x2524] ss:$16 sps:$4 sm:$0xff]  }
 0x295   :  { %13936 = vmatpush2.bf16.msra.mxu0 %v19237_v3  ;;  %v19266_v3 = vld [vmem:[#allocation5 + $0x2724] ss:$16 sps:$4 sm:$0xff]  }
 0x296   :  { %13977 = vmatpush2.bf16.msra.mxu1 %v19240_v59  ;;  %13937 = vmatprep.subr.bf16.mxu0 %v19245_v38  ;;  %v545_v59 = vcombine.low %v67_v34, %v83_v37  ;;  %v547_v38 = vcombine.low %v99_v7, %v115_v42 }
 0x297   :  { %13978 = vmatprep.subr.bf16.mxu1 %v19248_v17  ;;  %v546_v17 = vcombine.high %v67_v34, %v83_v37  ;;  %v541_v34 = vcombine.low %v21840_v53, %v21843_v55  ;;  %v543_v37 = vcombine.low %v21846_v2, %v21849_v60  ;;  %v19281_v2 = vld [vmem:[#allocation5 + $0x28c4] ss:$16 sps:$4 sm:$0xff]  }
 0x298   :  { %v19284_v60 = vld [vmem:[#allocation5 + $0x2ac4] ss:$16 sps:$4 sm:$0xff]  }
 0x299   :  { %13938 = vmatpush2.bf16.msra.mxu0 %v19243_v19  ;;  %v548_v19 = vcombine.high %v99_v7, %v115_v42  ;;  %v19267_v7 = vld [vmem:[#allocation5 + $0x2500] ss:$16 sps:$4 sm:$0xff]   ;;  %v21897_v53 = vpack.c.bf16 %v541_v34, %v541_v34  ;;  %v21899_v55 = vpack.c.bf16 %v543_v37, %v543_v37 }
 0x29a   :  { %13979 = vmatpush2.bf16.msra.mxu1 %v19246_v15  ;;  %13939 = vmatprep.subr.bf16.mxu0 %v19251_v14  ;;  %v19261_v15 = vld [vmem:[#allocation5 + $0x2520] ss:$16 sps:$4 sm:$0xff]  }
 0x29b   :  { %13980 = vmatprep.subr.bf16.mxu1 %v19254_v8  ;;  %v19264_v14 = vld [vmem:[#allocation5 + $0x2720] ss:$16 sps:$4 sm:$0xff]   ;;  %v19269_v8 = vld [vmem:[#allocation5 + $0x2504] ss:$16 sps:$4 sm:$0xff]   ;;  %22322 = vst [vmem:[#allocation14_spill] sm:$0xff] %v21897_v53  ;;  %22323 = vst [vmem:[#allocation15_spill] sm:$0xff] %v21899_v55 }
 0x29c   :  { %v19270_v42 = vld [vmem:[#allocation5 + $0x2700] ss:$16 sps:$4 sm:$0xff]  }
 0x29d   :  { %13940 = vmatpush2.bf16.msra.mxu0 %v19249_v1  ;;  %v21878_v1 = vrot.slane %v545_v59, %v21547_v54 }
 0x29e   :  { %13981 = vmatpush2.bf16.msra.mxu1 %v19252_v41  ;;  %13941 = vmatprep.subr.bf16.mxu0 %v19257_v4  ;;  %v21881_v41 = vrot.slane %v547_v38, %v21547_v54  ;;  %v21884_v4 = vrot.slane %v546_v17, %v21547_v54  ;;  %v19282_v17 = vld [vmem:[#allocation5 + $0x2ac0] ss:$16 sps:$4 sm:$0xff]  }
 0x29f   :  { %13982 = vmatprep.subr.bf16.mxu1 %v19260_v6  ;;  %v21887_v6 = vrot.slane %v548_v19, %v21547_v54 }
 0x2a0   :  { %v578_v59 = vcombine.high %v21878_v1, %v21881_v41 }
 0x2a1   :  { %13942 = vmatpush2.bf16.msra.mxu0 %v19255_v24  ;;  %v19275_v24 = vld [vmem:[#allocation5 + $0x28e4] ss:$16 sps:$4 sm:$0xff]   ;;  %v580_v38 = vcombine.high %v21884_v4, %v21887_v6 }
 0x2a2   :  { %13983 = vmatpush2.bf16.msra.mxu1 %v19258_v33  ;;  %13943 = vmatprep.subr.bf16.mxu0 %v19263_v62  ;;  %v19278_v33 = vld [vmem:[#allocation5 + $0x2ae4] ss:$16 sps:$4 sm:$0xff]   ;;  %v19273_v62 = vld [vmem:[#allocation5 + $0x28e0] ss:$16 sps:$4 sm:$0xff]   ;;  %v21901_v19 = vpack.c.bf16 %v578_v59, %v578_v59 }
 0x2a3   :  { %13984 = vmatprep.subr.bf16.mxu1 %v19266_v3  ;;  %v19276_v3 = vld [vmem:[#allocation5 + $0x2ae0] ss:$16 sps:$4 sm:$0xff]  }
 0x2a4   :  { %22324 = vst [vmem:[#allocation16_spill] sm:$0xff] %v21901_v19 }
 0x2a5   :  { %13944 = vmatpush2.bf16.msra.mxu0 %v19261_v15  ;;  %v21903_v15 = vpack.c.bf16 %v580_v38, %v580_v38  ;;  %v19285_v38 = vld [vmem:[#allocation5 + $0x28a0] ss:$16 sps:$4 sm:$0xff]  }
 0x2a6   :  { %13985 = vmatpush2.bf16.msra.mxu1 %v19264_v14  ;;  %13945 = vmatprep.subr.bf16.mxu0 %v19269_v8 }
 0x2a7   :  { %13986 = vmatprep.subr.bf16.mxu1 %v19272_v48  ;;  %v19279_v48 = vld [vmem:[#allocation5 + $0x28c0] ss:$16 sps:$4 sm:$0xff]   ;;  %22325 = vst [vmem:[#allocation17_spill] sm:$0xff] %v21903_v15 }
 0x2a9   :  { %13946 = vmatpush2.bf16.msra.mxu0 %v19267_v7 }
 0x2aa   :  { %13987 = vmatpush2.bf16.msra.mxu1 %v19270_v42  ;;  %13997 = vmatprep.subr.bf16.mxu0 %v19275_v24  ;;  %v19287_v42 = vld [vmem:[#allocation5 + $0x28a4] ss:$16 sps:$4 sm:$0xff]  }
 0x2ab   :  { %14038 = vmatprep.subr.bf16.mxu1 %v19278_v33  ;;  %v19290_v24 = vld [vmem:[#allocation5 + $0x2aa4] ss:$16 sps:$4 sm:$0xff]  }
 0x2ac   :  { %v13703_v14 = vpop.f32.mrf.mxu0  ;;  %13948 = vmatmul.mubr.bf16.vlgmr.msra.gmra.mxu0 %v21897_v53  ;;  %v19384_v53 = vld [vmem:[#allocation5 + $0x2ea0] ss:$16 sps:$4 sm:$0xff]  }
 0x2ad   :  { %v13744_v8 = vpop.f32.mrf.mxu1  ;;  %13989 = vmatmul.mubr.bf16.vlgmr.msra.gmra.mxu1 %v21899_v55  ;;  %v13704_v34 = vadd.f32 %v13703_v14, %v21870_v58  ;;  %13998 = vmatpush1.bf16.msra.mxu0 %v19273_v62  ;;  %v19296_v14 = vld [vmem:[#allocation5 + $0x2a84] ss:$16 sps:$4 sm:$0xff]  }
 0x2ae   :  { %14039 = vmatpush1.bf16.msra.mxu1 %v19276_v3  ;;  %v13705_v37 = vpop.f32.mrf.mxu0  ;;  %13999 = vmatprep.subr.bf16.mxu0 %v19281_v2 }
 0x2af   :  { %v13746_v7 = vpop.f32.mrf.mxu1  ;;  %14040 = vmatprep.subr.bf16.mxu1 %v19284_v60  ;;  %v21908_v33 = vadd.f32 %v13744_v8, %v13704_v34  ;;  %v13706_v59 = vadd.f32 %v13705_v37, %v21875_v32  ;;  %14029 = vmatprep.mubr.bf16.mxu0 %v21901_v19  ;;  %v19293_v60 = vld [vmem:[#allocation5 + $0x2884] ss:$16 sps:$4 sm:$0xff]   ;;  %v19291_v32 = vld [vmem:[#allocation5 + $0x2880] ss:$16 sps:$4 sm:$0xff]  }
 0x2b0   :  { %14070 = vmatprep.mubr.bf16.mxu1 %v21903_v15  ;;  %v13707_v55 = vpop.f32.mrf.mxu0  ;;  %v19294_v8 = vld [vmem:[#allocation5 + $0x2a80] ss:$16 sps:$4 sm:$0xff]   ;;  %v19299_v34 = vld [vmem:[#allocation5 + $0x2864] ss:$16 sps:$4 sm:$0xff]  }
 0x2b1   :  { %v13748_v58 = vpop.f32.mrf.mxu1  ;;  %v21913_v62 = vadd.f32 %v13746_v7, %v13706_v59  ;;  %14000 = vmatpush1.bf16.msra.mxu0 %v19279_v48  ;;  %v19302_v37 = vld [vmem:[#allocation5 + $0x2a64] ss:$16 sps:$4 sm:$0xff]   ;;  %v19297_v55 = vld [vmem:[#allocation5 + $0x2860] ss:$16 sps:$4 sm:$0xff]  }
 0x2b2   :  { %14041 = vmatpush1.bf16.msra.mxu1 %v19282_v17  ;;  %v13708_v3 = vpop.f32.mrf.mxu0  ;;  %14001 = vmatprep.subr.bf16.mxu0 %v19287_v42  ;;  %v19300_v7 = vld [vmem:[#allocation5 + $0x2a60] ss:$16 sps:$4 sm:$0xff]   ;;  %v19305_v48 = vld [vmem:[#allocation5 + $0x2844] ss:$16 sps:$4 sm:$0xff]  }
 0x2b3   :  { %v13749_v2 = vpop.f32.mrf.mxu1  ;;  %14042 = vmatprep.subr.bf16.mxu1 %v19290_v24  ;;  %v19308_v17 = vld [vmem:[#allocation5 + $0x2a44] ss:$16 sps:$4 sm:$0xff]   ;;  %v19303_v42 = vld [vmem:[#allocation5 + $0x2840] ss:$16 sps:$4 sm:$0xff]  }
 0x2b4   :  { %v19306_v24 = vld [vmem:[#allocation5 + $0x2a40] ss:$16 sps:$4 sm:$0xff]   ;;  %v19314_v59 = vld [vmem:[#allocation5 + $0x2a24] ss:$16 sps:$4 sm:$0xff]  }
 0x2b5   :  { %14002 = vmatpush1.bf16.msra.mxu0 %v19285_v38  ;;  %v19309_v38 = vld [vmem:[#allocation5 + $0x2820] ss:$16 sps:$4 sm:$0xff]   ;;  %v19317_v3 = vld [vmem:[#allocation5 + $0x2804] ss:$16 sps:$4 sm:$0xff]  }
 0x2b6   :  { %14043 = vmatpush1.bf16.msra.mxu1 %v19288_v47  ;;  %14003 = vmatprep.subr.bf16.mxu0 %v19293_v60  ;;  %v19311_v47 = vld [vmem:[#allocation5 + $0x2824] ss:$16 sps:$4 sm:$0xff]   ;;  %v19312_v58 = vld [vmem:[#allocation5 + $0x2a20] ss:$16 sps:$4 sm:$0xff]  }
 0x2b7   :  { %14044 = vmatprep.subr.bf16.mxu1 %v19296_v14  ;;  %v19320_v2 = vld [vmem:[#allocation5 + $0x2a04] ss:$16 sps:$4 sm:$0xff]   ;;  %v19315_v60 = vld [vmem:[#allocation5 + $0x2800] ss:$16 sps:$4 sm:$0xff]  }
 0x2b8   :  { %v19318_v14 = vld [vmem:[#allocation5 + $0x2a00] ss:$16 sps:$4 sm:$0xff]   ;;  %v19365_v15 = vld [vmem:[#allocation5 + $0x2904] ss:$16 sps:$4 sm:$0xff]  }
 0x2b9   :  { %14004 = vmatpush1.bf16.msra.mxu0 %v19291_v32  ;;  %v19323_v32 = vld [vmem:[#allocation5 + $0x29e4] ss:$16 sps:$4 sm:$0xff]  }
 0x2ba   :  { %14045 = vmatpush1.bf16.msra.mxu1 %v19294_v8  ;;  %14005 = vmatprep.subr.bf16.mxu0 %v19299_v34  ;;  %v19326_v8 = vld [vmem:[#allocation5 + $0x2be4] ss:$16 sps:$4 sm:$0xff]   ;;  %v19321_v34 = vld [vmem:[#allocation5 + $0x29e0] ss:$16 sps:$4 sm:$0xff]  }
 0x2bb   :  { %14046 = vmatprep.subr.bf16.mxu1 %v19302_v37  ;;  %v19324_v37 = vld [vmem:[#allocation5 + $0x2be0] ss:$16 sps:$4 sm:$0xff]   ;;  %v19368_v19 = vld [vmem:[#allocation5 + $0x2b04] ss:$16 sps:$4 sm:$0xff]  }
 0x2bd   :  { %14006 = vmatpush1.bf16.msra.mxu0 %v19297_v55  ;;  %v19329_v55 = vld [vmem:[#allocation5 + $0x29c4] ss:$16 sps:$4 sm:$0xff]  }
 0x2be   :  { %14047 = vmatpush1.bf16.msra.mxu1 %v19300_v7  ;;  %14007 = vmatprep.subr.bf16.mxu0 %v19305_v48  ;;  %v19332_v7 = vld [vmem:[#allocation5 + $0x2bc4] ss:$16 sps:$4 sm:$0xff]   ;;  %v19327_v48 = vld [vmem:[#allocation5 + $0x29c0] ss:$16 sps:$4 sm:$0xff]  }
 0x2bf   :  { %14048 = vmatprep.subr.bf16.mxu1 %v19308_v17  ;;  %v19330_v17 = vld [vmem:[#allocation5 + $0x2bc0] ss:$16 sps:$4 sm:$0xff]  }
 0x2c1   :  { %14008 = vmatpush1.bf16.msra.mxu0 %v19303_v42  ;;  %v19335_v42 = vld [vmem:[#allocation5 + $0x29a4] ss:$16 sps:$4 sm:$0xff]  }
 0x2c2   :  { %14049 = vmatpush1.bf16.msra.mxu1 %v19306_v24  ;;  %14009 = vmatprep.subr.bf16.mxu0 %v19311_v47  ;;  %v19338_v24 = vld [vmem:[#allocation5 + $0x2ba4] ss:$16 sps:$4 sm:$0xff]   ;;  %v19333_v47 = vld [vmem:[#allocation5 + $0x29a0] ss:$16 sps:$4 sm:$0xff]  }
 0x2c3   :  { %14050 = vmatprep.subr.bf16.mxu1 %v19314_v59  ;;  %v19336_v59 = vld [vmem:[#allocation5 + $0x2ba0] ss:$16 sps:$4 sm:$0xff]  }
 0x2c5   :  { %14010 = vmatpush1.bf16.msra.mxu0 %v19309_v38  ;;  %v19341_v38 = vld [vmem:[#allocation5 + $0x2984] ss:$16 sps:$4 sm:$0xff]  }
 0x2c6   :  { %14051 = vmatpush1.bf16.msra.mxu1 %v19312_v58  ;;  %14011 = vmatprep.subr.bf16.mxu0 %v19317_v3  ;;  %v19344_v58 = vld [vmem:[#allocation5 + $0x2b84] ss:$16 sps:$4 sm:$0xff]   ;;  %v19339_v3 = vld [vmem:[#allocation5 + $0x2980] ss:$16 sps:$4 sm:$0xff]  }
 0x2c7   :  { %14052 = vmatprep.subr.bf16.mxu1 %v19320_v2  ;;  %v19342_v2 = vld [vmem:[#allocation5 + $0x2b80] ss:$16 sps:$4 sm:$0xff]  }
 0x2c9   :  { %14012 = vmatpush1.bf16.msra.mxu0 %v19315_v60  ;;  %v19347_v60 = vld [vmem:[#allocation5 + $0x2964] ss:$16 sps:$4 sm:$0xff]  }
 0x2ca   :  { %14053 = vmatpush1.bf16.msra.mxu1 %v19318_v14  ;;  %14013 = vmatprep.subr.bf16.mxu0 %v19323_v32  ;;  %v19350_v14 = vld [vmem:[#allocation5 + $0x2b64] ss:$16 sps:$4 sm:$0xff]   ;;  %v19345_v32 = vld [vmem:[#allocation5 + $0x2960] ss:$16 sps:$4 sm:$0xff]  }
 0x2cb   :  { %14054 = vmatprep.subr.bf16.mxu1 %v19326_v8  ;;  %v19348_v8 = vld [vmem:[#allocation5 + $0x2b60] ss:$16 sps:$4 sm:$0xff]  }
 0x2cd   :  { %14014 = vmatpush2.bf16.msra.mxu0 %v19321_v34  ;;  %v19353_v34 = vld [vmem:[#allocation5 + $0x2944] ss:$16 sps:$4 sm:$0xff]  }
 0x2ce   :  { %14055 = vmatpush2.bf16.msra.mxu1 %v19324_v37  ;;  %14015 = vmatprep.subr.bf16.mxu0 %v19329_v55  ;;  %v19356_v37 = vld [vmem:[#allocation5 + $0x2b44] ss:$16 sps:$4 sm:$0xff]   ;;  %v68_v55 = vld [vmem:[#allocation2 + $0x58] sm:$0xff] }
 0x2cf   :  { %14056 = vmatprep.subr.bf16.mxu1 %v19332_v7  ;;  %v84_v7 = vld [vmem:[#allocation2 + $0xd8] sm:$0xff] }
 0x2d1   :  { %14016 = vmatpush2.bf16.msra.mxu0 %v19327_v48  ;;  %v100_v48 = vld [vmem:[#allocation2 + $0x158] sm:$0xff] }
 0x2d2   :  { %14057 = vmatpush2.bf16.msra.mxu1 %v19330_v17  ;;  %14017 = vmatprep.subr.bf16.mxu0 %v19335_v42  ;;  %v116_v17 = vld [vmem:[#allocation2 + $0x1d8] sm:$0xff]  ;;  %v19351_v42 = vld [vmem:[#allocation5 + $0x2940] ss:$16 sps:$4 sm:$0xff]  }
 0x2d3   :  { %14058 = vmatprep.subr.bf16.mxu1 %v19338_v24  ;;  %v19354_v24 = vld [vmem:[#allocation5 + $0x2b40] ss:$16 sps:$4 sm:$0xff]  }
 0x2d5   :  { %14018 = vmatpush2.bf16.msra.mxu0 %v19333_v47  ;;  %v19359_v47 = vld [vmem:[#allocation5 + $0x2924] ss:$16 sps:$4 sm:$0xff]  }
 0x2d6   :  { %14059 = vmatpush2.bf16.msra.mxu1 %v19336_v59  ;;  %14019 = vmatprep.subr.bf16.mxu0 %v19341_v38  ;;  %v19362_v59 = vld [vmem:[#allocation5 + $0x2b24] ss:$16 sps:$4 sm:$0xff]   ;;  %v581_v38 = vcombine.low %v68_v55, %v84_v7 }
 0x2d7   :  { %14060 = vmatprep.subr.bf16.mxu1 %v19344_v58  ;;  %v583_v58 = vcombine.low %v100_v48, %v116_v17 }
 0x2d9   :  { %14020 = vmatpush2.bf16.msra.mxu0 %v19339_v3  ;;  %v582_v3 = vcombine.high %v68_v55, %v84_v7  ;;  %v577_v55 = vcombine.low %v21878_v1, %v21881_v41  ;;  %v579_v7 = vcombine.low %v21884_v4, %v21887_v6  ;;  %v19377_v4 = vld [vmem:[#allocation5 + $0x2cc4] ss:$16 sps:$4 sm:$0xff]  }
 0x2da   :  { %14061 = vmatpush2.bf16.msra.mxu1 %v19342_v2  ;;  %14021 = vmatprep.subr.bf16.mxu0 %v19347_v60  ;;  %v584_v2 = vcombine.high %v100_v48, %v116_v17  ;;  %v19357_v60 = vld [vmem:[#allocation5 + $0x2920] ss:$16 sps:$4 sm:$0xff]   ;;  %v19380_v6 = vld [vmem:[#allocation5 + $0x2ec4] ss:$16 sps:$4 sm:$0xff]  }
 0x2db   :  { %14062 = vmatprep.subr.bf16.mxu1 %v19350_v14  ;;  %v19360_v14 = vld [vmem:[#allocation5 + $0x2b20] ss:$16 sps:$4 sm:$0xff]   ;;  %v21935_v1 = vpack.c.bf16 %v577_v55, %v577_v55  ;;  %v21937_v41 = vpack.c.bf16 %v579_v7, %v579_v7 }
 0x2dc   :  { %v19363_v48 = vld [vmem:[#allocation5 + $0x2900] ss:$16 sps:$4 sm:$0xff]  }
 0x2dd   :  { %14022 = vmatpush2.bf16.msra.mxu0 %v19345_v32  ;;  %v21916_v32 = vrot.slane %v581_v38, %v21547_v54  ;;  %v19366_v17 = vld [vmem:[#allocation5 + $0x2b00] ss:$16 sps:$4 sm:$0xff]   ;;  %22326 = vst [vmem:[#allocation18_spill] sm:$0xff] %v21935_v1  ;;  %22327 = vst [vmem:[#allocation19_spill] sm:$0xff] %v21937_v41 }
 0x2de   :  { %14063 = vmatpush2.bf16.msra.mxu1 %v19348_v8  ;;  %14023 = vmatprep.subr.bf16.mxu0 %v19353_v34  ;;  %v21919_v8 = vrot.slane %v583_v58, %v21547_v54  ;;  %v21922_v34 = vrot.slane %v582_v3, %v21547_v54 }
 0x2df   :  { %14064 = vmatprep.subr.bf16.mxu1 %v19356_v37  ;;  %v21925_v37 = vrot.slane %v584_v2, %v21547_v54 }
 0x2e0   :  { %v614_v38 = vcombine.high %v21916_v32, %v21919_v8 }
 0x2e1   :  { %14024 = vmatpush2.bf16.msra.mxu0 %v19351_v42  ;;  %v19371_v42 = vld [vmem:[#allocation5 + $0x2ce4] ss:$16 sps:$4 sm:$0xff]   ;;  %v616_v58 = vcombine.high %v21922_v34, %v21925_v37 }
 0x2e2   :  { %14065 = vmatpush2.bf16.msra.mxu1 %v19354_v24  ;;  %14025 = vmatprep.subr.bf16.mxu0 %v19359_v47  ;;  %v19374_v24 = vld [vmem:[#allocation5 + $0x2ee4] ss:$16 sps:$4 sm:$0xff]   ;;  %v19369_v47 = vld [vmem:[#allocation5 + $0x2ce0] ss:$16 sps:$4 sm:$0xff]   ;;  %v21939_v3 = vpack.c.bf16 %v614_v38, %v614_v38 }
 0x2e3   :  { %14066 = vmatprep.subr.bf16.mxu1 %v19362_v59  ;;  %v19372_v59 = vld [vmem:[#allocation5 + $0x2ee0] ss:$16 sps:$4 sm:$0xff]   ;;  %v21941_v2 = vpack.c.bf16 %v616_v58, %v616_v58 }
 0x2e4   :  { %22328 = vst [vmem:[#allocation20_spill] sm:$0xff] %v21939_v3  ;;  %v19381_v58 = vld [vmem:[#allocation5 + $0x2ca0] ss:$16 sps:$4 sm:$0xff]  }
 0x2e5   :  { %14026 = vmatpush2.bf16.msra.mxu0 %v19357_v60  ;;  %22329 = vst [vmem:[#allocation21_spill] sm:$0xff] %v21941_v2 }
 0x2e6   :  { %14067 = vmatpush2.bf16.msra.mxu1 %v19360_v14  ;;  %14027 = vmatprep.subr.bf16.mxu0 %v19365_v15  ;;  %v19378_v15 = vld [vmem:[#allocation5 + $0x2ec0] ss:$16 sps:$4 sm:$0xff]  }
 0x2e7   :  { %14068 = vmatprep.subr.bf16.mxu1 %v19368_v19  ;;  %v19375_v19 = vld [vmem:[#allocation5 + $0x2cc0] ss:$16 sps:$4 sm:$0xff]  }
 0x2e9   :  { %14028 = vmatpush2.bf16.msra.mxu0 %v19363_v48 }
 0x2ea   :  { %14069 = vmatpush2.bf16.msra.mxu1 %v19366_v17  ;;  %14079 = vmatprep.subr.bf16.mxu0 %v19371_v42  ;;  %v19383_v17 = vld [vmem:[#allocation5 + $0x2ca4] ss:$16 sps:$4 sm:$0xff]  }
 0x2eb   :  { %14120 = vmatprep.subr.bf16.mxu1 %v19374_v24  ;;  %v19386_v42 = vld [vmem:[#allocation5 + $0x2ea4] ss:$16 sps:$4 sm:$0xff]  }
 0x2ec   :  { %v13785_v60 = vpop.f32.mrf.mxu0  ;;  %14030 = vmatmul.mubr.bf16.vlgmr.msra.gmra.mxu0 %v21935_v1  ;;  %v19480_v1 = vld [vmem:[#allocation5 + $0x32a0] ss:$16 sps:$4 sm:$0xff]  }
 0x2ed   :  { %v13826_v14 = vpop.f32.mrf.mxu1  ;;  %14071 = vmatmul.mubr.bf16.vlgmr.msra.gmra.mxu1 %v21937_v41  ;;  %v13786_v55 = vadd.f32 %v13785_v60, %v21908_v33  ;;  %14080 = vmatpush1.bf16.msra.mxu0 %v19369_v47  ;;  %v19392_v60 = vld [vmem:[#allocation5 + $0x2e84] ss:$16 sps:$4 sm:$0xff]  }
 0x2ee   :  { %14121 = vmatpush1.bf16.msra.mxu1 %v19372_v59  ;;  %v13787_v7 = vpop.f32.mrf.mxu0  ;;  %14081 = vmatprep.subr.bf16.mxu0 %v19377_v4 }
 0x2ef   :  { %v13828_v48 = vpop.f32.mrf.mxu1  ;;  %14122 = vmatprep.subr.bf16.mxu1 %v19380_v6  ;;  %v21946_v24 = vadd.f32 %v13826_v14, %v13786_v55  ;;  %v13788_v38 = vadd.f32 %v13787_v7, %v21913_v62  ;;  %14111 = vmatprep.mubr.bf16.mxu0 %v21939_v3  ;;  %v19389_v6 = vld [vmem:[#allocation5 + $0x2c84] ss:$16 sps:$4 sm:$0xff]   ;;  %v19387_v62 = vld [vmem:[#allocation5 + $0x2c80] ss:$16 sps:$4 sm:$0xff]  }
 0x2f0   :  { %14152 = vmatprep.mubr.bf16.mxu1 %v21941_v2  ;;  %v13789_v41 = vpop.f32.mrf.mxu0  ;;  %v19390_v14 = vld [vmem:[#allocation5 + $0x2e80] ss:$16 sps:$4 sm:$0xff]   ;;  %v19395_v55 = vld [vmem:[#allocation5 + $0x2c64] ss:$16 sps:$4 sm:$0xff]  }
 0x2f1   :  { %v13830_v33 = vpop.f32.mrf.mxu1  ;;  %v21951_v47 = vadd.f32 %v13828_v48, %v13788_v38  ;;  %14082 = vmatpush1.bf16.msra.mxu0 %v19375_v19  ;;  %v19398_v7 = vld [vmem:[#allocation5 + $0x2e64] ss:$16 sps:$4 sm:$0xff]   ;;  %v19393_v41 = vld [vmem:[#allocation5 + $0x2c60] ss:$16 sps:$4 sm:$0xff]  }
 0x2f2   :  { %14123 = vmatpush1.bf16.msra.mxu1 %v19378_v15  ;;  %v13790_v59 = vpop.f32.mrf.mxu0  ;;  %14083 = vmatprep.subr.bf16.mxu0 %v19383_v17  ;;  %v19396_v48 = vld [vmem:[#allocation5 + $0x2e60] ss:$16 sps:$4 sm:$0xff]   ;;  %v19401_v19 = vld [vmem:[#allocation5 + $0x2c44] ss:$16 sps:$4 sm:$0xff]  }
 0x2f3   :  { %v13831_v4 = vpop.f32.mrf.mxu1  ;;  %14124 = vmatprep.subr.bf16.mxu1 %v19386_v42  ;;  %v19404_v15 = vld [vmem:[#allocation5 + $0x2e44] ss:$16 sps:$4 sm:$0xff]   ;;  %v19399_v17 = vld [vmem:[#allocation5 + $0x2c40] ss:$16 sps:$4 sm:$0xff]  }
 0x2f4   :  { %v19402_v42 = vld [vmem:[#allocation5 + $0x2e40] ss:$16 sps:$4 sm:$0xff]   ;;  %v19410_v38 = vld [vmem:[#allocation5 + $0x2e24] ss:$16 sps:$4 sm:$0xff]  }
 0x2f5   :  { %14084 = vmatpush1.bf16.msra.mxu0 %v19381_v58  ;;  %v19405_v58 = vld [vmem:[#allocation5 + $0x2c20] ss:$16 sps:$4 sm:$0xff]   ;;  %v19413_v59 = vld [vmem:[#allocation5 + $0x2c04] ss:$16 sps:$4 sm:$0xff]  }
 0x2f6   :  { %14125 = vmatpush1.bf16.msra.mxu1 %v19384_v53  ;;  %14085 = vmatprep.subr.bf16.mxu0 %v19389_v6  ;;  %v19407_v53 = vld [vmem:[#allocation5 + $0x2c24] ss:$16 sps:$4 sm:$0xff]   ;;  %v19408_v33 = vld [vmem:[#allocation5 + $0x2e20] ss:$16 sps:$4 sm:$0xff]  }
 0x2f7   :  { %14126 = vmatprep.subr.bf16.mxu1 %v19392_v60  ;;  %v19416_v4 = vld [vmem:[#allocation5 + $0x2e04] ss:$16 sps:$4 sm:$0xff]   ;;  %v19411_v6 = vld [vmem:[#allocation5 + $0x2c00] ss:$16 sps:$4 sm:$0xff]  }
 0x2f8   :  { %v19414_v60 = vld [vmem:[#allocation5 + $0x2e00] ss:$16 sps:$4 sm:$0xff]   ;;  %v19461_v2 = vld [vmem:[#allocation5 + $0x2d04] ss:$16 sps:$4 sm:$0xff]  }
 0x2f9   :  { %14086 = vmatpush1.bf16.msra.mxu0 %v19387_v62  ;;  %v19419_v62 = vld [vmem:[#allocation5 + $0x2de4] ss:$16 sps:$4 sm:$0xff]  }
 0x2fa   :  { %14127 = vmatpush1.bf16.msra.mxu1 %v19390_v14  ;;  %14087 = vmatprep.subr.bf16.mxu0 %v19395_v55  ;;  %v19422_v14 = vld [vmem:[#allocation5 + $0x2fe4] ss:$16 sps:$4 sm:$0xff]   ;;  %v19417_v55 = vld [vmem:[#allocation5 + $0x2de0] ss:$16 sps:$4 sm:$0xff]  }
 0x2fb   :  { %14128 = vmatprep.subr.bf16.mxu1 %v19398_v7  ;;  %v19420_v7 = vld [vmem:[#allocation5 + $0x2fe0] ss:$16 sps:$4 sm:$0xff]   ;;  %v19464_v3 = vld [vmem:[#allocation5 + $0x2f04] ss:$16 sps:$4 sm:$0xff]  }
 0x2fd   :  { %14088 = vmatpush1.bf16.msra.mxu0 %v19393_v41  ;;  %v19425_v41 = vld [vmem:[#allocation5 + $0x2dc4] ss:$16 sps:$4 sm:$0xff]  }
 0x2fe   :  { %14129 = vmatpush1.bf16.msra.mxu1 %v19396_v48  ;;  %14089 = vmatprep.subr.bf16.mxu0 %v19401_v19  ;;  %v19428_v48 = vld [vmem:[#allocation5 + $0x2fc4] ss:$16 sps:$4 sm:$0xff]   ;;  %v19423_v19 = vld [vmem:[#allocation5 + $0x2dc0] ss:$16 sps:$4 sm:$0xff]  }
 0x2ff   :  { %14130 = vmatprep.subr.bf16.mxu1 %v19404_v15  ;;  %v19426_v15 = vld [vmem:[#allocation5 + $0x2fc0] ss:$16 sps:$4 sm:$0xff]  }
 0x301   :  { %14090 = vmatpush1.bf16.msra.mxu0 %v19399_v17  ;;  %v19431_v17 = vld [vmem:[#allocation5 + $0x2da4] ss:$16 sps:$4 sm:$0xff]  }
 0x302   :  { %14131 = vmatpush1.bf16.msra.mxu1 %v19402_v42  ;;  %14091 = vmatprep.subr.bf16.mxu0 %v19407_v53  ;;  %v19434_v42 = vld [vmem:[#allocation5 + $0x2fa4] ss:$16 sps:$4 sm:$0xff]   ;;  %v19429_v53 = vld [vmem:[#allocation5 + $0x2da0] ss:$16 sps:$4 sm:$0xff]  }
 0x303   :  { %14132 = vmatprep.subr.bf16.mxu1 %v19410_v38  ;;  %v19432_v38 = vld [vmem:[#allocation5 + $0x2fa0] ss:$16 sps:$4 sm:$0xff]  }
 0x305   :  { %14092 = vmatpush1.bf16.msra.mxu0 %v19405_v58  ;;  %v19437_v58 = vld [vmem:[#allocation5 + $0x2d84] ss:$16 sps:$4 sm:$0xff]  }
 0x306   :  { %14133 = vmatpush1.bf16.msra.mxu1 %v19408_v33  ;;  %14093 = vmatprep.subr.bf16.mxu0 %v19413_v59  ;;  %v19440_v33 = vld [vmem:[#allocation5 + $0x2f84] ss:$16 sps:$4 sm:$0xff]   ;;  %v19435_v59 = vld [vmem:[#allocation5 + $0x2d80] ss:$16 sps:$4 sm:$0xff]  }
 0x307   :  { %14134 = vmatprep.subr.bf16.mxu1 %v19416_v4  ;;  %v19438_v4 = vld [vmem:[#allocation5 + $0x2f80] ss:$16 sps:$4 sm:$0xff]  }
 0x309   :  { %14094 = vmatpush1.bf16.msra.mxu0 %v19411_v6  ;;  %v19443_v6 = vld [vmem:[#allocation5 + $0x2d64] ss:$16 sps:$4 sm:$0xff]  }
 0x30a   :  { %14135 = vmatpush1.bf16.msra.mxu1 %v19414_v60  ;;  %14095 = vmatprep.subr.bf16.mxu0 %v19419_v62  ;;  %v19446_v60 = vld [vmem:[#allocation5 + $0x2f64] ss:$16 sps:$4 sm:$0xff]   ;;  %v19441_v62 = vld [vmem:[#allocation5 + $0x2d60] ss:$16 sps:$4 sm:$0xff]  }
 0x30b   :  { %14136 = vmatprep.subr.bf16.mxu1 %v19422_v14  ;;  %v19444_v14 = vld [vmem:[#allocation5 + $0x2f60] ss:$16 sps:$4 sm:$0xff]  }
 0x30d   :  { %14096 = vmatpush2.bf16.msra.mxu0 %v19417_v55  ;;  %v19449_v55 = vld [vmem:[#allocation5 + $0x2d44] ss:$16 sps:$4 sm:$0xff]  }
 0x30e   :  { %14137 = vmatpush2.bf16.msra.mxu1 %v19420_v7  ;;  %14097 = vmatprep.subr.bf16.mxu0 %v19425_v41  ;;  %v19452_v7 = vld [vmem:[#allocation5 + $0x2f44] ss:$16 sps:$4 sm:$0xff]  }
 0x30f   :  { %14138 = vmatprep.subr.bf16.mxu1 %v19428_v48  ;;  %v69_v41 = vld [vmem:[#allocation2 + $0x60] sm:$0xff] }
 0x310   :  { %v85_v48 = vld [vmem:[#allocation2 + $0xe0] sm:$0xff] }
 0x311   :  { %14098 = vmatpush2.bf16.msra.mxu0 %v19423_v19  ;;  %v101_v19 = vld [vmem:[#allocation2 + $0x160] sm:$0xff] }
 0x312   :  { %14139 = vmatpush2.bf16.msra.mxu1 %v19426_v15  ;;  %14099 = vmatprep.subr.bf16.mxu0 %v19431_v17  ;;  %v117_v15 = vld [vmem:[#allocation2 + $0x1e0] sm:$0xff] }
 0x313   :  { %14140 = vmatprep.subr.bf16.mxu1 %v19434_v42  ;;  %v19447_v17 = vld [vmem:[#allocation5 + $0x2d40] ss:$16 sps:$4 sm:$0xff]  }
 0x314   :  { %v19450_v42 = vld [vmem:[#allocation5 + $0x2f40] ss:$16 sps:$4 sm:$0xff]  }
 0x315   :  { %14100 = vmatpush2.bf16.msra.mxu0 %v19429_v53  ;;  %v19455_v53 = vld [vmem:[#allocation5 + $0x2d24] ss:$16 sps:$4 sm:$0xff]  }
 0x316   :  { %14141 = vmatpush2.bf16.msra.mxu1 %v19432_v38  ;;  %14101 = vmatprep.subr.bf16.mxu0 %v19437_v58  ;;  %v19458_v38 = vld [vmem:[#allocation5 + $0x2f24] ss:$16 sps:$4 sm:$0xff]   ;;  %v617_v58 = vcombine.low %v69_v41, %v85_v48 }
 0x317   :  { %14142 = vmatprep.subr.bf16.mxu1 %v19440_v33  ;;  %v619_v33 = vcombine.low %v101_v19, %v117_v15 }
 0x319   :  { %14102 = vmatpush2.bf16.msra.mxu0 %v19435_v59  ;;  %v618_v59 = vcombine.high %v69_v41, %v85_v48  ;;  %v613_v41 = vcombine.low %v21916_v32, %v21919_v8  ;;  %v615_v48 = vcombine.low %v21922_v34, %v21925_v37  ;;  %v19473_v34 = vld [vmem:[#allocation5 + $0x30c4] ss:$16 sps:$4 sm:$0xff]  }
 0x31a   :  { %14143 = vmatpush2.bf16.msra.mxu1 %v19438_v4  ;;  %14103 = vmatprep.subr.bf16.mxu0 %v19443_v6  ;;  %v620_v4 = vcombine.high %v101_v19, %v117_v15  ;;  %v19453_v6 = vld [vmem:[#allocation5 + $0x2d20] ss:$16 sps:$4 sm:$0xff]   ;;  %v19476_v37 = vld [vmem:[#allocation5 + $0x32c4] ss:$16 sps:$4 sm:$0xff]  }
 0x31b   :  { %14144 = vmatprep.subr.bf16.mxu1 %v19446_v60  ;;  %v19456_v60 = vld [vmem:[#allocation5 + $0x2f20] ss:$16 sps:$4 sm:$0xff]   ;;  %v21973_v32 = vpack.c.bf16 %v613_v41, %v613_v41  ;;  %v21975_v8 = vpack.c.bf16 %v615_v48, %v615_v48 }
 0x31c   :  { %v19459_v19 = vld [vmem:[#allocation5 + $0x2d00] ss:$16 sps:$4 sm:$0xff]  }
 0x31d   :  { %14104 = vmatpush2.bf16.msra.mxu0 %v19441_v62  ;;  %v21954_v62 = vrot.slane %v617_v58, %v21547_v54  ;;  %v19462_v15 = vld [vmem:[#allocation5 + $0x2f00] ss:$16 sps:$4 sm:$0xff]   ;;  %22330 = vst [vmem:[#allocation22_spill] sm:$0xff] %v21973_v32  ;;  %22331 = vst [vmem:[#allocation23_spill] sm:$0xff] %v21975_v8 }
 0x31e   :  { %14145 = vmatpush2.bf16.msra.mxu1 %v19444_v14  ;;  %14105 = vmatprep.subr.bf16.mxu0 %v19449_v55  ;;  %v21957_v14 = vrot.slane %v619_v33, %v21547_v54  ;;  %v21960_v55 = vrot.slane %v618_v59, %v21547_v54 }
 0x31f   :  { %14146 = vmatprep.subr.bf16.mxu1 %v19452_v7  ;;  %v21963_v7 = vrot.slane %v620_v4, %v21547_v54 }
 0x320   :  { %v650_v58 = vcombine.high %v21954_v62, %v21957_v14 }
 0x321   :  { %14106 = vmatpush2.bf16.msra.mxu0 %v19447_v17  ;;  %v19467_v17 = vld [vmem:[#allocation5 + $0x30e4] ss:$16 sps:$4 sm:$0xff]   ;;  %v652_v33 = vcombine.high %v21960_v55, %v21963_v7 }
 0x322   :  { %14147 = vmatpush2.bf16.msra.mxu1 %v19450_v42  ;;  %14107 = vmatprep.subr.bf16.mxu0 %v19455_v53  ;;  %v19470_v42 = vld [vmem:[#allocation5 + $0x32e4] ss:$16 sps:$4 sm:$0xff]   ;;  %v19465_v53 = vld [vmem:[#allocation5 + $0x30e0] ss:$16 sps:$4 sm:$0xff]   ;;  %v21977_v59 = vpack.c.bf16 %v650_v58, %v650_v58 }
 0x323   :  { %14148 = vmatprep.subr.bf16.mxu1 %v19458_v38  ;;  %v19468_v38 = vld [vmem:[#allocation5 + $0x32e0] ss:$16 sps:$4 sm:$0xff]   ;;  %v21979_v4 = vpack.c.bf16 %v652_v33, %v652_v33 }
 0x324   :  { %22332 = vst [vmem:[#allocation24_spill] sm:$0xff] %v21977_v59  ;;  %v19477_v33 = vld [vmem:[#allocation5 + $0x30a0] ss:$16 sps:$4 sm:$0xff]  }
 0x325   :  { %14108 = vmatpush2.bf16.msra.mxu0 %v19453_v6  ;;  %22333 = vst [vmem:[#allocation25_spill] sm:$0xff] %v21979_v4 }
 0x326   :  { %14149 = vmatpush2.bf16.msra.mxu1 %v19456_v60  ;;  %14109 = vmatprep.subr.bf16.mxu0 %v19461_v2  ;;  %v19474_v2 = vld [vmem:[#allocation5 + $0x32c0] ss:$16 sps:$4 sm:$0xff]  }
 0x327   :  { %14150 = vmatprep.subr.bf16.mxu1 %v19464_v3  ;;  %v19471_v3 = vld [vmem:[#allocation5 + $0x30c0] ss:$16 sps:$4 sm:$0xff]  }
 0x329   :  { %14110 = vmatpush2.bf16.msra.mxu0 %v19459_v19 }
 0x32a   :  { %14151 = vmatpush2.bf16.msra.mxu1 %v19462_v15  ;;  %14161 = vmatprep.subr.bf16.mxu0 %v19467_v17  ;;  %v19479_v15 = vld [vmem:[#allocation5 + $0x30a4] ss:$16 sps:$4 sm:$0xff]  }
 0x32b   :  { %14202 = vmatprep.subr.bf16.mxu1 %v19470_v42  ;;  %v19482_v17 = vld [vmem:[#allocation5 + $0x32a4] ss:$16 sps:$4 sm:$0xff]  }
 0x32c   :  { %v13867_v6 = vpop.f32.mrf.mxu0  ;;  %14112 = vmatmul.mubr.bf16.vlgmr.msra.gmra.mxu0 %v21973_v32  ;;  %v19576_v32 = vld [vmem:[#allocation5 + $0x36a0] ss:$16 sps:$4 sm:$0xff]  }
 0x32d   :  { %v13908_v60 = vpop.f32.mrf.mxu1  ;;  %14153 = vmatmul.mubr.bf16.vlgmr.msra.gmra.mxu1 %v21975_v8  ;;  %v13868_v41 = vadd.f32 %v13867_v6, %v21946_v24  ;;  %14162 = vmatpush1.bf16.msra.mxu0 %v19465_v53  ;;  %v19488_v6 = vld [vmem:[#allocation5 + $0x3284] ss:$16 sps:$4 sm:$0xff]  }
 0x32e   :  { %14203 = vmatpush1.bf16.msra.mxu1 %v19468_v38  ;;  %v13869_v48 = vpop.f32.mrf.mxu0  ;;  %14163 = vmatprep.subr.bf16.mxu0 %v19473_v34 }
 0x32f   :  { %v13910_v19 = vpop.f32.mrf.mxu1  ;;  %14204 = vmatprep.subr.bf16.mxu1 %v19476_v37  ;;  %v21984_v42 = vadd.f32 %v13908_v60, %v13868_v41  ;;  %v13870_v58 = vadd.f32 %v13869_v48, %v21951_v47  ;;  %14193 = vmatprep.mubr.bf16.mxu0 %v21977_v59  ;;  %v19485_v37 = vld [vmem:[#allocation5 + $0x3084] ss:$16 sps:$4 sm:$0xff]   ;;  %v19483_v47 = vld [vmem:[#allocation5 + $0x3080] ss:$16 sps:$4 sm:$0xff]  }
 0x330   :  { %14234 = vmatprep.mubr.bf16.mxu1 %v21979_v4  ;;  %v13871_v8 = vpop.f32.mrf.mxu0  ;;  %v19486_v60 = vld [vmem:[#allocation5 + $0x3280] ss:$16 sps:$4 sm:$0xff]   ;;  %v19491_v41 = vld [vmem:[#allocation5 + $0x3064] ss:$16 sps:$4 sm:$0xff]  }
 0x331   :  { %v13912_v24 = vpop.f32.mrf.mxu1  ;;  %v21989_v53 = vadd.f32 %v13910_v19, %v13870_v58  ;;  %14164 = vmatpush1.bf16.msra.mxu0 %v19471_v3  ;;  %v19494_v48 = vld [vmem:[#allocation5 + $0x3264] ss:$16 sps:$4 sm:$0xff]   ;;  %v19489_v8 = vld [vmem:[#allocation5 + $0x3060] ss:$16 sps:$4 sm:$0xff]  }
 0x332   :  { %14205 = vmatpush1.bf16.msra.mxu1 %v19474_v2  ;;  %v13872_v38 = vpop.f32.mrf.mxu0  ;;  %14165 = vmatprep.subr.bf16.mxu0 %v19479_v15  ;;  %v19492_v19 = vld [vmem:[#allocation5 + $0x3260] ss:$16 sps:$4 sm:$0xff]   ;;  %v19497_v3 = vld [vmem:[#allocation5 + $0x3044] ss:$16 sps:$4 sm:$0xff]  }
 0x333   :  { %v13913_v34 = vpop.f32.mrf.mxu1  ;;  %14206 = vmatprep.subr.bf16.mxu1 %v19482_v17  ;;  %v19500_v2 = vld [vmem:[#allocation5 + $0x3244] ss:$16 sps:$4 sm:$0xff]   ;;  %v19495_v15 = vld [vmem:[#allocation5 + $0x3040] ss:$16 sps:$4 sm:$0xff]  }
 0x334   :  { %v19498_v17 = vld [vmem:[#allocation5 + $0x3240] ss:$16 sps:$4 sm:$0xff]   ;;  %v19506_v58 = vld [vmem:[#allocation5 + $0x3224] ss:$16 sps:$4 sm:$0xff]  }
 0x335   :  { %14166 = vmatpush1.bf16.msra.mxu0 %v19477_v33  ;;  %v19501_v33 = vld [vmem:[#allocation5 + $0x3020] ss:$16 sps:$4 sm:$0xff]   ;;  %v19509_v38 = vld [vmem:[#allocation5 + $0x3004] ss:$16 sps:$4 sm:$0xff]  }
 0x336   :  { %14207 = vmatpush1.bf16.msra.mxu1 %v19480_v1  ;;  %14167 = vmatprep.subr.bf16.mxu0 %v19485_v37  ;;  %v19503_v1 = vld [vmem:[#allocation5 + $0x3024] ss:$16 sps:$4 sm:$0xff]   ;;  %v19504_v24 = vld [vmem:[#allocation5 + $0x3220] ss:$16 sps:$4 sm:$0xff]  }
 0x337   :  { %14208 = vmatprep.subr.bf16.mxu1 %v19488_v6  ;;  %v19512_v34 = vld [vmem:[#allocation5 + $0x3204] ss:$16 sps:$4 sm:$0xff]   ;;  %v19507_v37 = vld [vmem:[#allocation5 + $0x3000] ss:$16 sps:$4 sm:$0xff]  }
 0x338   :  { %v19510_v6 = vld [vmem:[#allocation5 + $0x3200] ss:$16 sps:$4 sm:$0xff]   ;;  %v19557_v4 = vld [vmem:[#allocation5 + $0x3104] ss:$16 sps:$4 sm:$0xff]  }
 0x339   :  { %14168 = vmatpush1.bf16.msra.mxu0 %v19483_v47  ;;  %v19515_v47 = vld [vmem:[#allocation5 + $0x31e4] ss:$16 sps:$4 sm:$0xff]  }
 0x33a   :  { %14209 = vmatpush1.bf16.msra.mxu1 %v19486_v60  ;;  %14169 = vmatprep.subr.bf16.mxu0 %v19491_v41  ;;  %v19518_v60 = vld [vmem:[#allocation5 + $0x33e4] ss:$16 sps:$4 sm:$0xff]   ;;  %v19513_v41 = vld [vmem:[#allocation5 + $0x31e0] ss:$16 sps:$4 sm:$0xff]  }
 0x33b   :  { %14210 = vmatprep.subr.bf16.mxu1 %v19494_v48  ;;  %v19516_v48 = vld [vmem:[#allocation5 + $0x33e0] ss:$16 sps:$4 sm:$0xff]   ;;  %v19560_v59 = vld [vmem:[#allocation5 + $0x3304] ss:$16 sps:$4 sm:$0xff]  }
 0x33d   :  { %14170 = vmatpush1.bf16.msra.mxu0 %v19489_v8  ;;  %v19521_v8 = vld [vmem:[#allocation5 + $0x31c4] ss:$16 sps:$4 sm:$0xff]  }
 0x33e   :  { %14211 = vmatpush1.bf16.msra.mxu1 %v19492_v19  ;;  %14171 = vmatprep.subr.bf16.mxu0 %v19497_v3  ;;  %v19524_v19 = vld [vmem:[#allocation5 + $0x33c4] ss:$16 sps:$4 sm:$0xff]   ;;  %v19519_v3 = vld [vmem:[#allocation5 + $0x31c0] ss:$16 sps:$4 sm:$0xff]  }
 0x33f   :  { %14212 = vmatprep.subr.bf16.mxu1 %v19500_v2  ;;  %v19522_v2 = vld [vmem:[#allocation5 + $0x33c0] ss:$16 sps:$4 sm:$0xff]  }
 0x341   :  { %14172 = vmatpush1.bf16.msra.mxu0 %v19495_v15  ;;  %v19527_v15 = vld [vmem:[#allocation5 + $0x31a4] ss:$16 sps:$4 sm:$0xff]  }
 0x342   :  { %14213 = vmatpush1.bf16.msra.mxu1 %v19498_v17  ;;  %14173 = vmatprep.subr.bf16.mxu0 %v19503_v1  ;;  %v19530_v17 = vld [vmem:[#allocation5 + $0x33a4] ss:$16 sps:$4 sm:$0xff]   ;;  %v19525_v1 = vld [vmem:[#allocation5 + $0x31a0] ss:$16 sps:$4 sm:$0xff]  }
 0x343   :  { %14214 = vmatprep.subr.bf16.mxu1 %v19506_v58  ;;  %v19528_v58 = vld [vmem:[#allocation5 + $0x33a0] ss:$16 sps:$4 sm:$0xff]  }
 0x345   :  { %14174 = vmatpush1.bf16.msra.mxu0 %v19501_v33  ;;  %v19533_v33 = vld [vmem:[#allocation5 + $0x3184] ss:$16 sps:$4 sm:$0xff]  }
 0x346   :  { %14215 = vmatpush1.bf16.msra.mxu1 %v19504_v24  ;;  %14175 = vmatprep.subr.bf16.mxu0 %v19509_v38  ;;  %v19536_v24 = vld [vmem:[#allocation5 + $0x3384] ss:$16 sps:$4 sm:$0xff]   ;;  %v19531_v38 = vld [vmem:[#allocation5 + $0x3180] ss:$16 sps:$4 sm:$0xff]  }
 0x347   :  { %14216 = vmatprep.subr.bf16.mxu1 %v19512_v34  ;;  %v19534_v34 = vld [vmem:[#allocation5 + $0x3380] ss:$16 sps:$4 sm:$0xff]  }
 0x349   :  { %14176 = vmatpush1.bf16.msra.mxu0 %v19507_v37  ;;  %v19539_v37 = vld [vmem:[#allocation5 + $0x3164] ss:$16 sps:$4 sm:$0xff]  }
 0x34a   :  { %14217 = vmatpush1.bf16.msra.mxu1 %v19510_v6  ;;  %14177 = vmatprep.subr.bf16.mxu0 %v19515_v47  ;;  %v19542_v6 = vld [vmem:[#allocation5 + $0x3364] ss:$16 sps:$4 sm:$0xff]   ;;  %v19537_v47 = vld [vmem:[#allocation5 + $0x3160] ss:$16 sps:$4 sm:$0xff]  }
 0x34b   :  { %14218 = vmatprep.subr.bf16.mxu1 %v19518_v60  ;;  %v19540_v60 = vld [vmem:[#allocation5 + $0x3360] ss:$16 sps:$4 sm:$0xff]  }
 0x34d   :  { %14178 = vmatpush2.bf16.msra.mxu0 %v19513_v41  ;;  %v19545_v41 = vld [vmem:[#allocation5 + $0x3144] ss:$16 sps:$4 sm:$0xff]  }
 0x34e   :  { %14219 = vmatpush2.bf16.msra.mxu1 %v19516_v48  ;;  %14179 = vmatprep.subr.bf16.mxu0 %v19521_v8  ;;  %v19548_v48 = vld [vmem:[#allocation5 + $0x3344] ss:$16 sps:$4 sm:$0xff]   ;;  %v70_v8 = vld [vmem:[#allocation2 + $0x68] sm:$0xff] }
 0x34f   :  { %14220 = vmatprep.subr.bf16.mxu1 %v19524_v19  ;;  %v86_v19 = vld [vmem:[#allocation2 + $0xe8] sm:$0xff] }
 0x351   :  { %14180 = vmatpush2.bf16.msra.mxu0 %v19519_v3  ;;  %v102_v3 = vld [vmem:[#allocation2 + $0x168] sm:$0xff] }
 0x352   :  { %14221 = vmatpush2.bf16.msra.mxu1 %v19522_v2  ;;  %14181 = vmatprep.subr.bf16.mxu0 %v19527_v15  ;;  %v118_v2 = vld [vmem:[#allocation2 + $0x1e8] sm:$0xff]  ;;  %v19543_v15 = vld [vmem:[#allocation5 + $0x3140] ss:$16 sps:$4 sm:$0xff]  }
 0x353   :  { %14222 = vmatprep.subr.bf16.mxu1 %v19530_v17  ;;  %v19546_v17 = vld [vmem:[#allocation5 + $0x3340] ss:$16 sps:$4 sm:$0xff]  }
 0x355   :  { %14182 = vmatpush2.bf16.msra.mxu0 %v19525_v1  ;;  %v19551_v1 = vld [vmem:[#allocation5 + $0x3124] ss:$16 sps:$4 sm:$0xff]  }
 0x356   :  { %14223 = vmatpush2.bf16.msra.mxu1 %v19528_v58  ;;  %14183 = vmatprep.subr.bf16.mxu0 %v19533_v33  ;;  %v19554_v58 = vld [vmem:[#allocation5 + $0x3324] ss:$16 sps:$4 sm:$0xff]   ;;  %v653_v33 = vcombine.low %v70_v8, %v86_v19 }
 0x357   :  { %14224 = vmatprep.subr.bf16.mxu1 %v19536_v24  ;;  %v655_v24 = vcombine.low %v102_v3, %v118_v2 }
 0x359   :  { %14184 = vmatpush2.bf16.msra.mxu0 %v19531_v38  ;;  %v654_v38 = vcombine.high %v70_v8, %v86_v19  ;;  %v649_v8 = vcombine.low %v21954_v62, %v21957_v14  ;;  %v651_v19 = vcombine.low %v21960_v55, %v21963_v7  ;;  %v19569_v55 = vld [vmem:[#allocation5 + $0x34c4] ss:$16 sps:$4 sm:$0xff]  }
 0x35a   :  { %14225 = vmatpush2.bf16.msra.mxu1 %v19534_v34  ;;  %14185 = vmatprep.subr.bf16.mxu0 %v19539_v37  ;;  %v656_v34 = vcombine.high %v102_v3, %v118_v2  ;;  %v19549_v37 = vld [vmem:[#allocation5 + $0x3120] ss:$16 sps:$4 sm:$0xff]   ;;  %v19572_v7 = vld [vmem:[#allocation5 + $0x36c4] ss:$16 sps:$4 sm:$0xff]  }
 0x35b   :  { %14226 = vmatprep.subr.bf16.mxu1 %v19542_v6  ;;  %v19552_v6 = vld [vmem:[#allocation5 + $0x3320] ss:$16 sps:$4 sm:$0xff]   ;;  %v22011_v62 = vpack.c.bf16 %v649_v8, %v649_v8  ;;  %v22013_v14 = vpack.c.bf16 %v651_v19, %v651_v19 }
 0x35c   :  { %v19555_v3 = vld [vmem:[#allocation5 + $0x3100] ss:$16 sps:$4 sm:$0xff]  }
 0x35d   :  { %14186 = vmatpush2.bf16.msra.mxu0 %v19537_v47  ;;  %v21992_v47 = vrot.slane %v653_v33, %v21547_v54  ;;  %v19558_v2 = vld [vmem:[#allocation5 + $0x3300] ss:$16 sps:$4 sm:$0xff]   ;;  %22334 = vst [vmem:[#allocation26_spill] sm:$0xff] %v22011_v62  ;;  %22335 = vst [vmem:[#allocation27_spill] sm:$0xff] %v22013_v14 }
 0x35e   :  { %14227 = vmatpush2.bf16.msra.mxu1 %v19540_v60  ;;  %14187 = vmatprep.subr.bf16.mxu0 %v19545_v41  ;;  %v21995_v60 = vrot.slane %v655_v24, %v21547_v54  ;;  %v21998_v41 = vrot.slane %v654_v38, %v21547_v54 }
 0x35f   :  { %14228 = vmatprep.subr.bf16.mxu1 %v19548_v48  ;;  %v22001_v48 = vrot.slane %v656_v34, %v21547_v54 }
 0x360   :  { %v686_v33 = vcombine.high %v21992_v47, %v21995_v60 }
 0x361   :  { %14188 = vmatpush2.bf16.msra.mxu0 %v19543_v15  ;;  %v19563_v15 = vld [vmem:[#allocation5 + $0x34e4] ss:$16 sps:$4 sm:$0xff]   ;;  %v688_v24 = vcombine.high %v21998_v41, %v22001_v48 }
 0x362   :  { %14229 = vmatpush2.bf16.msra.mxu1 %v19546_v17  ;;  %14189 = vmatprep.subr.bf16.mxu0 %v19551_v1  ;;  %v19566_v17 = vld [vmem:[#allocation5 + $0x36e4] ss:$16 sps:$4 sm:$0xff]   ;;  %v19561_v1 = vld [vmem:[#allocation5 + $0x34e0] ss:$16 sps:$4 sm:$0xff]   ;;  %v22015_v38 = vpack.c.bf16 %v686_v33, %v686_v33 }
 0x363   :  { %14230 = vmatprep.subr.bf16.mxu1 %v19554_v58  ;;  %v19564_v58 = vld [vmem:[#allocation5 + $0x36e0] ss:$16 sps:$4 sm:$0xff]   ;;  %v22017_v34 = vpack.c.bf16 %v688_v24, %v688_v24 }
 0x364   :  { %22336 = vst [vmem:[#allocation28_spill] sm:$0xff] %v22015_v38  ;;  %v19573_v24 = vld [vmem:[#allocation5 + $0x34a0] ss:$16 sps:$4 sm:$0xff]  }
 0x365   :  { %14190 = vmatpush2.bf16.msra.mxu0 %v19549_v37  ;;  %22337 = vst [vmem:[#allocation29_spill] sm:$0xff] %v22017_v34 }
 0x366   :  { %14231 = vmatpush2.bf16.msra.mxu1 %v19552_v6  ;;  %14191 = vmatprep.subr.bf16.mxu0 %v19557_v4  ;;  %v19570_v4 = vld [vmem:[#allocation5 + $0x36c0] ss:$16 sps:$4 sm:$0xff]  }
 0x367   :  { %14232 = vmatprep.subr.bf16.mxu1 %v19560_v59  ;;  %v19567_v59 = vld [vmem:[#allocation5 + $0x34c0] ss:$16 sps:$4 sm:$0xff]  }
 0x369   :  { %14192 = vmatpush2.bf16.msra.mxu0 %v19555_v3 }
 0x36a   :  { %14233 = vmatpush2.bf16.msra.mxu1 %v19558_v2  ;;  %14243 = vmatprep.subr.bf16.mxu0 %v19563_v15  ;;  %v19575_v2 = vld [vmem:[#allocation5 + $0x34a4] ss:$16 sps:$4 sm:$0xff]  }
 0x36b   :  { %14284 = vmatprep.subr.bf16.mxu1 %v19566_v17  ;;  %v19578_v15 = vld [vmem:[#allocation5 + $0x36a4] ss:$16 sps:$4 sm:$0xff]  }
 0x36c   :  { %v13949_v37 = vpop.f32.mrf.mxu0  ;;  %14194 = vmatmul.mubr.bf16.vlgmr.msra.gmra.mxu0 %v22011_v62  ;;  %v19672_v62 = vld [vmem:[#allocation5 + $0x3aa0] ss:$16 sps:$4 sm:$0xff]  }
 0x36d   :  { %v13990_v6 = vpop.f32.mrf.mxu1  ;;  %14235 = vmatmul.mubr.bf16.vlgmr.msra.gmra.mxu1 %v22013_v14  ;;  %v13950_v8 = vadd.f32 %v13949_v37, %v21984_v42  ;;  %14244 = vmatpush1.bf16.msra.mxu0 %v19561_v1  ;;  %v19584_v37 = vld [vmem:[#allocation5 + $0x3684] ss:$16 sps:$4 sm:$0xff]  }
 0x36e   :  { %14285 = vmatpush1.bf16.msra.mxu1 %v19564_v58  ;;  %v13951_v19 = vpop.f32.mrf.mxu0  ;;  %14245 = vmatprep.subr.bf16.mxu0 %v19569_v55 }
 0x36f   :  { %v13992_v3 = vpop.f32.mrf.mxu1  ;;  %14286 = vmatprep.subr.bf16.mxu1 %v19572_v7  ;;  %v22022_v17 = vadd.f32 %v13990_v6, %v13950_v8  ;;  %v13952_v33 = vadd.f32 %v13951_v19, %v21989_v53  ;;  %14275 = vmatprep.mubr.bf16.mxu0 %v22015_v38  ;;  %v19581_v7 = vld [vmem:[#allocation5 + $0x3484] ss:$16 sps:$4 sm:$0xff]   ;;  %v19579_v53 = vld [vmem:[#allocation5 + $0x3480] ss:$16 sps:$4 sm:$0xff]  }
 0x370   :  { %14316 = vmatprep.mubr.bf16.mxu1 %v22017_v34  ;;  %v13953_v14 = vpop.f32.mrf.mxu0  ;;  %v19582_v6 = vld [vmem:[#allocation5 + $0x3680] ss:$16 sps:$4 sm:$0xff]   ;;  %v19587_v8 = vld [vmem:[#allocation5 + $0x3464] ss:$16 sps:$4 sm:$0xff]  }
 0x371   :  { %v13994_v42 = vpop.f32.mrf.mxu1  ;;  %v22027_v1 = vadd.f32 %v13992_v3, %v13952_v33  ;;  %14246 = vmatpush1.bf16.msra.mxu0 %v19567_v59  ;;  %v19590_v19 = vld [vmem:[#allocation5 + $0x3664] ss:$16 sps:$4 sm:$0xff]   ;;  %v19585_v14 = vld [vmem:[#allocation5 + $0x3460] ss:$16 sps:$4 sm:$0xff]  }
 0x372   :  { %14287 = vmatpush1.bf16.msra.mxu1 %v19570_v4  ;;  %v13954_v58 = vpop.f32.mrf.mxu0  ;;  %14247 = vmatprep.subr.bf16.mxu0 %v19575_v2  ;;  %v19588_v3 = vld [vmem:[#allocation5 + $0x3660] ss:$16 sps:$4 sm:$0xff]   ;;  %v19593_v59 = vld [vmem:[#allocation5 + $0x3444] ss:$16 sps:$4 sm:$0xff]  }
 0x373   :  { %v13995_v55 = vpop.f32.mrf.mxu1  ;;  %14288 = vmatprep.subr.bf16.mxu1 %v19578_v15  ;;  %v19596_v4 = vld [vmem:[#allocation5 + $0x3644] ss:$16 sps:$4 sm:$0xff]   ;;  %v19591_v2 = vld [vmem:[#allocation5 + $0x3440] ss:$16 sps:$4 sm:$0xff]  }
 0x374   :  { %v19594_v15 = vld [vmem:[#allocation5 + $0x3640] ss:$16 sps:$4 sm:$0xff]   ;;  %v19602_v33 = vld [vmem:[#allocation5 + $0x3624] ss:$16 sps:$4 sm:$0xff]  }
 0x375   :  { %14248 = vmatpush1.bf16.msra.mxu0 %v19573_v24  ;;  %v19597_v24 = vld [vmem:[#allocation5 + $0x3420] ss:$16 sps:$4 sm:$0xff]   ;;  %v19605_v58 = vld [vmem:[#allocation5 + $0x3404] ss:$16 sps:$4 sm:$0xff]  }
 0x376   :  { %14289 = vmatpush1.bf16.msra.mxu1 %v19576_v32  ;;  %14249 = vmatprep.subr.bf16.mxu0 %v19581_v7  ;;  %v19599_v32 = vld [vmem:[#allocation5 + $0x3424] ss:$16 sps:$4 sm:$0xff]   ;;  %v19600_v42 = vld [vmem:[#allocation5 + $0x3620] ss:$16 sps:$4 sm:$0xff]  }
 0x377   :  { %14290 = vmatprep.subr.bf16.mxu1 %v19584_v37  ;;  %v19608_v55 = vld [vmem:[#allocation5 + $0x3604] ss:$16 sps:$4 sm:$0xff]   ;;  %v19603_v7 = vld [vmem:[#allocation5 + $0x3400] ss:$16 sps:$4 sm:$0xff]  }
 0x378   :  { %v19606_v37 = vld [vmem:[#allocation5 + $0x3600] ss:$16 sps:$4 sm:$0xff]   ;;  %v19653_v34 = vld [vmem:[#allocation5 + $0x3504] ss:$16 sps:$4 sm:$0xff]  }
 0x379   :  { %14250 = vmatpush1.bf16.msra.mxu0 %v19579_v53  ;;  %v19611_v53 = vld [vmem:[#allocation5 + $0x35e4] ss:$16 sps:$4 sm:$0xff]  }
 0x37a   :  { %14291 = vmatpush1.bf16.msra.mxu1 %v19582_v6  ;;  %14251 = vmatprep.subr.bf16.mxu0 %v19587_v8  ;;  %v19614_v6 = vld [vmem:[#allocation5 + $0x37e4] ss:$16 sps:$4 sm:$0xff]   ;;  %v19609_v8 = vld [vmem:[#allocation5 + $0x35e0] ss:$16 sps:$4 sm:$0xff]  }
 0x37b   :  { %14292 = vmatprep.subr.bf16.mxu1 %v19590_v19  ;;  %v19612_v19 = vld [vmem:[#allocation5 + $0x37e0] ss:$16 sps:$4 sm:$0xff]   ;;  %v19656_v38 = vld [vmem:[#allocation5 + $0x3704] ss:$16 sps:$4 sm:$0xff]  }
 0x37d   :  { %14252 = vmatpush1.bf16.msra.mxu0 %v19585_v14  ;;  %v19617_v14 = vld [vmem:[#allocation5 + $0x35c4] ss:$16 sps:$4 sm:$0xff]  }
 0x37e   :  { %14293 = vmatpush1.bf16.msra.mxu1 %v19588_v3  ;;  %14253 = vmatprep.subr.bf16.mxu0 %v19593_v59  ;;  %v19620_v3 = vld [vmem:[#allocation5 + $0x37c4] ss:$16 sps:$4 sm:$0xff]   ;;  %v19615_v59 = vld [vmem:[#allocation5 + $0x35c0] ss:$16 sps:$4 sm:$0xff]  }
 0x37f   :  { %14294 = vmatprep.subr.bf16.mxu1 %v19596_v4  ;;  %v19618_v4 = vld [vmem:[#allocation5 + $0x37c0] ss:$16 sps:$4 sm:$0xff]  }
 0x381   :  { %14254 = vmatpush1.bf16.msra.mxu0 %v19591_v2  ;;  %v19623_v2 = vld [vmem:[#allocation5 + $0x35a4] ss:$16 sps:$4 sm:$0xff]  }
 0x382   :  { %14295 = vmatpush1.bf16.msra.mxu1 %v19594_v15  ;;  %14255 = vmatprep.subr.bf16.mxu0 %v19599_v32  ;;  %v19626_v15 = vld [vmem:[#allocation5 + $0x37a4] ss:$16 sps:$4 sm:$0xff]   ;;  %v19621_v32 = vld [vmem:[#allocation5 + $0x35a0] ss:$16 sps:$4 sm:$0xff]  }
 0x383   :  { %14296 = vmatprep.subr.bf16.mxu1 %v19602_v33  ;;  %v19624_v33 = vld [vmem:[#allocation5 + $0x37a0] ss:$16 sps:$4 sm:$0xff]  }
 0x385   :  { %14256 = vmatpush1.bf16.msra.mxu0 %v19597_v24  ;;  %v19629_v24 = vld [vmem:[#allocation5 + $0x3584] ss:$16 sps:$4 sm:$0xff]  }
 0x386   :  { %14297 = vmatpush1.bf16.msra.mxu1 %v19600_v42  ;;  %14257 = vmatprep.subr.bf16.mxu0 %v19605_v58  ;;  %v19632_v42 = vld [vmem:[#allocation5 + $0x3784] ss:$16 sps:$4 sm:$0xff]   ;;  %v19627_v58 = vld [vmem:[#allocation5 + $0x3580] ss:$16 sps:$4 sm:$0xff]  }
 0x387   :  { %14298 = vmatprep.subr.bf16.mxu1 %v19608_v55  ;;  %v19630_v55 = vld [vmem:[#allocation5 + $0x3780] ss:$16 sps:$4 sm:$0xff]  }
 0x389   :  { %14258 = vmatpush1.bf16.msra.mxu0 %v19603_v7  ;;  %v19635_v7 = vld [vmem:[#allocation5 + $0x3564] ss:$16 sps:$4 sm:$0xff]  }
 0x38a   :  { %14299 = vmatpush1.bf16.msra.mxu1 %v19606_v37  ;;  %14259 = vmatprep.subr.bf16.mxu0 %v19611_v53  ;;  %v19638_v37 = vld [vmem:[#allocation5 + $0x3764] ss:$16 sps:$4 sm:$0xff]   ;;  %v19633_v53 = vld [vmem:[#allocation5 + $0x3560] ss:$16 sps:$4 sm:$0xff]  }
 0x38b   :  { %14300 = vmatprep.subr.bf16.mxu1 %v19614_v6  ;;  %v19636_v6 = vld [vmem:[#allocation5 + $0x3760] ss:$16 sps:$4 sm:$0xff]  }
 0x38d   :  { %14260 = vmatpush2.bf16.msra.mxu0 %v19609_v8  ;;  %v19641_v8 = vld [vmem:[#allocation5 + $0x3544] ss:$16 sps:$4 sm:$0xff]  }
 0x38e   :  { %14301 = vmatpush2.bf16.msra.mxu1 %v19612_v19  ;;  %14261 = vmatprep.subr.bf16.mxu0 %v19617_v14  ;;  %v19644_v19 = vld [vmem:[#allocation5 + $0x3744] ss:$16 sps:$4 sm:$0xff]  }
 0x38f   :  { %14302 = vmatprep.subr.bf16.mxu1 %v19620_v3  ;;  %v71_v14 = vld [vmem:[#allocation2 + $0x70] sm:$0xff] }
 0x390   :  { %v87_v3 = vld [vmem:[#allocation2 + $0xf0] sm:$0xff] }
 0x391   :  { %14262 = vmatpush2.bf16.msra.mxu0 %v19615_v59  ;;  %v103_v59 = vld [vmem:[#allocation2 + $0x170] sm:$0xff] }
 0x392   :  { %14303 = vmatpush2.bf16.msra.mxu1 %v19618_v4  ;;  %14263 = vmatprep.subr.bf16.mxu0 %v19623_v2  ;;  %v119_v4 = vld [vmem:[#allocation2 + $0x1f0] sm:$0xff] }
 0x393   :  { %14304 = vmatprep.subr.bf16.mxu1 %v19626_v15  ;;  %v19639_v2 = vld [vmem:[#allocation5 + $0x3540] ss:$16 sps:$4 sm:$0xff]  }
 0x394   :  { %v19642_v15 = vld [vmem:[#allocation5 + $0x3740] ss:$16 sps:$4 sm:$0xff]  }
 0x395   :  { %14264 = vmatpush2.bf16.msra.mxu0 %v19621_v32  ;;  %v19647_v32 = vld [vmem:[#allocation5 + $0x3524] ss:$16 sps:$4 sm:$0xff]  }
 0x396   :  { %14305 = vmatpush2.bf16.msra.mxu1 %v19624_v33  ;;  %14265 = vmatprep.subr.bf16.mxu0 %v19629_v24  ;;  %v19650_v33 = vld [vmem:[#allocation5 + $0x3724] ss:$16 sps:$4 sm:$0xff]   ;;  %v689_v24 = vcombine.low %v71_v14, %v87_v3 }
 0x397   :  { %14306 = vmatprep.subr.bf16.mxu1 %v19632_v42  ;;  %v691_v42 = vcombine.low %v103_v59, %v119_v4 }
 0x399   :  { %14266 = vmatpush2.bf16.msra.mxu0 %v19627_v58  ;;  %v690_v58 = vcombine.high %v71_v14, %v87_v3  ;;  %v685_v14 = vcombine.low %v21992_v47, %v21995_v60  ;;  %v687_v3 = vcombine.low %v21998_v41, %v22001_v48  ;;  %v19665_v41 = vld [vmem:[#allocation5 + $0x38c4] ss:$16 sps:$4 sm:$0xff]  }
 0x39a   :  { %14307 = vmatpush2.bf16.msra.mxu1 %v19630_v55  ;;  %14267 = vmatprep.subr.bf16.mxu0 %v19635_v7  ;;  %v692_v55 = vcombine.high %v103_v59, %v119_v4  ;;  %v19645_v7 = vld [vmem:[#allocation5 + $0x3520] ss:$16 sps:$4 sm:$0xff]   ;;  %v19668_v48 = vld [vmem:[#allocation5 + $0x3ac4] ss:$16 sps:$4 sm:$0xff]  }
 0x39b   :  { %14308 = vmatprep.subr.bf16.mxu1 %v19638_v37  ;;  %v19648_v37 = vld [vmem:[#allocation5 + $0x3720] ss:$16 sps:$4 sm:$0xff]   ;;  %v22049_v47 = vpack.c.bf16 %v685_v14, %v685_v14  ;;  %v22051_v60 = vpack.c.bf16 %v687_v3, %v687_v3 }
 0x39c   :  { %v19651_v59 = vld [vmem:[#allocation5 + $0x3500] ss:$16 sps:$4 sm:$0xff]  }
 0x39d   :  { %14268 = vmatpush2.bf16.msra.mxu0 %v19633_v53  ;;  %v22030_v53 = vrot.slane %v689_v24, %v21547_v54  ;;  %v19654_v4 = vld [vmem:[#allocation5 + $0x3700] ss:$16 sps:$4 sm:$0xff]   ;;  %22338 = vst [vmem:[#allocation30_spill] sm:$0xff] %v22051_v60 }
 0x39e   :  { %14309 = vmatpush2.bf16.msra.mxu1 %v19636_v6  ;;  %14269 = vmatprep.subr.bf16.mxu0 %v19641_v8  ;;  %v22033_v6 = vrot.slane %v691_v42, %v21547_v54  ;;  %v22036_v8 = vrot.slane %v690_v58, %v21547_v54 }
 0x39f   :  { %14310 = vmatprep.subr.bf16.mxu1 %v19644_v19  ;;  %v22039_v19 = vrot.slane %v692_v55, %v21547_v54 }
 0x3a0   :  { %v722_v24 = vcombine.high %v22030_v53, %v22033_v6 }
 0x3a1   :  { %14270 = vmatpush2.bf16.msra.mxu0 %v19639_v2  ;;  %v19659_v2 = vld [vmem:[#allocation5 + $0x38e4] ss:$16 sps:$4 sm:$0xff]   ;;  %v724_v42 = vcombine.high %v22036_v8, %v22039_v19 }
 0x3a2   :  { %14311 = vmatpush2.bf16.msra.mxu1 %v19642_v15  ;;  %14271 = vmatprep.subr.bf16.mxu0 %v19647_v32  ;;  %v19662_v15 = vld [vmem:[#allocation5 + $0x3ae4] ss:$16 sps:$4 sm:$0xff]   ;;  %v19657_v32 = vld [vmem:[#allocation5 + $0x38e0] ss:$16 sps:$4 sm:$0xff]   ;;  %v22053_v58 = vpack.c.bf16 %v722_v24, %v722_v24 }
 0x3a3   :  { %14312 = vmatprep.subr.bf16.mxu1 %v19650_v33  ;;  %v19660_v33 = vld [vmem:[#allocation5 + $0x3ae0] ss:$16 sps:$4 sm:$0xff]   ;;  %v22055_v55 = vpack.c.bf16 %v724_v42, %v724_v42 }
 0x3a4   :  { %22339 = vst [vmem:[#allocation31_spill] sm:$0xff] %v22053_v58  ;;  %v19669_v42 = vld [vmem:[#allocation5 + $0x38a0] ss:$16 sps:$4 sm:$0xff]  }
 0x3a5   :  { %14272 = vmatpush2.bf16.msra.mxu0 %v19645_v7  ;;  %22340 = vst [vmem:[#allocation32_spill] sm:$0xff] %v22055_v55 }
 0x3a6   :  { %14313 = vmatpush2.bf16.msra.mxu1 %v19648_v37  ;;  %14273 = vmatprep.subr.bf16.mxu0 %v19653_v34  ;;  %v19666_v34 = vld [vmem:[#allocation5 + $0x3ac0] ss:$16 sps:$4 sm:$0xff]  }
 0x3a7   :  { %14314 = vmatprep.subr.bf16.mxu1 %v19656_v38  ;;  %v19663_v38 = vld [vmem:[#allocation5 + $0x38c0] ss:$16 sps:$4 sm:$0xff]  }
 0x3a9   :  { %14274 = vmatpush2.bf16.msra.mxu0 %v19651_v59 }
 0x3aa   :  { %14315 = vmatpush2.bf16.msra.mxu1 %v19654_v4  ;;  %14325 = vmatprep.subr.bf16.mxu0 %v19659_v2  ;;  %v19671_v4 = vld [vmem:[#allocation5 + $0x38a4] ss:$16 sps:$4 sm:$0xff]  }
 0x3ab   :  { %14366 = vmatprep.subr.bf16.mxu1 %v19662_v15  ;;  %v19674_v2 = vld [vmem:[#allocation5 + $0x3aa4] ss:$16 sps:$4 sm:$0xff]  }
 0x3ac   :  { %v14031_v7 = vpop.f32.mrf.mxu0  ;;  %14276 = vmatmul.mubr.bf16.vlgmr.msra.gmra.mxu0 %v22049_v47 }
 0x3ad   :  { %v14072_v37 = vpop.f32.mrf.mxu1  ;;  %14317 = vmatmul.mubr.bf16.vlgmr.msra.gmra.mxu1 %v22051_v60  ;;  %v14032_v14 = vadd.f32 %v14031_v7, %v22022_v17  ;;  %14326 = vmatpush1.bf16.msra.mxu0 %v19657_v32  ;;  %v19680_v7 = vld [vmem:[#allocation5 + $0x3a84] ss:$16 sps:$4 sm:$0xff]  }
 0x3ae   :  { %14367 = vmatpush1.bf16.msra.mxu1 %v19660_v33  ;;  %v14033_v3 = vpop.f32.mrf.mxu0  ;;  %14327 = vmatprep.subr.bf16.mxu0 %v19665_v41 }
 0x3af   :  { %v14074_v59 = vpop.f32.mrf.mxu1  ;;  %14368 = vmatprep.subr.bf16.mxu1 %v19668_v48  ;;  %v22060_v15 = vadd.f32 %v14072_v37, %v14032_v14  ;;  %v14034_v24 = vadd.f32 %v14033_v3, %v22027_v1  ;;  %14357 = vmatprep.mubr.bf16.mxu0 %v22053_v58  ;;  %v19677_v48 = vld [vmem:[#allocation5 + $0x3884] ss:$16 sps:$4 sm:$0xff]   ;;  %v19675_v1 = vld [vmem:[#allocation5 + $0x3880] ss:$16 sps:$4 sm:$0xff]  }
 0x3b0   :  { %14398 = vmatprep.mubr.bf16.mxu1 %v22055_v55  ;;  %v14035_v60 = vpop.f32.mrf.mxu0  ;;  %v19678_v37 = vld [vmem:[#allocation5 + $0x3a80] ss:$16 sps:$4 sm:$0xff]   ;;  %v19683_v14 = vld [vmem:[#allocation5 + $0x3864] ss:$16 sps:$4 sm:$0xff]  }
 0x3b1   :  { %v14076_v17 = vpop.f32.mrf.mxu1  ;;  %v22065_v32 = vadd.f32 %v14074_v59, %v14034_v24  ;;  %14328 = vmatpush1.bf16.msra.mxu0 %v19663_v38  ;;  %v19686_v3 = vld [vmem:[#allocation5 + $0x3a64] ss:$16 sps:$4 sm:$0xff]   ;;  %v19681_v60 = vld [vmem:[#allocation5 + $0x3860] ss:$16 sps:$4 sm:$0xff]  }
 0x3b2   :  { %14369 = vmatpush1.bf16.msra.mxu1 %v19666_v34  ;;  %v14036_v33 = vpop.f32.mrf.mxu0  ;;  %14329 = vmatprep.subr.bf16.mxu0 %v19671_v4  ;;  %v19684_v59 = vld [vmem:[#allocation5 + $0x3a60] ss:$16 sps:$4 sm:$0xff]   ;;  %v19689_v38 = vld [vmem:[#allocation5 + $0x3844] ss:$16 sps:$4 sm:$0xff]  }
 0x3b3   :  { %v14077_v41 = vpop.f32.mrf.mxu1  ;;  %14370 = vmatprep.subr.bf16.mxu1 %v19674_v2  ;;  %v19692_v34 = vld [vmem:[#allocation5 + $0x3a44] ss:$16 sps:$4 sm:$0xff]   ;;  %v19687_v4 = vld [vmem:[#allocation5 + $0x3840] ss:$16 sps:$4 sm:$0xff]  }
 0x3b4   :  { %v19690_v2 = vld [vmem:[#allocation5 + $0x3a40] ss:$16 sps:$4 sm:$0xff]   ;;  %v19698_v24 = vld [vmem:[#allocation5 + $0x3a24] ss:$16 sps:$4 sm:$0xff]  }
 0x3b5   :  { %14330 = vmatpush1.bf16.msra.mxu0 %v19669_v42  ;;  %v19693_v42 = vld [vmem:[#allocation5 + $0x3820] ss:$16 sps:$4 sm:$0xff]   ;;  %v19701_v33 = vld [vmem:[#allocation5 + $0x3804] ss:$16 sps:$4 sm:$0xff]  }
 0x3b6   :  { %14371 = vmatpush1.bf16.msra.mxu1 %v19672_v62  ;;  %14331 = vmatprep.subr.bf16.mxu0 %v19677_v48  ;;  %v19695_v62 = vld [vmem:[#allocation5 + $0x3824] ss:$16 sps:$4 sm:$0xff]   ;;  %v19696_v17 = vld [vmem:[#allocation5 + $0x3a20] ss:$16 sps:$4 sm:$0xff]  }
 0x3b7   :  { %14372 = vmatprep.subr.bf16.mxu1 %v19680_v7  ;;  %v19704_v41 = vld [vmem:[#allocation5 + $0x3a04] ss:$16 sps:$4 sm:$0xff]   ;;  %v19699_v48 = vld [vmem:[#allocation5 + $0x3800] ss:$16 sps:$4 sm:$0xff]  }
 0x3b8   :  { %v19702_v7 = vld [vmem:[#allocation5 + $0x3a00] ss:$16 sps:$4 sm:$0xff]   ;;  %v19749_v55 = vld [vmem:[#allocation5 + $0x3904] ss:$16 sps:$4 sm:$0xff]  }
 0x3b9   :  { %14332 = vmatpush1.bf16.msra.mxu0 %v19675_v1  ;;  %v19707_v1 = vld [vmem:[#allocation5 + $0x39e4] ss:$16 sps:$4 sm:$0xff]  }
 0x3ba   :  { %14373 = vmatpush1.bf16.msra.mxu1 %v19678_v37  ;;  %14333 = vmatprep.subr.bf16.mxu0 %v19683_v14  ;;  %v19710_v37 = vld [vmem:[#allocation5 + $0x3be4] ss:$16 sps:$4 sm:$0xff]   ;;  %v19705_v14 = vld [vmem:[#allocation5 + $0x39e0] ss:$16 sps:$4 sm:$0xff]  }
 0x3bb   :  { %14374 = vmatprep.subr.bf16.mxu1 %v19686_v3  ;;  %v19708_v3 = vld [vmem:[#allocation5 + $0x3be0] ss:$16 sps:$4 sm:$0xff]   ;;  %v19752_v58 = vld [vmem:[#allocation5 + $0x3b04] ss:$16 sps:$4 sm:$0xff]  }
 0x3bd   :  { %14334 = vmatpush1.bf16.msra.mxu0 %v19681_v60  ;;  %v19713_v60 = vld [vmem:[#allocation5 + $0x39c4] ss:$16 sps:$4 sm:$0xff]  }
 0x3be   :  { %14375 = vmatpush1.bf16.msra.mxu1 %v19684_v59  ;;  %14335 = vmatprep.subr.bf16.mxu0 %v19689_v38  ;;  %v19716_v59 = vld [vmem:[#allocation5 + $0x3bc4] ss:$16 sps:$4 sm:$0xff]   ;;  %v19711_v38 = vld [vmem:[#allocation5 + $0x39c0] ss:$16 sps:$4 sm:$0xff]  }
 0x3bf   :  { %14376 = vmatprep.subr.bf16.mxu1 %v19692_v34  ;;  %v19714_v34 = vld [vmem:[#allocation5 + $0x3bc0] ss:$16 sps:$4 sm:$0xff]  }
 0x3c1   :  { %14336 = vmatpush1.bf16.msra.mxu0 %v19687_v4  ;;  %v19719_v4 = vld [vmem:[#allocation5 + $0x39a4] ss:$16 sps:$4 sm:$0xff]  }
 0x3c2   :  { %14377 = vmatpush1.bf16.msra.mxu1 %v19690_v2  ;;  %14337 = vmatprep.subr.bf16.mxu0 %v19695_v62  ;;  %v19722_v2 = vld [vmem:[#allocation5 + $0x3ba4] ss:$16 sps:$4 sm:$0xff]   ;;  %v19717_v62 = vld [vmem:[#allocation5 + $0x39a0] ss:$16 sps:$4 sm:$0xff]  }
 0x3c3   :  { %14378 = vmatprep.subr.bf16.mxu1 %v19698_v24  ;;  %v19720_v24 = vld [vmem:[#allocation5 + $0x3ba0] ss:$16 sps:$4 sm:$0xff]  }
 0x3c5   :  { %14338 = vmatpush1.bf16.msra.mxu0 %v19693_v42  ;;  %v19725_v42 = vld [vmem:[#allocation5 + $0x3984] ss:$16 sps:$4 sm:$0xff]  }
 0x3c6   :  { %14379 = vmatpush1.bf16.msra.mxu1 %v19696_v17  ;;  %14339 = vmatprep.subr.bf16.mxu0 %v19701_v33  ;;  %v19728_v17 = vld [vmem:[#allocation5 + $0x3b84] ss:$16 sps:$4 sm:$0xff]   ;;  %v19723_v33 = vld [vmem:[#allocation5 + $0x3980] ss:$16 sps:$4 sm:$0xff]  }
 0x3c7   :  { %14380 = vmatprep.subr.bf16.mxu1 %v19704_v41  ;;  %v19726_v41 = vld [vmem:[#allocation5 + $0x3b80] ss:$16 sps:$4 sm:$0xff]  }
 0x3c9   :  { %14340 = vmatpush1.bf16.msra.mxu0 %v19699_v48  ;;  %v19731_v48 = vld [vmem:[#allocation5 + $0x3964] ss:$16 sps:$4 sm:$0xff]  }
 0x3ca   :  { %14381 = vmatpush1.bf16.msra.mxu1 %v19702_v7  ;;  %14341 = vmatprep.subr.bf16.mxu0 %v19707_v1  ;;  %v19734_v7 = vld [vmem:[#allocation5 + $0x3b64] ss:$16 sps:$4 sm:$0xff]   ;;  %v19729_v1 = vld [vmem:[#allocation5 + $0x3960] ss:$16 sps:$4 sm:$0xff]  }
 0x3cb   :  { %14382 = vmatprep.subr.bf16.mxu1 %v19710_v37  ;;  %v19732_v37 = vld [vmem:[#allocation5 + $0x3b60] ss:$16 sps:$4 sm:$0xff]  }
 0x3cd   :  { %14342 = vmatpush2.bf16.msra.mxu0 %v19705_v14  ;;  %v19737_v14 = vld [vmem:[#allocation5 + $0x3944] ss:$16 sps:$4 sm:$0xff]  }
 0x3ce   :  { %14383 = vmatpush2.bf16.msra.mxu1 %v19708_v3  ;;  %14343 = vmatprep.subr.bf16.mxu0 %v19713_v60  ;;  %v19740_v3 = vld [vmem:[#allocation5 + $0x3b44] ss:$16 sps:$4 sm:$0xff]   ;;  %v72_v60 = vld [vmem:[#allocation2 + $0x78] sm:$0xff] }
 0x3cf   :  { %14384 = vmatprep.subr.bf16.mxu1 %v19716_v59  ;;  %v88_v59 = vld [vmem:[#allocation2 + $0xf8] sm:$0xff] }
 0x3d1   :  { %14344 = vmatpush2.bf16.msra.mxu0 %v19711_v38  ;;  %v104_v38 = vld [vmem:[#allocation2 + $0x178] sm:$0xff] }
 0x3d2   :  { %14385 = vmatpush2.bf16.msra.mxu1 %v19714_v34  ;;  %14345 = vmatprep.subr.bf16.mxu0 %v19719_v4  ;;  %v120_v34 = vld [vmem:[#allocation2 + $0x1f8] sm:$0xff]  ;;  %v19735_v4 = vld [vmem:[#allocation5 + $0x3940] ss:$16 sps:$4 sm:$0xff]  }
 0x3d3   :  { %14386 = vmatprep.subr.bf16.mxu1 %v19722_v2  ;;  %v19738_v2 = vld [vmem:[#allocation5 + $0x3b40] ss:$16 sps:$4 sm:$0xff]  }
 0x3d5   :  { %14346 = vmatpush2.bf16.msra.mxu0 %v19717_v62  ;;  %v19743_v62 = vld [vmem:[#allocation5 + $0x3924] ss:$16 sps:$4 sm:$0xff]  }
 0x3d6   :  { %14387 = vmatpush2.bf16.msra.mxu1 %v19720_v24  ;;  %14347 = vmatprep.subr.bf16.mxu0 %v19725_v42  ;;  %v19746_v24 = vld [vmem:[#allocation5 + $0x3b24] ss:$16 sps:$4 sm:$0xff]   ;;  %v725_v42 = vcombine.low %v72_v60, %v88_v59 }
 0x3d7   :  { %14388 = vmatprep.subr.bf16.mxu1 %v19728_v17  ;;  %v727_v17 = vcombine.low %v104_v38, %v120_v34 }
 0x3d9   :  { %14348 = vmatpush2.bf16.msra.mxu0 %v19723_v33  ;;  %v726_v33 = vcombine.high %v72_v60, %v88_v59  ;;  %v721_v60 = vcombine.low %v22030_v53, %v22033_v6  ;;  %v723_v59 = vcombine.low %v22036_v8, %v22039_v19  ;;  %v19761_v8 = vld [vmem:[#allocation5 + $0x3cc4] ss:$16 sps:$4 sm:$0xff]  }
 0x3da   :  { %14389 = vmatpush2.bf16.msra.mxu1 %v19726_v41  ;;  %14349 = vmatprep.subr.bf16.mxu0 %v19731_v48  ;;  %v728_v41 = vcombine.high %v104_v38, %v120_v34  ;;  %v19741_v48 = vld [vmem:[#allocation5 + $0x3920] ss:$16 sps:$4 sm:$0xff]   ;;  %v19764_v19 = vld [vmem:[#allocation5 + $0x3ec4] ss:$16 sps:$4 sm:$0xff]  }
 0x3db   :  { %14390 = vmatprep.subr.bf16.mxu1 %v19734_v7  ;;  %v19744_v7 = vld [vmem:[#allocation5 + $0x3b20] ss:$16 sps:$4 sm:$0xff]   ;;  %v22087_v53 = vpack.c.bf16 %v721_v60, %v721_v60  ;;  %v22089_v6 = vpack.c.bf16 %v723_v59, %v723_v59 }
 0x3dc   :  { %v19747_v38 = vld [vmem:[#allocation5 + $0x3900] ss:$16 sps:$4 sm:$0xff]  }
 0x3dd   :  { %14350 = vmatpush2.bf16.msra.mxu0 %v19729_v1  ;;  %v22068_v1 = vrot.slane %v725_v42, %v21547_v54  ;;  %v19750_v34 = vld [vmem:[#allocation5 + $0x3b00] ss:$16 sps:$4 sm:$0xff]   ;;  %22341 = vst [vmem:[#allocation33_spill] sm:$0xff] %v22089_v6 }
 0x3de   :  { %14391 = vmatpush2.bf16.msra.mxu1 %v19732_v37  ;;  %14351 = vmatprep.subr.bf16.mxu0 %v19737_v14  ;;  %v22071_v37 = vrot.slane %v727_v17, %v21547_v54  ;;  %v22074_v14 = vrot.slane %v726_v33, %v21547_v54 }
 0x3df   :  { %14392 = vmatprep.subr.bf16.mxu1 %v19740_v3  ;;  %v22077_v3 = vrot.slane %v728_v41, %v21547_v54 }
 0x3e0   :  { %v758_v54 = vcombine.high %v22068_v1, %v22071_v37 }
 0x3e1   :  { %14352 = vmatpush2.bf16.msra.mxu0 %v19735_v4  ;;  %v19755_v4 = vld [vmem:[#allocation5 + $0x3ce4] ss:$16 sps:$4 sm:$0xff]   ;;  %v760_v42 = vcombine.high %v22074_v14, %v22077_v3 }
 0x3e2   :  { %14393 = vmatpush2.bf16.msra.mxu1 %v19738_v2  ;;  %14353 = vmatprep.subr.bf16.mxu0 %v19743_v62  ;;  %v19758_v2 = vld [vmem:[#allocation5 + $0x3ee4] ss:$16 sps:$4 sm:$0xff]   ;;  %v19753_v62 = vld [vmem:[#allocation5 + $0x3ce0] ss:$16 sps:$4 sm:$0xff]   ;;  %v22091_v17 = vpack.c.bf16 %v758_v54, %v758_v54 }
 0x3e3   :  { %14394 = vmatprep.subr.bf16.mxu1 %v19746_v24  ;;  %v19756_v24 = vld [vmem:[#allocation5 + $0x3ee0] ss:$16 sps:$4 sm:$0xff]   ;;  %v22093_v33 = vpack.c.bf16 %v760_v42, %v760_v42 }
 0x3e4   :  { %v19765_v54 = vld [vmem:[#allocation5 + $0x3ca0] ss:$16 sps:$4 sm:$0xff]  }
 0x3e5   :  { %14354 = vmatpush2.bf16.msra.mxu0 %v19741_v48  ;;  %v19768_v42 = vld [vmem:[#allocation5 + $0x3ea0] ss:$16 sps:$4 sm:$0xff]  }
 0x3e6   :  { %14395 = vmatpush2.bf16.msra.mxu1 %v19744_v7  ;;  %14355 = vmatprep.subr.bf16.mxu0 %v19749_v55  ;;  %v19762_v55 = vld [vmem:[#allocation5 + $0x3ec0] ss:$16 sps:$4 sm:$0xff]  }
 0x3e7   :  { %14396 = vmatprep.subr.bf16.mxu1 %v19752_v58  ;;  %v19759_v58 = vld [vmem:[#allocation5 + $0x3cc0] ss:$16 sps:$4 sm:$0xff]  }
 0x3e9   :  { %14356 = vmatpush2.bf16.msra.mxu0 %v19747_v38  ;;  %v19767_v38 = vld [vmem:[#allocation5 + $0x3ca4] ss:$16 sps:$4 sm:$0xff]  }
 0x3ea   :  { %14397 = vmatpush2.bf16.msra.mxu1 %v19750_v34  ;;  %14407 = vmatprep.subr.bf16.mxu0 %v19755_v4  ;;  %v19770_v34 = vld [vmem:[#allocation5 + $0x3ea4] ss:$16 sps:$4 sm:$0xff]  }
 0x3eb   :  { %14448 = vmatprep.subr.bf16.mxu1 %v19758_v2 }
 0x3ec   :  { %v14113_v41 = vpop.f32.mrf.mxu0  ;;  %14358 = vmatmul.mubr.bf16.vlgmr.msra.gmra.mxu0 %v22087_v53 }
 0x3ed   :  { %v14154_v48 = vpop.f32.mrf.mxu1  ;;  %14399 = vmatmul.mubr.bf16.vlgmr.msra.gmra.mxu1 %v22089_v6  ;;  %v14114_v7 = vadd.f32 %v14113_v41, %v22060_v15  ;;  %14408 = vmatpush1.bf16.msra.mxu0 %v19753_v62  ;;  %v19776_v41 = vld [vmem:[#allocation5 + $0x3e84] ss:$16 sps:$4 sm:$0xff]  }
 0x3ee   :  { %14449 = vmatpush1.bf16.msra.mxu1 %v19756_v24  ;;  %v14115_v60 = vpop.f32.mrf.mxu0  ;;  %14409 = vmatprep.subr.bf16.mxu0 %v19761_v8 }
 0x3ef   :  { %v14156_v59 = vpop.f32.mrf.mxu1  ;;  %14450 = vmatprep.subr.bf16.mxu1 %v19764_v19  ;;  %v22098_v4 = vadd.f32 %v14154_v48, %v14114_v7  ;;  %v14116_v2 = vadd.f32 %v14115_v60, %v22065_v32  ;;  %14439 = vmatprep.mubr.bf16.mxu0 %v22091_v17  ;;  %v19773_v19 = vld [vmem:[#allocation5 + $0x3c84] ss:$16 sps:$4 sm:$0xff]   ;;  %v19771_v32 = vld [vmem:[#allocation5 + $0x3c80] ss:$16 sps:$4 sm:$0xff]  }
 0x3f0   :  { %14480 = vmatprep.mubr.bf16.mxu1 %v22093_v33  ;;  %v14117_v6 = vpop.f32.mrf.mxu0  ;;  %v19774_v48 = vld [vmem:[#allocation5 + $0x3e80] ss:$16 sps:$4 sm:$0xff]   ;;  %v19779_v7 = vld [vmem:[#allocation5 + $0x3c64] ss:$16 sps:$4 sm:$0xff]  }
 0x3f1   :  { %v14158_v15 = vpop.f32.mrf.mxu1  ;;  %v22103_v62 = vadd.f32 %v14156_v59, %v14116_v2  ;;  %14410 = vmatpush1.bf16.msra.mxu0 %v19759_v58  ;;  %v19782_v60 = vld [vmem:[#allocation5 + $0x3e64] ss:$16 sps:$4 sm:$0xff]   ;;  %v19777_v6 = vld [vmem:[#allocation5 + $0x3c60] ss:$16 sps:$4 sm:$0xff]  }
 0x3f2   :  { %14451 = vmatpush1.bf16.msra.mxu1 %v19762_v55  ;;  %v14118_v24 = vpop.f32.mrf.mxu0  ;;  %14411 = vmatprep.subr.bf16.mxu0 %v19767_v38  ;;  %v19780_v59 = vld [vmem:[#allocation5 + $0x3e60] ss:$16 sps:$4 sm:$0xff]   ;;  %v19785_v58 = vld [vmem:[#allocation5 + $0x3c44] ss:$16 sps:$4 sm:$0xff]  }
 0x3f3   :  { %v14159_v8 = vpop.f32.mrf.mxu1  ;;  %14452 = vmatprep.subr.bf16.mxu1 %v19770_v34  ;;  %v19788_v55 = vld [vmem:[#allocation5 + $0x3e44] ss:$16 sps:$4 sm:$0xff]   ;;  %v19783_v38 = vld [vmem:[#allocation5 + $0x3c40] ss:$16 sps:$4 sm:$0xff]  }
 0x3f4   :  { %v19786_v34 = vld [vmem:[#allocation5 + $0x3e40] ss:$16 sps:$4 sm:$0xff]   ;;  %v19791_v2 = vld [vmem:[#allocation5 + $0x3c24] ss:$16 sps:$4 sm:$0xff]  }
 0x3f5   :  { %14412 = vmatpush1.bf16.msra.mxu0 %v19765_v54  ;;  %v19794_v54 = vld [vmem:[#allocation5 + $0x3e24] ss:$16 sps:$4 sm:$0xff]   ;;  %v19792_v15 = vld [vmem:[#allocation5 + $0x3e20] ss:$16 sps:$4 sm:$0xff]  }
 0x3f6   :  { %14453 = vmatpush1.bf16.msra.mxu1 %v19768_v42  ;;  %14413 = vmatprep.subr.bf16.mxu0 %v19773_v19  ;;  %v19789_v42 = vld [vmem:[#allocation5 + $0x3c20] ss:$16 sps:$4 sm:$0xff]   ;;  %v19797_v24 = vld [vmem:[#allocation5 + $0x3c04] ss:$16 sps:$4 sm:$0xff]  }
 0x3f7   :  { %14454 = vmatprep.subr.bf16.mxu1 %v19776_v41  ;;  %v19800_v8 = vld [vmem:[#allocation5 + $0x3e04] ss:$16 sps:$4 sm:$0xff]   ;;  %v19795_v19 = vld [vmem:[#allocation5 + $0x3c00] ss:$16 sps:$4 sm:$0xff]  }
 0x3f8   :  { %v19798_v41 = vld [vmem:[#allocation5 + $0x3e00] ss:$16 sps:$4 sm:$0xff]  }
 0x3f9   :  { %14414 = vmatpush1.bf16.msra.mxu0 %v19771_v32  ;;  %v19803_v32 = vld [vmem:[#allocation5 + $0x3de4] ss:$16 sps:$4 sm:$0xff]  }
 0x3fa   :  { %14455 = vmatpush1.bf16.msra.mxu1 %v19774_v48  ;;  %14415 = vmatprep.subr.bf16.mxu0 %v19779_v7  ;;  %v19806_v48 = vld [vmem:[#allocation5 + $0x3fe4] ss:$16 sps:$4 sm:$0xff]   ;;  %v19801_v7 = vld [vmem:[#allocation5 + $0x3de0] ss:$16 sps:$4 sm:$0xff]  }
 0x3fb   :  { %14456 = vmatprep.subr.bf16.mxu1 %v19782_v60  ;;  %v19804_v60 = vld [vmem:[#allocation5 + $0x3fe0] ss:$16 sps:$4 sm:$0xff]  }
 0x3fd   :  { %14416 = vmatpush1.bf16.msra.mxu0 %v19777_v6  ;;  %v19809_v6 = vld [vmem:[#allocation5 + $0x3dc4] ss:$16 sps:$4 sm:$0xff]  }
 0x3fe   :  { %14457 = vmatpush1.bf16.msra.mxu1 %v19780_v59  ;;  %14417 = vmatprep.subr.bf16.mxu0 %v19785_v58  ;;  %v19812_v59 = vld [vmem:[#allocation5 + $0x3fc4] ss:$16 sps:$4 sm:$0xff]   ;;  %v19807_v58 = vld [vmem:[#allocation5 + $0x3dc0] ss:$16 sps:$4 sm:$0xff]  }
 0x3ff   :  { %14458 = vmatprep.subr.bf16.mxu1 %v19788_v55  ;;  %v19810_v55 = vld [vmem:[#allocation5 + $0x3fc0] ss:$16 sps:$4 sm:$0xff]  }
 0x401   :  { %14418 = vmatpush1.bf16.msra.mxu0 %v19783_v38  ;;  %v19815_v38 = vld [vmem:[#allocation5 + $0x3da4] ss:$16 sps:$4 sm:$0xff]  }
 0x402   :  { %14459 = vmatpush1.bf16.msra.mxu1 %v19786_v34  ;;  %14419 = vmatprep.subr.bf16.mxu0 %v19791_v2  ;;  %v19818_v34 = vld [vmem:[#allocation5 + $0x3fa4] ss:$16 sps:$4 sm:$0xff]   ;;  %v19813_v2 = vld [vmem:[#allocation5 + $0x3da0] ss:$16 sps:$4 sm:$0xff]  }
 0x403   :  { %14460 = vmatprep.subr.bf16.mxu1 %v19794_v54  ;;  %v19816_v54 = vld [vmem:[#allocation5 + $0x3fa0] ss:$16 sps:$4 sm:$0xff]  }
 0x405   :  { %14420 = vmatpush1.bf16.msra.mxu0 %v19789_v42  ;;  %v19821_v42 = vld [vmem:[#allocation5 + $0x3d84] ss:$16 sps:$4 sm:$0xff]  }
 0x406   :  { %14461 = vmatpush1.bf16.msra.mxu1 %v19792_v15  ;;  %14421 = vmatprep.subr.bf16.mxu0 %v19797_v24  ;;  %v19824_v15 = vld [vmem:[#allocation5 + $0x3f84] ss:$16 sps:$4 sm:$0xff]   ;;  %v19819_v24 = vld [vmem:[#allocation5 + $0x3d80] ss:$16 sps:$4 sm:$0xff]  }
 0x407   :  { %14462 = vmatprep.subr.bf16.mxu1 %v19800_v8  ;;  %v19822_v8 = vld [vmem:[#allocation5 + $0x3f80] ss:$16 sps:$4 sm:$0xff]  }
 0x409   :  { %14422 = vmatpush1.bf16.msra.mxu0 %v19795_v19  ;;  %v19827_v19 = vld [vmem:[#allocation5 + $0x3d64] ss:$16 sps:$4 sm:$0xff]  }
 0x40a   :  { %14463 = vmatpush1.bf16.msra.mxu1 %v19798_v41  ;;  %14423 = vmatprep.subr.bf16.mxu0 %v19803_v32  ;;  %v19830_v41 = vld [vmem:[#allocation5 + $0x3f64] ss:$16 sps:$4 sm:$0xff]   ;;  %v19825_v32 = vld [vmem:[#allocation5 + $0x3d60] ss:$16 sps:$4 sm:$0xff]  }
 0x40b   :  { %14464 = vmatprep.subr.bf16.mxu1 %v19806_v48  ;;  %v19828_v48 = vld [vmem:[#allocation5 + $0x3f60] ss:$16 sps:$4 sm:$0xff]  }
 0x40d   :  { %14424 = vmatpush2.bf16.msra.mxu0 %v19801_v7  ;;  %v19833_v7 = vld [vmem:[#allocation5 + $0x3d44] ss:$16 sps:$4 sm:$0xff]  }
 0x40e   :  { %14465 = vmatpush2.bf16.msra.mxu1 %v19804_v60  ;;  %14425 = vmatprep.subr.bf16.mxu0 %v19809_v6  ;;  %v19836_v60 = vld [vmem:[#allocation5 + $0x3f44] ss:$16 sps:$4 sm:$0xff]   ;;  %v19831_v6 = vld [vmem:[#allocation5 + $0x3d40] ss:$16 sps:$4 sm:$0xff]  }
 0x40f   :  { %14466 = vmatprep.subr.bf16.mxu1 %v19812_v59  ;;  %v19834_v59 = vld [vmem:[#allocation5 + $0x3f40] ss:$16 sps:$4 sm:$0xff]  }
 0x411   :  { %14426 = vmatpush2.bf16.msra.mxu0 %v19807_v58  ;;  %v19839_v58 = vld [vmem:[#allocation5 + $0x3d24] ss:$16 sps:$4 sm:$0xff]  }
 0x412   :  { %14467 = vmatpush2.bf16.msra.mxu1 %v19810_v55  ;;  %14427 = vmatprep.subr.bf16.mxu0 %v19815_v38  ;;  %v19842_v55 = vld [vmem:[#allocation5 + $0x3f24] ss:$16 sps:$4 sm:$0xff]   ;;  %v19837_v38 = vld [vmem:[#allocation5 + $0x3d20] ss:$16 sps:$4 sm:$0xff]  }
 0x413   :  { %14468 = vmatprep.subr.bf16.mxu1 %v19818_v34  ;;  %v19840_v34 = vld [vmem:[#allocation5 + $0x3f20] ss:$16 sps:$4 sm:$0xff]  }
 0x415   :  { %14428 = vmatpush2.bf16.msra.mxu0 %v19813_v2  ;;  %v19845_v2 = vld [vmem:[#allocation5 + $0x3d04] ss:$16 sps:$4 sm:$0xff]  }
 0x416   :  { %14469 = vmatpush2.bf16.msra.mxu1 %v19816_v54  ;;  %14429 = vmatprep.subr.bf16.mxu0 %v19821_v42  ;;  %v19848_v54 = vld [vmem:[#allocation5 + $0x3f04] ss:$16 sps:$4 sm:$0xff]   ;;  %v757_v42 = vcombine.low %v22068_v1, %v22071_v37  ;;  %v19857_v1 = vld [vmem:[#allocation5 + $0xcc] ss:$16 sps:$4 sm:$0xff]  }
 0x417   :  { %14470 = vmatprep.subr.bf16.mxu1 %v19824_v15  ;;  %v759_v15 = vcombine.low %v22074_v14, %v22077_v3  ;;  %v19860_v37 = vld [vmem:[#allocation5 + $0x2cc] ss:$16 sps:$4 sm:$0xff]   ;;  %v19855_v14 = vld [vmem:[#allocation5 + $0xc8] ss:$16 sps:$4 sm:$0xff]  }
 0x418   :  { %v19858_v3 = vld [vmem:[#allocation5 + $0x2c8] ss:$16 sps:$4 sm:$0xff]  }
 0x419   :  { %14430 = vmatpush2.bf16.msra.mxu0 %v19819_v24  ;;  %v19843_v24 = vld [vmem:[#allocation5 + $0x3d00] ss:$16 sps:$4 sm:$0xff]  }
 0x41a   :  { %14471 = vmatpush2.bf16.msra.mxu1 %v19822_v8  ;;  %14431 = vmatprep.subr.bf16.mxu0 %v19827_v19  ;;  %v19846_v8 = vld [vmem:[#allocation5 + $0x3f00] ss:$16 sps:$4 sm:$0xff]   ;;  %v19851_v19 = vld [vmem:[#allocation5 + $0xec] ss:$16 sps:$4 sm:$0xff]  }
 0x41b   :  { %14472 = vmatprep.subr.bf16.mxu1 %v19830_v41  ;;  %v19854_v41 = vld [vmem:[#allocation5 + $0x2ec] ss:$16 sps:$4 sm:$0xff]  }
 0x41d   :  { %14432 = vmatpush2.bf16.msra.mxu0 %v19825_v32  ;;  %v19849_v32 = vld [vmem:[#allocation5 + $0xe8] ss:$16 sps:$4 sm:$0xff]  }
 0x41e   :  { %14473 = vmatpush2.bf16.msra.mxu1 %v19828_v48  ;;  %14433 = vmatprep.subr.bf16.mxu0 %v19833_v7  ;;  %v19852_v48 = vld [vmem:[#allocation5 + $0x2e8] ss:$16 sps:$4 sm:$0xff]   ;;  %v22109_v7 = vpack.c.bf16 %v757_v42, %v757_v42 }
 0x41f   :  { %14474 = vmatprep.subr.bf16.mxu1 %v19836_v60  ;;  %v22111_v60 = vpack.c.bf16 %v759_v15, %v759_v15  ;;  %v19861_v15 = vld [vmem:[#allocation5 + $0xa8] ss:$16 sps:$4 sm:$0xff]  }
 0x421   :  { %14434 = vmatpush2.bf16.msra.mxu0 %v19831_v6 }
 0x422   :  { %14475 = vmatpush2.bf16.msra.mxu1 %v19834_v59  ;;  %14435 = vmatprep.subr.bf16.mxu0 %v19839_v58 }
 0x423   :  { %14476 = vmatprep.subr.bf16.mxu1 %v19842_v55 }
 0x425   :  { %14436 = vmatpush2.bf16.msra.mxu0 %v19837_v38 }
 0x426   :  { %14477 = vmatpush2.bf16.msra.mxu1 %v19840_v34  ;;  %14437 = vmatprep.subr.bf16.mxu0 %v19845_v2  ;;  %v19863_v34 = vld [vmem:[#allocation5 + $0xac] ss:$16 sps:$4 sm:$0xff]  }
 0x427   :  { %14478 = vmatprep.subr.bf16.mxu1 %v19848_v54  ;;  %v19866_v2 = vld [vmem:[#allocation5 + $0x2ac] ss:$16 sps:$4 sm:$0xff]  }
 0x429   :  { %14438 = vmatpush2.bf16.msra.mxu0 %v19843_v24  ;;  %v19864_v24 = vld [vmem:[#allocation5 + $0x2a8] ss:$16 sps:$4 sm:$0xff]  }
 0x42a   :  { %14479 = vmatpush2.bf16.msra.mxu1 %v19846_v8  ;;  %14489 = vmatprep.subr.bf16.mxu0 %v19851_v19 }
 0x42b   :  { %14530 = vmatprep.subr.bf16.mxu1 %v19854_v41 }
 0x42c   :  { %v14195_v6 = vpop.f32.mrf.mxu0  ;;  %14440 = vmatmul.mubr.bf16.vlgmr.msra.gmra.mxu0 %v22109_v7 }
 0x42d   :  { %v14236_v59 = vpop.f32.mrf.mxu1  ;;  %14481 = vmatmul.mubr.bf16.vlgmr.msra.gmra.mxu1 %v22111_v60  ;;  %v14196_v58 = vadd.f32 %v14195_v6, %v22098_v4  ;;  %14490 = vmatpush1.bf16.msra.mxu0 %v19849_v32  ;;  %v19873_v6 = vld [vmem:[#allocation5 + $0x68] ss:$16 sps:$4 sm:$0xff]  }
 0x42e   :  { %14531 = vmatpush1.bf16.msra.mxu1 %v19852_v48  ;;  %v14197_v55 = vpop.f32.mrf.mxu0  ;;  %14491 = vmatprep.subr.bf16.mxu0 %v19857_v1  ;;  %v19869_v48 = vld [vmem:[#allocation5 + $0x8c] ss:$16 sps:$4 sm:$0xff]  }
 0x42f   :  { %v14238_v38 = vpop.f32.mrf.mxu1  ;;  %14532 = vmatprep.subr.bf16.mxu1 %v19860_v37  ;;  %v22116_v54 = vadd.f32 %v14236_v59, %v14196_v58  ;;  %v14198_v42 = vadd.f32 %v14197_v55, %v22103_v62  ;;  %14521 = vmatprep.mubr.bf16.mxu0 %v21553_v10  ;;  %v19872_v1 = vld [vmem:[#allocation5 + $0x28c] ss:$16 sps:$4 sm:$0xff]   ;;  %v19867_v62 = vld [vmem:[#allocation5 + $0x88] ss:$16 sps:$4 sm:$0xff]  }
 0x430   :  { %14562 = vmatprep.mubr.bf16.mxu1 %v21555_v13  ;;  %v14199_v8 = vpop.f32.mrf.mxu0  ;;  %v19870_v37 = vld [vmem:[#allocation5 + $0x288] ss:$16 sps:$4 sm:$0xff]   ;;  %v19875_v10 = vld [vmem:[#allocation5 + $0x6c] ss:$16 sps:$4 sm:$0xff]  }
 0x431   :  { %v14240_v4 = vpop.f32.mrf.mxu1  ;;  %v22121_v19 = vadd.f32 %v14238_v38, %v14198_v42  ;;  %14492 = vmatpush1.bf16.msra.mxu0 %v19855_v14  ;;  %v19878_v13 = vld [vmem:[#allocation5 + $0x26c] ss:$16 sps:$4 sm:$0xff]   ;;  %v19876_v59 = vld [vmem:[#allocation5 + $0x268] ss:$16 sps:$4 sm:$0xff]  }
 0x432   :  { %14533 = vmatpush1.bf16.msra.mxu1 %v19858_v3  ;;  %v14200_v41 = vpop.f32.mrf.mxu0  ;;  %14493 = vmatprep.subr.bf16.mxu0 %v19863_v34  ;;  %v19881_v14 = vld [vmem:[#allocation5 + $0x4c] ss:$16 sps:$4 sm:$0xff]   ;;  %v19879_v58 = vld [vmem:[#allocation5 + $0x48] ss:$16 sps:$4 sm:$0xff]  }
 0x433   :  { %v14241_v32 = vpop.f32.mrf.mxu1  ;;  %14534 = vmatprep.subr.bf16.mxu1 %v19866_v2  ;;  %v19884_v3 = vld [vmem:[#allocation5 + $0x24c] ss:$16 sps:$4 sm:$0xff]   ;;  %v19882_v55 = vld [vmem:[#allocation5 + $0x248] ss:$16 sps:$4 sm:$0xff]  }
 0x434   :  { %v19887_v38 = vld [vmem:[#allocation5 + $0x2c] ss:$16 sps:$4 sm:$0xff]   ;;  %v19885_v2 = vld [vmem:[#allocation5 + $0x28] ss:$16 sps:$4 sm:$0xff]  }
 0x435   :  { %14494 = vmatpush1.bf16.msra.mxu0 %v19861_v15  ;;  %v19890_v34 = vld [vmem:[#allocation5 + $0x22c] ss:$16 sps:$4 sm:$0xff]   ;;  %v19888_v42 = vld [vmem:[#allocation5 + $0x228] ss:$16 sps:$4 sm:$0xff]  }
 0x436   :  { %14535 = vmatpush1.bf16.msra.mxu1 %v19864_v24  ;;  %14495 = vmatprep.subr.bf16.mxu0 %v19869_v48  ;;  %v19893_v15 = vld [vmem:[#allocation5 + $0xc] ss:$16 sps:$4 sm:$0xff]   ;;  %v19891_v8 = vld [vmem:[#allocation5 + $0x8] ss:$16 sps:$4 sm:$0xff]  }
 0x437   :  { %14536 = vmatprep.subr.bf16.mxu1 %v19872_v1  ;;  %v19896_v24 = vld [vmem:[#allocation5 + $0x20c] ss:$16 sps:$4 sm:$0xff]   ;;  %v19894_v4 = vld [vmem:[#allocation5 + $0x208] ss:$16 sps:$4 sm:$0xff]  }
 0x438   :  { %v19899_v41 = vld [vmem:[#allocation5 + $0x1ec] ss:$16 sps:$4 sm:$0xff]   ;;  %v19897_v48 = vld [vmem:[#allocation5 + $0x1e8] ss:$16 sps:$4 sm:$0xff]  }
 0x439   :  { %14496 = vmatpush1.bf16.msra.mxu0 %v19867_v62  ;;  %v19902_v32 = vld [vmem:[#allocation5 + $0x3ec] ss:$16 sps:$4 sm:$0xff]   ;;  %v19900_v1 = vld [vmem:[#allocation5 + $0x3e8] ss:$16 sps:$4 sm:$0xff]  }
 0x43a   :  { %14537 = vmatpush1.bf16.msra.mxu1 %v19870_v37  ;;  %14497 = vmatprep.subr.bf16.mxu0 %v19875_v10  ;;  %v19905_v62 = vld [vmem:[#allocation5 + $0x1cc] ss:$16 sps:$4 sm:$0xff]   ;;  %v19903_v10 = vld [vmem:[#allocation5 + $0x1c8] ss:$16 sps:$4 sm:$0xff]  }
 0x43b   :  { %14538 = vmatprep.subr.bf16.mxu1 %v19878_v13  ;;  %v19908_v37 = vld [vmem:[#allocation5 + $0x3cc] ss:$16 sps:$4 sm:$0xff]   ;;  %v19906_v13 = vld [vmem:[#allocation5 + $0x3c8] ss:$16 sps:$4 sm:$0xff]  }
 0x43d   :  { %14498 = vmatpush1.bf16.msra.mxu0 %v19873_v6  ;;  %v19911_v6 = vld [vmem:[#allocation5 + $0x1ac] ss:$16 sps:$4 sm:$0xff]  }
 0x43e   :  { %14539 = vmatpush1.bf16.msra.mxu1 %v19876_v59  ;;  %14499 = vmatprep.subr.bf16.mxu0 %v19881_v14  ;;  %v19914_v59 = vld [vmem:[#allocation5 + $0x3ac] ss:$16 sps:$4 sm:$0xff]   ;;  %v19909_v14 = vld [vmem:[#allocation5 + $0x1a8] ss:$16 sps:$4 sm:$0xff]  }
 0x43f   :  { %14540 = vmatprep.subr.bf16.mxu1 %v19884_v3  ;;  %v19912_v3 = vld [vmem:[#allocation5 + $0x3a8] ss:$16 sps:$4 sm:$0xff]  }
 0x441   :  { %14500 = vmatpush1.bf16.msra.mxu0 %v19879_v58  ;;  %v19917_v58 = vld [vmem:[#allocation5 + $0x18c] ss:$16 sps:$4 sm:$0xff]  }
 0x442   :  { %14541 = vmatpush1.bf16.msra.mxu1 %v19882_v55  ;;  %14501 = vmatprep.subr.bf16.mxu0 %v19887_v38  ;;  %v19920_v55 = vld [vmem:[#allocation5 + $0x38c] ss:$16 sps:$4 sm:$0xff]   ;;  %v19915_v38 = vld [vmem:[#allocation5 + $0x188] ss:$16 sps:$4 sm:$0xff]  }
 0x443   :  { %14542 = vmatprep.subr.bf16.mxu1 %v19890_v34  ;;  %v19918_v34 = vld [vmem:[#allocation5 + $0x388] ss:$16 sps:$4 sm:$0xff]  }
 0x445   :  { %14502 = vmatpush1.bf16.msra.mxu0 %v19885_v2  ;;  %v19923_v2 = vld [vmem:[#allocation5 + $0x16c] ss:$16 sps:$4 sm:$0xff]  }
 0x446   :  { %14543 = vmatpush1.bf16.msra.mxu1 %v19888_v42  ;;  %14503 = vmatprep.subr.bf16.mxu0 %v19893_v15  ;;  %v19926_v42 = vld [vmem:[#allocation5 + $0x36c] ss:$16 sps:$4 sm:$0xff]   ;;  %v19921_v15 = vld [vmem:[#allocation5 + $0x168] ss:$16 sps:$4 sm:$0xff]  }
 0x447   :  { %14544 = vmatprep.subr.bf16.mxu1 %v19896_v24  ;;  %v19924_v24 = vld [vmem:[#allocation5 + $0x368] ss:$16 sps:$4 sm:$0xff]  }
 0x449   :  { %14504 = vmatpush1.bf16.msra.mxu0 %v19891_v8  ;;  %v19929_v8 = vld [vmem:[#allocation5 + $0x14c] ss:$16 sps:$4 sm:$0xff]  }
 0x44a   :  { %14545 = vmatpush1.bf16.msra.mxu1 %v19894_v4  ;;  %14505 = vmatprep.subr.bf16.mxu0 %v19899_v41  ;;  %v19932_v4 = vld [vmem:[#allocation5 + $0x34c] ss:$16 sps:$4 sm:$0xff]   ;;  %v19927_v41 = vld [vmem:[#allocation5 + $0x148] ss:$16 sps:$4 sm:$0xff]  }
 0x44b   :  { %14546 = vmatprep.subr.bf16.mxu1 %v19902_v32  ;;  %v19930_v32 = vld [vmem:[#allocation5 + $0x348] ss:$16 sps:$4 sm:$0xff]  }
 0x44d   :  { %14506 = vmatpush2.bf16.msra.mxu0 %v19897_v48  ;;  %v19935_v48 = vld [vmem:[#allocation5 + $0x12c] ss:$16 sps:$4 sm:$0xff]  }
 0x44e   :  { %14547 = vmatpush2.bf16.msra.mxu1 %v19900_v1  ;;  %14507 = vmatprep.subr.bf16.mxu0 %v19905_v62  ;;  %v19938_v1 = vld [vmem:[#allocation5 + $0x32c] ss:$16 sps:$4 sm:$0xff]   ;;  %v19933_v62 = vld [vmem:[#allocation5 + $0x128] ss:$16 sps:$4 sm:$0xff]  }
 0x44f   :  { %14548 = vmatprep.subr.bf16.mxu1 %v19908_v37  ;;  %v19936_v37 = vld [vmem:[#allocation5 + $0x328] ss:$16 sps:$4 sm:$0xff]  }
 0x451   :  { %14508 = vmatpush2.bf16.msra.mxu0 %v19903_v10  ;;  %v19941_v10 = vld [vmem:[#allocation5 + $0x10c] ss:$16 sps:$4 sm:$0xff]  }
 0x452   :  { %14549 = vmatpush2.bf16.msra.mxu1 %v19906_v13  ;;  %14509 = vmatprep.subr.bf16.mxu0 %v19911_v6  ;;  %v19944_v13 = vld [vmem:[#allocation5 + $0x30c] ss:$16 sps:$4 sm:$0xff]   ;;  %v19939_v6 = vld [vmem:[#allocation5 + $0x108] ss:$16 sps:$4 sm:$0xff]  }
 0x453   :  { %14550 = vmatprep.subr.bf16.mxu1 %v19914_v59  ;;  %v19942_v59 = vld [vmem:[#allocation5 + $0x308] ss:$16 sps:$4 sm:$0xff]  }
 0x455   :  { %14510 = vmatpush2.bf16.msra.mxu0 %v19909_v14  ;;  %v19947_v14 = vld [vmem:[#allocation5 + $0x4ec] ss:$16 sps:$4 sm:$0xff]  }
 0x456   :  { %14551 = vmatpush2.bf16.msra.mxu1 %v19912_v3  ;;  %14511 = vmatprep.subr.bf16.mxu0 %v19917_v58  ;;  %v19950_v3 = vld [vmem:[#allocation5 + $0x6ec] ss:$16 sps:$4 sm:$0xff]   ;;  %v19945_v58 = vld [vmem:[#allocation5 + $0x4e8] ss:$16 sps:$4 sm:$0xff]  }
 0x457   :  { %14552 = vmatprep.subr.bf16.mxu1 %v19920_v55  ;;  %v19948_v55 = vld [vmem:[#allocation5 + $0x6e8] ss:$16 sps:$4 sm:$0xff]  }
 0x459   :  { %14512 = vmatpush2.bf16.msra.mxu0 %v19915_v38  ;;  %v19953_v38 = vld [vmem:[#allocation5 + $0x4cc] ss:$16 sps:$4 sm:$0xff]  }
 0x45a   :  { %14553 = vmatpush2.bf16.msra.mxu1 %v19918_v34  ;;  %14513 = vmatprep.subr.bf16.mxu0 %v19923_v2  ;;  %v19956_v34 = vld [vmem:[#allocation5 + $0x6cc] ss:$16 sps:$4 sm:$0xff]   ;;  %v19951_v2 = vld [vmem:[#allocation5 + $0x4c8] ss:$16 sps:$4 sm:$0xff]  }
 0x45b   :  { %14554 = vmatprep.subr.bf16.mxu1 %v19926_v42  ;;  %v19954_v42 = vld [vmem:[#allocation5 + $0x6c8] ss:$16 sps:$4 sm:$0xff]  }
 0x45d   :  { %14514 = vmatpush2.bf16.msra.mxu0 %v19921_v15 }
 0x45e   :  { %14555 = vmatpush2.bf16.msra.mxu1 %v19924_v24  ;;  %14515 = vmatprep.subr.bf16.mxu0 %v19929_v8 }
 0x45f   :  { %14556 = vmatprep.subr.bf16.mxu1 %v19932_v4 }
 0x461   :  { %14516 = vmatpush2.bf16.msra.mxu0 %v19927_v41 }
 0x462   :  { %14557 = vmatpush2.bf16.msra.mxu1 %v19930_v32  ;;  %14517 = vmatprep.subr.bf16.mxu0 %v19935_v48  ;;  %v19959_v32 = vld [vmem:[#allocation5 + $0x4ac] ss:$16 sps:$4 sm:$0xff]  }
 0x463   :  { %14558 = vmatprep.subr.bf16.mxu1 %v19938_v1  ;;  %v19962_v48 = vld [vmem:[#allocation5 + $0x6ac] ss:$16 sps:$4 sm:$0xff]  }
 0x465   :  { %14518 = vmatpush2.bf16.msra.mxu0 %v19933_v62 }
 0x466   :  { %14559 = vmatpush2.bf16.msra.mxu1 %v19936_v37  ;;  %14519 = vmatprep.subr.bf16.mxu0 %v19941_v10  ;;  %v19957_v37 = vld [vmem:[#allocation5 + $0x4a8] ss:$16 sps:$4 sm:$0xff]  }
 0x467   :  { %14560 = vmatprep.subr.bf16.mxu1 %v19944_v13  ;;  %v19960_v10 = vld [vmem:[#allocation5 + $0x6a8] ss:$16 sps:$4 sm:$0xff]  }
 0x469   :  { %14520 = vmatpush2.bf16.msra.mxu0 %v19939_v6 }
 0x46a   :  { %14561 = vmatpush2.bf16.msra.mxu1 %v19942_v59  ;;  %14571 = vmatprep.subr.bf16.mxu0 %v19947_v14  ;;  %v19965_v59 = vld [vmem:[#allocation5 + $0x48c] ss:$16 sps:$4 sm:$0xff]  }
 0x46b   :  { %14612 = vmatprep.subr.bf16.mxu1 %v19950_v3  ;;  %v19968_v14 = vld [vmem:[#allocation5 + $0x68c] ss:$16 sps:$4 sm:$0xff]   ;;  %v19966_v3 = vld [vmem:[#allocation5 + $0x688] ss:$16 sps:$4 sm:$0xff]  }
 0x46c   :  { %v14277_v15 = vpop.f32.mrf.mxu0  ;;  %14522 = vmatmul.mubr.bf16.vlgmr.msra.gmra.mxu0 %v21559_v26 }
 0x46d   :  { %v14318_v24 = vpop.f32.mrf.mxu1  ;;  %14563 = vmatmul.mubr.bf16.vlgmr.msra.gmra.mxu1 %v21561_v27  ;;  %v14278_v8 = vadd.f32 %v14277_v15, %v22116_v54  ;;  %14572 = vmatpush1.bf16.msra.mxu0 %v19945_v58  ;;  %v19969_v58 = vld [vmem:[#allocation5 + $0x468] ss:$16 sps:$4 sm:$0xff]   ;;  %v19983_v15 = vld [vmem:[#allocation5 + $0x42c] ss:$16 sps:$4 sm:$0xff]  }
 0x46e   :  { %14613 = vmatpush1.bf16.msra.mxu1 %v19948_v55  ;;  %v14279_v4 = vpop.f32.mrf.mxu0  ;;  %14573 = vmatprep.subr.bf16.mxu0 %v19953_v38  ;;  %v19972_v55 = vld [vmem:[#allocation5 + $0x668] ss:$16 sps:$4 sm:$0xff]   ;;  %v19977_v38 = vld [vmem:[#allocation5 + $0x44c] ss:$16 sps:$4 sm:$0xff]  }
 0x46f   :  { %v14320_v41 = vpop.f32.mrf.mxu1  ;;  %14614 = vmatprep.subr.bf16.mxu1 %v19956_v34  ;;  %v22126_v1 = vadd.f32 %v14318_v24, %v14278_v8  ;;  %v14280_v62 = vadd.f32 %v14279_v4, %v22121_v19  ;;  %14603 = vmatprep.mubr.bf16.mxu0 %v21581_v12  ;;  %v19963_v19 = vld [vmem:[#allocation5 + $0x488] ss:$16 sps:$4 sm:$0xff]   ;;  %v19971_v12 = vld [vmem:[#allocation5 + $0x46c] ss:$16 sps:$4 sm:$0xff]  }
 0x470   :  { %14644 = vmatprep.mubr.bf16.mxu1 %v21583_v16  ;;  %v14281_v26 = vpop.f32.mrf.mxu0  ;;  %v19974_v16 = vld [vmem:[#allocation5 + $0x66c] ss:$16 sps:$4 sm:$0xff]   ;;  %v19981_v8 = vld [vmem:[#allocation5 + $0x428] ss:$16 sps:$4 sm:$0xff]  }
 0x471   :  { %v14322_v27 = vpop.f32.mrf.mxu1  ;;  %v22131_v54 = vadd.f32 %v14320_v41, %v14280_v62  ;;  %14574 = vmatpush1.bf16.msra.mxu0 %v19951_v2  ;;  %v19980_v34 = vld [vmem:[#allocation5 + $0x64c] ss:$16 sps:$4 sm:$0xff]   ;;  %v19975_v2 = vld [vmem:[#allocation5 + $0x448] ss:$16 sps:$4 sm:$0xff]  }
 0x472   :  { %14615 = vmatpush1.bf16.msra.mxu1 %v19954_v42  ;;  %v14282_v13 = vpop.f32.mrf.mxu0  ;;  %14575 = vmatprep.subr.bf16.mxu0 %v19959_v32  ;;  %v19978_v42 = vld [vmem:[#allocation5 + $0x648] ss:$16 sps:$4 sm:$0xff]   ;;  %v19986_v24 = vld [vmem:[#allocation5 + $0x62c] ss:$16 sps:$4 sm:$0xff]  }
 0x473   :  { %v14323_v6 = vpop.f32.mrf.mxu1  ;;  %14616 = vmatprep.subr.bf16.mxu1 %v19962_v48  ;;  %v19984_v4 = vld [vmem:[#allocation5 + $0x628] ss:$16 sps:$4 sm:$0xff]   ;;  %v19989_v41 = vld [vmem:[#allocation5 + $0x40c] ss:$16 sps:$4 sm:$0xff]  }
 0x474   :  { %v19992_v32 = vld [vmem:[#allocation5 + $0x60c] ss:$16 sps:$4 sm:$0xff]   ;;  %v19987_v48 = vld [vmem:[#allocation5 + $0x408] ss:$16 sps:$4 sm:$0xff]  }
 0x475   :  { %14576 = vmatpush1.bf16.msra.mxu0 %v19957_v37  ;;  %v19990_v62 = vld [vmem:[#allocation5 + $0x608] ss:$16 sps:$4 sm:$0xff]   ;;  %v19995_v37 = vld [vmem:[#allocation5 + $0x5ec] ss:$16 sps:$4 sm:$0xff]  }
 0x476   :  { %14617 = vmatpush1.bf16.msra.mxu1 %v19960_v10  ;;  %14577 = vmatprep.subr.bf16.mxu0 %v19965_v59  ;;  %v19998_v10 = vld [vmem:[#allocation5 + $0x7ec] ss:$16 sps:$4 sm:$0xff]   ;;  %v19993_v26 = vld [vmem:[#allocation5 + $0x5e8] ss:$16 sps:$4 sm:$0xff]  }
 0x477   :  { %14618 = vmatprep.subr.bf16.mxu1 %v19968_v14  ;;  %v19996_v27 = vld [vmem:[#allocation5 + $0x7e8] ss:$16 sps:$4 sm:$0xff]   ;;  %v20001_v13 = vld [vmem:[#allocation5 + $0x5cc] ss:$16 sps:$4 sm:$0xff]  }
 0x478   :  { %v20004_v6 = vld [vmem:[#allocation5 + $0x7cc] ss:$16 sps:$4 sm:$0xff]   ;;  %v19999_v59 = vld [vmem:[#allocation5 + $0x5c8] ss:$16 sps:$4 sm:$0xff]  }
 0x479   :  { %14578 = vmatpush1.bf16.msra.mxu0 %v19963_v19  ;;  %v20002_v14 = vld [vmem:[#allocation5 + $0x7c8] ss:$16 sps:$4 sm:$0xff]   ;;  %v20007_v19 = vld [vmem:[#allocation5 + $0x5ac] ss:$16 sps:$4 sm:$0xff]  }
 0x47a   :  { %14619 = vmatpush1.bf16.msra.mxu1 %v19966_v3  ;;  %14579 = vmatprep.subr.bf16.mxu0 %v19971_v12  ;;  %v20010_v3 = vld [vmem:[#allocation5 + $0x7ac] ss:$16 sps:$4 sm:$0xff]   ;;  %v20005_v12 = vld [vmem:[#allocation5 + $0x5a8] ss:$16 sps:$4 sm:$0xff]  }
 0x47b   :  { %14620 = vmatprep.subr.bf16.mxu1 %v19974_v16  ;;  %v20008_v16 = vld [vmem:[#allocation5 + $0x7a8] ss:$16 sps:$4 sm:$0xff]  }
 0x47d   :  { %14580 = vmatpush1.bf16.msra.mxu0 %v19969_v58  ;;  %v20013_v58 = vld [vmem:[#allocation5 + $0x58c] ss:$16 sps:$4 sm:$0xff]  }
 0x47e   :  { %14621 = vmatpush1.bf16.msra.mxu1 %v19972_v55  ;;  %14581 = vmatprep.subr.bf16.mxu0 %v19977_v38  ;;  %v20016_v55 = vld [vmem:[#allocation5 + $0x78c] ss:$16 sps:$4 sm:$0xff]   ;;  %v20011_v38 = vld [vmem:[#allocation5 + $0x588] ss:$16 sps:$4 sm:$0xff]  }
 0x47f   :  { %14622 = vmatprep.subr.bf16.mxu1 %v19980_v34  ;;  %v20014_v34 = vld [vmem:[#allocation5 + $0x788] ss:$16 sps:$4 sm:$0xff]  }
 0x481   :  { %14582 = vmatpush1.bf16.msra.mxu0 %v19975_v2  ;;  %v20019_v2 = vld [vmem:[#allocation5 + $0x56c] ss:$16 sps:$4 sm:$0xff]  }
 0x482   :  { %14623 = vmatpush1.bf16.msra.mxu1 %v19978_v42  ;;  %14583 = vmatprep.subr.bf16.mxu0 %v19983_v15  ;;  %v20022_v42 = vld [vmem:[#allocation5 + $0x76c] ss:$16 sps:$4 sm:$0xff]   ;;  %v20017_v15 = vld [vmem:[#allocation5 + $0x568] ss:$16 sps:$4 sm:$0xff]  }
 0x483   :  { %14624 = vmatprep.subr.bf16.mxu1 %v19986_v24  ;;  %v20020_v24 = vld [vmem:[#allocation5 + $0x768] ss:$16 sps:$4 sm:$0xff]  }
 0x485   :  { %14584 = vmatpush1.bf16.msra.mxu0 %v19981_v8  ;;  %v20025_v8 = vld [vmem:[#allocation5 + $0x54c] ss:$16 sps:$4 sm:$0xff]  }
 0x486   :  { %14625 = vmatpush1.bf16.msra.mxu1 %v19984_v4  ;;  %14585 = vmatprep.subr.bf16.mxu0 %v19989_v41  ;;  %v20028_v4 = vld [vmem:[#allocation5 + $0x74c] ss:$16 sps:$4 sm:$0xff]   ;;  %v20023_v41 = vld [vmem:[#allocation5 + $0x548] ss:$16 sps:$4 sm:$0xff]  }
 0x487   :  { %14626 = vmatprep.subr.bf16.mxu1 %v19992_v32  ;;  %v20026_v32 = vld [vmem:[#allocation5 + $0x748] ss:$16 sps:$4 sm:$0xff]  }
 0x489   :  { %14586 = vmatpush1.bf16.msra.mxu0 %v19987_v48  ;;  %v20031_v48 = vld [vmem:[#allocation5 + $0x52c] ss:$16 sps:$4 sm:$0xff]  }
 0x48a   :  { %14627 = vmatpush1.bf16.msra.mxu1 %v19990_v62  ;;  %14587 = vmatprep.subr.bf16.mxu0 %v19995_v37  ;;  %v20034_v62 = vld [vmem:[#allocation5 + $0x72c] ss:$16 sps:$4 sm:$0xff]   ;;  %v20029_v37 = vld [vmem:[#allocation5 + $0x528] ss:$16 sps:$4 sm:$0xff]  }
 0x48b   :  { %14628 = vmatprep.subr.bf16.mxu1 %v19998_v10  ;;  %v20032_v10 = vld [vmem:[#allocation5 + $0x728] ss:$16 sps:$4 sm:$0xff]  }
 0x48d   :  { %14588 = vmatpush2.bf16.msra.mxu0 %v19993_v26  ;;  %v20037_v26 = vld [vmem:[#allocation5 + $0x50c] ss:$16 sps:$4 sm:$0xff]  }
 0x48e   :  { %14629 = vmatpush2.bf16.msra.mxu1 %v19996_v27  ;;  %14589 = vmatprep.subr.bf16.mxu0 %v20001_v13  ;;  %v20040_v27 = vld [vmem:[#allocation5 + $0x70c] ss:$16 sps:$4 sm:$0xff]   ;;  %v20035_v13 = vld [vmem:[#allocation5 + $0x508] ss:$16 sps:$4 sm:$0xff]  }
 0x48f   :  { %14630 = vmatprep.subr.bf16.mxu1 %v20004_v6  ;;  %v20038_v6 = vld [vmem:[#allocation5 + $0x708] ss:$16 sps:$4 sm:$0xff]  }
 0x491   :  { %14590 = vmatpush2.bf16.msra.mxu0 %v19999_v59  ;;  %v20043_v59 = vld [vmem:[#allocation5 + $0x8ec] ss:$16 sps:$4 sm:$0xff]  }
 0x492   :  { %14631 = vmatpush2.bf16.msra.mxu1 %v20002_v14  ;;  %14591 = vmatprep.subr.bf16.mxu0 %v20007_v19  ;;  %v20046_v14 = vld [vmem:[#allocation5 + $0xaec] ss:$16 sps:$4 sm:$0xff]   ;;  %v20041_v19 = vld [vmem:[#allocation5 + $0x8e8] ss:$16 sps:$4 sm:$0xff]  }
 0x493   :  { %14632 = vmatprep.subr.bf16.mxu1 %v20010_v3  ;;  %v20044_v3 = vld [vmem:[#allocation5 + $0xae8] ss:$16 sps:$4 sm:$0xff]  }
 0x495   :  { %14592 = vmatpush2.bf16.msra.mxu0 %v20005_v12  ;;  %v20049_v12 = vld [vmem:[#allocation5 + $0x8cc] ss:$16 sps:$4 sm:$0xff]  }
 0x496   :  { %14633 = vmatpush2.bf16.msra.mxu1 %v20008_v16  ;;  %14593 = vmatprep.subr.bf16.mxu0 %v20013_v58  ;;  %v20052_v16 = vld [vmem:[#allocation5 + $0xacc] ss:$16 sps:$4 sm:$0xff]  }
 0x497   :  { %14634 = vmatprep.subr.bf16.mxu1 %v20016_v55 }
 0x499   :  { %14594 = vmatpush2.bf16.msra.mxu0 %v20011_v38 }
 0x49a   :  { %14635 = vmatpush2.bf16.msra.mxu1 %v20014_v34  ;;  %14595 = vmatprep.subr.bf16.mxu0 %v20019_v2  ;;  %v20047_v34 = vld [vmem:[#allocation5 + $0x8c8] ss:$16 sps:$4 sm:$0xff]  }
 0x49b   :  { %14636 = vmatprep.subr.bf16.mxu1 %v20022_v42  ;;  %v20050_v2 = vld [vmem:[#allocation5 + $0xac8] ss:$16 sps:$4 sm:$0xff]  }
 0x49d   :  { %14596 = vmatpush2.bf16.msra.mxu0 %v20017_v15 }
 0x49e   :  { %14637 = vmatpush2.bf16.msra.mxu1 %v20020_v24  ;;  %14597 = vmatprep.subr.bf16.mxu0 %v20025_v8  ;;  %v20055_v24 = vld [vmem:[#allocation5 + $0x8ac] ss:$16 sps:$4 sm:$0xff]  }
 0x49f   :  { %14638 = vmatprep.subr.bf16.mxu1 %v20028_v4  ;;  %v20058_v8 = vld [vmem:[#allocation5 + $0xaac] ss:$16 sps:$4 sm:$0xff]  }
 0x4a1   :  { %14598 = vmatpush2.bf16.msra.mxu0 %v20023_v41 }
 0x4a2   :  { %14639 = vmatpush2.bf16.msra.mxu1 %v20026_v32  ;;  %14599 = vmatprep.subr.bf16.mxu0 %v20031_v48  ;;  %v20053_v32 = vld [vmem:[#allocation5 + $0x8a8] ss:$16 sps:$4 sm:$0xff]  }
 0x4a3   :  { %14640 = vmatprep.subr.bf16.mxu1 %v20034_v62  ;;  %v20056_v48 = vld [vmem:[#allocation5 + $0xaa8] ss:$16 sps:$4 sm:$0xff]  }
 0x4a5   :  { %14600 = vmatpush2.bf16.msra.mxu0 %v20029_v37 }
 0x4a6   :  { %14641 = vmatpush2.bf16.msra.mxu1 %v20032_v10  ;;  %14601 = vmatprep.subr.bf16.mxu0 %v20037_v26  ;;  %v20061_v10 = vld [vmem:[#allocation5 + $0x88c] ss:$16 sps:$4 sm:$0xff]  }
 0x4a7   :  { %14642 = vmatprep.subr.bf16.mxu1 %v20040_v27  ;;  %v20064_v26 = vld [vmem:[#allocation5 + $0xa8c] ss:$16 sps:$4 sm:$0xff]  }
 0x4a8   :  { %v20070_v27 = vld [vmem:[#allocation5 + $0xa6c] ss:$16 sps:$4 sm:$0xff]  }
 0x4a9   :  { %14602 = vmatpush2.bf16.msra.mxu0 %v20035_v13  ;;  %v20065_v13 = vld [vmem:[#allocation5 + $0x868] ss:$16 sps:$4 sm:$0xff]  }
 0x4aa   :  { %14643 = vmatpush2.bf16.msra.mxu1 %v20038_v6  ;;  %14653 = vmatprep.subr.bf16.mxu0 %v20043_v59  ;;  %v20068_v6 = vld [vmem:[#allocation5 + $0xa68] ss:$16 sps:$4 sm:$0xff]   ;;  %v20073_v59 = vld [vmem:[#allocation5 + $0x84c] ss:$16 sps:$4 sm:$0xff]  }
 0x4ab   :  { %14694 = vmatprep.subr.bf16.mxu1 %v20046_v14  ;;  %v20076_v14 = vld [vmem:[#allocation5 + $0xa4c] ss:$16 sps:$4 sm:$0xff]  }
 0x4ac   :  { %v14359_v58 = vpop.f32.mrf.mxu0  ;;  %14604 = vmatmul.mubr.bf16.vlgmr.msra.gmra.mxu0 %v21591_v51 }
 0x4ad   :  { %v14400_v55 = vpop.f32.mrf.mxu1  ;;  %14645 = vmatmul.mubr.bf16.vlgmr.msra.gmra.mxu1 %v21593_v52  ;;  %v14360_v38 = vadd.f32 %v14359_v58, %v22126_v1  ;;  %14654 = vmatpush1.bf16.msra.mxu0 %v20041_v19  ;;  %v20071_v19 = vld [vmem:[#allocation5 + $0x848] ss:$16 sps:$4 sm:$0xff]  }
 0x4ae   :  { %14695 = vmatpush1.bf16.msra.mxu1 %v20044_v3  ;;  %v14361_v42 = vpop.f32.mrf.mxu0  ;;  %14655 = vmatprep.subr.bf16.mxu0 %v20049_v12  ;;  %v20074_v3 = vld [vmem:[#allocation5 + $0xa48] ss:$16 sps:$4 sm:$0xff]   ;;  %v20079_v12 = vld [vmem:[#allocation5 + $0x82c] ss:$16 sps:$4 sm:$0xff]  }
 0x4af   :  { %v14402_v15 = vpop.f32.mrf.mxu1  ;;  %14696 = vmatprep.subr.bf16.mxu1 %v20052_v16  ;;  %v22136_v4 = vadd.f32 %v14400_v55, %v14360_v38  ;;  %v14362_v41 = vadd.f32 %v14361_v42, %v22131_v54  ;;  %14685 = vmatprep.mubr.bf16.mxu0 %v21613_v20  ;;  %v20059_v54 = vld [vmem:[#allocation5 + $0x888] ss:$16 sps:$4 sm:$0xff]   ;;  %v20082_v16 = vld [vmem:[#allocation5 + $0xa2c] ss:$16 sps:$4 sm:$0xff]  }
 0x4b0   :  { %14726 = vmatprep.mubr.bf16.mxu1 %v21615_v23  ;;  %v14363_v51 = vpop.f32.mrf.mxu0  ;;  %v20062_v20 = vld [vmem:[#allocation5 + $0xa88] ss:$16 sps:$4 sm:$0xff]   ;;  %v20067_v23 = vld [vmem:[#allocation5 + $0x86c] ss:$16 sps:$4 sm:$0xff]  }
 0x4b1   :  { %v14404_v52 = vpop.f32.mrf.mxu1  ;;  %v22141_v1 = vadd.f32 %v14402_v15, %v14362_v41  ;;  %14656 = vmatpush1.bf16.msra.mxu0 %v20047_v34  ;;  %v20077_v58 = vld [vmem:[#allocation5 + $0x828] ss:$16 sps:$4 sm:$0xff]   ;;  %v20085_v38 = vld [vmem:[#allocation5 + $0x80c] ss:$16 sps:$4 sm:$0xff]  }
 0x4b2   :  { %14697 = vmatpush1.bf16.msra.mxu1 %v20050_v2  ;;  %v14364_v62 = vpop.f32.mrf.mxu0  ;;  %14657 = vmatprep.subr.bf16.mxu0 %v20055_v24  ;;  %v20080_v55 = vld [vmem:[#allocation5 + $0xa28] ss:$16 sps:$4 sm:$0xff]   ;;  %v20088_v34 = vld [vmem:[#allocation5 + $0xa0c] ss:$16 sps:$4 sm:$0xff]  }
 0x4b3   :  { %v14405_v37 = vpop.f32.mrf.mxu1  ;;  %14698 = vmatprep.subr.bf16.mxu1 %v20058_v8  ;;  %v20083_v2 = vld [vmem:[#allocation5 + $0x808] ss:$16 sps:$4 sm:$0xff]   ;;  %v20091_v15 = vld [vmem:[#allocation5 + $0x9ec] ss:$16 sps:$4 sm:$0xff]  }
 0x4b4   :  { %v20086_v42 = vld [vmem:[#allocation5 + $0xa08] ss:$16 sps:$4 sm:$0xff]   ;;  %v20094_v24 = vld [vmem:[#allocation5 + $0xbec] ss:$16 sps:$4 sm:$0xff]  }
 0x4b5   :  { %14658 = vmatpush1.bf16.msra.mxu0 %v20053_v32  ;;  %v20089_v8 = vld [vmem:[#allocation5 + $0x9e8] ss:$16 sps:$4 sm:$0xff]   ;;  %v20097_v51 = vld [vmem:[#allocation5 + $0x9cc] ss:$16 sps:$4 sm:$0xff]  }
 0x4b6   :  { %14699 = vmatpush1.bf16.msra.mxu1 %v20056_v48  ;;  %14659 = vmatprep.subr.bf16.mxu0 %v20061_v10  ;;  %v20092_v41 = vld [vmem:[#allocation5 + $0xbe8] ss:$16 sps:$4 sm:$0xff]   ;;  %v20100_v52 = vld [vmem:[#allocation5 + $0xbcc] ss:$16 sps:$4 sm:$0xff]  }
 0x4b7   :  { %14700 = vmatprep.subr.bf16.mxu1 %v20064_v26  ;;  %v20095_v32 = vld [vmem:[#allocation5 + $0x9c8] ss:$16 sps:$4 sm:$0xff]   ;;  %v20103_v62 = vld [vmem:[#allocation5 + $0x9ac] ss:$16 sps:$4 sm:$0xff]  }
 0x4b8   :  { %v20098_v48 = vld [vmem:[#allocation5 + $0xbc8] ss:$16 sps:$4 sm:$0xff]   ;;  %v20106_v37 = vld [vmem:[#allocation5 + $0xbac] ss:$16 sps:$4 sm:$0xff]  }
 0x4b9   :  { %14660 = vmatpush1.bf16.msra.mxu0 %v20059_v54  ;;  %v20101_v10 = vld [vmem:[#allocation5 + $0x9a8] ss:$16 sps:$4 sm:$0xff]   ;;  %v20109_v54 = vld [vmem:[#allocation5 + $0x98c] ss:$16 sps:$4 sm:$0xff]  }
 0x4ba   :  { %14701 = vmatpush1.bf16.msra.mxu1 %v20062_v20  ;;  %14661 = vmatprep.subr.bf16.mxu0 %v20067_v23  ;;  %v20104_v26 = vld [vmem:[#allocation5 + $0xba8] ss:$16 sps:$4 sm:$0xff]   ;;  %v20112_v20 = vld [vmem:[#allocation5 + $0xb8c] ss:$16 sps:$4 sm:$0xff]  }
 0x4bb   :  { %14702 = vmatprep.subr.bf16.mxu1 %v20070_v27  ;;  %v20107_v23 = vld [vmem:[#allocation5 + $0x988] ss:$16 sps:$4 sm:$0xff]  }
 0x4bc   :  { %v20110_v27 = vld [vmem:[#allocation5 + $0xb88] ss:$16 sps:$4 sm:$0xff]  }
 0x4bd   :  { %14662 = vmatpush1.bf16.msra.mxu0 %v20065_v13  ;;  %v20115_v13 = vld [vmem:[#allocation5 + $0x96c] ss:$16 sps:$4 sm:$0xff]  }
 0x4be   :  { %14703 = vmatpush1.bf16.msra.mxu1 %v20068_v6  ;;  %14663 = vmatprep.subr.bf16.mxu0 %v20073_v59  ;;  %v20118_v6 = vld [vmem:[#allocation5 + $0xb6c] ss:$16 sps:$4 sm:$0xff]   ;;  %v20113_v59 = vld [vmem:[#allocation5 + $0x968] ss:$16 sps:$4 sm:$0xff]  }
 0x4bf   :  { %14704 = vmatprep.subr.bf16.mxu1 %v20076_v14  ;;  %v20116_v14 = vld [vmem:[#allocation5 + $0xb68] ss:$16 sps:$4 sm:$0xff]  }
 0x4c1   :  { %14664 = vmatpush1.bf16.msra.mxu0 %v20071_v19  ;;  %v20121_v19 = vld [vmem:[#allocation5 + $0x94c] ss:$16 sps:$4 sm:$0xff]  }
 0x4c2   :  { %14705 = vmatpush1.bf16.msra.mxu1 %v20074_v3  ;;  %14665 = vmatprep.subr.bf16.mxu0 %v20079_v12  ;;  %v20124_v3 = vld [vmem:[#allocation5 + $0xb4c] ss:$16 sps:$4 sm:$0xff]   ;;  %v20119_v12 = vld [vmem:[#allocation5 + $0x948] ss:$16 sps:$4 sm:$0xff]  }
 0x4c3   :  { %14706 = vmatprep.subr.bf16.mxu1 %v20082_v16  ;;  %v20122_v16 = vld [vmem:[#allocation5 + $0xb48] ss:$16 sps:$4 sm:$0xff]  }
 0x4c5   :  { %14666 = vmatpush1.bf16.msra.mxu0 %v20077_v58  ;;  %v20127_v58 = vld [vmem:[#allocation5 + $0x92c] ss:$16 sps:$4 sm:$0xff]  }
 0x4c6   :  { %14707 = vmatpush1.bf16.msra.mxu1 %v20080_v55  ;;  %14667 = vmatprep.subr.bf16.mxu0 %v20085_v38  ;;  %v20130_v55 = vld [vmem:[#allocation5 + $0xb2c] ss:$16 sps:$4 sm:$0xff]   ;;  %v20125_v38 = vld [vmem:[#allocation5 + $0x928] ss:$16 sps:$4 sm:$0xff]  }
 0x4c7   :  { %14708 = vmatprep.subr.bf16.mxu1 %v20088_v34  ;;  %v20128_v34 = vld [vmem:[#allocation5 + $0xb28] ss:$16 sps:$4 sm:$0xff]  }
 0x4c9   :  { %14668 = vmatpush1.bf16.msra.mxu0 %v20083_v2  ;;  %v20133_v2 = vld [vmem:[#allocation5 + $0x90c] ss:$16 sps:$4 sm:$0xff]  }
 0x4ca   :  { %14709 = vmatpush1.bf16.msra.mxu1 %v20086_v42  ;;  %14669 = vmatprep.subr.bf16.mxu0 %v20091_v15  ;;  %v20136_v42 = vld [vmem:[#allocation5 + $0xb0c] ss:$16 sps:$4 sm:$0xff]   ;;  %v20131_v15 = vld [vmem:[#allocation5 + $0x908] ss:$16 sps:$4 sm:$0xff]  }
 0x4cb   :  { %14710 = vmatprep.subr.bf16.mxu1 %v20094_v24  ;;  %v20134_v24 = vld [vmem:[#allocation5 + $0xb08] ss:$16 sps:$4 sm:$0xff]  }
 0x4cd   :  { %14670 = vmatpush2.bf16.msra.mxu0 %v20089_v8  ;;  %v20139_v8 = vld [vmem:[#allocation5 + $0xcec] ss:$16 sps:$4 sm:$0xff]  }
 0x4ce   :  { %14711 = vmatpush2.bf16.msra.mxu1 %v20092_v41  ;;  %14671 = vmatprep.subr.bf16.mxu0 %v20097_v51  ;;  %v20142_v41 = vld [vmem:[#allocation5 + $0xeec] ss:$16 sps:$4 sm:$0xff]   ;;  %v20137_v51 = vld [vmem:[#allocation5 + $0xce8] ss:$16 sps:$4 sm:$0xff]  }
 0x4cf   :  { %14712 = vmatprep.subr.bf16.mxu1 %v20100_v52  ;;  %v20140_v52 = vld [vmem:[#allocation5 + $0xee8] ss:$16 sps:$4 sm:$0xff]  }
 0x4d1   :  { %14672 = vmatpush2.bf16.msra.mxu0 %v20095_v32  ;;  %v20145_v32 = vld [vmem:[#allocation5 + $0xccc] ss:$16 sps:$4 sm:$0xff]  }
 0x4d2   :  { %14713 = vmatpush2.bf16.msra.mxu1 %v20098_v48  ;;  %14673 = vmatprep.subr.bf16.mxu0 %v20103_v62  ;;  %v20148_v48 = vld [vmem:[#allocation5 + $0xecc] ss:$16 sps:$4 sm:$0xff]  }
 0x4d3   :  { %14714 = vmatprep.subr.bf16.mxu1 %v20106_v37 }
 0x4d5   :  { %14674 = vmatpush2.bf16.msra.mxu0 %v20101_v10 }
 0x4d6   :  { %14715 = vmatpush2.bf16.msra.mxu1 %v20104_v26  ;;  %14675 = vmatprep.subr.bf16.mxu0 %v20109_v54  ;;  %v20143_v26 = vld [vmem:[#allocation5 + $0xcc8] ss:$16 sps:$4 sm:$0xff]  }
 0x4d7   :  { %14716 = vmatprep.subr.bf16.mxu1 %v20112_v20  ;;  %v20146_v54 = vld [vmem:[#allocation5 + $0xec8] ss:$16 sps:$4 sm:$0xff]  }
 0x4d9   :  { %14676 = vmatpush2.bf16.msra.mxu0 %v20107_v23 }
 0x4da   :  { %14717 = vmatpush2.bf16.msra.mxu1 %v20110_v27  ;;  %14677 = vmatprep.subr.bf16.mxu0 %v20115_v13  ;;  %v20151_v27 = vld [vmem:[#allocation5 + $0xcac] ss:$16 sps:$4 sm:$0xff]  }
 0x4db   :  { %14718 = vmatprep.subr.bf16.mxu1 %v20118_v6  ;;  %v20154_v13 = vld [vmem:[#allocation5 + $0xeac] ss:$16 sps:$4 sm:$0xff]  }
 0x4dd   :  { %14678 = vmatpush2.bf16.msra.mxu0 %v20113_v59 }
 0x4de   :  { %14719 = vmatpush2.bf16.msra.mxu1 %v20116_v14  ;;  %14679 = vmatprep.subr.bf16.mxu0 %v20121_v19  ;;  %v20149_v14 = vld [vmem:[#allocation5 + $0xca8] ss:$16 sps:$4 sm:$0xff]  }
 0x4df   :  { %14720 = vmatprep.subr.bf16.mxu1 %v20124_v3  ;;  %v20152_v19 = vld [vmem:[#allocation5 + $0xea8] ss:$16 sps:$4 sm:$0xff]  }
 0x4e1   :  { %14680 = vmatpush2.bf16.msra.mxu0 %v20119_v12 }
 0x4e2   :  { %14721 = vmatpush2.bf16.msra.mxu1 %v20122_v16  ;;  %14681 = vmatprep.subr.bf16.mxu0 %v20127_v58  ;;  %v20157_v16 = vld [vmem:[#allocation5 + $0xc8c] ss:$16 sps:$4 sm:$0xff]  }
 0x4e3   :  { %14722 = vmatprep.subr.bf16.mxu1 %v20130_v55  ;;  %v20160_v58 = vld [vmem:[#allocation5 + $0xe8c] ss:$16 sps:$4 sm:$0xff]  }
 0x4e4   :  { %v20166_v55 = vld [vmem:[#allocation5 + $0xe6c] ss:$16 sps:$4 sm:$0xff]  }
 0x4e5   :  { %14682 = vmatpush2.bf16.msra.mxu0 %v20125_v38  ;;  %v20161_v38 = vld [vmem:[#allocation5 + $0xc68] ss:$16 sps:$4 sm:$0xff]  }
 0x4e6   :  { %14723 = vmatpush2.bf16.msra.mxu1 %v20128_v34  ;;  %14683 = vmatprep.subr.bf16.mxu0 %v20133_v2  ;;  %v20164_v34 = vld [vmem:[#allocation5 + $0xe68] ss:$16 sps:$4 sm:$0xff]   ;;  %v20169_v2 = vld [vmem:[#allocation5 + $0xc4c] ss:$16 sps:$4 sm:$0xff]  }
 0x4e7   :  { %14724 = vmatprep.subr.bf16.mxu1 %v20136_v42  ;;  %v20172_v42 = vld [vmem:[#allocation5 + $0xe4c] ss:$16 sps:$4 sm:$0xff]  }
 0x4e9   :  { %14684 = vmatpush2.bf16.msra.mxu0 %v20131_v15  ;;  %v20167_v15 = vld [vmem:[#allocation5 + $0xc48] ss:$16 sps:$4 sm:$0xff]  }
 0x4ea   :  { %14725 = vmatpush2.bf16.msra.mxu1 %v20134_v24  ;;  %14735 = vmatprep.subr.bf16.mxu0 %v20139_v8  ;;  %v20170_v24 = vld [vmem:[#allocation5 + $0xe48] ss:$16 sps:$4 sm:$0xff]   ;;  %v20175_v8 = vld [vmem:[#allocation5 + $0xc2c] ss:$16 sps:$4 sm:$0xff]  }
 0x4eb   :  { %14776 = vmatprep.subr.bf16.mxu1 %v20142_v41  ;;  %v20178_v41 = vld [vmem:[#allocation5 + $0xe2c] ss:$16 sps:$4 sm:$0xff]  }
 0x4ec   :  { %v14441_v62 = vpop.f32.mrf.mxu0  ;;  %14686 = vmatmul.mubr.bf16.vlgmr.msra.gmra.mxu0 %v21639_v43 }
 0x4ed   :  { %v14482_v37 = vpop.f32.mrf.mxu1  ;;  %14727 = vmatmul.mubr.bf16.vlgmr.msra.gmra.mxu1 %v21641_v44  ;;  %v14442_v10 = vadd.f32 %v14441_v62, %v22136_v4  ;;  %14736 = vmatpush1.bf16.msra.mxu0 %v20137_v51  ;;  %v20173_v51 = vld [vmem:[#allocation5 + $0xc28] ss:$16 sps:$4 sm:$0xff]  }
 0x4ee   :  { %14777 = vmatpush1.bf16.msra.mxu1 %v20140_v52  ;;  %v14443_v20 = vpop.f32.mrf.mxu0  ;;  %14737 = vmatprep.subr.bf16.mxu0 %v20145_v32  ;;  %v20176_v52 = vld [vmem:[#allocation5 + $0xe28] ss:$16 sps:$4 sm:$0xff]   ;;  %v20181_v32 = vld [vmem:[#allocation5 + $0xc0c] ss:$16 sps:$4 sm:$0xff]  }
 0x4ef   :  { %v14484_v23 = vpop.f32.mrf.mxu1  ;;  %14778 = vmatprep.subr.bf16.mxu1 %v20148_v48  ;;  %v22146_v6 = vadd.f32 %v14482_v37, %v14442_v10  ;;  %v14444_v59 = vadd.f32 %v14443_v20, %v22141_v1  ;;  %14767 = vmatprep.mubr.bf16.mxu0 %v21643_v45  ;;  %v20155_v1 = vld [vmem:[#allocation5 + $0xc88] ss:$16 sps:$4 sm:$0xff]   ;;  %v20184_v48 = vld [vmem:[#allocation5 + $0xe0c] ss:$16 sps:$4 sm:$0xff]  }
 0x4f0   :  { %14808 = vmatprep.mubr.bf16.mxu1 %v21645_v46  ;;  %v14445_v43 = vpop.f32.mrf.mxu0  ;;  %v20158_v45 = vld [vmem:[#allocation5 + $0xe88] ss:$16 sps:$4 sm:$0xff]   ;;  %v20163_v46 = vld [vmem:[#allocation5 + $0xc6c] ss:$16 sps:$4 sm:$0xff]  }
 0x4f1   :  { %v14486_v44 = vpop.f32.mrf.mxu1  ;;  %v22151_v4 = vadd.f32 %v14484_v23, %v14444_v59  ;;  %14738 = vmatpush1.bf16.msra.mxu0 %v20143_v26  ;;  %v20179_v62 = vld [vmem:[#allocation5 + $0xc08] ss:$16 sps:$4 sm:$0xff]   ;;  %v20187_v10 = vld [vmem:[#allocation5 + $0xdec] ss:$16 sps:$4 sm:$0xff]  }
 0x4f2   :  { %14779 = vmatpush1.bf16.msra.mxu1 %v20146_v54  ;;  %v14446_v3 = vpop.f32.mrf.mxu0  ;;  %14739 = vmatprep.subr.bf16.mxu0 %v20151_v27  ;;  %v20182_v37 = vld [vmem:[#allocation5 + $0xe08] ss:$16 sps:$4 sm:$0xff]   ;;  %v20190_v26 = vld [vmem:[#allocation5 + $0xfec] ss:$16 sps:$4 sm:$0xff]  }
 0x4f3   :  { %v14487_v12 = vpop.f32.mrf.mxu1  ;;  %14780 = vmatprep.subr.bf16.mxu1 %v20154_v13  ;;  %v20185_v54 = vld [vmem:[#allocation5 + $0xde8] ss:$16 sps:$4 sm:$0xff]   ;;  %v20193_v23 = vld [vmem:[#allocation5 + $0xdcc] ss:$16 sps:$4 sm:$0xff]  }
 0x4f4   :  { %v20188_v20 = vld [vmem:[#allocation5 + $0xfe8] ss:$16 sps:$4 sm:$0xff]   ;;  %v20196_v27 = vld [vmem:[#allocation5 + $0xfcc] ss:$16 sps:$4 sm:$0xff]  }
 0x4f5   :  { %14740 = vmatpush1.bf16.msra.mxu0 %v20149_v14  ;;  %v20191_v13 = vld [vmem:[#allocation5 + $0xdc8] ss:$16 sps:$4 sm:$0xff]   ;;  %v20199_v43 = vld [vmem:[#allocation5 + $0xdac] ss:$16 sps:$4 sm:$0xff]  }
 0x4f6   :  { %14781 = vmatpush1.bf16.msra.mxu1 %v20152_v19  ;;  %14741 = vmatprep.subr.bf16.mxu0 %v20157_v16  ;;  %v20194_v59 = vld [vmem:[#allocation5 + $0xfc8] ss:$16 sps:$4 sm:$0xff]   ;;  %v20202_v44 = vld [vmem:[#allocation5 + $0xfac] ss:$16 sps:$4 sm:$0xff]  }
 0x4f7   :  { %14782 = vmatprep.subr.bf16.mxu1 %v20160_v58  ;;  %v20197_v14 = vld [vmem:[#allocation5 + $0xda8] ss:$16 sps:$4 sm:$0xff]   ;;  %v20205_v3 = vld [vmem:[#allocation5 + $0xd8c] ss:$16 sps:$4 sm:$0xff]  }
 0x4f8   :  { %v20200_v19 = vld [vmem:[#allocation5 + $0xfa8] ss:$16 sps:$4 sm:$0xff]   ;;  %v20208_v12 = vld [vmem:[#allocation5 + $0xf8c] ss:$16 sps:$4 sm:$0xff]  }
 0x4f9   :  { %14742 = vmatpush1.bf16.msra.mxu0 %v20155_v1  ;;  %v20203_v16 = vld [vmem:[#allocation5 + $0xd88] ss:$16 sps:$4 sm:$0xff]   ;;  %v20211_v1 = vld [vmem:[#allocation5 + $0xd6c] ss:$16 sps:$4 sm:$0xff]  }
 0x4fa   :  { %14783 = vmatpush1.bf16.msra.mxu1 %v20158_v45  ;;  %14743 = vmatprep.subr.bf16.mxu0 %v20163_v46  ;;  %v20206_v58 = vld [vmem:[#allocation5 + $0xf88] ss:$16 sps:$4 sm:$0xff]   ;;  %v20214_v45 = vld [vmem:[#allocation5 + $0xf6c] ss:$16 sps:$4 sm:$0xff]  }
 0x4fb   :  { %14784 = vmatprep.subr.bf16.mxu1 %v20166_v55  ;;  %v20209_v46 = vld [vmem:[#allocation5 + $0xd68] ss:$16 sps:$4 sm:$0xff]  }
 0x4fc   :  { %v20212_v55 = vld [vmem:[#allocation5 + $0xf68] ss:$16 sps:$4 sm:$0xff]  }
 0x4fd   :  { %14744 = vmatpush1.bf16.msra.mxu0 %v20161_v38  ;;  %v20217_v38 = vld [vmem:[#allocation5 + $0xd4c] ss:$16 sps:$4 sm:$0xff]  }
 0x4fe   :  { %14785 = vmatpush1.bf16.msra.mxu1 %v20164_v34  ;;  %14745 = vmatprep.subr.bf16.mxu0 %v20169_v2  ;;  %v20220_v34 = vld [vmem:[#allocation5 + $0xf4c] ss:$16 sps:$4 sm:$0xff]   ;;  %v20215_v2 = vld [vmem:[#allocation5 + $0xd48] ss:$16 sps:$4 sm:$0xff]  }
 0x4ff   :  { %14786 = vmatprep.subr.bf16.mxu1 %v20172_v42  ;;  %v20218_v42 = vld [vmem:[#allocation5 + $0xf48] ss:$16 sps:$4 sm:$0xff]  }
 0x501   :  { %14746 = vmatpush1.bf16.msra.mxu0 %v20167_v15  ;;  %v20223_v15 = vld [vmem:[#allocation5 + $0xd2c] ss:$16 sps:$4 sm:$0xff]  }
 0x502   :  { %14787 = vmatpush1.bf16.msra.mxu1 %v20170_v24  ;;  %14747 = vmatprep.subr.bf16.mxu0 %v20175_v8  ;;  %v20226_v24 = vld [vmem:[#allocation5 + $0xf2c] ss:$16 sps:$4 sm:$0xff]   ;;  %v20221_v8 = vld [vmem:[#allocation5 + $0xd28] ss:$16 sps:$4 sm:$0xff]  }
 0x503   :  { %14788 = vmatprep.subr.bf16.mxu1 %v20178_v41  ;;  %v20224_v41 = vld [vmem:[#allocation5 + $0xf28] ss:$16 sps:$4 sm:$0xff]  }
 0x505   :  { %14748 = vmatpush1.bf16.msra.mxu0 %v20173_v51  ;;  %v20229_v51 = vld [vmem:[#allocation5 + $0xd0c] ss:$16 sps:$4 sm:$0xff]  }
 0x506   :  { %14789 = vmatpush1.bf16.msra.mxu1 %v20176_v52  ;;  %14749 = vmatprep.subr.bf16.mxu0 %v20181_v32  ;;  %v20232_v52 = vld [vmem:[#allocation5 + $0xf0c] ss:$16 sps:$4 sm:$0xff]   ;;  %v20227_v32 = vld [vmem:[#allocation5 + $0xd08] ss:$16 sps:$4 sm:$0xff]  }
 0x507   :  { %14790 = vmatprep.subr.bf16.mxu1 %v20184_v48  ;;  %v20230_v48 = vld [vmem:[#allocation5 + $0xf08] ss:$16 sps:$4 sm:$0xff]  }
 0x509   :  { %14750 = vmatpush1.bf16.msra.mxu0 %v20179_v62  ;;  %v20235_v62 = vld [vmem:[#allocation5 + $0x10ec] ss:$16 sps:$4 sm:$0xff]  }
 0x50a   :  { %14791 = vmatpush1.bf16.msra.mxu1 %v20182_v37  ;;  %14751 = vmatprep.subr.bf16.mxu0 %v20187_v10  ;;  %v20238_v37 = vld [vmem:[#allocation5 + $0x12ec] ss:$16 sps:$4 sm:$0xff]   ;;  %v20233_v10 = vld [vmem:[#allocation5 + $0x10e8] ss:$16 sps:$4 sm:$0xff]  }
 0x50b   :  { %14792 = vmatprep.subr.bf16.mxu1 %v20190_v26  ;;  %v20236_v26 = vld [vmem:[#allocation5 + $0x12e8] ss:$16 sps:$4 sm:$0xff]  }
 0x50d   :  { %14752 = vmatpush2.bf16.msra.mxu0 %v20185_v54  ;;  %v20241_v54 = vld [vmem:[#allocation5 + $0x10cc] ss:$16 sps:$4 sm:$0xff]  }
 0x50e   :  { %14793 = vmatpush2.bf16.msra.mxu1 %v20188_v20  ;;  %14753 = vmatprep.subr.bf16.mxu0 %v20193_v23  ;;  %v20244_v20 = vld [vmem:[#allocation5 + $0x12cc] ss:$16 sps:$4 sm:$0xff]  }
 0x50f   :  { %14794 = vmatprep.subr.bf16.mxu1 %v20196_v27 }
 0x511   :  { %14754 = vmatpush2.bf16.msra.mxu0 %v20191_v13 }
 0x512   :  { %14795 = vmatpush2.bf16.msra.mxu1 %v20194_v59  ;;  %14755 = vmatprep.subr.bf16.mxu0 %v20199_v43  ;;  %v20239_v59 = vld [vmem:[#allocation5 + $0x10c8] ss:$16 sps:$4 sm:$0xff]  }
 0x513   :  { %14796 = vmatprep.subr.bf16.mxu1 %v20202_v44  ;;  %v20242_v43 = vld [vmem:[#allocation5 + $0x12c8] ss:$16 sps:$4 sm:$0xff]  }
 0x515   :  { %14756 = vmatpush2.bf16.msra.mxu0 %v20197_v14 }
 0x516   :  { %14797 = vmatpush2.bf16.msra.mxu1 %v20200_v19  ;;  %14757 = vmatprep.subr.bf16.mxu0 %v20205_v3  ;;  %v20247_v19 = vld [vmem:[#allocation5 + $0x10ac] ss:$16 sps:$4 sm:$0xff]  }
 0x517   :  { %14798 = vmatprep.subr.bf16.mxu1 %v20208_v12  ;;  %v20250_v3 = vld [vmem:[#allocation5 + $0x12ac] ss:$16 sps:$4 sm:$0xff]  }
 0x519   :  { %14758 = vmatpush2.bf16.msra.mxu0 %v20203_v16  ;;  %v20245_v16 = vld [vmem:[#allocation5 + $0x10a8] ss:$16 sps:$4 sm:$0xff]  }
 0x51a   :  { %14799 = vmatpush2.bf16.msra.mxu1 %v20206_v58  ;;  %14759 = vmatprep.subr.bf16.mxu0 %v20211_v1  ;;  %v20248_v58 = vld [vmem:[#allocation5 + $0x12a8] ss:$16 sps:$4 sm:$0xff]  }
 0x51b   :  { %14800 = vmatprep.subr.bf16.mxu1 %v20214_v45 }
 0x51d   :  { %14760 = vmatpush2.bf16.msra.mxu0 %v20209_v46  ;;  %v20253_v46 = vld [vmem:[#allocation5 + $0x108c] ss:$16 sps:$4 sm:$0xff]  }
 0x51e   :  { %14801 = vmatpush2.bf16.msra.mxu1 %v20212_v55  ;;  %14761 = vmatprep.subr.bf16.mxu0 %v20217_v38  ;;  %v20256_v55 = vld [vmem:[#allocation5 + $0x128c] ss:$16 sps:$4 sm:$0xff]   ;;  %v20251_v38 = vld [vmem:[#allocation5 + $0x1088] ss:$16 sps:$4 sm:$0xff]  }
 0x51f   :  { %14802 = vmatprep.subr.bf16.mxu1 %v20220_v34  ;;  %v20254_v34 = vld [vmem:[#allocation5 + $0x1288] ss:$16 sps:$4 sm:$0xff]  }
 0x521   :  { %14762 = vmatpush2.bf16.msra.mxu0 %v20215_v2  ;;  %v20257_v2 = vld [vmem:[#allocation5 + $0x1068] ss:$16 sps:$4 sm:$0xff]  }
 0x522   :  { %14803 = vmatpush2.bf16.msra.mxu1 %v20218_v42  ;;  %14763 = vmatprep.subr.bf16.mxu0 %v20223_v15  ;;  %v20260_v42 = vld [vmem:[#allocation5 + $0x1268] ss:$16 sps:$4 sm:$0xff]   ;;  %v20265_v15 = vld [vmem:[#allocation5 + $0x104c] ss:$16 sps:$4 sm:$0xff]  }
 0x523   :  { %14804 = vmatprep.subr.bf16.mxu1 %v20226_v24  ;;  %v20268_v24 = vld [vmem:[#allocation5 + $0x124c] ss:$16 sps:$4 sm:$0xff]  }
 0x525   :  { %14764 = vmatpush2.bf16.msra.mxu0 %v20221_v8  ;;  %v20263_v8 = vld [vmem:[#allocation5 + $0x1048] ss:$16 sps:$4 sm:$0xff]  }
 0x526   :  { %14805 = vmatpush2.bf16.msra.mxu1 %v20224_v41  ;;  %14765 = vmatprep.subr.bf16.mxu0 %v20229_v51  ;;  %v20266_v41 = vld [vmem:[#allocation5 + $0x1248] ss:$16 sps:$4 sm:$0xff]   ;;  %v20271_v51 = vld [vmem:[#allocation5 + $0x102c] ss:$16 sps:$4 sm:$0xff]  }
 0x527   :  { %14806 = vmatprep.subr.bf16.mxu1 %v20232_v52  ;;  %v20274_v52 = vld [vmem:[#allocation5 + $0x122c] ss:$16 sps:$4 sm:$0xff]  }
 0x529   :  { %14766 = vmatpush2.bf16.msra.mxu0 %v20227_v32  ;;  %v20269_v32 = vld [vmem:[#allocation5 + $0x1028] ss:$16 sps:$4 sm:$0xff]  }
 0x52a   :  { %14807 = vmatpush2.bf16.msra.mxu1 %v20230_v48  ;;  %14817 = vmatprep.subr.bf16.mxu0 %v20235_v62  ;;  %v20272_v48 = vld [vmem:[#allocation5 + $0x1228] ss:$16 sps:$4 sm:$0xff]   ;;  %v20277_v62 = vld [vmem:[#allocation5 + $0x100c] ss:$16 sps:$4 sm:$0xff]  }
 0x52b   :  { %14858 = vmatprep.subr.bf16.mxu1 %v20238_v37  ;;  %v20280_v37 = vld [vmem:[#allocation5 + $0x120c] ss:$16 sps:$4 sm:$0xff]  }
 0x52c   :  { %v14523_v23 = vpop.f32.mrf.mxu0  ;;  %14768 = vmatmul.mubr.bf16.vlgmr.msra.gmra.mxu0 %v21671_v29 }
 0x52d   :  { %v14564_v27 = vpop.f32.mrf.mxu1  ;;  %14809 = vmatmul.mubr.bf16.vlgmr.msra.gmra.mxu1 %v21673_v30  ;;  %14818 = vmatpush1.bf16.msra.mxu0 %v20233_v10  ;;  %v20275_v10 = vld [vmem:[#allocation5 + $0x1008] ss:$16 sps:$4 sm:$0xff]  }
 0x52e   :  { %v22155_v13 = vadd.f32 %v14564_v27, %v14523_v23  ;;  %14859 = vmatpush1.bf16.msra.mxu1 %v20236_v26  ;;  %v14525_v44 = vpop.f32.mrf.mxu0  ;;  %14819 = vmatprep.subr.bf16.mxu0 %v20241_v54  ;;  %v20278_v26 = vld [vmem:[#allocation5 + $0x1208] ss:$16 sps:$4 sm:$0xff]   ;;  %v20283_v54 = vld [vmem:[#allocation5 + $0x11ec] ss:$16 sps:$4 sm:$0xff]  }
 0x52f   :  { %v14566_v14 = vpop.f32.mrf.mxu1  ;;  %14860 = vmatprep.subr.bf16.mxu1 %v20244_v20  ;;  %14849 = vmatprep.mubr.bf16.mxu0 %v21675_v35  ;;  %v20259_v35 = vld [vmem:[#allocation5 + $0x106c] ss:$16 sps:$4 sm:$0xff]   ;;  %v20281_v23 = vld [vmem:[#allocation5 + $0x11e8] ss:$16 sps:$4 sm:$0xff]  }
 0x530   :  { %v22157_v12 = vadd.f32 %v14566_v14, %v14525_v44  ;;  %14890 = vmatprep.mubr.bf16.mxu1 %v21677_v36  ;;  %v14527_v29 = vpop.f32.mrf.mxu0  ;;  %v20262_v36 = vld [vmem:[#allocation5 + $0x126c] ss:$16 sps:$4 sm:$0xff]   ;;  %v20284_v27 = vld [vmem:[#allocation5 + $0x13e8] ss:$16 sps:$4 sm:$0xff]  }
 0x531   :  { %v14568_v30 = vpop.f32.mrf.mxu1  ;;  %14820 = vmatpush1.bf16.msra.mxu0 %v20239_v59  ;;  %v20286_v20 = vld [vmem:[#allocation5 + $0x13ec] ss:$16 sps:$4 sm:$0xff]   ;;  %v20287_v44 = vld [vmem:[#allocation5 + $0x11c8] ss:$16 sps:$4 sm:$0xff]  }
 0x532   :  { %14861 = vmatpush1.bf16.msra.mxu1 %v20242_v43  ;;  %v14528_v1 = vpop.f32.mrf.mxu0  ;;  %14821 = vmatprep.subr.bf16.mxu0 %v20247_v19  ;;  %v20289_v59 = vld [vmem:[#allocation5 + $0x11cc] ss:$16 sps:$4 sm:$0xff]   ;;  %v20290_v14 = vld [vmem:[#allocation5 + $0x13c8] ss:$16 sps:$4 sm:$0xff]  }
 0x533   :  { %v14569_v45 = vpop.f32.mrf.mxu1  ;;  %14862 = vmatprep.subr.bf16.mxu1 %v20250_v3  ;;  %v20292_v43 = vld [vmem:[#allocation5 + $0x13cc] ss:$16 sps:$4 sm:$0xff]   ;;  %v20293_v29 = vld [vmem:[#allocation5 + $0x11a8] ss:$16 sps:$4 sm:$0xff]  }
 0x534   :  { %v20295_v19 = vld [vmem:[#allocation5 + $0x11ac] ss:$16 sps:$4 sm:$0xff]   ;;  %v20296_v30 = vld [vmem:[#allocation5 + $0x13a8] ss:$16 sps:$4 sm:$0xff]  }
 0x535   :  { %14822 = vmatpush1.bf16.msra.mxu0 %v20245_v16  ;;  %v20298_v3 = vld [vmem:[#allocation5 + $0x13ac] ss:$16 sps:$4 sm:$0xff]   ;;  %v20299_v1 = vld [vmem:[#allocation5 + $0x1188] ss:$16 sps:$4 sm:$0xff]  }
 0x536   :  { %14863 = vmatpush1.bf16.msra.mxu1 %v20248_v58  ;;  %14823 = vmatprep.subr.bf16.mxu0 %v20253_v46  ;;  %v20301_v16 = vld [vmem:[#allocation5 + $0x118c] ss:$16 sps:$4 sm:$0xff]   ;;  %v20302_v45 = vld [vmem:[#allocation5 + $0x1388] ss:$16 sps:$4 sm:$0xff]  }
 0x537   :  { %14864 = vmatprep.subr.bf16.mxu1 %v20256_v55  ;;  %v20304_v58 = vld [vmem:[#allocation5 + $0x138c] ss:$16 sps:$4 sm:$0xff]  }
 0x538   :  { %v20307_v46 = vld [vmem:[#allocation5 + $0x116c] ss:$16 sps:$4 sm:$0xff]  }
 0x539   :  { %14824 = vmatpush1.bf16.msra.mxu0 %v20251_v38  ;;  %v20310_v55 = vld [vmem:[#allocation5 + $0x136c] ss:$16 sps:$4 sm:$0xff]   ;;  %v20305_v38 = vld [vmem:[#allocation5 + $0x1168] ss:$16 sps:$4 sm:$0xff]  }
 0x53a   :  { %14865 = vmatpush1.bf16.msra.mxu1 %v20254_v34  ;;  %14825 = vmatprep.subr.bf16.mxu0 %v20259_v35  ;;  %v20308_v34 = vld [vmem:[#allocation5 + $0x1368] ss:$16 sps:$4 sm:$0xff]   ;;  %v20313_v35 = vld [vmem:[#allocation5 + $0x114c] ss:$16 sps:$4 sm:$0xff]  }
 0x53b   :  { %14866 = vmatprep.subr.bf16.mxu1 %v20262_v36  ;;  %v20316_v36 = vld [vmem:[#allocation5 + $0x134c] ss:$16 sps:$4 sm:$0xff]  }
 0x53d   :  { %14826 = vmatpush1.bf16.msra.mxu0 %v20257_v2  ;;  %v20311_v2 = vld [vmem:[#allocation5 + $0x1148] ss:$16 sps:$4 sm:$0xff]  }
 0x53e   :  { %14867 = vmatpush1.bf16.msra.mxu1 %v20260_v42  ;;  %14827 = vmatprep.subr.bf16.mxu0 %v20265_v15  ;;  %v20314_v42 = vld [vmem:[#allocation5 + $0x1348] ss:$16 sps:$4 sm:$0xff]   ;;  %v20319_v15 = vld [vmem:[#allocation5 + $0x112c] ss:$16 sps:$4 sm:$0xff]  }
 0x53f   :  { %14868 = vmatprep.subr.bf16.mxu1 %v20268_v24  ;;  %v20322_v24 = vld [vmem:[#allocation5 + $0x132c] ss:$16 sps:$4 sm:$0xff]  }
 0x541   :  { %14828 = vmatpush1.bf16.msra.mxu0 %v20263_v8  ;;  %v20317_v8 = vld [vmem:[#allocation5 + $0x1128] ss:$16 sps:$4 sm:$0xff]  }
 0x542   :  { %14869 = vmatpush1.bf16.msra.mxu1 %v20266_v41  ;;  %14829 = vmatprep.subr.bf16.mxu0 %v20271_v51  ;;  %v20320_v41 = vld [vmem:[#allocation5 + $0x1328] ss:$16 sps:$4 sm:$0xff]   ;;  %v20325_v51 = vld [vmem:[#allocation5 + $0x110c] ss:$16 sps:$4 sm:$0xff]  }
 0x543   :  { %14870 = vmatprep.subr.bf16.mxu1 %v20274_v52  ;;  %v20328_v52 = vld [vmem:[#allocation5 + $0x130c] ss:$16 sps:$4 sm:$0xff]  }
 0x545   :  { %14830 = vmatpush1.bf16.msra.mxu0 %v20269_v32  ;;  %v20323_v32 = vld [vmem:[#allocation5 + $0x1108] ss:$16 sps:$4 sm:$0xff]  }
 0x546   :  { %14871 = vmatpush1.bf16.msra.mxu1 %v20272_v48  ;;  %14831 = vmatprep.subr.bf16.mxu0 %v20277_v62  ;;  %v20326_v48 = vld [vmem:[#allocation5 + $0x1308] ss:$16 sps:$4 sm:$0xff]   ;;  %v20331_v62 = vld [vmem:[#allocation5 + $0x14ec] ss:$16 sps:$4 sm:$0xff]  }
 0x547   :  { %14872 = vmatprep.subr.bf16.mxu1 %v20280_v37  ;;  %v20334_v37 = vld [vmem:[#allocation5 + $0x16ec] ss:$16 sps:$4 sm:$0xff]  }
 0x549   :  { %14832 = vmatpush1.bf16.msra.mxu0 %v20275_v10  ;;  %v20329_v10 = vld [vmem:[#allocation5 + $0x14e8] ss:$16 sps:$4 sm:$0xff]  }
 0x54a   :  { %14873 = vmatpush1.bf16.msra.mxu1 %v20278_v26  ;;  %14833 = vmatprep.subr.bf16.mxu0 %v20283_v54  ;;  %v20332_v26 = vld [vmem:[#allocation5 + $0x16e8] ss:$16 sps:$4 sm:$0xff]   ;;  %v20337_v54 = vld [vmem:[#allocation5 + $0x14cc] ss:$16 sps:$4 sm:$0xff]  }
 0x54b   :  { %14874 = vmatprep.subr.bf16.mxu1 %v20286_v20  ;;  %v20340_v20 = vld [vmem:[#allocation5 + $0x16cc] ss:$16 sps:$4 sm:$0xff]  }
 0x54d   :  { %14834 = vmatpush2.bf16.msra.mxu0 %v20281_v23 }
 0x54e   :  { %14875 = vmatpush2.bf16.msra.mxu1 %v20284_v27  ;;  %14835 = vmatprep.subr.bf16.mxu0 %v20289_v59 }
 0x54f   :  { %14876 = vmatprep.subr.bf16.mxu1 %v20292_v43  ;;  %v20335_v43 = vld [vmem:[#allocation5 + $0x14c8] ss:$16 sps:$4 sm:$0xff]  }
 0x551   :  { %14836 = vmatpush2.bf16.msra.mxu0 %v20287_v44  ;;  %v20338_v44 = vld [vmem:[#allocation5 + $0x16c8] ss:$16 sps:$4 sm:$0xff]  }
 0x552   :  { %14877 = vmatpush2.bf16.msra.mxu1 %v20290_v14  ;;  %14837 = vmatprep.subr.bf16.mxu0 %v20295_v19 }
 0x553   :  { %14878 = vmatprep.subr.bf16.mxu1 %v20298_v3  ;;  %v20343_v3 = vld [vmem:[#allocation5 + $0x14ac] ss:$16 sps:$4 sm:$0xff]  }
 0x555   :  { %14838 = vmatpush2.bf16.msra.mxu0 %v20293_v29  ;;  %v20346_v29 = vld [vmem:[#allocation5 + $0x16ac] ss:$16 sps:$4 sm:$0xff]  }
 0x556   :  { %14879 = vmatpush2.bf16.msra.mxu1 %v20296_v30  ;;  %14839 = vmatprep.subr.bf16.mxu0 %v20301_v16 }
 0x557   :  { %14880 = vmatprep.subr.bf16.mxu1 %v20304_v58  ;;  %v20341_v58 = vld [vmem:[#allocation5 + $0x14a8] ss:$16 sps:$4 sm:$0xff]  }
 0x559   :  { %14840 = vmatpush2.bf16.msra.mxu0 %v20299_v1  ;;  %v20344_v1 = vld [vmem:[#allocation5 + $0x16a8] ss:$16 sps:$4 sm:$0xff]  }
 0x55a   :  { %14881 = vmatpush2.bf16.msra.mxu1 %v20302_v45  ;;  %14841 = vmatprep.subr.bf16.mxu0 %v20307_v46 }
 0x55b   :  { %14882 = vmatprep.subr.bf16.mxu1 %v20310_v55  ;;  %v20349_v55 = vld [vmem:[#allocation5 + $0x148c] ss:$16 sps:$4 sm:$0xff]  }
 0x55d   :  { %14842 = vmatpush2.bf16.msra.mxu0 %v20305_v38  ;;  %v20352_v38 = vld [vmem:[#allocation5 + $0x168c] ss:$16 sps:$4 sm:$0xff]  }
 0x55e   :  { %14883 = vmatpush2.bf16.msra.mxu1 %v20308_v34  ;;  %14843 = vmatprep.subr.bf16.mxu0 %v20313_v35  ;;  %v20358_v34 = vld [vmem:[#allocation5 + $0x166c] ss:$16 sps:$4 sm:$0xff]   ;;  %v20353_v35 = vld [vmem:[#allocation5 + $0x1468] ss:$16 sps:$4 sm:$0xff]  }
 0x55f   :  { %14884 = vmatprep.subr.bf16.mxu1 %v20316_v36  ;;  %v20356_v36 = vld [vmem:[#allocation5 + $0x1668] ss:$16 sps:$4 sm:$0xff]  }
 0x561   :  { %14844 = vmatpush2.bf16.msra.mxu0 %v20311_v2  ;;  %v20361_v2 = vld [vmem:[#allocation5 + $0x144c] ss:$16 sps:$4 sm:$0xff]  }
 0x562   :  { %14885 = vmatpush2.bf16.msra.mxu1 %v20314_v42  ;;  %14845 = vmatprep.subr.bf16.mxu0 %v20319_v15  ;;  %v20364_v42 = vld [vmem:[#allocation5 + $0x164c] ss:$16 sps:$4 sm:$0xff]   ;;  %v20359_v15 = vld [vmem:[#allocation5 + $0x1448] ss:$16 sps:$4 sm:$0xff]  }
 0x563   :  { %14886 = vmatprep.subr.bf16.mxu1 %v20322_v24  ;;  %v20362_v24 = vld [vmem:[#allocation5 + $0x1648] ss:$16 sps:$4 sm:$0xff]  }
 0x565   :  { %14846 = vmatpush2.bf16.msra.mxu0 %v20317_v8  ;;  %v20367_v8 = vld [vmem:[#allocation5 + $0x142c] ss:$16 sps:$4 sm:$0xff]  }
 0x566   :  { %14887 = vmatpush2.bf16.msra.mxu1 %v20320_v41  ;;  %14847 = vmatprep.subr.bf16.mxu0 %v20325_v51  ;;  %v20370_v41 = vld [vmem:[#allocation5 + $0x162c] ss:$16 sps:$4 sm:$0xff]   ;;  %v20365_v51 = vld [vmem:[#allocation5 + $0x1428] ss:$16 sps:$4 sm:$0xff]  }
 0x567   :  { %14888 = vmatprep.subr.bf16.mxu1 %v20328_v52  ;;  %v20368_v52 = vld [vmem:[#allocation5 + $0x1628] ss:$16 sps:$4 sm:$0xff]  }
 0x569   :  { %14848 = vmatpush2.bf16.msra.mxu0 %v20323_v32  ;;  %v20373_v32 = vld [vmem:[#allocation5 + $0x140c] ss:$16 sps:$4 sm:$0xff]  }
 0x56a   :  { %14889 = vmatpush2.bf16.msra.mxu1 %v20326_v48  ;;  %14899 = vmatprep.subr.bf16.mxu0 %v20331_v62  ;;  %v20376_v48 = vld [vmem:[#allocation5 + $0x160c] ss:$16 sps:$4 sm:$0xff]   ;;  %v20371_v62 = vld [vmem:[#allocation5 + $0x1408] ss:$16 sps:$4 sm:$0xff]  }
 0x56b   :  { %14940 = vmatprep.subr.bf16.mxu1 %v20334_v37  ;;  %v20374_v37 = vld [vmem:[#allocation5 + $0x1608] ss:$16 sps:$4 sm:$0xff]  }
 0x56c   :  { %v14605_v23 = vpop.f32.mrf.mxu0  ;;  %14850 = vmatmul.mubr.bf16.vlgmr.msra.gmra.mxu0 %v21707_v5 }
 0x56d   :  { %v14646_v27 = vpop.f32.mrf.mxu1  ;;  %14891 = vmatmul.mubr.bf16.vlgmr.msra.gmra.mxu1 %v21709_v9  ;;  %v14606_v59 = vadd.f32 %v14605_v23, %v22155_v13  ;;  %14900 = vmatpush1.bf16.msra.mxu0 %v20329_v10  ;;  %v20379_v10 = vld [vmem:[#allocation5 + $0x15ec] ss:$16 sps:$4 sm:$0xff]  }
 0x56e   :  { %14941 = vmatpush1.bf16.msra.mxu1 %v20332_v26  ;;  %v14607_v14 = vpop.f32.mrf.mxu0  ;;  %14901 = vmatprep.subr.bf16.mxu0 %v20337_v54  ;;  %v20382_v26 = vld [vmem:[#allocation5 + $0x17ec] ss:$16 sps:$4 sm:$0xff]   ;;  %v20377_v54 = vld [vmem:[#allocation5 + $0x15e8] ss:$16 sps:$4 sm:$0xff]  }
 0x56f   :  { %v14648_v19 = vpop.f32.mrf.mxu1  ;;  %14942 = vmatprep.subr.bf16.mxu1 %v20340_v20  ;;  %v22164_v30 = vadd.f32 %v14646_v27, %v14606_v59  ;;  %v14608_v16 = vadd.f32 %v14607_v14, %v22157_v12  ;;  %14931 = vmatprep.mubr.bf16.mxu0 %v21711_v49  ;;  %v20347_v12 = vld [vmem:[#allocation5 + $0x1488] ss:$16 sps:$4 sm:$0xff]   ;;  %v20385_v23 = vld [vmem:[#allocation5 + $0x15cc] ss:$16 sps:$4 sm:$0xff]  }
 0x570   :  { %14972 = vmatprep.mubr.bf16.mxu1 %v21713_v50  ;;  %v14609_v5 = vpop.f32.mrf.mxu0  ;;  %v20350_v49 = vld [vmem:[#allocation5 + $0x1688] ss:$16 sps:$4 sm:$0xff]   ;;  %v20355_v50 = vld [vmem:[#allocation5 + $0x146c] ss:$16 sps:$4 sm:$0xff]  }
 0x571   :  { %v14650_v9 = vpop.f32.mrf.mxu1  ;;  %v22169_v13 = vadd.f32 %v14648_v19, %v14608_v16  ;;  %14902 = vmatpush1.bf16.msra.mxu0 %v20335_v43  ;;  %v20380_v20 = vld [vmem:[#allocation5 + $0x17e8] ss:$16 sps:$4 sm:$0xff]   ;;  %v20388_v27 = vld [vmem:[#allocation5 + $0x17cc] ss:$16 sps:$4 sm:$0xff]  }
 0x572   :  { %14943 = vmatpush1.bf16.msra.mxu1 %v20338_v44  ;;  %v14610_v45 = vpop.f32.mrf.mxu0  ;;  %14903 = vmatprep.subr.bf16.mxu0 %v20343_v3  ;;  %v20383_v59 = vld [vmem:[#allocation5 + $0x15c8] ss:$16 sps:$4 sm:$0xff]   ;;  %v20391_v44 = vld [vmem:[#allocation5 + $0x15ac] ss:$16 sps:$4 sm:$0xff]  }
 0x573   :  { %v14651_v46 = vpop.f32.mrf.mxu1  ;;  %14944 = vmatprep.subr.bf16.mxu1 %v20346_v29  ;;  %v20386_v43 = vld [vmem:[#allocation5 + $0x17c8] ss:$16 sps:$4 sm:$0xff]   ;;  %v20394_v14 = vld [vmem:[#allocation5 + $0x17ac] ss:$16 sps:$4 sm:$0xff]  }
 0x574   :  { %v20389_v19 = vld [vmem:[#allocation5 + $0x15a8] ss:$16 sps:$4 sm:$0xff]   ;;  %v20397_v29 = vld [vmem:[#allocation5 + $0x158c] ss:$16 sps:$4 sm:$0xff]  }
 0x575   :  { %14904 = vmatpush1.bf16.msra.mxu0 %v20341_v58  ;;  %v20392_v3 = vld [vmem:[#allocation5 + $0x17a8] ss:$16 sps:$4 sm:$0xff]   ;;  %v20400_v16 = vld [vmem:[#allocation5 + $0x178c] ss:$16 sps:$4 sm:$0xff]  }
 0x576   :  { %14945 = vmatpush1.bf16.msra.mxu1 %v20344_v1  ;;  %14905 = vmatprep.subr.bf16.mxu0 %v20349_v55  ;;  %v20395_v5 = vld [vmem:[#allocation5 + $0x1588] ss:$16 sps:$4 sm:$0xff]   ;;  %v20403_v58 = vld [vmem:[#allocation5 + $0x156c] ss:$16 sps:$4 sm:$0xff]  }
 0x577   :  { %14946 = vmatprep.subr.bf16.mxu1 %v20352_v38  ;;  %v20398_v9 = vld [vmem:[#allocation5 + $0x1788] ss:$16 sps:$4 sm:$0xff]   ;;  %v20406_v1 = vld [vmem:[#allocation5 + $0x176c] ss:$16 sps:$4 sm:$0xff]  }
 0x578   :  { %v20401_v45 = vld [vmem:[#allocation5 + $0x1568] ss:$16 sps:$4 sm:$0xff]   ;;  %v20409_v55 = vld [vmem:[#allocation5 + $0x154c] ss:$16 sps:$4 sm:$0xff]  }
 0x579   :  { %14906 = vmatpush1.bf16.msra.mxu0 %v20347_v12  ;;  %v20404_v46 = vld [vmem:[#allocation5 + $0x1768] ss:$16 sps:$4 sm:$0xff]   ;;  %v20412_v38 = vld [vmem:[#allocation5 + $0x174c] ss:$16 sps:$4 sm:$0xff]  }
 0x57a   :  { %14947 = vmatpush1.bf16.msra.mxu1 %v20350_v49  ;;  %14907 = vmatprep.subr.bf16.mxu0 %v20355_v50  ;;  %v20407_v12 = vld [vmem:[#allocation5 + $0x1548] ss:$16 sps:$4 sm:$0xff]   ;;  %v20415_v50 = vld [vmem:[#allocation5 + $0x152c] ss:$16 sps:$4 sm:$0xff]  }
 0x57b   :  { %14948 = vmatprep.subr.bf16.mxu1 %v20358_v34  ;;  %v20410_v49 = vld [vmem:[#allocation5 + $0x1748] ss:$16 sps:$4 sm:$0xff]   ;;  %v20418_v34 = vld [vmem:[#allocation5 + $0x172c] ss:$16 sps:$4 sm:$0xff]  }
 0x57d   :  { %14908 = vmatpush1.bf16.msra.mxu0 %v20353_v35  ;;  %v20413_v35 = vld [vmem:[#allocation5 + $0x1528] ss:$16 sps:$4 sm:$0xff]  }
 0x57e   :  { %14949 = vmatpush1.bf16.msra.mxu1 %v20356_v36  ;;  %14909 = vmatprep.subr.bf16.mxu0 %v20361_v2  ;;  %v20416_v36 = vld [vmem:[#allocation5 + $0x1728] ss:$16 sps:$4 sm:$0xff]   ;;  %v20421_v2 = vld [vmem:[#allocation5 + $0x150c] ss:$16 sps:$4 sm:$0xff]  }
 0x57f   :  { %14950 = vmatprep.subr.bf16.mxu1 %v20364_v42  ;;  %v20424_v42 = vld [vmem:[#allocation5 + $0x170c] ss:$16 sps:$4 sm:$0xff]  }
 0x581   :  { %14910 = vmatpush1.bf16.msra.mxu0 %v20359_v15  ;;  %v20419_v15 = vld [vmem:[#allocation5 + $0x1508] ss:$16 sps:$4 sm:$0xff]  }
 0x582   :  { %14951 = vmatpush1.bf16.msra.mxu1 %v20362_v24  ;;  %14911 = vmatprep.subr.bf16.mxu0 %v20367_v8  ;;  %v20422_v24 = vld [vmem:[#allocation5 + $0x1708] ss:$16 sps:$4 sm:$0xff]   ;;  %v20427_v8 = vld [vmem:[#allocation5 + $0x18ec] ss:$16 sps:$4 sm:$0xff]  }
 0x583   :  { %14952 = vmatprep.subr.bf16.mxu1 %v20370_v41  ;;  %v20430_v41 = vld [vmem:[#allocation5 + $0x1aec] ss:$16 sps:$4 sm:$0xff]  }
 0x585   :  { %14912 = vmatpush1.bf16.msra.mxu0 %v20365_v51  ;;  %v20425_v51 = vld [vmem:[#allocation5 + $0x18e8] ss:$16 sps:$4 sm:$0xff]  }
 0x586   :  { %14953 = vmatpush1.bf16.msra.mxu1 %v20368_v52  ;;  %14913 = vmatprep.subr.bf16.mxu0 %v20373_v32  ;;  %v20428_v52 = vld [vmem:[#allocation5 + $0x1ae8] ss:$16 sps:$4 sm:$0xff]   ;;  %v20433_v32 = vld [vmem:[#allocation5 + $0x18cc] ss:$16 sps:$4 sm:$0xff]  }
 0x587   :  { %14954 = vmatprep.subr.bf16.mxu1 %v20376_v48  ;;  %v20436_v48 = vld [vmem:[#allocation5 + $0x1acc] ss:$16 sps:$4 sm:$0xff]  }
 0x589   :  { %14914 = vmatpush1.bf16.msra.mxu0 %v20371_v62 }
 0x58a   :  { %14955 = vmatpush1.bf16.msra.mxu1 %v20374_v37  ;;  %14915 = vmatprep.subr.bf16.mxu0 %v20379_v10 }
 0x58b   :  { %14956 = vmatprep.subr.bf16.mxu1 %v20382_v26  ;;  %v20431_v26 = vld [vmem:[#allocation5 + $0x18c8] ss:$16 sps:$4 sm:$0xff]  }
 0x58d   :  { %14916 = vmatpush2.bf16.msra.mxu0 %v20377_v54  ;;  %v20434_v54 = vld [vmem:[#allocation5 + $0x1ac8] ss:$16 sps:$4 sm:$0xff]  }
 0x58e   :  { %14957 = vmatpush2.bf16.msra.mxu1 %v20380_v20  ;;  %14917 = vmatprep.subr.bf16.mxu0 %v20385_v23 }
 0x58f   :  { %14958 = vmatprep.subr.bf16.mxu1 %v20388_v27  ;;  %v20439_v27 = vld [vmem:[#allocation5 + $0x18ac] ss:$16 sps:$4 sm:$0xff]  }
 0x591   :  { %14918 = vmatpush2.bf16.msra.mxu0 %v20383_v59  ;;  %v20442_v59 = vld [vmem:[#allocation5 + $0x1aac] ss:$16 sps:$4 sm:$0xff]  }
 0x592   :  { %14959 = vmatpush2.bf16.msra.mxu1 %v20386_v43  ;;  %14919 = vmatprep.subr.bf16.mxu0 %v20391_v44 }
 0x593   :  { %14960 = vmatprep.subr.bf16.mxu1 %v20394_v14  ;;  %v20437_v14 = vld [vmem:[#allocation5 + $0x18a8] ss:$16 sps:$4 sm:$0xff]  }
 0x595   :  { %14920 = vmatpush2.bf16.msra.mxu0 %v20389_v19  ;;  %v20440_v19 = vld [vmem:[#allocation5 + $0x1aa8] ss:$16 sps:$4 sm:$0xff]  }
 0x596   :  { %14961 = vmatpush2.bf16.msra.mxu1 %v20392_v3  ;;  %14921 = vmatprep.subr.bf16.mxu0 %v20397_v29 }
 0x597   :  { %14962 = vmatprep.subr.bf16.mxu1 %v20400_v16  ;;  %v20445_v16 = vld [vmem:[#allocation5 + $0x188c] ss:$16 sps:$4 sm:$0xff]  }
 0x599   :  { %14922 = vmatpush2.bf16.msra.mxu0 %v20395_v5  ;;  %v20448_v5 = vld [vmem:[#allocation5 + $0x1a8c] ss:$16 sps:$4 sm:$0xff]  }
 0x59a   :  { %14963 = vmatpush2.bf16.msra.mxu1 %v20398_v9  ;;  %14923 = vmatprep.subr.bf16.mxu0 %v20403_v58  ;;  %v20454_v9 = vld [vmem:[#allocation5 + $0x1a6c] ss:$16 sps:$4 sm:$0xff]   ;;  %v20449_v58 = vld [vmem:[#allocation5 + $0x1868] ss:$16 sps:$4 sm:$0xff]  }
 0x59b   :  { %14964 = vmatprep.subr.bf16.mxu1 %v20406_v1  ;;  %v20452_v1 = vld [vmem:[#allocation5 + $0x1a68] ss:$16 sps:$4 sm:$0xff]  }
 0x59d   :  { %14924 = vmatpush2.bf16.msra.mxu0 %v20401_v45  ;;  %v20457_v45 = vld [vmem:[#allocation5 + $0x184c] ss:$16 sps:$4 sm:$0xff]  }
 0x59e   :  { %14965 = vmatpush2.bf16.msra.mxu1 %v20404_v46  ;;  %14925 = vmatprep.subr.bf16.mxu0 %v20409_v55  ;;  %v20460_v46 = vld [vmem:[#allocation5 + $0x1a4c] ss:$16 sps:$4 sm:$0xff]   ;;  %v20455_v55 = vld [vmem:[#allocation5 + $0x1848] ss:$16 sps:$4 sm:$0xff]  }
 0x59f   :  { %14966 = vmatprep.subr.bf16.mxu1 %v20412_v38  ;;  %v20458_v38 = vld [vmem:[#allocation5 + $0x1a48] ss:$16 sps:$4 sm:$0xff]  }
 0x5a1   :  { %14926 = vmatpush2.bf16.msra.mxu0 %v20407_v12  ;;  %v20463_v12 = vld [vmem:[#allocation5 + $0x182c] ss:$16 sps:$4 sm:$0xff]  }
 0x5a2   :  { %14967 = vmatpush2.bf16.msra.mxu1 %v20410_v49  ;;  %14927 = vmatprep.subr.bf16.mxu0 %v20415_v50  ;;  %v20466_v49 = vld [vmem:[#allocation5 + $0x1a2c] ss:$16 sps:$4 sm:$0xff]   ;;  %v20461_v50 = vld [vmem:[#allocation5 + $0x1828] ss:$16 sps:$4 sm:$0xff]  }
 0x5a3   :  { %14968 = vmatprep.subr.bf16.mxu1 %v20418_v34  ;;  %v20464_v34 = vld [vmem:[#allocation5 + $0x1a28] ss:$16 sps:$4 sm:$0xff]  }
 0x5a5   :  { %14928 = vmatpush2.bf16.msra.mxu0 %v20413_v35  ;;  %v20469_v35 = vld [vmem:[#allocation5 + $0x180c] ss:$16 sps:$4 sm:$0xff]  }
 0x5a6   :  { %14969 = vmatpush2.bf16.msra.mxu1 %v20416_v36  ;;  %14929 = vmatprep.subr.bf16.mxu0 %v20421_v2  ;;  %v20472_v36 = vld [vmem:[#allocation5 + $0x1a0c] ss:$16 sps:$4 sm:$0xff]   ;;  %v20467_v2 = vld [vmem:[#allocation5 + $0x1808] ss:$16 sps:$4 sm:$0xff]  }
 0x5a7   :  { %14970 = vmatprep.subr.bf16.mxu1 %v20424_v42  ;;  %v20470_v42 = vld [vmem:[#allocation5 + $0x1a08] ss:$16 sps:$4 sm:$0xff]  }
 0x5a9   :  { %14930 = vmatpush2.bf16.msra.mxu0 %v20419_v15  ;;  %v20475_v15 = vld [vmem:[#allocation5 + $0x19ec] ss:$16 sps:$4 sm:$0xff]  }
 0x5aa   :  { %14971 = vmatpush2.bf16.msra.mxu1 %v20422_v24  ;;  %14981 = vmatprep.subr.bf16.mxu0 %v20427_v8  ;;  %v20478_v24 = vld [vmem:[#allocation5 + $0x1bec] ss:$16 sps:$4 sm:$0xff]   ;;  %v20473_v8 = vld [vmem:[#allocation5 + $0x19e8] ss:$16 sps:$4 sm:$0xff]  }
 0x5ab   :  { %15022 = vmatprep.subr.bf16.mxu1 %v20430_v41  ;;  %v20476_v41 = vld [vmem:[#allocation5 + $0x1be8] ss:$16 sps:$4 sm:$0xff]  }
 0x5ac   :  { %v14687_v62 = vpop.f32.mrf.mxu0  ;;  %14932 = vmatmul.mubr.bf16.vlgmr.msra.gmra.mxu0 %v21745_v25 }
 0x5ad   :  { %v14728_v37 = vpop.f32.mrf.mxu1  ;;  %14973 = vmatmul.mubr.bf16.vlgmr.msra.gmra.mxu1 %v21747_v28  ;;  %v14688_v10 = vadd.f32 %v14687_v62, %v22164_v30  ;;  %14982 = vmatpush1.bf16.msra.mxu0 %v20425_v51  ;;  %v20481_v51 = vld [vmem:[#allocation5 + $0x19cc] ss:$16 sps:$4 sm:$0xff]  }
 0x5ae   :  { %15023 = vmatpush1.bf16.msra.mxu1 %v20428_v52  ;;  %v14689_v20 = vpop.f32.mrf.mxu0  ;;  %14983 = vmatprep.subr.bf16.mxu0 %v20433_v32  ;;  %v20484_v52 = vld [vmem:[#allocation5 + $0x1bcc] ss:$16 sps:$4 sm:$0xff]   ;;  %v20479_v32 = vld [vmem:[#allocation5 + $0x19c8] ss:$16 sps:$4 sm:$0xff]  }
 0x5af   :  { %v14730_v23 = vpop.f32.mrf.mxu1  ;;  %15024 = vmatprep.subr.bf16.mxu1 %v20436_v48  ;;  %v22174_v43 = vadd.f32 %v14728_v37, %v14688_v10  ;;  %v14690_v44 = vadd.f32 %v14689_v20, %v22169_v13  ;;  %15013 = vmatprep.mubr.bf16.mxu0 %v21749_v21  ;;  %v20443_v13 = vld [vmem:[#allocation5 + $0x1888] ss:$16 sps:$4 sm:$0xff]   ;;  %v20487_v62 = vld [vmem:[#allocation5 + $0x19ac] ss:$16 sps:$4 sm:$0xff]  }
 0x5b0   :  { %15054 = vmatprep.mubr.bf16.mxu1 %v21751_v22  ;;  %v14691_v25 = vpop.f32.mrf.mxu0  ;;  %v20446_v21 = vld [vmem:[#allocation5 + $0x1a88] ss:$16 sps:$4 sm:$0xff]   ;;  %v20451_v22 = vld [vmem:[#allocation5 + $0x186c] ss:$16 sps:$4 sm:$0xff]  }
 0x5b1   :  { %v14732_v28 = vpop.f32.mrf.mxu1  ;;  %v22179_v30 = vadd.f32 %v14730_v23, %v14690_v44  ;;  %14984 = vmatpush1.bf16.msra.mxu0 %v20431_v26  ;;  %v20482_v48 = vld [vmem:[#allocation5 + $0x1bc8] ss:$16 sps:$4 sm:$0xff]   ;;  %v20490_v37 = vld [vmem:[#allocation5 + $0x1bac] ss:$16 sps:$4 sm:$0xff]  }
 0x5b2   :  { %15025 = vmatpush1.bf16.msra.mxu1 %v20434_v54  ;;  %v14692_v3 = vpop.f32.mrf.mxu0  ;;  %14985 = vmatprep.subr.bf16.mxu0 %v20439_v27  ;;  %v20485_v10 = vld [vmem:[#allocation5 + $0x19a8] ss:$16 sps:$4 sm:$0xff]   ;;  %v20493_v54 = vld [vmem:[#allocation5 + $0x198c] ss:$16 sps:$4 sm:$0xff]  }
 0x5b3   :  { %v14733_v29 = vpop.f32.mrf.mxu1  ;;  %15026 = vmatprep.subr.bf16.mxu1 %v20442_v59  ;;  %v20488_v26 = vld [vmem:[#allocation5 + $0x1ba8] ss:$16 sps:$4 sm:$0xff]   ;;  %v20496_v20 = vld [vmem:[#allocation5 + $0x1b8c] ss:$16 sps:$4 sm:$0xff]  }
 0x5b4   :  { %v20491_v23 = vld [vmem:[#allocation5 + $0x1988] ss:$16 sps:$4 sm:$0xff]   ;;  %v20499_v59 = vld [vmem:[#allocation5 + $0x196c] ss:$16 sps:$4 sm:$0xff]  }
 0x5b5   :  { %14986 = vmatpush1.bf16.msra.mxu0 %v20437_v14  ;;  %v20494_v27 = vld [vmem:[#allocation5 + $0x1b88] ss:$16 sps:$4 sm:$0xff]   ;;  %v20502_v44 = vld [vmem:[#allocation5 + $0x1b6c] ss:$16 sps:$4 sm:$0xff]  }
 0x5b6   :  { %15027 = vmatpush1.bf16.msra.mxu1 %v20440_v19  ;;  %14987 = vmatprep.subr.bf16.mxu0 %v20445_v16  ;;  %v20497_v25 = vld [vmem:[#allocation5 + $0x1968] ss:$16 sps:$4 sm:$0xff]   ;;  %v20505_v14 = vld [vmem:[#allocation5 + $0x194c] ss:$16 sps:$4 sm:$0xff]  }
 0x5b7   :  { %15028 = vmatprep.subr.bf16.mxu1 %v20448_v5  ;;  %v20500_v28 = vld [vmem:[#allocation5 + $0x1b68] ss:$16 sps:$4 sm:$0xff]   ;;  %v20508_v19 = vld [vmem:[#allocation5 + $0x1b4c] ss:$16 sps:$4 sm:$0xff]  }
 0x5b8   :  { %v20503_v3 = vld [vmem:[#allocation5 + $0x1948] ss:$16 sps:$4 sm:$0xff]   ;;  %v20511_v16 = vld [vmem:[#allocation5 + $0x192c] ss:$16 sps:$4 sm:$0xff]  }
 0x5b9   :  { %14988 = vmatpush1.bf16.msra.mxu0 %v20443_v13  ;;  %v20506_v29 = vld [vmem:[#allocation5 + $0x1b48] ss:$16 sps:$4 sm:$0xff]   ;;  %v20514_v5 = vld [vmem:[#allocation5 + $0x1b2c] ss:$16 sps:$4 sm:$0xff]  }
 0x5ba   :  { %15029 = vmatpush1.bf16.msra.mxu1 %v20446_v21  ;;  %14989 = vmatprep.subr.bf16.mxu0 %v20451_v22  ;;  %v20509_v13 = vld [vmem:[#allocation5 + $0x1928] ss:$16 sps:$4 sm:$0xff]   ;;  %v20517_v22 = vld [vmem:[#allocation5 + $0x190c] ss:$16 sps:$4 sm:$0xff]  }
 0x5bb   :  { %15030 = vmatprep.subr.bf16.mxu1 %v20454_v9  ;;  %v20512_v21 = vld [vmem:[#allocation5 + $0x1b28] ss:$16 sps:$4 sm:$0xff]   ;;  %v20520_v9 = vld [vmem:[#allocation5 + $0x1b0c] ss:$16 sps:$4 sm:$0xff]  }
 0x5bd   :  { %14990 = vmatpush1.bf16.msra.mxu0 %v20449_v58  ;;  %v20515_v58 = vld [vmem:[#allocation5 + $0x1908] ss:$16 sps:$4 sm:$0xff]  }
 0x5be   :  { %15031 = vmatpush1.bf16.msra.mxu1 %v20452_v1  ;;  %14991 = vmatprep.subr.bf16.mxu0 %v20457_v45  ;;  %v20518_v1 = vld [vmem:[#allocation5 + $0x1b08] ss:$16 sps:$4 sm:$0xff]   ;;  %v20523_v45 = vld [vmem:[#allocation5 + $0x1cec] ss:$16 sps:$4 sm:$0xff]  }
 0x5bf   :  { %15032 = vmatprep.subr.bf16.mxu1 %v20460_v46  ;;  %v20526_v46 = vld [vmem:[#allocation5 + $0x1eec] ss:$16 sps:$4 sm:$0xff]  }
 0x5c1   :  { %14992 = vmatpush1.bf16.msra.mxu0 %v20455_v55  ;;  %v20521_v55 = vld [vmem:[#allocation5 + $0x1ce8] ss:$16 sps:$4 sm:$0xff]  }
 0x5c2   :  { %15033 = vmatpush1.bf16.msra.mxu1 %v20458_v38  ;;  %14993 = vmatprep.subr.bf16.mxu0 %v20463_v12  ;;  %v20524_v38 = vld [vmem:[#allocation5 + $0x1ee8] ss:$16 sps:$4 sm:$0xff]   ;;  %v20529_v12 = vld [vmem:[#allocation5 + $0x1ccc] ss:$16 sps:$4 sm:$0xff]  }
 0x5c3   :  { %15034 = vmatprep.subr.bf16.mxu1 %v20466_v49  ;;  %v20532_v49 = vld [vmem:[#allocation5 + $0x1ecc] ss:$16 sps:$4 sm:$0xff]  }
 0x5c5   :  { %14994 = vmatpush1.bf16.msra.mxu0 %v20461_v50 }
 0x5c6   :  { %15035 = vmatpush1.bf16.msra.mxu1 %v20464_v34  ;;  %14995 = vmatprep.subr.bf16.mxu0 %v20469_v35 }
 0x5c7   :  { %15036 = vmatprep.subr.bf16.mxu1 %v20472_v36  ;;  %v20527_v36 = vld [vmem:[#allocation5 + $0x1cc8] ss:$16 sps:$4 sm:$0xff]  }
 0x5c9   :  { %14996 = vmatpush1.bf16.msra.mxu0 %v20467_v2  ;;  %v20530_v2 = vld [vmem:[#allocation5 + $0x1ec8] ss:$16 sps:$4 sm:$0xff]  }
 0x5ca   :  { %15037 = vmatpush1.bf16.msra.mxu1 %v20470_v42  ;;  %14997 = vmatprep.subr.bf16.mxu0 %v20475_v15 }
 0x5cb   :  { %15038 = vmatprep.subr.bf16.mxu1 %v20478_v24  ;;  %v20535_v24 = vld [vmem:[#allocation5 + $0x1cac] ss:$16 sps:$4 sm:$0xff]  }
 0x5cd   :  { %14998 = vmatpush2.bf16.msra.mxu0 %v20473_v8  ;;  %v20538_v8 = vld [vmem:[#allocation5 + $0x1eac] ss:$16 sps:$4 sm:$0xff]  }
 0x5ce   :  { %15039 = vmatpush2.bf16.msra.mxu1 %v20476_v41  ;;  %14999 = vmatprep.subr.bf16.mxu0 %v20481_v51 }
 0x5cf   :  { %15040 = vmatprep.subr.bf16.mxu1 %v20484_v52  ;;  %v20533_v52 = vld [vmem:[#allocation5 + $0x1ca8] ss:$16 sps:$4 sm:$0xff]  }
 0x5d1   :  { %15000 = vmatpush2.bf16.msra.mxu0 %v20479_v32  ;;  %v20536_v32 = vld [vmem:[#allocation5 + $0x1ea8] ss:$16 sps:$4 sm:$0xff]  }
 0x5d2   :  { %15041 = vmatpush2.bf16.msra.mxu1 %v20482_v48  ;;  %15001 = vmatprep.subr.bf16.mxu0 %v20487_v62 }
 0x5d3   :  { %15042 = vmatprep.subr.bf16.mxu1 %v20490_v37  ;;  %v20541_v37 = vld [vmem:[#allocation5 + $0x1c8c] ss:$16 sps:$4 sm:$0xff]  }
 0x5d5   :  { %15002 = vmatpush2.bf16.msra.mxu0 %v20485_v10  ;;  %v20544_v10 = vld [vmem:[#allocation5 + $0x1e8c] ss:$16 sps:$4 sm:$0xff]  }
 0x5d6   :  { %15043 = vmatpush2.bf16.msra.mxu1 %v20488_v26  ;;  %15003 = vmatprep.subr.bf16.mxu0 %v20493_v54  ;;  %v20550_v26 = vld [vmem:[#allocation5 + $0x1e6c] ss:$16 sps:$4 sm:$0xff]   ;;  %v20545_v54 = vld [vmem:[#allocation5 + $0x1c68] ss:$16 sps:$4 sm:$0xff]  }
 0x5d7   :  { %15044 = vmatprep.subr.bf16.mxu1 %v20496_v20  ;;  %v20548_v20 = vld [vmem:[#allocation5 + $0x1e68] ss:$16 sps:$4 sm:$0xff]  }
 0x5d9   :  { %15004 = vmatpush2.bf16.msra.mxu0 %v20491_v23  ;;  %v20553_v23 = vld [vmem:[#allocation5 + $0x1c4c] ss:$16 sps:$4 sm:$0xff]  }
 0x5da   :  { %15045 = vmatpush2.bf16.msra.mxu1 %v20494_v27  ;;  %15005 = vmatprep.subr.bf16.mxu0 %v20499_v59  ;;  %v20556_v27 = vld [vmem:[#allocation5 + $0x1e4c] ss:$16 sps:$4 sm:$0xff]   ;;  %v20551_v59 = vld [vmem:[#allocation5 + $0x1c48] ss:$16 sps:$4 sm:$0xff]  }
 0x5db   :  { %15046 = vmatprep.subr.bf16.mxu1 %v20502_v44  ;;  %v20554_v44 = vld [vmem:[#allocation5 + $0x1e48] ss:$16 sps:$4 sm:$0xff]  }
 0x5dd   :  { %15006 = vmatpush2.bf16.msra.mxu0 %v20497_v25  ;;  %v20559_v25 = vld [vmem:[#allocation5 + $0x1c2c] ss:$16 sps:$4 sm:$0xff]  }
 0x5de   :  { %15047 = vmatpush2.bf16.msra.mxu1 %v20500_v28  ;;  %15007 = vmatprep.subr.bf16.mxu0 %v20505_v14  ;;  %v20562_v28 = vld [vmem:[#allocation5 + $0x1e2c] ss:$16 sps:$4 sm:$0xff]   ;;  %v20557_v14 = vld [vmem:[#allocation5 + $0x1c28] ss:$16 sps:$4 sm:$0xff]  }
 0x5df   :  { %15048 = vmatprep.subr.bf16.mxu1 %v20508_v19  ;;  %v20560_v19 = vld [vmem:[#allocation5 + $0x1e28] ss:$16 sps:$4 sm:$0xff]  }
 0x5e1   :  { %15008 = vmatpush2.bf16.msra.mxu0 %v20503_v3  ;;  %v20565_v3 = vld [vmem:[#allocation5 + $0x1c0c] ss:$16 sps:$4 sm:$0xff]  }
 0x5e2   :  { %15049 = vmatpush2.bf16.msra.mxu1 %v20506_v29  ;;  %15009 = vmatprep.subr.bf16.mxu0 %v20511_v16  ;;  %v20568_v29 = vld [vmem:[#allocation5 + $0x1e0c] ss:$16 sps:$4 sm:$0xff]   ;;  %v20563_v16 = vld [vmem:[#allocation5 + $0x1c08] ss:$16 sps:$4 sm:$0xff]  }
 0x5e3   :  { %15050 = vmatprep.subr.bf16.mxu1 %v20514_v5  ;;  %v20566_v5 = vld [vmem:[#allocation5 + $0x1e08] ss:$16 sps:$4 sm:$0xff]  }
 0x5e5   :  { %15010 = vmatpush2.bf16.msra.mxu0 %v20509_v13  ;;  %v20571_v13 = vld [vmem:[#allocation5 + $0x1dec] ss:$16 sps:$4 sm:$0xff]  }
 0x5e6   :  { %15051 = vmatpush2.bf16.msra.mxu1 %v20512_v21  ;;  %15011 = vmatprep.subr.bf16.mxu0 %v20517_v22  ;;  %v20574_v21 = vld [vmem:[#allocation5 + $0x1fec] ss:$16 sps:$4 sm:$0xff]   ;;  %v20569_v22 = vld [vmem:[#allocation5 + $0x1de8] ss:$16 sps:$4 sm:$0xff]  }
 0x5e7   :  { %15052 = vmatprep.subr.bf16.mxu1 %v20520_v9  ;;  %v20572_v9 = vld [vmem:[#allocation5 + $0x1fe8] ss:$16 sps:$4 sm:$0xff]  }
 0x5e9   :  { %15012 = vmatpush2.bf16.msra.mxu0 %v20515_v58  ;;  %v20577_v58 = vld [vmem:[#allocation5 + $0x1dcc] ss:$16 sps:$4 sm:$0xff]  }
 0x5ea   :  { %15053 = vmatpush2.bf16.msra.mxu1 %v20518_v1  ;;  %15063 = vmatprep.subr.bf16.mxu0 %v20523_v45  ;;  %v20580_v1 = vld [vmem:[#allocation5 + $0x1fcc] ss:$16 sps:$4 sm:$0xff]   ;;  %v20575_v45 = vld [vmem:[#allocation5 + $0x1dc8] ss:$16 sps:$4 sm:$0xff]  }
 0x5eb   :  { %15104 = vmatprep.subr.bf16.mxu1 %v20526_v46  ;;  %v20578_v46 = vld [vmem:[#allocation5 + $0x1fc8] ss:$16 sps:$4 sm:$0xff]  }
 0x5ec   :  { %v14769_v50 = vpop.f32.mrf.mxu0  ;;  %15014 = vmatmul.mubr.bf16.vlgmr.msra.gmra.mxu0 %v21783_v56 }
 0x5ed   :  { %v14810_v34 = vpop.f32.mrf.mxu1  ;;  %15055 = vmatmul.mubr.bf16.vlgmr.msra.gmra.mxu1 %v21785_v57  ;;  %v14770_v35 = vadd.f32 %v14769_v50, %v22174_v43  ;;  %15064 = vmatpush1.bf16.msra.mxu0 %v20521_v55  ;;  %v20583_v55 = vld [vmem:[#allocation5 + $0x1dac] ss:$16 sps:$4 sm:$0xff]  }
 0x5ee   :  { %15105 = vmatpush1.bf16.msra.mxu1 %v20524_v38  ;;  %v14771_v42 = vpop.f32.mrf.mxu0  ;;  %15065 = vmatprep.subr.bf16.mxu0 %v20529_v12  ;;  %v20586_v38 = vld [vmem:[#allocation5 + $0x1fac] ss:$16 sps:$4 sm:$0xff]   ;;  %v20581_v12 = vld [vmem:[#allocation5 + $0x1da8] ss:$16 sps:$4 sm:$0xff]  }
 0x5ef   :  { %v14812_v15 = vpop.f32.mrf.mxu1  ;;  %15106 = vmatprep.subr.bf16.mxu1 %v20532_v49  ;;  %v22184_v41 = vadd.f32 %v14810_v34, %v14770_v35  ;;  %v14772_v51 = vadd.f32 %v14771_v42, %v22179_v30  ;;  %15095 = vmatprep.mubr.bf16.mxu0 %v21787_v18  ;;  %v20539_v30 = vld [vmem:[#allocation5 + $0x1c88] ss:$16 sps:$4 sm:$0xff]   ;;  %v20589_v50 = vld [vmem:[#allocation5 + $0x1d8c] ss:$16 sps:$4 sm:$0xff]  }
 0x5f0   :  { %15136 = vmatprep.mubr.bf16.mxu1 %v21789_v31  ;;  %v14773_v56 = vpop.f32.mrf.mxu0  ;;  %v20542_v18 = vld [vmem:[#allocation5 + $0x1e88] ss:$16 sps:$4 sm:$0xff]   ;;  %v20547_v31 = vld [vmem:[#allocation5 + $0x1c6c] ss:$16 sps:$4 sm:$0xff]  }
 0x5f1   :  { %v14814_v57 = vpop.f32.mrf.mxu1  ;;  %v22189_v43 = vadd.f32 %v14812_v15, %v14772_v51  ;;  %15066 = vmatpush1.bf16.msra.mxu0 %v20527_v36  ;;  %v20584_v49 = vld [vmem:[#allocation5 + $0x1fa8] ss:$16 sps:$4 sm:$0xff]   ;;  %v20592_v34 = vld [vmem:[#allocation5 + $0x1f8c] ss:$16 sps:$4 sm:$0xff]  }
 0x5f2   :  { %15107 = vmatpush1.bf16.msra.mxu1 %v20530_v2  ;;  %v14774_v48 = vpop.f32.mrf.mxu0  ;;  %15067 = vmatprep.subr.bf16.mxu0 %v20535_v24  ;;  %v20587_v35 = vld [vmem:[#allocation5 + $0x1d88] ss:$16 sps:$4 sm:$0xff]   ;;  %v20595_v2 = vld [vmem:[#allocation5 + $0x1d6c] ss:$16 sps:$4 sm:$0xff]  }
 0x5f3   :  { %v14815_v62 = vpop.f32.mrf.mxu1  ;;  %15108 = vmatprep.subr.bf16.mxu1 %v20538_v8  ;;  %v20590_v36 = vld [vmem:[#allocation5 + $0x1f88] ss:$16 sps:$4 sm:$0xff]   ;;  %v20598_v42 = vld [vmem:[#allocation5 + $0x1f6c] ss:$16 sps:$4 sm:$0xff]  }
 0x5f4   :  { %v20593_v15 = vld [vmem:[#allocation5 + $0x1d68] ss:$16 sps:$4 sm:$0xff]   ;;  %v20601_v8 = vld [vmem:[#allocation5 + $0x1d4c] ss:$16 sps:$4 sm:$0xff]  }
 0x5f5   :  { %15068 = vmatpush1.bf16.msra.mxu0 %v20533_v52  ;;  %v20596_v24 = vld [vmem:[#allocation5 + $0x1f68] ss:$16 sps:$4 sm:$0xff]   ;;  %v20604_v51 = vld [vmem:[#allocation5 + $0x1f4c] ss:$16 sps:$4 sm:$0xff]  }
 0x5f6   :  { %15109 = vmatpush1.bf16.msra.mxu1 %v20536_v32  ;;  %15069 = vmatprep.subr.bf16.mxu0 %v20541_v37  ;;  %v20599_v56 = vld [vmem:[#allocation5 + $0x1d48] ss:$16 sps:$4 sm:$0xff]   ;;  %v20607_v52 = vld [vmem:[#allocation5 + $0x1d2c] ss:$16 sps:$4 sm:$0xff]  }
 0x5f7   :  { %15110 = vmatprep.subr.bf16.mxu1 %v20544_v10  ;;  %v20602_v57 = vld [vmem:[#allocation5 + $0x1f48] ss:$16 sps:$4 sm:$0xff]   ;;  %v20610_v32 = vld [vmem:[#allocation5 + $0x1f2c] ss:$16 sps:$4 sm:$0xff]  }
 0x5f8   :  { %v20605_v48 = vld [vmem:[#allocation5 + $0x1d28] ss:$16 sps:$4 sm:$0xff]   ;;  %v20613_v37 = vld [vmem:[#allocation5 + $0x1d0c] ss:$16 sps:$4 sm:$0xff]  }
 0x5f9   :  { %15070 = vmatpush1.bf16.msra.mxu0 %v20539_v30  ;;  %v20608_v62 = vld [vmem:[#allocation5 + $0x1f28] ss:$16 sps:$4 sm:$0xff]   ;;  %v20616_v10 = vld [vmem:[#allocation5 + $0x1f0c] ss:$16 sps:$4 sm:$0xff]  }
 0x5fa   :  { %15111 = vmatpush1.bf16.msra.mxu1 %v20542_v18  ;;  %15071 = vmatprep.subr.bf16.mxu0 %v20547_v31  ;;  %v20611_v30 = vld [vmem:[#allocation5 + $0x1d08] ss:$16 sps:$4 sm:$0xff]   ;;  %v20619_v31 = vld [vmem:[#allocation5 + $0x20ec] ss:$16 sps:$4 sm:$0xff]  }
 0x5fb   :  { %15112 = vmatprep.subr.bf16.mxu1 %v20550_v26  ;;  %v20614_v18 = vld [vmem:[#allocation5 + $0x1f08] ss:$16 sps:$4 sm:$0xff]   ;;  %v20622_v26 = vld [vmem:[#allocation5 + $0x22ec] ss:$16 sps:$4 sm:$0xff]  }
 0x5fd   :  { %15072 = vmatpush1.bf16.msra.mxu0 %v20545_v54  ;;  %v20617_v54 = vld [vmem:[#allocation5 + $0x20e8] ss:$16 sps:$4 sm:$0xff]  }
 0x5fe   :  { %15113 = vmatpush1.bf16.msra.mxu1 %v20548_v20  ;;  %15073 = vmatprep.subr.bf16.mxu0 %v20553_v23  ;;  %v20620_v20 = vld [vmem:[#allocation5 + $0x22e8] ss:$16 sps:$4 sm:$0xff]   ;;  %v20625_v23 = vld [vmem:[#allocation5 + $0x20cc] ss:$16 sps:$4 sm:$0xff]  }
 0x5ff   :  { %15114 = vmatprep.subr.bf16.mxu1 %v20556_v27  ;;  %v20628_v27 = vld [vmem:[#allocation5 + $0x22cc] ss:$16 sps:$4 sm:$0xff]  }
 0x601   :  { %15074 = vmatpush1.bf16.msra.mxu0 %v20551_v59 }
 0x602   :  { %15115 = vmatpush1.bf16.msra.mxu1 %v20554_v44  ;;  %15075 = vmatprep.subr.bf16.mxu0 %v20559_v25 }
 0x603   :  { %15116 = vmatprep.subr.bf16.mxu1 %v20562_v28  ;;  %v20623_v28 = vld [vmem:[#allocation5 + $0x20c8] ss:$16 sps:$4 sm:$0xff]  }
 0x605   :  { %15076 = vmatpush1.bf16.msra.mxu0 %v20557_v14  ;;  %v20626_v14 = vld [vmem:[#allocation5 + $0x22c8] ss:$16 sps:$4 sm:$0xff]  }
 0x606   :  { %15117 = vmatpush1.bf16.msra.mxu1 %v20560_v19  ;;  %15077 = vmatprep.subr.bf16.mxu0 %v20565_v3 }
 0x607   :  { %15118 = vmatprep.subr.bf16.mxu1 %v20568_v29  ;;  %v20631_v29 = vld [vmem:[#allocation5 + $0x20ac] ss:$16 sps:$4 sm:$0xff]  }
 0x609   :  { %15078 = vmatpush1.bf16.msra.mxu0 %v20563_v16  ;;  %v20634_v16 = vld [vmem:[#allocation5 + $0x22ac] ss:$16 sps:$4 sm:$0xff]  }
 0x60a   :  { %15119 = vmatpush1.bf16.msra.mxu1 %v20566_v5  ;;  %15079 = vmatprep.subr.bf16.mxu0 %v20571_v13 }
 0x60b   :  { %15120 = vmatprep.subr.bf16.mxu1 %v20574_v21  ;;  %v20629_v21 = vld [vmem:[#allocation5 + $0x20a8] ss:$16 sps:$4 sm:$0xff]  }
 0x60d   :  { %15080 = vmatpush2.bf16.msra.mxu0 %v20569_v22  ;;  %v20632_v22 = vld [vmem:[#allocation5 + $0x22a8] ss:$16 sps:$4 sm:$0xff]  }
 0x60e   :  { %15121 = vmatpush2.bf16.msra.mxu1 %v20572_v9  ;;  %15081 = vmatprep.subr.bf16.mxu0 %v20577_v58 }
 0x60f   :  { %15122 = vmatprep.subr.bf16.mxu1 %v20580_v1  ;;  %v20637_v1 = vld [vmem:[#allocation5 + $0x208c] ss:$16 sps:$4 sm:$0xff]  }
 0x611   :  { %15082 = vmatpush2.bf16.msra.mxu0 %v20575_v45  ;;  %v20640_v45 = vld [vmem:[#allocation5 + $0x228c] ss:$16 sps:$4 sm:$0xff]  }
 0x612   :  { %15123 = vmatpush2.bf16.msra.mxu1 %v20578_v46  ;;  %15083 = vmatprep.subr.bf16.mxu0 %v20583_v55  ;;  %v20646_v46 = vld [vmem:[#allocation5 + $0x226c] ss:$16 sps:$4 sm:$0xff]   ;;  %v20641_v55 = vld [vmem:[#allocation5 + $0x2068] ss:$16 sps:$4 sm:$0xff]  }
 0x613   :  { %15124 = vmatprep.subr.bf16.mxu1 %v20586_v38  ;;  %v20644_v38 = vld [vmem:[#allocation5 + $0x2268] ss:$16 sps:$4 sm:$0xff]  }
 0x615   :  { %15084 = vmatpush2.bf16.msra.mxu0 %v20581_v12  ;;  %v20649_v12 = vld [vmem:[#allocation5 + $0x204c] ss:$16 sps:$4 sm:$0xff]  }
 0x616   :  { %15125 = vmatpush2.bf16.msra.mxu1 %v20584_v49  ;;  %15085 = vmatprep.subr.bf16.mxu0 %v20589_v50  ;;  %v20652_v49 = vld [vmem:[#allocation5 + $0x224c] ss:$16 sps:$4 sm:$0xff]   ;;  %v20647_v50 = vld [vmem:[#allocation5 + $0x2048] ss:$16 sps:$4 sm:$0xff]  }
 0x617   :  { %15126 = vmatprep.subr.bf16.mxu1 %v20592_v34  ;;  %v20650_v34 = vld [vmem:[#allocation5 + $0x2248] ss:$16 sps:$4 sm:$0xff]  }
 0x619   :  { %15086 = vmatpush2.bf16.msra.mxu0 %v20587_v35  ;;  %v20655_v35 = vld [vmem:[#allocation5 + $0x202c] ss:$16 sps:$4 sm:$0xff]  }
 0x61a   :  { %15127 = vmatpush2.bf16.msra.mxu1 %v20590_v36  ;;  %15087 = vmatprep.subr.bf16.mxu0 %v20595_v2  ;;  %v20658_v36 = vld [vmem:[#allocation5 + $0x222c] ss:$16 sps:$4 sm:$0xff]   ;;  %v20653_v2 = vld [vmem:[#allocation5 + $0x2028] ss:$16 sps:$4 sm:$0xff]  }
 0x61b   :  { %15128 = vmatprep.subr.bf16.mxu1 %v20598_v42  ;;  %v20656_v42 = vld [vmem:[#allocation5 + $0x2228] ss:$16 sps:$4 sm:$0xff]  }
 0x61d   :  { %15088 = vmatpush2.bf16.msra.mxu0 %v20593_v15  ;;  %v20661_v15 = vld [vmem:[#allocation5 + $0x200c] ss:$16 sps:$4 sm:$0xff]  }
 0x61e   :  { %15129 = vmatpush2.bf16.msra.mxu1 %v20596_v24  ;;  %15089 = vmatprep.subr.bf16.mxu0 %v20601_v8  ;;  %v20664_v24 = vld [vmem:[#allocation5 + $0x220c] ss:$16 sps:$4 sm:$0xff]   ;;  %v20659_v8 = vld [vmem:[#allocation5 + $0x2008] ss:$16 sps:$4 sm:$0xff]  }
 0x61f   :  { %15130 = vmatprep.subr.bf16.mxu1 %v20604_v51  ;;  %v20662_v51 = vld [vmem:[#allocation5 + $0x2208] ss:$16 sps:$4 sm:$0xff]  }
 0x621   :  { %15090 = vmatpush2.bf16.msra.mxu0 %v20599_v56  ;;  %v20667_v56 = vld [vmem:[#allocation5 + $0x21ec] ss:$16 sps:$4 sm:$0xff]  }
 0x622   :  { %15131 = vmatpush2.bf16.msra.mxu1 %v20602_v57  ;;  %15091 = vmatprep.subr.bf16.mxu0 %v20607_v52  ;;  %v20670_v57 = vld [vmem:[#allocation5 + $0x23ec] ss:$16 sps:$4 sm:$0xff]   ;;  %v20665_v52 = vld [vmem:[#allocation5 + $0x21e8] ss:$16 sps:$4 sm:$0xff]  }
 0x623   :  { %15132 = vmatprep.subr.bf16.mxu1 %v20610_v32  ;;  %v20668_v32 = vld [vmem:[#allocation5 + $0x23e8] ss:$16 sps:$4 sm:$0xff]  }
 0x625   :  { %15092 = vmatpush2.bf16.msra.mxu0 %v20605_v48  ;;  %v20673_v48 = vld [vmem:[#allocation5 + $0x21cc] ss:$16 sps:$4 sm:$0xff]  }
 0x626   :  { %15133 = vmatpush2.bf16.msra.mxu1 %v20608_v62  ;;  %15093 = vmatprep.subr.bf16.mxu0 %v20613_v37  ;;  %v20676_v62 = vld [vmem:[#allocation5 + $0x23cc] ss:$16 sps:$4 sm:$0xff]   ;;  %v20671_v37 = vld [vmem:[#allocation5 + $0x21c8] ss:$16 sps:$4 sm:$0xff]  }
 0x627   :  { %15134 = vmatprep.subr.bf16.mxu1 %v20616_v10  ;;  %v20674_v10 = vld [vmem:[#allocation5 + $0x23c8] ss:$16 sps:$4 sm:$0xff]  }
 0x629   :  { %15094 = vmatpush2.bf16.msra.mxu0 %v20611_v30  ;;  %v20679_v30 = vld [vmem:[#allocation5 + $0x21ac] ss:$16 sps:$4 sm:$0xff]  }
 0x62a   :  { %15135 = vmatpush2.bf16.msra.mxu1 %v20614_v18  ;;  %15145 = vmatprep.subr.bf16.mxu0 %v20619_v31  ;;  %v20682_v18 = vld [vmem:[#allocation5 + $0x23ac] ss:$16 sps:$4 sm:$0xff]   ;;  %v20677_v31 = vld [vmem:[#allocation5 + $0x21a8] ss:$16 sps:$4 sm:$0xff]  }
 0x62b   :  { %15186 = vmatprep.subr.bf16.mxu1 %v20622_v26  ;;  %v20680_v26 = vld [vmem:[#allocation5 + $0x23a8] ss:$16 sps:$4 sm:$0xff]  }
 0x62c   :  { %v14851_v59 = vpop.f32.mrf.mxu0  ;;  %15096 = vmatmul.mubr.bf16.vlgmr.msra.gmra.mxu0 %v21821_v11 }
 0x62d   :  { %v14892_v44 = vpop.f32.mrf.mxu1  ;;  %15137 = vmatmul.mubr.bf16.vlgmr.msra.gmra.mxu1 %v21823_v61  ;;  %v14852_v25 = vadd.f32 %v14851_v59, %v22184_v41  ;;  %15146 = vmatpush1.bf16.msra.mxu0 %v20617_v54  ;;  %v20685_v54 = vld [vmem:[#allocation5 + $0x218c] ss:$16 sps:$4 sm:$0xff]  }
 0x62e   :  { %15187 = vmatpush1.bf16.msra.mxu1 %v20620_v20  ;;  %v14853_v19 = vpop.f32.mrf.mxu0  ;;  %15147 = vmatprep.subr.bf16.mxu0 %v20625_v23  ;;  %v20688_v20 = vld [vmem:[#allocation5 + $0x238c] ss:$16 sps:$4 sm:$0xff]   ;;  %v20683_v23 = vld [vmem:[#allocation5 + $0x2188] ss:$16 sps:$4 sm:$0xff]  }
 0x62f   :  { %v14894_v3 = vpop.f32.mrf.mxu1  ;;  %15188 = vmatprep.subr.bf16.mxu1 %v20628_v27  ;;  %v22194_v5 = vadd.f32 %v14892_v44, %v14852_v25  ;;  %v14854_v13 = vadd.f32 %v14853_v19, %v22189_v43  ;;  %15177 = vmatprep.mubr.bf16.mxu0 %v21825_v39  ;;  %v20635_v43 = vld [vmem:[#allocation5 + $0x2088] ss:$16 sps:$4 sm:$0xff]   ;;  %v20691_v59 = vld [vmem:[#allocation5 + $0x216c] ss:$16 sps:$4 sm:$0xff]  }
 0x630   :  { %15218 = vmatprep.mubr.bf16.mxu1 %v21827_v40  ;;  %v14855_v11 = vpop.f32.mrf.mxu0  ;;  %v20638_v39 = vld [vmem:[#allocation5 + $0x2288] ss:$16 sps:$4 sm:$0xff]   ;;  %v20643_v40 = vld [vmem:[#allocation5 + $0x206c] ss:$16 sps:$4 sm:$0xff]  }
 0x631   :  { %v14896_v61 = vpop.f32.mrf.mxu1  ;;  %v22199_v41 = vadd.f32 %v14894_v3, %v14854_v13  ;;  %15148 = vmatpush1.bf16.msra.mxu0 %v20623_v28  ;;  %v20686_v27 = vld [vmem:[#allocation5 + $0x2388] ss:$16 sps:$4 sm:$0xff]   ;;  %v20694_v44 = vld [vmem:[#allocation5 + $0x236c] ss:$16 sps:$4 sm:$0xff]  }
 0x632   :  { %15189 = vmatpush1.bf16.msra.mxu1 %v20626_v14  ;;  %v14856_v9 = vpop.f32.mrf.mxu0  ;;  %15149 = vmatprep.subr.bf16.mxu0 %v20631_v29  ;;  %v20689_v25 = vld [vmem:[#allocation5 + $0x2168] ss:$16 sps:$4 sm:$0xff]   ;;  %v20697_v14 = vld [vmem:[#allocation5 + $0x214c] ss:$16 sps:$4 sm:$0xff]  }
 0x633   :  { %v14897_v58 = vpop.f32.mrf.mxu1  ;;  %15190 = vmatprep.subr.bf16.mxu1 %v20634_v16  ;;  %v20692_v28 = vld [vmem:[#allocation5 + $0x2368] ss:$16 sps:$4 sm:$0xff]   ;;  %v20700_v19 = vld [vmem:[#allocation5 + $0x234c] ss:$16 sps:$4 sm:$0xff]  }
 0x634   :  { %v20695_v3 = vld [vmem:[#allocation5 + $0x2148] ss:$16 sps:$4 sm:$0xff]   ;;  %v20703_v16 = vld [vmem:[#allocation5 + $0x212c] ss:$16 sps:$4 sm:$0xff]  }
 0x635   :  { %15150 = vmatpush1.bf16.msra.mxu0 %v20629_v21  ;;  %v20698_v29 = vld [vmem:[#allocation5 + $0x2348] ss:$16 sps:$4 sm:$0xff]   ;;  %v20706_v13 = vld [vmem:[#allocation5 + $0x232c] ss:$16 sps:$4 sm:$0xff]  }
 0x636   :  { %15191 = vmatpush1.bf16.msra.mxu1 %v20632_v22  ;;  %15151 = vmatprep.subr.bf16.mxu0 %v20637_v1  ;;  %v20701_v11 = vld [vmem:[#allocation5 + $0x2128] ss:$16 sps:$4 sm:$0xff]   ;;  %v20709_v21 = vld [vmem:[#allocation5 + $0x210c] ss:$16 sps:$4 sm:$0xff]  }
 0x637   :  { %15192 = vmatprep.subr.bf16.mxu1 %v20640_v45  ;;  %v20704_v61 = vld [vmem:[#allocation5 + $0x2328] ss:$16 sps:$4 sm:$0xff]   ;;  %v20712_v22 = vld [vmem:[#allocation5 + $0x230c] ss:$16 sps:$4 sm:$0xff]  }
 0x638   :  { %v20707_v9 = vld [vmem:[#allocation5 + $0x2108] ss:$16 sps:$4 sm:$0xff]   ;;  %v20715_v1 = vld [vmem:[#allocation5 + $0x24ec] ss:$16 sps:$4 sm:$0xff]  }
 0x639   :  { %15152 = vmatpush1.bf16.msra.mxu0 %v20635_v43  ;;  %v20710_v58 = vld [vmem:[#allocation5 + $0x2308] ss:$16 sps:$4 sm:$0xff]   ;;  %v20718_v45 = vld [vmem:[#allocation5 + $0x26ec] ss:$16 sps:$4 sm:$0xff]  }
 0x63a   :  { %15193 = vmatpush1.bf16.msra.mxu1 %v20638_v39  ;;  %15153 = vmatprep.subr.bf16.mxu0 %v20643_v40  ;;  %v20713_v43 = vld [vmem:[#allocation5 + $0x24e8] ss:$16 sps:$4 sm:$0xff]   ;;  %v20721_v40 = vld [vmem:[#allocation5 + $0x24cc] ss:$16 sps:$4 sm:$0xff]  }
 0x63b   :  { %15194 = vmatprep.subr.bf16.mxu1 %v20646_v46  ;;  %v20716_v39 = vld [vmem:[#allocation5 + $0x26e8] ss:$16 sps:$4 sm:$0xff]   ;;  %v20724_v46 = vld [vmem:[#allocation5 + $0x26cc] ss:$16 sps:$4 sm:$0xff]  }
 0x63d   :  { %15154 = vmatpush1.bf16.msra.mxu0 %v20641_v55 }
 0x63e   :  { %15195 = vmatpush1.bf16.msra.mxu1 %v20644_v38  ;;  %15155 = vmatprep.subr.bf16.mxu0 %v20649_v12 }
 0x63f   :  { %15196 = vmatprep.subr.bf16.mxu1 %v20652_v49  ;;  %v20719_v49 = vld [vmem:[#allocation5 + $0x24c8] ss:$16 sps:$4 sm:$0xff]  }
 0x641   :  { %15156 = vmatpush1.bf16.msra.mxu0 %v20647_v50  ;;  %v20722_v50 = vld [vmem:[#allocation5 + $0x26c8] ss:$16 sps:$4 sm:$0xff]  }
 0x642   :  { %15197 = vmatpush1.bf16.msra.mxu1 %v20650_v34  ;;  %15157 = vmatprep.subr.bf16.mxu0 %v20655_v35 }
 0x643   :  { %15198 = vmatprep.subr.bf16.mxu1 %v20658_v36  ;;  %v20727_v36 = vld [vmem:[#allocation5 + $0x24ac] ss:$16 sps:$4 sm:$0xff]  }
 0x645   :  { %15158 = vmatpush1.bf16.msra.mxu0 %v20653_v2  ;;  %v20730_v2 = vld [vmem:[#allocation5 + $0x26ac] ss:$16 sps:$4 sm:$0xff]  }
 0x646   :  { %15199 = vmatpush1.bf16.msra.mxu1 %v20656_v42  ;;  %15159 = vmatprep.subr.bf16.mxu0 %v20661_v15 }
 0x647   :  { %15200 = vmatprep.subr.bf16.mxu1 %v20664_v24  ;;  %v22342_v24 = vld [vmem:[#allocation12_spill] sm:$0xff] }
 0x649   :  { %15160 = vmatpush1.bf16.msra.mxu0 %v20659_v8 }
 0x64a   :  { %15201 = vmatpush1.bf16.msra.mxu1 %v20662_v51  ;;  %15161 = vmatprep.subr.bf16.mxu0 %v20667_v56  ;;  %v20725_v51 = vld [vmem:[#allocation5 + $0x24a8] ss:$16 sps:$4 sm:$0xff]  }
 0x64b   :  { %15202 = vmatprep.subr.bf16.mxu1 %v20670_v57  ;;  %v20728_v56 = vld [vmem:[#allocation5 + $0x26a8] ss:$16 sps:$4 sm:$0xff]  }
 0x64d   :  { %15162 = vmatpush2.bf16.msra.mxu0 %v20665_v52 }
 0x64e   :  { %15203 = vmatpush2.bf16.msra.mxu1 %v20668_v32  ;;  %15163 = vmatprep.subr.bf16.mxu0 %v20673_v48  ;;  %v20733_v32 = vld [vmem:[#allocation5 + $0x248c] ss:$16 sps:$4 sm:$0xff]  }
 0x64f   :  { %15204 = vmatprep.subr.bf16.mxu1 %v20676_v62  ;;  %v20736_v48 = vld [vmem:[#allocation5 + $0x268c] ss:$16 sps:$4 sm:$0xff]   ;;  %v20734_v62 = vld [vmem:[#allocation5 + $0x2688] ss:$16 sps:$4 sm:$0xff]  }
 0x651   :  { %15164 = vmatpush2.bf16.msra.mxu0 %v20671_v37  ;;  %v20739_v37 = vld [vmem:[#allocation5 + $0x246c] ss:$16 sps:$4 sm:$0xff]  }
 0x652   :  { %15205 = vmatpush2.bf16.msra.mxu1 %v20674_v10  ;;  %15165 = vmatprep.subr.bf16.mxu0 %v20679_v30  ;;  %v20742_v10 = vld [vmem:[#allocation5 + $0x266c] ss:$16 sps:$4 sm:$0xff]   ;;  %v20737_v30 = vld [vmem:[#allocation5 + $0x2468] ss:$16 sps:$4 sm:$0xff]  }
 0x653   :  { %15206 = vmatprep.subr.bf16.mxu1 %v20682_v18  ;;  %v20740_v18 = vld [vmem:[#allocation5 + $0x2668] ss:$16 sps:$4 sm:$0xff]  }
 0x655   :  { %15166 = vmatpush2.bf16.msra.mxu0 %v20677_v31  ;;  %v20745_v31 = vld [vmem:[#allocation5 + $0x244c] ss:$16 sps:$4 sm:$0xff]  }
 0x656   :  { %15207 = vmatpush2.bf16.msra.mxu1 %v20680_v26  ;;  %15167 = vmatprep.subr.bf16.mxu0 %v20685_v54  ;;  %v20748_v26 = vld [vmem:[#allocation5 + $0x264c] ss:$16 sps:$4 sm:$0xff]   ;;  %v20743_v54 = vld [vmem:[#allocation5 + $0x2448] ss:$16 sps:$4 sm:$0xff]  }
 0x657   :  { %15208 = vmatprep.subr.bf16.mxu1 %v20688_v20  ;;  %v20746_v20 = vld [vmem:[#allocation5 + $0x2648] ss:$16 sps:$4 sm:$0xff]  }
 0x659   :  { %15168 = vmatpush2.bf16.msra.mxu0 %v20683_v23  ;;  %v20751_v23 = vld [vmem:[#allocation5 + $0x242c] ss:$16 sps:$4 sm:$0xff]  }
 0x65a   :  { %15209 = vmatpush2.bf16.msra.mxu1 %v20686_v27  ;;  %15169 = vmatprep.subr.bf16.mxu0 %v20691_v59  ;;  %v20754_v27 = vld [vmem:[#allocation5 + $0x262c] ss:$16 sps:$4 sm:$0xff]   ;;  %v20749_v59 = vld [vmem:[#allocation5 + $0x2428] ss:$16 sps:$4 sm:$0xff]  }
 0x65b   :  { %15210 = vmatprep.subr.bf16.mxu1 %v20694_v44  ;;  %v20752_v44 = vld [vmem:[#allocation5 + $0x2628] ss:$16 sps:$4 sm:$0xff]  }
 0x65d   :  { %15170 = vmatpush2.bf16.msra.mxu0 %v20689_v25  ;;  %v20757_v25 = vld [vmem:[#allocation5 + $0x240c] ss:$16 sps:$4 sm:$0xff]  }
 0x65e   :  { %15211 = vmatpush2.bf16.msra.mxu1 %v20692_v28  ;;  %15171 = vmatprep.subr.bf16.mxu0 %v20697_v14  ;;  %v20760_v28 = vld [vmem:[#allocation5 + $0x260c] ss:$16 sps:$4 sm:$0xff]   ;;  %v20755_v14 = vld [vmem:[#allocation5 + $0x2408] ss:$16 sps:$4 sm:$0xff]  }
 0x65f   :  { %15212 = vmatprep.subr.bf16.mxu1 %v20700_v19  ;;  %v20758_v19 = vld [vmem:[#allocation5 + $0x2608] ss:$16 sps:$4 sm:$0xff]  }
 0x661   :  { %15172 = vmatpush2.bf16.msra.mxu0 %v20695_v3  ;;  %v20763_v3 = vld [vmem:[#allocation5 + $0x25ec] ss:$16 sps:$4 sm:$0xff]  }
 0x662   :  { %15213 = vmatpush2.bf16.msra.mxu1 %v20698_v29  ;;  %15173 = vmatprep.subr.bf16.mxu0 %v20703_v16  ;;  %v20766_v29 = vld [vmem:[#allocation5 + $0x27ec] ss:$16 sps:$4 sm:$0xff]   ;;  %v20761_v16 = vld [vmem:[#allocation5 + $0x25e8] ss:$16 sps:$4 sm:$0xff]  }
 0x663   :  { %15214 = vmatprep.subr.bf16.mxu1 %v20706_v13  ;;  %v20764_v13 = vld [vmem:[#allocation5 + $0x27e8] ss:$16 sps:$4 sm:$0xff]  }
 0x665   :  { %15174 = vmatpush2.bf16.msra.mxu0 %v20701_v11  ;;  %v20769_v11 = vld [vmem:[#allocation5 + $0x25cc] ss:$16 sps:$4 sm:$0xff]  }
 0x666   :  { %15215 = vmatpush2.bf16.msra.mxu1 %v20704_v61  ;;  %15175 = vmatprep.subr.bf16.mxu0 %v20709_v21  ;;  %v20772_v61 = vld [vmem:[#allocation5 + $0x27cc] ss:$16 sps:$4 sm:$0xff]   ;;  %v20767_v21 = vld [vmem:[#allocation5 + $0x25c8] ss:$16 sps:$4 sm:$0xff]  }
 0x667   :  { %15216 = vmatprep.subr.bf16.mxu1 %v20712_v22  ;;  %v20770_v22 = vld [vmem:[#allocation5 + $0x27c8] ss:$16 sps:$4 sm:$0xff]  }
 0x669   :  { %15176 = vmatpush2.bf16.msra.mxu0 %v20707_v9  ;;  %v20775_v9 = vld [vmem:[#allocation5 + $0x25ac] ss:$16 sps:$4 sm:$0xff]  }
 0x66a   :  { %15217 = vmatpush2.bf16.msra.mxu1 %v20710_v58  ;;  %15227 = vmatprep.subr.bf16.mxu0 %v20715_v1  ;;  %v20778_v58 = vld [vmem:[#allocation5 + $0x27ac] ss:$16 sps:$4 sm:$0xff]   ;;  %v20773_v1 = vld [vmem:[#allocation5 + $0x25a8] ss:$16 sps:$4 sm:$0xff]  }
 0x66b   :  { %15268 = vmatprep.subr.bf16.mxu1 %v20718_v45  ;;  %v20776_v45 = vld [vmem:[#allocation5 + $0x27a8] ss:$16 sps:$4 sm:$0xff]  }
 0x66c   :  { %v14933_v55 = vpop.f32.mrf.mxu0  ;;  %15178 = vmatmul.mubr.bf16.vlgmr.msra.gmra.mxu0 %v21859_v63  ;;  %v22343_v63 = vld [vmem:[#allocation13_spill] sm:$0xff] }
 0x66d   :  { %v14974_v38 = vpop.f32.mrf.mxu1  ;;  %15219 = vmatmul.mubr.bf16.vlgmr.msra.gmra.mxu1 %v21861_v0  ;;  %v14934_v12 = vadd.f32 %v14933_v55, %v22194_v5  ;;  %15228 = vmatpush1.bf16.msra.mxu0 %v20713_v43  ;;  %v20781_v43 = vld [vmem:[#allocation5 + $0x258c] ss:$16 sps:$4 sm:$0xff]  }
 0x66e   :  { %15269 = vmatpush1.bf16.msra.mxu1 %v20716_v39  ;;  %v14935_v34 = vpop.f32.mrf.mxu0  ;;  %15229 = vmatprep.subr.bf16.mxu0 %v20721_v40  ;;  %v20784_v39 = vld [vmem:[#allocation5 + $0x278c] ss:$16 sps:$4 sm:$0xff]   ;;  %v20779_v40 = vld [vmem:[#allocation5 + $0x2588] ss:$16 sps:$4 sm:$0xff]  }
 0x66f   :  { %v14976_v35 = vpop.f32.mrf.mxu1  ;;  %15270 = vmatprep.subr.bf16.mxu1 %v20724_v46  ;;  %v22204_v42 = vadd.f32 %v14974_v38, %v14934_v12  ;;  %v14936_v15 = vadd.f32 %v14935_v34, %v22199_v41  ;;  %15259 = vmatprep.mubr.bf16.mxu0 %v22342_v24  ;;  %v20731_v41 = vld [vmem:[#allocation5 + $0x2488] ss:$16 sps:$4 sm:$0xff]   ;;  %v20787_v55 = vld [vmem:[#allocation5 + $0x256c] ss:$16 sps:$4 sm:$0xff]  }
 0x670   :  { %15300 = vmatprep.mubr.bf16.mxu1 %v22343_v63  ;;  %v14937_v0 = vpop.f32.mrf.mxu0  ;;  %v20782_v46 = vld [vmem:[#allocation5 + $0x2788] ss:$16 sps:$4 sm:$0xff]   ;;  %v20790_v38 = vld [vmem:[#allocation5 + $0x276c] ss:$16 sps:$4 sm:$0xff]  }
 0x671   :  { %v14978_v5 = vpop.f32.mrf.mxu1  ;;  %v22209_v8 = vadd.f32 %v14976_v35, %v14936_v15  ;;  %15230 = vmatpush1.bf16.msra.mxu0 %v20719_v49  ;;  %v20785_v12 = vld [vmem:[#allocation5 + $0x2568] ss:$16 sps:$4 sm:$0xff]   ;;  %v20796_v34 = vld [vmem:[#allocation5 + $0x274c] ss:$16 sps:$4 sm:$0xff]  }
 0x672   :  { %15271 = vmatpush1.bf16.msra.mxu1 %v20722_v50  ;;  %v14938_v57 = vpop.f32.mrf.mxu0  ;;  %15231 = vmatprep.subr.bf16.mxu0 %v20727_v36  ;;  %v20788_v49 = vld [vmem:[#allocation5 + $0x2768] ss:$16 sps:$4 sm:$0xff]   ;;  %v20793_v50 = vld [vmem:[#allocation5 + $0x254c] ss:$16 sps:$4 sm:$0xff]  }
 0x673   :  { %v14979_v52 = vpop.f32.mrf.mxu1  ;;  %15272 = vmatprep.subr.bf16.mxu1 %v20730_v2  ;;  %v20791_v35 = vld [vmem:[#allocation5 + $0x2548] ss:$16 sps:$4 sm:$0xff]   ;;  %v20799_v2 = vld [vmem:[#allocation5 + $0x252c] ss:$16 sps:$4 sm:$0xff]  }
 0x674   :  { %v20794_v36 = vld [vmem:[#allocation5 + $0x2748] ss:$16 sps:$4 sm:$0xff]   ;;  %v20802_v15 = vld [vmem:[#allocation5 + $0x272c] ss:$16 sps:$4 sm:$0xff]  }
 0x675   :  { %15232 = vmatpush1.bf16.msra.mxu0 %v20725_v51  ;;  %v20797_v24 = vld [vmem:[#allocation5 + $0x2528] ss:$16 sps:$4 sm:$0xff]   ;;  %v20805_v0 = vld [vmem:[#allocation5 + $0x250c] ss:$16 sps:$4 sm:$0xff]  }
 0x676   :  { %15273 = vmatpush1.bf16.msra.mxu1 %v20728_v56  ;;  %15233 = vmatprep.subr.bf16.mxu0 %v20733_v32  ;;  %v20800_v63 = vld [vmem:[#allocation5 + $0x2728] ss:$16 sps:$4 sm:$0xff]   ;;  %v20808_v5 = vld [vmem:[#allocation5 + $0x270c] ss:$16 sps:$4 sm:$0xff]  }
 0x677   :  { %15274 = vmatprep.subr.bf16.mxu1 %v20736_v48  ;;  %v20803_v51 = vld [vmem:[#allocation5 + $0x2508] ss:$16 sps:$4 sm:$0xff]   ;;  %v20811_v57 = vld [vmem:[#allocation5 + $0x28ec] ss:$16 sps:$4 sm:$0xff]  }
 0x678   :  { %v20806_v56 = vld [vmem:[#allocation5 + $0x2708] ss:$16 sps:$4 sm:$0xff]   ;;  %v20814_v52 = vld [vmem:[#allocation5 + $0x2aec] ss:$16 sps:$4 sm:$0xff]  }
 0x679   :  { %15234 = vmatpush1.bf16.msra.mxu0 %v20731_v41  ;;  %v20809_v32 = vld [vmem:[#allocation5 + $0x28e8] ss:$16 sps:$4 sm:$0xff]   ;;  %v20817_v41 = vld [vmem:[#allocation5 + $0x28cc] ss:$16 sps:$4 sm:$0xff]  }
 0x67a   :  { %15275 = vmatpush1.bf16.msra.mxu1 %v20734_v62  ;;  %15235 = vmatprep.subr.bf16.mxu0 %v20739_v37  ;;  %v20812_v48 = vld [vmem:[#allocation5 + $0x2ae8] ss:$16 sps:$4 sm:$0xff]   ;;  %v20820_v62 = vld [vmem:[#allocation5 + $0x2acc] ss:$16 sps:$4 sm:$0xff]  }
 0x67b   :  { %15276 = vmatprep.subr.bf16.mxu1 %v20742_v10 }
 0x67d   :  { %15236 = vmatpush1.bf16.msra.mxu0 %v20737_v30  ;;  %v22344_v30 = vld [vmem:[#allocation14_spill] sm:$0xff] }
 0x67e   :  { %15277 = vmatpush1.bf16.msra.mxu1 %v20740_v18  ;;  %15237 = vmatprep.subr.bf16.mxu0 %v20745_v31  ;;  %v22345_v18 = vld [vmem:[#allocation15_spill] sm:$0xff] }
 0x67f   :  { %15278 = vmatprep.subr.bf16.mxu1 %v20748_v26  ;;  %v20815_v26 = vld [vmem:[#allocation5 + $0x28c8] ss:$16 sps:$4 sm:$0xff]  }
 0x681   :  { %15238 = vmatpush1.bf16.msra.mxu0 %v20743_v54  ;;  %v20818_v54 = vld [vmem:[#allocation5 + $0x2ac8] ss:$16 sps:$4 sm:$0xff]  }
 0x682   :  { %15279 = vmatpush1.bf16.msra.mxu1 %v20746_v20  ;;  %15239 = vmatprep.subr.bf16.mxu0 %v20751_v23 }
 0x683   :  { %15280 = vmatprep.subr.bf16.mxu1 %v20754_v27  ;;  %v20823_v27 = vld [vmem:[#allocation5 + $0x28ac] ss:$16 sps:$4 sm:$0xff]  }
 0x685   :  { %15240 = vmatpush1.bf16.msra.mxu0 %v20749_v59  ;;  %v20826_v59 = vld [vmem:[#allocation5 + $0x2aac] ss:$16 sps:$4 sm:$0xff]  }
 0x686   :  { %15281 = vmatpush1.bf16.msra.mxu1 %v20752_v44  ;;  %15241 = vmatprep.subr.bf16.mxu0 %v20757_v25 }
 0x687   :  { %15282 = vmatprep.subr.bf16.mxu1 %v20760_v28  ;;  %v22346_v28 = vld [vmem:[#allocation16_spill] sm:$0xff] }
 0x689   :  { %15242 = vmatpush1.bf16.msra.mxu0 %v20755_v14  ;;  %v22347_v14 = vld [vmem:[#allocation17_spill] sm:$0xff] }
 0x68a   :  { %15283 = vmatpush1.bf16.msra.mxu1 %v20758_v19  ;;  %15243 = vmatprep.subr.bf16.mxu0 %v20763_v3 }
 0x68b   :  { %15284 = vmatprep.subr.bf16.mxu1 %v20766_v29  ;;  %v20821_v29 = vld [vmem:[#allocation5 + $0x28a8] ss:$16 sps:$4 sm:$0xff]  }
 0x68d   :  { %15244 = vmatpush2.bf16.msra.mxu0 %v20761_v16  ;;  %v20824_v16 = vld [vmem:[#allocation5 + $0x2aa8] ss:$16 sps:$4 sm:$0xff]  }
 0x68e   :  { %15285 = vmatpush2.bf16.msra.mxu1 %v20764_v13  ;;  %15245 = vmatprep.subr.bf16.mxu0 %v20769_v11 }
 0x68f   :  { %15286 = vmatprep.subr.bf16.mxu1 %v20772_v61  ;;  %v20829_v61 = vld [vmem:[#allocation5 + $0x288c] ss:$16 sps:$4 sm:$0xff]  }
 0x691   :  { %15246 = vmatpush2.bf16.msra.mxu0 %v20767_v21  ;;  %v20832_v21 = vld [vmem:[#allocation5 + $0x2a8c] ss:$16 sps:$4 sm:$0xff]  }
 0x692   :  { %15287 = vmatpush2.bf16.msra.mxu1 %v20770_v22  ;;  %15247 = vmatprep.subr.bf16.mxu0 %v20775_v9  ;;  %v20830_v22 = vld [vmem:[#allocation5 + $0x2a88] ss:$16 sps:$4 sm:$0xff]   ;;  %v20835_v9 = vld [vmem:[#allocation5 + $0x286c] ss:$16 sps:$4 sm:$0xff]  }
 0x693   :  { %15288 = vmatprep.subr.bf16.mxu1 %v20778_v58  ;;  %v20838_v58 = vld [vmem:[#allocation5 + $0x2a6c] ss:$16 sps:$4 sm:$0xff]  }
 0x695   :  { %15248 = vmatpush2.bf16.msra.mxu0 %v20773_v1  ;;  %v20833_v1 = vld [vmem:[#allocation5 + $0x2868] ss:$16 sps:$4 sm:$0xff]  }
 0x696   :  { %15289 = vmatpush2.bf16.msra.mxu1 %v20776_v45  ;;  %15249 = vmatprep.subr.bf16.mxu0 %v20781_v43  ;;  %v20836_v45 = vld [vmem:[#allocation5 + $0x2a68] ss:$16 sps:$4 sm:$0xff]   ;;  %v20841_v43 = vld [vmem:[#allocation5 + $0x284c] ss:$16 sps:$4 sm:$0xff]  }
 0x697   :  { %15290 = vmatprep.subr.bf16.mxu1 %v20784_v39  ;;  %v20844_v39 = vld [vmem:[#allocation5 + $0x2a4c] ss:$16 sps:$4 sm:$0xff]  }
 0x699   :  { %15250 = vmatpush2.bf16.msra.mxu0 %v20779_v40  ;;  %v20839_v40 = vld [vmem:[#allocation5 + $0x2848] ss:$16 sps:$4 sm:$0xff]  }
 0x69a   :  { %15291 = vmatpush2.bf16.msra.mxu1 %v20782_v46  ;;  %15251 = vmatprep.subr.bf16.mxu0 %v20787_v55  ;;  %v20842_v46 = vld [vmem:[#allocation5 + $0x2a48] ss:$16 sps:$4 sm:$0xff]   ;;  %v20847_v55 = vld [vmem:[#allocation5 + $0x282c] ss:$16 sps:$4 sm:$0xff]  }
 0x69b   :  { %15292 = vmatprep.subr.bf16.mxu1 %v20790_v38  ;;  %v20850_v38 = vld [vmem:[#allocation5 + $0x2a2c] ss:$16 sps:$4 sm:$0xff]  }
 0x69d   :  { %15252 = vmatpush2.bf16.msra.mxu0 %v20785_v12  ;;  %v20845_v12 = vld [vmem:[#allocation5 + $0x2828] ss:$16 sps:$4 sm:$0xff]  }
 0x69e   :  { %15293 = vmatpush2.bf16.msra.mxu1 %v20788_v49  ;;  %15253 = vmatprep.subr.bf16.mxu0 %v20793_v50  ;;  %v20848_v49 = vld [vmem:[#allocation5 + $0x2a28] ss:$16 sps:$4 sm:$0xff]   ;;  %v20853_v50 = vld [vmem:[#allocation5 + $0x280c] ss:$16 sps:$4 sm:$0xff]  }
 0x69f   :  { %15294 = vmatprep.subr.bf16.mxu1 %v20796_v34  ;;  %v20856_v34 = vld [vmem:[#allocation5 + $0x2a0c] ss:$16 sps:$4 sm:$0xff]  }
 0x6a1   :  { %15254 = vmatpush2.bf16.msra.mxu0 %v20791_v35  ;;  %v20851_v35 = vld [vmem:[#allocation5 + $0x2808] ss:$16 sps:$4 sm:$0xff]  }
 0x6a2   :  { %15295 = vmatpush2.bf16.msra.mxu1 %v20794_v36  ;;  %15255 = vmatprep.subr.bf16.mxu0 %v20799_v2  ;;  %v20854_v36 = vld [vmem:[#allocation5 + $0x2a08] ss:$16 sps:$4 sm:$0xff]   ;;  %v20859_v2 = vld [vmem:[#allocation5 + $0x29ec] ss:$16 sps:$4 sm:$0xff]  }
 0x6a3   :  { %15296 = vmatprep.subr.bf16.mxu1 %v20802_v15  ;;  %v20862_v15 = vld [vmem:[#allocation5 + $0x2bec] ss:$16 sps:$4 sm:$0xff]  }
 0x6a5   :  { %15256 = vmatpush2.bf16.msra.mxu0 %v20797_v24  ;;  %v20857_v24 = vld [vmem:[#allocation5 + $0x29e8] ss:$16 sps:$4 sm:$0xff]  }
 0x6a6   :  { %15297 = vmatpush2.bf16.msra.mxu1 %v20800_v63  ;;  %15257 = vmatprep.subr.bf16.mxu0 %v20805_v0  ;;  %v20860_v63 = vld [vmem:[#allocation5 + $0x2be8] ss:$16 sps:$4 sm:$0xff]   ;;  %v20865_v0 = vld [vmem:[#allocation5 + $0x29cc] ss:$16 sps:$4 sm:$0xff]  }
 0x6a7   :  { %15298 = vmatprep.subr.bf16.mxu1 %v20808_v5  ;;  %v20868_v5 = vld [vmem:[#allocation5 + $0x2bcc] ss:$16 sps:$4 sm:$0xff]  }
 0x6a9   :  { %15258 = vmatpush2.bf16.msra.mxu0 %v20803_v51  ;;  %v20863_v51 = vld [vmem:[#allocation5 + $0x29c8] ss:$16 sps:$4 sm:$0xff]  }
 0x6aa   :  { %15299 = vmatpush2.bf16.msra.mxu1 %v20806_v56  ;;  %15309 = vmatprep.subr.bf16.mxu0 %v20811_v57  ;;  %v20866_v56 = vld [vmem:[#allocation5 + $0x2bc8] ss:$16 sps:$4 sm:$0xff]   ;;  %v20871_v57 = vld [vmem:[#allocation5 + $0x29ac] ss:$16 sps:$4 sm:$0xff]  }
 0x6ab   :  { %15350 = vmatprep.subr.bf16.mxu1 %v20814_v52  ;;  %v20874_v52 = vld [vmem:[#allocation5 + $0x2bac] ss:$16 sps:$4 sm:$0xff]  }
 0x6ac   :  { %v15015_v37 = vpop.f32.mrf.mxu0  ;;  %15260 = vmatmul.mubr.bf16.vlgmr.msra.gmra.mxu0 %v22344_v30  ;;  %v20883_v30 = vld [vmem:[#allocation5 + $0x296c] ss:$16 sps:$4 sm:$0xff]  }
 0x6ad   :  { %v15056_v10 = vpop.f32.mrf.mxu1  ;;  %15301 = vmatmul.mubr.bf16.vlgmr.msra.gmra.mxu1 %v22345_v18  ;;  %v15016_v31 = vadd.f32 %v15015_v37, %v22204_v42  ;;  %15310 = vmatpush1.bf16.msra.mxu0 %v20809_v32  ;;  %v20869_v32 = vld [vmem:[#allocation5 + $0x29a8] ss:$16 sps:$4 sm:$0xff]   ;;  %v20886_v18 = vld [vmem:[#allocation5 + $0x2b6c] ss:$16 sps:$4 sm:$0xff]  }
 0x6ae   :  { %15351 = vmatpush1.bf16.msra.mxu1 %v20812_v48  ;;  %v15017_v20 = vpop.f32.mrf.mxu0  ;;  %15311 = vmatprep.subr.bf16.mxu0 %v20817_v41  ;;  %v20872_v48 = vld [vmem:[#allocation5 + $0x2ba8] ss:$16 sps:$4 sm:$0xff]   ;;  %v20877_v41 = vld [vmem:[#allocation5 + $0x298c] ss:$16 sps:$4 sm:$0xff]  }
 0x6af   :  { %v15058_v23 = vpop.f32.mrf.mxu1  ;;  %15352 = vmatprep.subr.bf16.mxu1 %v20820_v62  ;;  %v22214_v44 = vadd.f32 %v15056_v10, %v15016_v31  ;;  %v15018_v25 = vadd.f32 %v15017_v20, %v22209_v8  ;;  %15341 = vmatprep.mubr.bf16.mxu0 %v22346_v28  ;;  %v20827_v8 = vld [vmem:[#allocation5 + $0x2888] ss:$16 sps:$4 sm:$0xff]   ;;  %v20880_v62 = vld [vmem:[#allocation5 + $0x2b8c] ss:$16 sps:$4 sm:$0xff]  }
 0x6b0   :  { %15382 = vmatprep.mubr.bf16.mxu1 %v22347_v14  ;;  %v15019_v19 = vpop.f32.mrf.mxu0  ;;  %v20875_v37 = vld [vmem:[#allocation5 + $0x2988] ss:$16 sps:$4 sm:$0xff]   ;;  %v20892_v20 = vld [vmem:[#allocation5 + $0x2b4c] ss:$16 sps:$4 sm:$0xff]  }
 0x6b1   :  { %v15060_v42 = vpop.f32.mrf.mxu1  ;;  %v22219_v3 = vadd.f32 %v15058_v23, %v15018_v25  ;;  %15312 = vmatpush1.bf16.msra.mxu0 %v20815_v26  ;;  %v20878_v10 = vld [vmem:[#allocation5 + $0x2b88] ss:$16 sps:$4 sm:$0xff]   ;;  %v20898_v25 = vld [vmem:[#allocation5 + $0x2b2c] ss:$16 sps:$4 sm:$0xff]  }
 0x6b2   :  { %15353 = vmatpush1.bf16.msra.mxu1 %v20818_v54  ;;  %v15020_v13 = vpop.f32.mrf.mxu0  ;;  %15313 = vmatprep.subr.bf16.mxu0 %v20823_v27  ;;  %v20881_v31 = vld [vmem:[#allocation5 + $0x2968] ss:$16 sps:$4 sm:$0xff]   ;;  %v20889_v54 = vld [vmem:[#allocation5 + $0x294c] ss:$16 sps:$4 sm:$0xff]  }
 0x6b3   :  { %v15061_v11 = vpop.f32.mrf.mxu1  ;;  %15354 = vmatprep.subr.bf16.mxu1 %v20826_v59  ;;  %v20884_v26 = vld [vmem:[#allocation5 + $0x2b68] ss:$16 sps:$4 sm:$0xff]   ;;  %v20895_v59 = vld [vmem:[#allocation5 + $0x292c] ss:$16 sps:$4 sm:$0xff]  }
 0x6b4   :  { %v20887_v23 = vld [vmem:[#allocation5 + $0x2948] ss:$16 sps:$4 sm:$0xff]   ;;  %v20901_v19 = vld [vmem:[#allocation5 + $0x290c] ss:$16 sps:$4 sm:$0xff]  }
 0x6b5   :  { %15314 = vmatpush1.bf16.msra.mxu0 %v20821_v29  ;;  %v20890_v27 = vld [vmem:[#allocation5 + $0x2b48] ss:$16 sps:$4 sm:$0xff]   ;;  %v20904_v42 = vld [vmem:[#allocation5 + $0x2b0c] ss:$16 sps:$4 sm:$0xff]  }
 0x6b6   :  { %15355 = vmatpush1.bf16.msra.mxu1 %v20824_v16  ;;  %15315 = vmatprep.subr.bf16.mxu0 %v20829_v61  ;;  %v20893_v28 = vld [vmem:[#allocation5 + $0x2928] ss:$16 sps:$4 sm:$0xff]   ;;  %v20907_v13 = vld [vmem:[#allocation5 + $0x2cec] ss:$16 sps:$4 sm:$0xff]  }
 0x6b7   :  { %15356 = vmatprep.subr.bf16.mxu1 %v20832_v21  ;;  %v20896_v14 = vld [vmem:[#allocation5 + $0x2b28] ss:$16 sps:$4 sm:$0xff]   ;;  %v20910_v11 = vld [vmem:[#allocation5 + $0x2eec] ss:$16 sps:$4 sm:$0xff]  }
 0x6b8   :  { %v20899_v29 = vld [vmem:[#allocation5 + $0x2908] ss:$16 sps:$4 sm:$0xff]  }
 0x6b9   :  { %15316 = vmatpush1.bf16.msra.mxu0 %v20827_v8  ;;  %v20902_v16 = vld [vmem:[#allocation5 + $0x2b08] ss:$16 sps:$4 sm:$0xff]   ;;  %v20913_v8 = vld [vmem:[#allocation5 + $0x2ccc] ss:$16 sps:$4 sm:$0xff]  }
 0x6ba   :  { %15357 = vmatpush1.bf16.msra.mxu1 %v20830_v22  ;;  %15317 = vmatprep.subr.bf16.mxu0 %v20835_v9  ;;  %v20905_v61 = vld [vmem:[#allocation5 + $0x2ce8] ss:$16 sps:$4 sm:$0xff]   ;;  %v20916_v22 = vld [vmem:[#allocation5 + $0x2ecc] ss:$16 sps:$4 sm:$0xff]  }
 0x6bb   :  { %15358 = vmatprep.subr.bf16.mxu1 %v20838_v58  ;;  %v20908_v21 = vld [vmem:[#allocation5 + $0x2ee8] ss:$16 sps:$4 sm:$0xff]  }
 0x6bd   :  { %15318 = vmatpush1.bf16.msra.mxu0 %v20833_v1  ;;  %v22348_v1 = vld [vmem:[#allocation18_spill] sm:$0xff] }
 0x6be   :  { %15359 = vmatpush1.bf16.msra.mxu1 %v20836_v45  ;;  %15319 = vmatprep.subr.bf16.mxu0 %v20841_v43  ;;  %v22349_v45 = vld [vmem:[#allocation19_spill] sm:$0xff] }
 0x6bf   :  { %15360 = vmatprep.subr.bf16.mxu1 %v20844_v39  ;;  %v20911_v39 = vld [vmem:[#allocation5 + $0x2cc8] ss:$16 sps:$4 sm:$0xff]  }
 0x6c1   :  { %15320 = vmatpush1.bf16.msra.mxu0 %v20839_v40  ;;  %v20914_v40 = vld [vmem:[#allocation5 + $0x2ec8] ss:$16 sps:$4 sm:$0xff]  }
 0x6c2   :  { %15361 = vmatpush1.bf16.msra.mxu1 %v20842_v46  ;;  %15321 = vmatprep.subr.bf16.mxu0 %v20847_v55 }
 0x6c3   :  { %15362 = vmatprep.subr.bf16.mxu1 %v20850_v38  ;;  %v20919_v38 = vld [vmem:[#allocation5 + $0x2cac] ss:$16 sps:$4 sm:$0xff]  }
 0x6c5   :  { %15322 = vmatpush1.bf16.msra.mxu0 %v20845_v12  ;;  %v20922_v12 = vld [vmem:[#allocation5 + $0x2eac] ss:$16 sps:$4 sm:$0xff]  }
 0x6c6   :  { %15363 = vmatpush1.bf16.msra.mxu1 %v20848_v49  ;;  %15323 = vmatprep.subr.bf16.mxu0 %v20853_v50 }
 0x6c7   :  { %15364 = vmatprep.subr.bf16.mxu1 %v20856_v34  ;;  %v22350_v34 = vld [vmem:[#allocation20_spill] sm:$0xff] }
 0x6c9   :  { %15324 = vmatpush1.bf16.msra.mxu0 %v20851_v35  ;;  %v22351_v35 = vld [vmem:[#allocation21_spill] sm:$0xff] }
 0x6ca   :  { %15365 = vmatpush1.bf16.msra.mxu1 %v20854_v36  ;;  %15325 = vmatprep.subr.bf16.mxu0 %v20859_v2 }
 0x6cb   :  { %15366 = vmatprep.subr.bf16.mxu1 %v20862_v15  ;;  %v20917_v15 = vld [vmem:[#allocation5 + $0x2ca8] ss:$16 sps:$4 sm:$0xff]  }
 0x6cd   :  { %15326 = vmatpush2.bf16.msra.mxu0 %v20857_v24  ;;  %v20920_v24 = vld [vmem:[#allocation5 + $0x2ea8] ss:$16 sps:$4 sm:$0xff]  }
 0x6ce   :  { %15367 = vmatpush2.bf16.msra.mxu1 %v20860_v63  ;;  %15327 = vmatprep.subr.bf16.mxu0 %v20865_v0 }
 0x6cf   :  { %15368 = vmatprep.subr.bf16.mxu1 %v20868_v5  ;;  %v20925_v5 = vld [vmem:[#allocation5 + $0x2c8c] ss:$16 sps:$4 sm:$0xff]  }
 0x6d1   :  { %15328 = vmatpush2.bf16.msra.mxu0 %v20863_v51  ;;  %v20928_v51 = vld [vmem:[#allocation5 + $0x2e8c] ss:$16 sps:$4 sm:$0xff]  }
 0x6d2   :  { %15369 = vmatpush2.bf16.msra.mxu1 %v20866_v56  ;;  %15329 = vmatprep.subr.bf16.mxu0 %v20871_v57  ;;  %v20926_v56 = vld [vmem:[#allocation5 + $0x2e88] ss:$16 sps:$4 sm:$0xff]   ;;  %v20931_v57 = vld [vmem:[#allocation5 + $0x2c6c] ss:$16 sps:$4 sm:$0xff]  }
 0x6d3   :  { %15370 = vmatprep.subr.bf16.mxu1 %v20874_v52  ;;  %v20934_v52 = vld [vmem:[#allocation5 + $0x2e6c] ss:$16 sps:$4 sm:$0xff]  }
 0x6d5   :  { %15330 = vmatpush2.bf16.msra.mxu0 %v20869_v32  ;;  %v20929_v32 = vld [vmem:[#allocation5 + $0x2c68] ss:$16 sps:$4 sm:$0xff]  }
 0x6d6   :  { %15371 = vmatpush2.bf16.msra.mxu1 %v20872_v48  ;;  %15331 = vmatprep.subr.bf16.mxu0 %v20877_v41  ;;  %v20932_v48 = vld [vmem:[#allocation5 + $0x2e68] ss:$16 sps:$4 sm:$0xff]   ;;  %v20937_v41 = vld [vmem:[#allocation5 + $0x2c4c] ss:$16 sps:$4 sm:$0xff]  }
 0x6d7   :  { %15372 = vmatprep.subr.bf16.mxu1 %v20880_v62  ;;  %v20940_v62 = vld [vmem:[#allocation5 + $0x2e4c] ss:$16 sps:$4 sm:$0xff]  }
 0x6d9   :  { %15332 = vmatpush2.bf16.msra.mxu0 %v20875_v37  ;;  %v20935_v37 = vld [vmem:[#allocation5 + $0x2c48] ss:$16 sps:$4 sm:$0xff]  }
 0x6da   :  { %15373 = vmatpush2.bf16.msra.mxu1 %v20878_v10  ;;  %15333 = vmatprep.subr.bf16.mxu0 %v20883_v30  ;;  %v20938_v10 = vld [vmem:[#allocation5 + $0x2e48] ss:$16 sps:$4 sm:$0xff]   ;;  %v20943_v30 = vld [vmem:[#allocation5 + $0x2c2c] ss:$16 sps:$4 sm:$0xff]  }
 0x6db   :  { %15374 = vmatprep.subr.bf16.mxu1 %v20886_v18  ;;  %v20946_v18 = vld [vmem:[#allocation5 + $0x2e2c] ss:$16 sps:$4 sm:$0xff]  }
 0x6dd   :  { %15334 = vmatpush2.bf16.msra.mxu0 %v20881_v31  ;;  %v20941_v31 = vld [vmem:[#allocation5 + $0x2c28] ss:$16 sps:$4 sm:$0xff]  }
 0x6de   :  { %15375 = vmatpush2.bf16.msra.mxu1 %v20884_v26  ;;  %15335 = vmatprep.subr.bf16.mxu0 %v20889_v54  ;;  %v20944_v26 = vld [vmem:[#allocation5 + $0x2e28] ss:$16 sps:$4 sm:$0xff]   ;;  %v20949_v54 = vld [vmem:[#allocation5 + $0x2c0c] ss:$16 sps:$4 sm:$0xff]  }
 0x6df   :  { %15376 = vmatprep.subr.bf16.mxu1 %v20892_v20  ;;  %v20952_v20 = vld [vmem:[#allocation5 + $0x2e0c] ss:$16 sps:$4 sm:$0xff]  }
 0x6e1   :  { %15336 = vmatpush2.bf16.msra.mxu0 %v20887_v23  ;;  %v20947_v23 = vld [vmem:[#allocation5 + $0x2c08] ss:$16 sps:$4 sm:$0xff]  }
 0x6e2   :  { %15377 = vmatpush2.bf16.msra.mxu1 %v20890_v27  ;;  %15337 = vmatprep.subr.bf16.mxu0 %v20895_v59  ;;  %v20950_v27 = vld [vmem:[#allocation5 + $0x2e08] ss:$16 sps:$4 sm:$0xff]   ;;  %v20955_v59 = vld [vmem:[#allocation5 + $0x2dec] ss:$16 sps:$4 sm:$0xff]  }
 0x6e3   :  { %15378 = vmatprep.subr.bf16.mxu1 %v20898_v25  ;;  %v20958_v25 = vld [vmem:[#allocation5 + $0x2fec] ss:$16 sps:$4 sm:$0xff]  }
 0x6e5   :  { %15338 = vmatpush2.bf16.msra.mxu0 %v20893_v28  ;;  %v20953_v28 = vld [vmem:[#allocation5 + $0x2de8] ss:$16 sps:$4 sm:$0xff]  }
 0x6e6   :  { %15379 = vmatpush2.bf16.msra.mxu1 %v20896_v14  ;;  %15339 = vmatprep.subr.bf16.mxu0 %v20901_v19  ;;  %v20956_v14 = vld [vmem:[#allocation5 + $0x2fe8] ss:$16 sps:$4 sm:$0xff]   ;;  %v20961_v19 = vld [vmem:[#allocation5 + $0x2dcc] ss:$16 sps:$4 sm:$0xff]  }
 0x6e7   :  { %15380 = vmatprep.subr.bf16.mxu1 %v20904_v42  ;;  %v20964_v42 = vld [vmem:[#allocation5 + $0x2fcc] ss:$16 sps:$4 sm:$0xff]  }
 0x6e9   :  { %15340 = vmatpush2.bf16.msra.mxu0 %v20899_v29  ;;  %v20959_v29 = vld [vmem:[#allocation5 + $0x2dc8] ss:$16 sps:$4 sm:$0xff]  }
 0x6ea   :  { %15381 = vmatpush2.bf16.msra.mxu1 %v20902_v16  ;;  %15391 = vmatprep.subr.bf16.mxu0 %v20907_v13  ;;  %v20962_v16 = vld [vmem:[#allocation5 + $0x2fc8] ss:$16 sps:$4 sm:$0xff]   ;;  %v20967_v13 = vld [vmem:[#allocation5 + $0x2dac] ss:$16 sps:$4 sm:$0xff]  }
 0x6eb   :  { %15432 = vmatprep.subr.bf16.mxu1 %v20910_v11  ;;  %v20970_v11 = vld [vmem:[#allocation5 + $0x2fac] ss:$16 sps:$4 sm:$0xff]  }
 0x6ec   :  { %v15097_v9 = vpop.f32.mrf.mxu0  ;;  %15342 = vmatmul.mubr.bf16.vlgmr.msra.gmra.mxu0 %v22348_v1  ;;  %v20979_v1 = vld [vmem:[#allocation5 + $0x2d6c] ss:$16 sps:$4 sm:$0xff]  }
 0x6ed   :  { %v15138_v58 = vpop.f32.mrf.mxu1  ;;  %15383 = vmatmul.mubr.bf16.vlgmr.msra.gmra.mxu1 %v22349_v45  ;;  %v15098_v43 = vadd.f32 %v15097_v9, %v22214_v44  ;;  %15392 = vmatpush1.bf16.msra.mxu0 %v20905_v61  ;;  %v20965_v61 = vld [vmem:[#allocation5 + $0x2da8] ss:$16 sps:$4 sm:$0xff]   ;;  %v20982_v45 = vld [vmem:[#allocation5 + $0x2f6c] ss:$16 sps:$4 sm:$0xff]  }
 0x6ee   :  { %15433 = vmatpush1.bf16.msra.mxu1 %v20908_v21  ;;  %v15099_v46 = vpop.f32.mrf.mxu0  ;;  %15393 = vmatprep.subr.bf16.mxu0 %v20913_v8  ;;  %v20968_v21 = vld [vmem:[#allocation5 + $0x2fa8] ss:$16 sps:$4 sm:$0xff]   ;;  %v20973_v8 = vld [vmem:[#allocation5 + $0x2d8c] ss:$16 sps:$4 sm:$0xff]  }
 0x6ef   :  { %v15140_v55 = vpop.f32.mrf.mxu1  ;;  %15434 = vmatprep.subr.bf16.mxu1 %v20916_v22  ;;  %v22224_v49 = vadd.f32 %v15138_v58, %v15098_v43  ;;  %v15100_v50 = vadd.f32 %v15099_v46, %v22219_v3  ;;  %15423 = vmatprep.mubr.bf16.mxu0 %v22350_v34  ;;  %v20923_v3 = vld [vmem:[#allocation5 + $0x2c88] ss:$16 sps:$4 sm:$0xff]   ;;  %v20976_v22 = vld [vmem:[#allocation5 + $0x2f8c] ss:$16 sps:$4 sm:$0xff]  }
 0x6f0   :  { %15464 = vmatprep.mubr.bf16.mxu1 %v22351_v35  ;;  %v15101_v36 = vpop.f32.mrf.mxu0  ;;  %v20971_v9 = vld [vmem:[#allocation5 + $0x2d88] ss:$16 sps:$4 sm:$0xff]   ;;  %v20988_v46 = vld [vmem:[#allocation5 + $0x2f4c] ss:$16 sps:$4 sm:$0xff]  }
 0x6f1   :  { %v15142_v44 = vpop.f32.mrf.mxu1  ;;  %v22229_v2 = vadd.f32 %v15140_v55, %v15100_v50  ;;  %15394 = vmatpush1.bf16.msra.mxu0 %v20911_v39  ;;  %v20974_v58 = vld [vmem:[#allocation5 + $0x2f88] ss:$16 sps:$4 sm:$0xff]   ;;  %v20994_v50 = vld [vmem:[#allocation5 + $0x2f2c] ss:$16 sps:$4 sm:$0xff]  }
 0x6f2   :  { %15435 = vmatpush1.bf16.msra.mxu1 %v20914_v40  ;;  %v15102_v63 = vpop.f32.mrf.mxu0  ;;  %15395 = vmatprep.subr.bf16.mxu0 %v20919_v38  ;;  %v20977_v43 = vld [vmem:[#allocation5 + $0x2d68] ss:$16 sps:$4 sm:$0xff]   ;;  %v20985_v40 = vld [vmem:[#allocation5 + $0x2d4c] ss:$16 sps:$4 sm:$0xff]  }
 0x6f3   :  { %v15143_v0 = vpop.f32.mrf.mxu1  ;;  %15436 = vmatprep.subr.bf16.mxu1 %v20922_v12  ;;  %v20980_v39 = vld [vmem:[#allocation5 + $0x2f68] ss:$16 sps:$4 sm:$0xff]   ;;  %v20991_v12 = vld [vmem:[#allocation5 + $0x2d2c] ss:$16 sps:$4 sm:$0xff]  }
 0x6f4   :  { %v20983_v55 = vld [vmem:[#allocation5 + $0x2d48] ss:$16 sps:$4 sm:$0xff]   ;;  %v20997_v36 = vld [vmem:[#allocation5 + $0x2d0c] ss:$16 sps:$4 sm:$0xff]  }
 0x6f5   :  { %15396 = vmatpush1.bf16.msra.mxu0 %v20917_v15  ;;  %v20986_v38 = vld [vmem:[#allocation5 + $0x2f48] ss:$16 sps:$4 sm:$0xff]   ;;  %v21000_v44 = vld [vmem:[#allocation5 + $0x2f0c] ss:$16 sps:$4 sm:$0xff]  }
 0x6f6   :  { %15437 = vmatpush1.bf16.msra.mxu1 %v20920_v24  ;;  %15397 = vmatprep.subr.bf16.mxu0 %v20925_v5  ;;  %v20989_v34 = vld [vmem:[#allocation5 + $0x2d28] ss:$16 sps:$4 sm:$0xff]   ;;  %v21003_v63 = vld [vmem:[#allocation5 + $0x30ec] ss:$16 sps:$4 sm:$0xff]  }
 0x6f7   :  { %15438 = vmatprep.subr.bf16.mxu1 %v20928_v51  ;;  %v20992_v35 = vld [vmem:[#allocation5 + $0x2f28] ss:$16 sps:$4 sm:$0xff]   ;;  %v21006_v0 = vld [vmem:[#allocation5 + $0x32ec] ss:$16 sps:$4 sm:$0xff]  }
 0x6f8   :  { %v20995_v15 = vld [vmem:[#allocation5 + $0x2d08] ss:$16 sps:$4 sm:$0xff]  }
 0x6f9   :  { %15398 = vmatpush1.bf16.msra.mxu0 %v20923_v3  ;;  %v20998_v24 = vld [vmem:[#allocation5 + $0x2f08] ss:$16 sps:$4 sm:$0xff]   ;;  %v21009_v3 = vld [vmem:[#allocation5 + $0x30cc] ss:$16 sps:$4 sm:$0xff]  }
 0x6fa   :  { %15439 = vmatpush1.bf16.msra.mxu1 %v20926_v56  ;;  %15399 = vmatprep.subr.bf16.mxu0 %v20931_v57  ;;  %v21001_v5 = vld [vmem:[#allocation5 + $0x30e8] ss:$16 sps:$4 sm:$0xff]   ;;  %v21012_v56 = vld [vmem:[#allocation5 + $0x32cc] ss:$16 sps:$4 sm:$0xff]  }
 0x6fb   :  { %15440 = vmatprep.subr.bf16.mxu1 %v20934_v52  ;;  %v21004_v51 = vld [vmem:[#allocation5 + $0x32e8] ss:$16 sps:$4 sm:$0xff]  }
 0x6fd   :  { %15400 = vmatpush1.bf16.msra.mxu0 %v20929_v32  ;;  %v22352_v32 = vld [vmem:[#allocation22_spill] sm:$0xff] }
 0x6fe   :  { %15441 = vmatpush1.bf16.msra.mxu1 %v20932_v48  ;;  %15401 = vmatprep.subr.bf16.mxu0 %v20937_v41  ;;  %v22353_v48 = vld [vmem:[#allocation23_spill] sm:$0xff] }
 0x6ff   :  { %15442 = vmatprep.subr.bf16.mxu1 %v20940_v62  ;;  %v21007_v62 = vld [vmem:[#allocation5 + $0x30c8] ss:$16 sps:$4 sm:$0xff]  }
 0x701   :  { %15402 = vmatpush1.bf16.msra.mxu0 %v20935_v37  ;;  %v21010_v37 = vld [vmem:[#allocation5 + $0x32c8] ss:$16 sps:$4 sm:$0xff]  }
 0x702   :  { %15443 = vmatpush1.bf16.msra.mxu1 %v20938_v10  ;;  %15403 = vmatprep.subr.bf16.mxu0 %v20943_v30 }
 0x703   :  { %15444 = vmatprep.subr.bf16.mxu1 %v20946_v18  ;;  %v21015_v18 = vld [vmem:[#allocation5 + $0x30ac] ss:$16 sps:$4 sm:$0xff]  }
 0x705   :  { %15404 = vmatpush1.bf16.msra.mxu0 %v20941_v31  ;;  %v21018_v31 = vld [vmem:[#allocation5 + $0x32ac] ss:$16 sps:$4 sm:$0xff]  }
 0x706   :  { %15445 = vmatpush1.bf16.msra.mxu1 %v20944_v26  ;;  %15405 = vmatprep.subr.bf16.mxu0 %v20949_v54 }
 0x707   :  { %15446 = vmatprep.subr.bf16.mxu1 %v20952_v20  ;;  %v22354_v20 = vld [vmem:[#allocation24_spill] sm:$0xff] }
 0x709   :  { %15406 = vmatpush1.bf16.msra.mxu0 %v20947_v23  ;;  %v22355_v23 = vld [vmem:[#allocation25_spill] sm:$0xff] }
 0x70a   :  { %15447 = vmatpush1.bf16.msra.mxu1 %v20950_v27  ;;  %15407 = vmatprep.subr.bf16.mxu0 %v20955_v59 }
 0x70b   :  { %15448 = vmatprep.subr.bf16.mxu1 %v20958_v25  ;;  %v21013_v25 = vld [vmem:[#allocation5 + $0x30a8] ss:$16 sps:$4 sm:$0xff]  }
 0x70d   :  { %15408 = vmatpush2.bf16.msra.mxu0 %v20953_v28  ;;  %v21016_v28 = vld [vmem:[#allocation5 + $0x32a8] ss:$16 sps:$4 sm:$0xff]  }
 0x70e   :  { %15449 = vmatpush2.bf16.msra.mxu1 %v20956_v14  ;;  %15409 = vmatprep.subr.bf16.mxu0 %v20961_v19 }
 0x70f   :  { %15450 = vmatprep.subr.bf16.mxu1 %v20964_v42  ;;  %v21021_v42 = vld [vmem:[#allocation5 + $0x308c] ss:$16 sps:$4 sm:$0xff]  }
 0x711   :  { %15410 = vmatpush2.bf16.msra.mxu0 %v20959_v29  ;;  %v21024_v29 = vld [vmem:[#allocation5 + $0x328c] ss:$16 sps:$4 sm:$0xff]  }
 0x712   :  { %15451 = vmatpush2.bf16.msra.mxu1 %v20962_v16  ;;  %15411 = vmatprep.subr.bf16.mxu0 %v20967_v13  ;;  %v21022_v16 = vld [vmem:[#allocation5 + $0x3288] ss:$16 sps:$4 sm:$0xff]   ;;  %v21027_v13 = vld [vmem:[#allocation5 + $0x306c] ss:$16 sps:$4 sm:$0xff]  }
 0x713   :  { %15452 = vmatprep.subr.bf16.mxu1 %v20970_v11  ;;  %v21030_v11 = vld [vmem:[#allocation5 + $0x326c] ss:$16 sps:$4 sm:$0xff]  }
 0x715   :  { %15412 = vmatpush2.bf16.msra.mxu0 %v20965_v61  ;;  %v21025_v61 = vld [vmem:[#allocation5 + $0x3068] ss:$16 sps:$4 sm:$0xff]  }
 0x716   :  { %15453 = vmatpush2.bf16.msra.mxu1 %v20968_v21  ;;  %15413 = vmatprep.subr.bf16.mxu0 %v20973_v8  ;;  %v21028_v21 = vld [vmem:[#allocation5 + $0x3268] ss:$16 sps:$4 sm:$0xff]   ;;  %v21033_v8 = vld [vmem:[#allocation5 + $0x304c] ss:$16 sps:$4 sm:$0xff]  }
 0x717   :  { %15454 = vmatprep.subr.bf16.mxu1 %v20976_v22  ;;  %v21036_v22 = vld [vmem:[#allocation5 + $0x324c] ss:$16 sps:$4 sm:$0xff]  }
 0x719   :  { %15414 = vmatpush2.bf16.msra.mxu0 %v20971_v9  ;;  %v21031_v9 = vld [vmem:[#allocation5 + $0x3048] ss:$16 sps:$4 sm:$0xff]  }
 0x71a   :  { %15455 = vmatpush2.bf16.msra.mxu1 %v20974_v58  ;;  %15415 = vmatprep.subr.bf16.mxu0 %v20979_v1  ;;  %v21034_v58 = vld [vmem:[#allocation5 + $0x3248] ss:$16 sps:$4 sm:$0xff]   ;;  %v21039_v1 = vld [vmem:[#allocation5 + $0x302c] ss:$16 sps:$4 sm:$0xff]  }
 0x71b   :  { %15456 = vmatprep.subr.bf16.mxu1 %v20982_v45  ;;  %v21042_v45 = vld [vmem:[#allocation5 + $0x322c] ss:$16 sps:$4 sm:$0xff]  }
 0x71d   :  { %15416 = vmatpush2.bf16.msra.mxu0 %v20977_v43  ;;  %v21037_v43 = vld [vmem:[#allocation5 + $0x3028] ss:$16 sps:$4 sm:$0xff]  }
 0x71e   :  { %15457 = vmatpush2.bf16.msra.mxu1 %v20980_v39  ;;  %15417 = vmatprep.subr.bf16.mxu0 %v20985_v40  ;;  %v21040_v39 = vld [vmem:[#allocation5 + $0x3228] ss:$16 sps:$4 sm:$0xff]   ;;  %v21045_v40 = vld [vmem:[#allocation5 + $0x300c] ss:$16 sps:$4 sm:$0xff]  }
 0x71f   :  { %15458 = vmatprep.subr.bf16.mxu1 %v20988_v46  ;;  %v21048_v46 = vld [vmem:[#allocation5 + $0x320c] ss:$16 sps:$4 sm:$0xff]  }
 0x721   :  { %15418 = vmatpush2.bf16.msra.mxu0 %v20983_v55  ;;  %v21043_v55 = vld [vmem:[#allocation5 + $0x3008] ss:$16 sps:$4 sm:$0xff]  }
 0x722   :  { %15459 = vmatpush2.bf16.msra.mxu1 %v20986_v38  ;;  %15419 = vmatprep.subr.bf16.mxu0 %v20991_v12  ;;  %v21046_v38 = vld [vmem:[#allocation5 + $0x3208] ss:$16 sps:$4 sm:$0xff]   ;;  %v21051_v12 = vld [vmem:[#allocation5 + $0x31ec] ss:$16 sps:$4 sm:$0xff]  }
 0x723   :  { %15460 = vmatprep.subr.bf16.mxu1 %v20994_v50  ;;  %v21054_v50 = vld [vmem:[#allocation5 + $0x33ec] ss:$16 sps:$4 sm:$0xff]  }
 0x725   :  { %15420 = vmatpush2.bf16.msra.mxu0 %v20989_v34  ;;  %v21049_v34 = vld [vmem:[#allocation5 + $0x31e8] ss:$16 sps:$4 sm:$0xff]  }
 0x726   :  { %15461 = vmatpush2.bf16.msra.mxu1 %v20992_v35  ;;  %15421 = vmatprep.subr.bf16.mxu0 %v20997_v36  ;;  %v21052_v35 = vld [vmem:[#allocation5 + $0x33e8] ss:$16 sps:$4 sm:$0xff]   ;;  %v21057_v36 = vld [vmem:[#allocation5 + $0x31cc] ss:$16 sps:$4 sm:$0xff]  }
 0x727   :  { %15462 = vmatprep.subr.bf16.mxu1 %v21000_v44  ;;  %v21060_v44 = vld [vmem:[#allocation5 + $0x33cc] ss:$16 sps:$4 sm:$0xff]  }
 0x729   :  { %15422 = vmatpush2.bf16.msra.mxu0 %v20995_v15  ;;  %v21055_v15 = vld [vmem:[#allocation5 + $0x31c8] ss:$16 sps:$4 sm:$0xff]  }
 0x72a   :  { %15463 = vmatpush2.bf16.msra.mxu1 %v20998_v24  ;;  %15473 = vmatprep.subr.bf16.mxu0 %v21003_v63  ;;  %v21058_v24 = vld [vmem:[#allocation5 + $0x33c8] ss:$16 sps:$4 sm:$0xff]   ;;  %v21063_v63 = vld [vmem:[#allocation5 + $0x31ac] ss:$16 sps:$4 sm:$0xff]  }
 0x72b   :  { %15514 = vmatprep.subr.bf16.mxu1 %v21006_v0  ;;  %v21066_v0 = vld [vmem:[#allocation5 + $0x33ac] ss:$16 sps:$4 sm:$0xff]  }
 0x72c   :  { %v15179_v57 = vpop.f32.mrf.mxu0  ;;  %15424 = vmatmul.mubr.bf16.vlgmr.msra.gmra.mxu0 %v22352_v32  ;;  %v21075_v32 = vld [vmem:[#allocation5 + $0x316c] ss:$16 sps:$4 sm:$0xff]  }
 0x72d   :  { %v15220_v52 = vpop.f32.mrf.mxu1  ;;  %15465 = vmatmul.mubr.bf16.vlgmr.msra.gmra.mxu1 %v22353_v48  ;;  %v15180_v41 = vadd.f32 %v15179_v57, %v22224_v49  ;;  %15474 = vmatpush1.bf16.msra.mxu0 %v21001_v5  ;;  %v21061_v5 = vld [vmem:[#allocation5 + $0x31a8] ss:$16 sps:$4 sm:$0xff]   ;;  %v21078_v48 = vld [vmem:[#allocation5 + $0x336c] ss:$16 sps:$4 sm:$0xff]  }
 0x72e   :  { %15515 = vmatpush1.bf16.msra.mxu1 %v21004_v51  ;;  %v15181_v10 = vpop.f32.mrf.mxu0  ;;  %15475 = vmatprep.subr.bf16.mxu0 %v21009_v3  ;;  %v21064_v51 = vld [vmem:[#allocation5 + $0x33a8] ss:$16 sps:$4 sm:$0xff]   ;;  %v21069_v3 = vld [vmem:[#allocation5 + $0x318c] ss:$16 sps:$4 sm:$0xff]  }
 0x72f   :  { %v15222_v30 = vpop.f32.mrf.mxu1  ;;  %15516 = vmatprep.subr.bf16.mxu1 %v21012_v56  ;;  %v22234_v26 = vadd.f32 %v15220_v52, %v15180_v41  ;;  %v15182_v54 = vadd.f32 %v15181_v10, %v22229_v2  ;;  %15505 = vmatprep.mubr.bf16.mxu0 %v22354_v20  ;;  %v21019_v2 = vld [vmem:[#allocation5 + $0x3088] ss:$16 sps:$4 sm:$0xff]   ;;  %v21072_v56 = vld [vmem:[#allocation5 + $0x338c] ss:$16 sps:$4 sm:$0xff]  }
 0x730   :  { %15546 = vmatprep.mubr.bf16.mxu1 %v22355_v23  ;;  %v15183_v27 = vpop.f32.mrf.mxu0  ;;  %v21067_v57 = vld [vmem:[#allocation5 + $0x3188] ss:$16 sps:$4 sm:$0xff]   ;;  %v21084_v10 = vld [vmem:[#allocation5 + $0x334c] ss:$16 sps:$4 sm:$0xff]  }
 0x731   :  { %v15224_v49 = vpop.f32.mrf.mxu1  ;;  %v22239_v59 = vadd.f32 %v15222_v30, %v15182_v54  ;;  %15476 = vmatpush1.bf16.msra.mxu0 %v21007_v62  ;;  %v21070_v52 = vld [vmem:[#allocation5 + $0x3388] ss:$16 sps:$4 sm:$0xff]   ;;  %v21090_v54 = vld [vmem:[#allocation5 + $0x332c] ss:$16 sps:$4 sm:$0xff]  }
 0x732   :  { %15517 = vmatpush1.bf16.msra.mxu1 %v21010_v37  ;;  %v15184_v14 = vpop.f32.mrf.mxu0  ;;  %15477 = vmatprep.subr.bf16.mxu0 %v21015_v18  ;;  %v21073_v41 = vld [vmem:[#allocation5 + $0x3168] ss:$16 sps:$4 sm:$0xff]   ;;  %v21081_v37 = vld [vmem:[#allocation5 + $0x314c] ss:$16 sps:$4 sm:$0xff]  }
 0x733   :  { %v15225_v19 = vpop.f32.mrf.mxu1  ;;  %15518 = vmatprep.subr.bf16.mxu1 %v21018_v31  ;;  %v21076_v62 = vld [vmem:[#allocation5 + $0x3368] ss:$16 sps:$4 sm:$0xff]   ;;  %v21087_v31 = vld [vmem:[#allocation5 + $0x312c] ss:$16 sps:$4 sm:$0xff]  }
 0x734   :  { %v21079_v30 = vld [vmem:[#allocation5 + $0x3148] ss:$16 sps:$4 sm:$0xff]   ;;  %v21093_v27 = vld [vmem:[#allocation5 + $0x310c] ss:$16 sps:$4 sm:$0xff]  }
 0x735   :  { %15478 = vmatpush1.bf16.msra.mxu0 %v21013_v25  ;;  %v21082_v18 = vld [vmem:[#allocation5 + $0x3348] ss:$16 sps:$4 sm:$0xff]   ;;  %v21096_v49 = vld [vmem:[#allocation5 + $0x330c] ss:$16 sps:$4 sm:$0xff]  }
 0x736   :  { %15519 = vmatpush1.bf16.msra.mxu1 %v21016_v28  ;;  %15479 = vmatprep.subr.bf16.mxu0 %v21021_v42  ;;  %v21085_v20 = vld [vmem:[#allocation5 + $0x3128] ss:$16 sps:$4 sm:$0xff]   ;;  %v21099_v14 = vld [vmem:[#allocation5 + $0x34ec] ss:$16 sps:$4 sm:$0xff]  }
 0x737   :  { %15520 = vmatprep.subr.bf16.mxu1 %v21024_v29  ;;  %v21088_v23 = vld [vmem:[#allocation5 + $0x3328] ss:$16 sps:$4 sm:$0xff]   ;;  %v21102_v19 = vld [vmem:[#allocation5 + $0x36ec] ss:$16 sps:$4 sm:$0xff]  }
 0x738   :  { %v21091_v25 = vld [vmem:[#allocation5 + $0x3108] ss:$16 sps:$4 sm:$0xff]  }
 0x739   :  { %15480 = vmatpush1.bf16.msra.mxu0 %v21019_v2  ;;  %v21094_v28 = vld [vmem:[#allocation5 + $0x3308] ss:$16 sps:$4 sm:$0xff]   ;;  %v21105_v2 = vld [vmem:[#allocation5 + $0x34cc] ss:$16 sps:$4 sm:$0xff]  }
 0x73a   :  { %15521 = vmatpush1.bf16.msra.mxu1 %v21022_v16  ;;  %15481 = vmatprep.subr.bf16.mxu0 %v21027_v13  ;;  %v21097_v42 = vld [vmem:[#allocation5 + $0x34e8] ss:$16 sps:$4 sm:$0xff]   ;;  %v21108_v16 = vld [vmem:[#allocation5 + $0x36cc] ss:$16 sps:$4 sm:$0xff]  }
 0x73b   :  { %15522 = vmatprep.subr.bf16.mxu1 %v21030_v11  ;;  %v21100_v29 = vld [vmem:[#allocation5 + $0x36e8] ss:$16 sps:$4 sm:$0xff]  }
 0x73d   :  { %15482 = vmatpush1.bf16.msra.mxu0 %v21025_v61  ;;  %v22356_v61 = vld [vmem:[#allocation26_spill] sm:$0xff] }
 0x73e   :  { %15523 = vmatpush1.bf16.msra.mxu1 %v21028_v21  ;;  %15483 = vmatprep.subr.bf16.mxu0 %v21033_v8  ;;  %v22357_v21 = vld [vmem:[#allocation27_spill] sm:$0xff] }
 0x73f   :  { %15524 = vmatprep.subr.bf16.mxu1 %v21036_v22  ;;  %v21103_v22 = vld [vmem:[#allocation5 + $0x34c8] ss:$16 sps:$4 sm:$0xff]  }
 0x741   :  { %15484 = vmatpush1.bf16.msra.mxu0 %v21031_v9  ;;  %v21106_v9 = vld [vmem:[#allocation5 + $0x36c8] ss:$16 sps:$4 sm:$0xff]  }
 0x742   :  { %15525 = vmatpush1.bf16.msra.mxu1 %v21034_v58  ;;  %15485 = vmatprep.subr.bf16.mxu0 %v21039_v1 }
 0x743   :  { %15526 = vmatprep.subr.bf16.mxu1 %v21042_v45  ;;  %v21111_v45 = vld [vmem:[#allocation5 + $0x34ac] ss:$16 sps:$4 sm:$0xff]  }
 0x745   :  { %15486 = vmatpush1.bf16.msra.mxu0 %v21037_v43  ;;  %v21114_v43 = vld [vmem:[#allocation5 + $0x36ac] ss:$16 sps:$4 sm:$0xff]  }
 0x746   :  { %15527 = vmatpush1.bf16.msra.mxu1 %v21040_v39  ;;  %15487 = vmatprep.subr.bf16.mxu0 %v21045_v40 }
 0x747   :  { %15528 = vmatprep.subr.bf16.mxu1 %v21048_v46  ;;  %v22358_v46 = vld [vmem:[#allocation28_spill] sm:$0xff] }
 0x749   :  { %15488 = vmatpush1.bf16.msra.mxu0 %v21043_v55  ;;  %v22359_v55 = vld [vmem:[#allocation29_spill] sm:$0xff] }
 0x74a   :  { %15529 = vmatpush1.bf16.msra.mxu1 %v21046_v38  ;;  %15489 = vmatprep.subr.bf16.mxu0 %v21051_v12 }
 0x74b   :  { %15530 = vmatprep.subr.bf16.mxu1 %v21054_v50  ;;  %v21109_v50 = vld [vmem:[#allocation5 + $0x34a8] ss:$16 sps:$4 sm:$0xff]  }
 0x74d   :  { %15490 = vmatpush2.bf16.msra.mxu0 %v21049_v34  ;;  %v21112_v34 = vld [vmem:[#allocation5 + $0x36a8] ss:$16 sps:$4 sm:$0xff]  }
 0x74e   :  { %15531 = vmatpush2.bf16.msra.mxu1 %v21052_v35  ;;  %15491 = vmatprep.subr.bf16.mxu0 %v21057_v36 }
 0x74f   :  { %15532 = vmatprep.subr.bf16.mxu1 %v21060_v44  ;;  %v21117_v44 = vld [vmem:[#allocation5 + $0x348c] ss:$16 sps:$4 sm:$0xff]  }
 0x751   :  { %15492 = vmatpush2.bf16.msra.mxu0 %v21055_v15  ;;  %v21120_v15 = vld [vmem:[#allocation5 + $0x368c] ss:$16 sps:$4 sm:$0xff]  }
 0x752   :  { %15533 = vmatpush2.bf16.msra.mxu1 %v21058_v24  ;;  %15493 = vmatprep.subr.bf16.mxu0 %v21063_v63  ;;  %v21118_v24 = vld [vmem:[#allocation5 + $0x3688] ss:$16 sps:$4 sm:$0xff]   ;;  %v21123_v63 = vld [vmem:[#allocation5 + $0x346c] ss:$16 sps:$4 sm:$0xff]  }
 0x753   :  { %15534 = vmatprep.subr.bf16.mxu1 %v21066_v0  ;;  %v21126_v0 = vld [vmem:[#allocation5 + $0x366c] ss:$16 sps:$4 sm:$0xff]  }
 0x755   :  { %15494 = vmatpush2.bf16.msra.mxu0 %v21061_v5  ;;  %v21121_v5 = vld [vmem:[#allocation5 + $0x3468] ss:$16 sps:$4 sm:$0xff]  }
 0x756   :  { %15535 = vmatpush2.bf16.msra.mxu1 %v21064_v51  ;;  %15495 = vmatprep.subr.bf16.mxu0 %v21069_v3  ;;  %v21124_v51 = vld [vmem:[#allocation5 + $0x3668] ss:$16 sps:$4 sm:$0xff]   ;;  %v21129_v3 = vld [vmem:[#allocation5 + $0x344c] ss:$16 sps:$4 sm:$0xff]  }
 0x757   :  { %15536 = vmatprep.subr.bf16.mxu1 %v21072_v56  ;;  %v21132_v56 = vld [vmem:[#allocation5 + $0x364c] ss:$16 sps:$4 sm:$0xff]  }
 0x759   :  { %15496 = vmatpush2.bf16.msra.mxu0 %v21067_v57  ;;  %v21127_v57 = vld [vmem:[#allocation5 + $0x3448] ss:$16 sps:$4 sm:$0xff]  }
 0x75a   :  { %15537 = vmatpush2.bf16.msra.mxu1 %v21070_v52  ;;  %15497 = vmatprep.subr.bf16.mxu0 %v21075_v32  ;;  %v21130_v52 = vld [vmem:[#allocation5 + $0x3648] ss:$16 sps:$4 sm:$0xff]   ;;  %v21135_v32 = vld [vmem:[#allocation5 + $0x342c] ss:$16 sps:$4 sm:$0xff]  }
 0x75b   :  { %15538 = vmatprep.subr.bf16.mxu1 %v21078_v48  ;;  %v21138_v48 = vld [vmem:[#allocation5 + $0x362c] ss:$16 sps:$4 sm:$0xff]  }
 0x75d   :  { %15498 = vmatpush2.bf16.msra.mxu0 %v21073_v41  ;;  %v21133_v41 = vld [vmem:[#allocation5 + $0x3428] ss:$16 sps:$4 sm:$0xff]  }
 0x75e   :  { %15539 = vmatpush2.bf16.msra.mxu1 %v21076_v62  ;;  %15499 = vmatprep.subr.bf16.mxu0 %v21081_v37  ;;  %v21136_v62 = vld [vmem:[#allocation5 + $0x3628] ss:$16 sps:$4 sm:$0xff]   ;;  %v21141_v37 = vld [vmem:[#allocation5 + $0x340c] ss:$16 sps:$4 sm:$0xff]  }
 0x75f   :  { %15540 = vmatprep.subr.bf16.mxu1 %v21084_v10  ;;  %v21144_v10 = vld [vmem:[#allocation5 + $0x360c] ss:$16 sps:$4 sm:$0xff]  }
 0x761   :  { %15500 = vmatpush2.bf16.msra.mxu0 %v21079_v30  ;;  %v21139_v30 = vld [vmem:[#allocation5 + $0x3408] ss:$16 sps:$4 sm:$0xff]  }
 0x762   :  { %15541 = vmatpush2.bf16.msra.mxu1 %v21082_v18  ;;  %15501 = vmatprep.subr.bf16.mxu0 %v21087_v31  ;;  %v21142_v18 = vld [vmem:[#allocation5 + $0x3608] ss:$16 sps:$4 sm:$0xff]   ;;  %v21147_v31 = vld [vmem:[#allocation5 + $0x35ec] ss:$16 sps:$4 sm:$0xff]  }
 0x763   :  { %15542 = vmatprep.subr.bf16.mxu1 %v21090_v54  ;;  %v21150_v54 = vld [vmem:[#allocation5 + $0x37ec] ss:$16 sps:$4 sm:$0xff]  }
 0x765   :  { %15502 = vmatpush2.bf16.msra.mxu0 %v21085_v20  ;;  %v21145_v20 = vld [vmem:[#allocation5 + $0x35e8] ss:$16 sps:$4 sm:$0xff]  }
 0x766   :  { %15543 = vmatpush2.bf16.msra.mxu1 %v21088_v23  ;;  %15503 = vmatprep.subr.bf16.mxu0 %v21093_v27  ;;  %v21148_v23 = vld [vmem:[#allocation5 + $0x37e8] ss:$16 sps:$4 sm:$0xff]   ;;  %v21153_v27 = vld [vmem:[#allocation5 + $0x35cc] ss:$16 sps:$4 sm:$0xff]  }
 0x767   :  { %15544 = vmatprep.subr.bf16.mxu1 %v21096_v49  ;;  %v21156_v49 = vld [vmem:[#allocation5 + $0x37cc] ss:$16 sps:$4 sm:$0xff]  }
 0x769   :  { %15504 = vmatpush2.bf16.msra.mxu0 %v21091_v25  ;;  %v21151_v25 = vld [vmem:[#allocation5 + $0x35c8] ss:$16 sps:$4 sm:$0xff]  }
 0x76a   :  { %15545 = vmatpush2.bf16.msra.mxu1 %v21094_v28  ;;  %15555 = vmatprep.subr.bf16.mxu0 %v21099_v14  ;;  %v21154_v28 = vld [vmem:[#allocation5 + $0x37c8] ss:$16 sps:$4 sm:$0xff]   ;;  %v21159_v14 = vld [vmem:[#allocation5 + $0x35ac] ss:$16 sps:$4 sm:$0xff]  }
 0x76b   :  { %15596 = vmatprep.subr.bf16.mxu1 %v21102_v19  ;;  %v21162_v19 = vld [vmem:[#allocation5 + $0x37ac] ss:$16 sps:$4 sm:$0xff]  }
 0x76c   :  { %v15261_v13 = vpop.f32.mrf.mxu0  ;;  %15506 = vmatmul.mubr.bf16.vlgmr.msra.gmra.mxu0 %v22356_v61  ;;  %v21171_v61 = vld [vmem:[#allocation5 + $0x356c] ss:$16 sps:$4 sm:$0xff]  }
 0x76d   :  { %v15302_v11 = vpop.f32.mrf.mxu1  ;;  %15547 = vmatmul.mubr.bf16.vlgmr.msra.gmra.mxu1 %v22357_v21  ;;  %v15262_v8 = vadd.f32 %v15261_v13, %v22234_v26  ;;  %15556 = vmatpush1.bf16.msra.mxu0 %v21097_v42  ;;  %v21157_v42 = vld [vmem:[#allocation5 + $0x35a8] ss:$16 sps:$4 sm:$0xff]   ;;  %v21174_v21 = vld [vmem:[#allocation5 + $0x376c] ss:$16 sps:$4 sm:$0xff]  }
 0x76e   :  { %15597 = vmatpush1.bf16.msra.mxu1 %v21100_v29  ;;  %v15263_v58 = vpop.f32.mrf.mxu0  ;;  %15557 = vmatprep.subr.bf16.mxu0 %v21105_v2  ;;  %v21160_v29 = vld [vmem:[#allocation5 + $0x37a8] ss:$16 sps:$4 sm:$0xff]   ;;  %v21165_v2 = vld [vmem:[#allocation5 + $0x358c] ss:$16 sps:$4 sm:$0xff]  }
 0x76f   :  { %v15304_v1 = vpop.f32.mrf.mxu1  ;;  %15598 = vmatprep.subr.bf16.mxu1 %v21108_v16  ;;  %v22244_v39 = vadd.f32 %v15302_v11, %v15262_v8  ;;  %v15264_v40 = vadd.f32 %v15263_v58, %v22239_v59  ;;  %15587 = vmatprep.mubr.bf16.mxu0 %v22358_v46  ;;  %v21115_v59 = vld [vmem:[#allocation5 + $0x3488] ss:$16 sps:$4 sm:$0xff]   ;;  %v21168_v16 = vld [vmem:[#allocation5 + $0x378c] ss:$16 sps:$4 sm:$0xff]  }
 0x770   :  { %15628 = vmatprep.mubr.bf16.mxu1 %v22359_v55  ;;  %v15265_v38 = vpop.f32.mrf.mxu0  ;;  %v21163_v13 = vld [vmem:[#allocation5 + $0x3588] ss:$16 sps:$4 sm:$0xff]   ;;  %v21180_v58 = vld [vmem:[#allocation5 + $0x374c] ss:$16 sps:$4 sm:$0xff]  }
 0x771   :  { %v15306_v26 = vpop.f32.mrf.mxu1  ;;  %v22249_v12 = vadd.f32 %v15304_v1, %v15264_v40  ;;  %15558 = vmatpush1.bf16.msra.mxu0 %v21103_v22  ;;  %v21166_v11 = vld [vmem:[#allocation5 + $0x3788] ss:$16 sps:$4 sm:$0xff]   ;;  %v21186_v40 = vld [vmem:[#allocation5 + $0x372c] ss:$16 sps:$4 sm:$0xff]  }
 0x772   :  { %15599 = vmatpush1.bf16.msra.mxu1 %v21106_v9  ;;  %v15266_v35 = vpop.f32.mrf.mxu0  ;;  %15559 = vmatprep.subr.bf16.mxu0 %v21111_v45  ;;  %v21169_v8 = vld [vmem:[#allocation5 + $0x3568] ss:$16 sps:$4 sm:$0xff]   ;;  %v21177_v9 = vld [vmem:[#allocation5 + $0x354c] ss:$16 sps:$4 sm:$0xff]  }
 0x773   :  { %v15307_v36 = vpop.f32.mrf.mxu1  ;;  %15600 = vmatprep.subr.bf16.mxu1 %v21114_v43  ;;  %v21172_v22 = vld [vmem:[#allocation5 + $0x3768] ss:$16 sps:$4 sm:$0xff]   ;;  %v21183_v43 = vld [vmem:[#allocation5 + $0x352c] ss:$16 sps:$4 sm:$0xff]  }
 0x774   :  { %v21175_v1 = vld [vmem:[#allocation5 + $0x3548] ss:$16 sps:$4 sm:$0xff]   ;;  %v21189_v38 = vld [vmem:[#allocation5 + $0x350c] ss:$16 sps:$4 sm:$0xff]  }
 0x775   :  { %15560 = vmatpush1.bf16.msra.mxu0 %v21109_v50  ;;  %v21178_v45 = vld [vmem:[#allocation5 + $0x3748] ss:$16 sps:$4 sm:$0xff]   ;;  %v21192_v26 = vld [vmem:[#allocation5 + $0x370c] ss:$16 sps:$4 sm:$0xff]  }
 0x776   :  { %15601 = vmatpush1.bf16.msra.mxu1 %v21112_v34  ;;  %15561 = vmatprep.subr.bf16.mxu0 %v21117_v44  ;;  %v21181_v46 = vld [vmem:[#allocation5 + $0x3528] ss:$16 sps:$4 sm:$0xff]   ;;  %v21195_v35 = vld [vmem:[#allocation5 + $0x38ec] ss:$16 sps:$4 sm:$0xff]  }
 0x777   :  { %15602 = vmatprep.subr.bf16.mxu1 %v21120_v15  ;;  %v21184_v55 = vld [vmem:[#allocation5 + $0x3728] ss:$16 sps:$4 sm:$0xff]   ;;  %v21198_v36 = vld [vmem:[#allocation5 + $0x3aec] ss:$16 sps:$4 sm:$0xff]  }
 0x778   :  { %v21187_v50 = vld [vmem:[#allocation5 + $0x3508] ss:$16 sps:$4 sm:$0xff]  }
 0x779   :  { %15562 = vmatpush1.bf16.msra.mxu0 %v21115_v59  ;;  %v21190_v34 = vld [vmem:[#allocation5 + $0x3708] ss:$16 sps:$4 sm:$0xff]   ;;  %v21201_v59 = vld [vmem:[#allocation5 + $0x38cc] ss:$16 sps:$4 sm:$0xff]  }
 0x77a   :  { %15603 = vmatpush1.bf16.msra.mxu1 %v21118_v24  ;;  %15563 = vmatprep.subr.bf16.mxu0 %v21123_v63  ;;  %v21193_v44 = vld [vmem:[#allocation5 + $0x38e8] ss:$16 sps:$4 sm:$0xff]   ;;  %v21204_v24 = vld [vmem:[#allocation5 + $0x3acc] ss:$16 sps:$4 sm:$0xff]  }
 0x77b   :  { %15604 = vmatprep.subr.bf16.mxu1 %v21126_v0  ;;  %v21196_v15 = vld [vmem:[#allocation5 + $0x3ae8] ss:$16 sps:$4 sm:$0xff]  }
 0x77d   :  { %15564 = vmatpush1.bf16.msra.mxu0 %v21121_v5  ;;  %v22360_v5 = vld [vmem:[#allocation30_spill] sm:$0xff] }
 0x77e   :  { %15605 = vmatpush1.bf16.msra.mxu1 %v21124_v51  ;;  %15565 = vmatprep.subr.bf16.mxu0 %v21129_v3  ;;  %v21199_v3 = vld [vmem:[#allocation5 + $0x38c8] ss:$16 sps:$4 sm:$0xff]  }
 0x77f   :  { %15606 = vmatprep.subr.bf16.mxu1 %v21132_v56  ;;  %v21202_v56 = vld [vmem:[#allocation5 + $0x3ac8] ss:$16 sps:$4 sm:$0xff]  }
 0x781   :  { %15566 = vmatpush1.bf16.msra.mxu0 %v21127_v57 }
 0x782   :  { %15607 = vmatpush1.bf16.msra.mxu1 %v21130_v52  ;;  %15567 = vmatprep.subr.bf16.mxu0 %v21135_v32  ;;  %v21207_v32 = vld [vmem:[#allocation5 + $0x38ac] ss:$16 sps:$4 sm:$0xff]  }
 0x783   :  { %15608 = vmatprep.subr.bf16.mxu1 %v21138_v48  ;;  %v21210_v48 = vld [vmem:[#allocation5 + $0x3aac] ss:$16 sps:$4 sm:$0xff]  }
 0x785   :  { %15568 = vmatpush1.bf16.msra.mxu0 %v21133_v41 }
 0x786   :  { %15609 = vmatpush1.bf16.msra.mxu1 %v21136_v62  ;;  %15569 = vmatprep.subr.bf16.mxu0 %v21141_v37  ;;  %v22361_v37 = vld [vmem:[#allocation31_spill] sm:$0xff] }
 0x787   :  { %15610 = vmatprep.subr.bf16.mxu1 %v21144_v10 }
 0x789   :  { %15570 = vmatpush1.bf16.msra.mxu0 %v21139_v30 }
 0x78a   :  { %15611 = vmatpush1.bf16.msra.mxu1 %v21142_v18  ;;  %15571 = vmatprep.subr.bf16.mxu0 %v21147_v31  ;;  %v21205_v18 = vld [vmem:[#allocation5 + $0x38a8] ss:$16 sps:$4 sm:$0xff]  }
 0x78b   :  { %15612 = vmatprep.subr.bf16.mxu1 %v21150_v54  ;;  %v21208_v31 = vld [vmem:[#allocation5 + $0x3aa8] ss:$16 sps:$4 sm:$0xff]  }
 0x78d   :  { %15572 = vmatpush2.bf16.msra.mxu0 %v21145_v20 }
 0x78e   :  { %15613 = vmatpush2.bf16.msra.mxu1 %v21148_v23  ;;  %15573 = vmatprep.subr.bf16.mxu0 %v21153_v27  ;;  %v21213_v23 = vld [vmem:[#allocation5 + $0x388c] ss:$16 sps:$4 sm:$0xff]  }
 0x78f   :  { %15614 = vmatprep.subr.bf16.mxu1 %v21156_v49  ;;  %v21216_v27 = vld [vmem:[#allocation5 + $0x3a8c] ss:$16 sps:$4 sm:$0xff]   ;;  %v21214_v49 = vld [vmem:[#allocation5 + $0x3a88] ss:$16 sps:$4 sm:$0xff]  }
 0x791   :  { %15574 = vmatpush2.bf16.msra.mxu0 %v21151_v25  ;;  %v21219_v25 = vld [vmem:[#allocation5 + $0x386c] ss:$16 sps:$4 sm:$0xff]  }
 0x792   :  { %15615 = vmatpush2.bf16.msra.mxu1 %v21154_v28  ;;  %15575 = vmatprep.subr.bf16.mxu0 %v21159_v14  ;;  %v21222_v28 = vld [vmem:[#allocation5 + $0x3a6c] ss:$16 sps:$4 sm:$0xff]   ;;  %v21217_v14 = vld [vmem:[#allocation5 + $0x3868] ss:$16 sps:$4 sm:$0xff]  }
 0x793   :  { %15616 = vmatprep.subr.bf16.mxu1 %v21162_v19  ;;  %v21220_v19 = vld [vmem:[#allocation5 + $0x3a68] ss:$16 sps:$4 sm:$0xff]  }
 0x795   :  { %15576 = vmatpush2.bf16.msra.mxu0 %v21157_v42  ;;  %v21225_v42 = vld [vmem:[#allocation5 + $0x384c] ss:$16 sps:$4 sm:$0xff]  }
 0x796   :  { %15617 = vmatpush2.bf16.msra.mxu1 %v21160_v29  ;;  %15577 = vmatprep.subr.bf16.mxu0 %v21165_v2  ;;  %v21228_v29 = vld [vmem:[#allocation5 + $0x3a4c] ss:$16 sps:$4 sm:$0xff]   ;;  %v21223_v2 = vld [vmem:[#allocation5 + $0x3848] ss:$16 sps:$4 sm:$0xff]  }
 0x797   :  { %15618 = vmatprep.subr.bf16.mxu1 %v21168_v16  ;;  %v21226_v16 = vld [vmem:[#allocation5 + $0x3a48] ss:$16 sps:$4 sm:$0xff]  }
 0x799   :  { %15578 = vmatpush2.bf16.msra.mxu0 %v21163_v13  ;;  %v21231_v13 = vld [vmem:[#allocation5 + $0x382c] ss:$16 sps:$4 sm:$0xff]  }
 0x79a   :  { %15619 = vmatpush2.bf16.msra.mxu1 %v21166_v11  ;;  %15579 = vmatprep.subr.bf16.mxu0 %v21171_v61  ;;  %v21234_v11 = vld [vmem:[#allocation5 + $0x3a2c] ss:$16 sps:$4 sm:$0xff]   ;;  %v21229_v61 = vld [vmem:[#allocation5 + $0x3828] ss:$16 sps:$4 sm:$0xff]  }
 0x79b   :  { %15620 = vmatprep.subr.bf16.mxu1 %v21174_v21  ;;  %v21232_v21 = vld [vmem:[#allocation5 + $0x3a28] ss:$16 sps:$4 sm:$0xff]  }
 0x79d   :  { %15580 = vmatpush2.bf16.msra.mxu0 %v21169_v8  ;;  %v21237_v8 = vld [vmem:[#allocation5 + $0x380c] ss:$16 sps:$4 sm:$0xff]  }
 0x79e   :  { %15621 = vmatpush2.bf16.msra.mxu1 %v21172_v22  ;;  %15581 = vmatprep.subr.bf16.mxu0 %v21177_v9  ;;  %v21240_v22 = vld [vmem:[#allocation5 + $0x3a0c] ss:$16 sps:$4 sm:$0xff]   ;;  %v21235_v9 = vld [vmem:[#allocation5 + $0x3808] ss:$16 sps:$4 sm:$0xff]  }
 0x79f   :  { %15622 = vmatprep.subr.bf16.mxu1 %v21180_v58  ;;  %v21238_v58 = vld [vmem:[#allocation5 + $0x3a08] ss:$16 sps:$4 sm:$0xff]  }
 0x7a1   :  { %15582 = vmatpush2.bf16.msra.mxu0 %v21175_v1  ;;  %v21243_v1 = vld [vmem:[#allocation5 + $0x39ec] ss:$16 sps:$4 sm:$0xff]  }
 0x7a2   :  { %15623 = vmatpush2.bf16.msra.mxu1 %v21178_v45  ;;  %15583 = vmatprep.subr.bf16.mxu0 %v21183_v43  ;;  %v21246_v45 = vld [vmem:[#allocation5 + $0x3bec] ss:$16 sps:$4 sm:$0xff]   ;;  %v21241_v43 = vld [vmem:[#allocation5 + $0x39e8] ss:$16 sps:$4 sm:$0xff]  }
 0x7a3   :  { %15624 = vmatprep.subr.bf16.mxu1 %v21186_v40  ;;  %v21244_v40 = vld [vmem:[#allocation5 + $0x3be8] ss:$16 sps:$4 sm:$0xff]  }
 0x7a5   :  { %15584 = vmatpush2.bf16.msra.mxu0 %v21181_v46  ;;  %v21249_v46 = vld [vmem:[#allocation5 + $0x39cc] ss:$16 sps:$4 sm:$0xff]  }
 0x7a6   :  { %15625 = vmatpush2.bf16.msra.mxu1 %v21184_v55  ;;  %15585 = vmatprep.subr.bf16.mxu0 %v21189_v38  ;;  %v21252_v55 = vld [vmem:[#allocation5 + $0x3bcc] ss:$16 sps:$4 sm:$0xff]   ;;  %v21247_v38 = vld [vmem:[#allocation5 + $0x39c8] ss:$16 sps:$4 sm:$0xff]  }
 0x7a7   :  { %15626 = vmatprep.subr.bf16.mxu1 %v21192_v26  ;;  %v21250_v26 = vld [vmem:[#allocation5 + $0x3bc8] ss:$16 sps:$4 sm:$0xff]  }
 0x7a9   :  { %15586 = vmatpush2.bf16.msra.mxu0 %v21187_v50  ;;  %v21255_v50 = vld [vmem:[#allocation5 + $0x39ac] ss:$16 sps:$4 sm:$0xff]  }
 0x7aa   :  { %15627 = vmatpush2.bf16.msra.mxu1 %v21190_v34  ;;  %15637 = vmatprep.subr.bf16.mxu0 %v21195_v35  ;;  %v21258_v34 = vld [vmem:[#allocation5 + $0x3bac] ss:$16 sps:$4 sm:$0xff]   ;;  %v21253_v35 = vld [vmem:[#allocation5 + $0x39a8] ss:$16 sps:$4 sm:$0xff]  }
 0x7ab   :  { %15678 = vmatprep.subr.bf16.mxu1 %v21198_v36  ;;  %v21256_v36 = vld [vmem:[#allocation5 + $0x3ba8] ss:$16 sps:$4 sm:$0xff]  }
 0x7ac   :  { %v15343_v63 = vpop.f32.mrf.mxu0  ;;  %15588 = vmatmul.mubr.bf16.vlgmr.msra.gmra.mxu0 %v22049_v47  ;;  %v22362_v47 = vld [vmem:[#allocation32_spill] sm:$0xff] }
 0x7ad   :  { %v15384_v0 = vpop.f32.mrf.mxu1  ;;  %15629 = vmatmul.mubr.bf16.vlgmr.msra.gmra.mxu1 %v22360_v5  ;;  %v15344_v51 = vadd.f32 %v15343_v63, %v22244_v39  ;;  %15638 = vmatpush1.bf16.msra.mxu0 %v21193_v44  ;;  %v21261_v44 = vld [vmem:[#allocation5 + $0x398c] ss:$16 sps:$4 sm:$0xff]   ;;  %v21265_v5 = vld [vmem:[#allocation5 + $0x3968] ss:$16 sps:$4 sm:$0xff]  }
 0x7ae   :  { %15679 = vmatpush1.bf16.msra.mxu1 %v21196_v15  ;;  %v15345_v57 = vpop.f32.mrf.mxu0  ;;  %15639 = vmatprep.subr.bf16.mxu0 %v21201_v59  ;;  %v21264_v15 = vld [vmem:[#allocation5 + $0x3b8c] ss:$16 sps:$4 sm:$0xff]   ;;  %v21259_v59 = vld [vmem:[#allocation5 + $0x3988] ss:$16 sps:$4 sm:$0xff]  }
 0x7af   :  { %v15386_v52 = vpop.f32.mrf.mxu1  ;;  %15680 = vmatprep.subr.bf16.mxu1 %v21204_v24  ;;  %v22254_v41 = vadd.f32 %v15384_v0, %v15344_v51  ;;  %v15346_v62 = vadd.f32 %v15345_v57, %v22249_v12  ;;  %15669 = vmatprep.mubr.bf16.mxu0 %v22361_v37  ;;  %v21211_v12 = vld [vmem:[#allocation5 + $0x3888] ss:$16 sps:$4 sm:$0xff]   ;;  %v21267_v63 = vld [vmem:[#allocation5 + $0x396c] ss:$16 sps:$4 sm:$0xff]  }
 0x7b0   :  { %15710 = vmatprep.mubr.bf16.mxu1 %v22362_v47  ;;  %v15347_v10 = vpop.f32.mrf.mxu0  ;;  %v21262_v24 = vld [vmem:[#allocation5 + $0x3b88] ss:$16 sps:$4 sm:$0xff]   ;;  %v21270_v0 = vld [vmem:[#allocation5 + $0x3b6c] ss:$16 sps:$4 sm:$0xff]  }
 0x7b1   :  { %v15388_v39 = vpop.f32.mrf.mxu1  ;;  %v22259_v30 = vadd.f32 %v15386_v52, %v15346_v62  ;;  %15640 = vmatpush1.bf16.msra.mxu0 %v21199_v3  ;;  %v21268_v51 = vld [vmem:[#allocation5 + $0x3b68] ss:$16 sps:$4 sm:$0xff]   ;;  %v21273_v3 = vld [vmem:[#allocation5 + $0x394c] ss:$16 sps:$4 sm:$0xff]  }
 0x7b2   :  { %15681 = vmatpush1.bf16.msra.mxu1 %v21202_v56  ;;  %v15348_v54 = vpop.f32.mrf.mxu0  ;;  %15641 = vmatprep.subr.bf16.mxu0 %v21207_v32  ;;  %v21276_v56 = vld [vmem:[#allocation5 + $0x3b4c] ss:$16 sps:$4 sm:$0xff]   ;;  %v21271_v57 = vld [vmem:[#allocation5 + $0x3948] ss:$16 sps:$4 sm:$0xff]  }
 0x7b3   :  { %v15389_v20 = vpop.f32.mrf.mxu1  ;;  %15682 = vmatprep.subr.bf16.mxu1 %v21210_v48  ;;  %v21274_v52 = vld [vmem:[#allocation5 + $0x3b48] ss:$16 sps:$4 sm:$0xff]   ;;  %v21279_v32 = vld [vmem:[#allocation5 + $0x392c] ss:$16 sps:$4 sm:$0xff]  }
 0x7b4   :  { %v21282_v48 = vld [vmem:[#allocation5 + $0x3b2c] ss:$16 sps:$4 sm:$0xff]   ;;  %v21277_v62 = vld [vmem:[#allocation5 + $0x3928] ss:$16 sps:$4 sm:$0xff]  }
 0x7b5   :  { %15642 = vmatpush1.bf16.msra.mxu0 %v21205_v18  ;;  %v21280_v37 = vld [vmem:[#allocation5 + $0x3b28] ss:$16 sps:$4 sm:$0xff]   ;;  %v21285_v47 = vld [vmem:[#allocation5 + $0x390c] ss:$16 sps:$4 sm:$0xff]  }
 0x7b6   :  { %15683 = vmatpush1.bf16.msra.mxu1 %v21208_v31  ;;  %15643 = vmatprep.subr.bf16.mxu0 %v21213_v23  ;;  %v21288_v10 = vld [vmem:[#allocation5 + $0x3b0c] ss:$16 sps:$4 sm:$0xff]   ;;  %v21283_v39 = vld [vmem:[#allocation5 + $0x3908] ss:$16 sps:$4 sm:$0xff]  }
 0x7b7   :  { %15684 = vmatprep.subr.bf16.mxu1 %v21216_v27  ;;  %v21286_v18 = vld [vmem:[#allocation5 + $0x3b08] ss:$16 sps:$4 sm:$0xff]   ;;  %v21291_v31 = vld [vmem:[#allocation5 + $0x3cec] ss:$16 sps:$4 sm:$0xff]  }
 0x7b8   :  { %v21294_v54 = vld [vmem:[#allocation5 + $0x3eec] ss:$16 sps:$4 sm:$0xff]   ;;  %v21289_v20 = vld [vmem:[#allocation5 + $0x3ce8] ss:$16 sps:$4 sm:$0xff]  }
 0x7b9   :  { %15644 = vmatpush1.bf16.msra.mxu0 %v21211_v12  ;;  %v21292_v23 = vld [vmem:[#allocation5 + $0x3ee8] ss:$16 sps:$4 sm:$0xff]   ;;  %v21297_v27 = vld [vmem:[#allocation5 + $0x3ccc] ss:$16 sps:$4 sm:$0xff]  }
 0x7ba   :  { %15685 = vmatpush1.bf16.msra.mxu1 %v21214_v49  ;;  %15645 = vmatprep.subr.bf16.mxu0 %v21219_v25  ;;  %v21300_v12 = vld [vmem:[#allocation5 + $0x3ecc] ss:$16 sps:$4 sm:$0xff]  }
 0x7bb   :  { %15686 = vmatprep.subr.bf16.mxu1 %v21222_v28  ;;  %v22363_v28 = vld [vmem:[#allocation33_spill] sm:$0xff] }
 0x7bd   :  { %15646 = vmatpush1.bf16.msra.mxu0 %v21217_v14 }
 0x7be   :  { %15687 = vmatpush1.bf16.msra.mxu1 %v21220_v19  ;;  %15647 = vmatprep.subr.bf16.mxu0 %v21225_v42  ;;  %v21295_v19 = vld [vmem:[#allocation5 + $0x3cc8] ss:$16 sps:$4 sm:$0xff]  }
 0x7bf   :  { %15688 = vmatprep.subr.bf16.mxu1 %v21228_v29  ;;  %v21298_v42 = vld [vmem:[#allocation5 + $0x3ec8] ss:$16 sps:$4 sm:$0xff]  }
 0x7c1   :  { %15648 = vmatpush1.bf16.msra.mxu0 %v21223_v2 }
 0x7c2   :  { %15689 = vmatpush1.bf16.msra.mxu1 %v21226_v16  ;;  %15649 = vmatprep.subr.bf16.mxu0 %v21231_v13  ;;  %v21303_v16 = vld [vmem:[#allocation5 + $0x3cac] ss:$16 sps:$4 sm:$0xff]  }
 0x7c3   :  { %15690 = vmatprep.subr.bf16.mxu1 %v21234_v11  ;;  %v21306_v13 = vld [vmem:[#allocation5 + $0x3eac] ss:$16 sps:$4 sm:$0xff]  }
 0x7c5   :  { %15650 = vmatpush1.bf16.msra.mxu0 %v21229_v61 }
 0x7c6   :  { %15691 = vmatpush1.bf16.msra.mxu1 %v21232_v21  ;;  %15651 = vmatprep.subr.bf16.mxu0 %v21237_v8  ;;  %v21301_v8 = vld [vmem:[#allocation5 + $0x3ca8] ss:$16 sps:$4 sm:$0xff]  }
 0x7c7   :  { %15692 = vmatprep.subr.bf16.mxu1 %v21240_v22  ;;  %v21304_v22 = vld [vmem:[#allocation5 + $0x3ea8] ss:$16 sps:$4 sm:$0xff]  }
 0x7c9   :  { %15652 = vmatpush1.bf16.msra.mxu0 %v21235_v9 }
 0x7ca   :  { %15693 = vmatpush1.bf16.msra.mxu1 %v21238_v58  ;;  %15653 = vmatprep.subr.bf16.mxu0 %v21243_v1  ;;  %v21309_v1 = vld [vmem:[#allocation5 + $0x3c8c] ss:$16 sps:$4 sm:$0xff]  }
 0x7cb   :  { %15694 = vmatprep.subr.bf16.mxu1 %v21246_v45  ;;  %v21312_v45 = vld [vmem:[#allocation5 + $0x3e8c] ss:$16 sps:$4 sm:$0xff]  }
 0x7cd   :  { %15654 = vmatpush2.bf16.msra.mxu0 %v21241_v43  ;;  %v21318_v43 = vld [vmem:[#allocation5 + $0x3e6c] ss:$16 sps:$4 sm:$0xff]  }
 0x7ce   :  { %15695 = vmatpush2.bf16.msra.mxu1 %v21244_v40  ;;  %15655 = vmatprep.subr.bf16.mxu0 %v21249_v46  ;;  %v21313_v40 = vld [vmem:[#allocation5 + $0x3c68] ss:$16 sps:$4 sm:$0xff]  }
 0x7cf   :  { %15696 = vmatprep.subr.bf16.mxu1 %v21252_v55  ;;  %v21316_v46 = vld [vmem:[#allocation5 + $0x3e68] ss:$16 sps:$4 sm:$0xff]   ;;  %v21321_v55 = vld [vmem:[#allocation5 + $0x3c4c] ss:$16 sps:$4 sm:$0xff]  }
 0x7d1   :  { %15656 = vmatpush2.bf16.msra.mxu0 %v21247_v38  ;;  %v21324_v38 = vld [vmem:[#allocation5 + $0x3e4c] ss:$16 sps:$4 sm:$0xff]  }
 0x7d2   :  { %15697 = vmatpush2.bf16.msra.mxu1 %v21250_v26  ;;  %15657 = vmatprep.subr.bf16.mxu0 %v21255_v50  ;;  %v21319_v26 = vld [vmem:[#allocation5 + $0x3c48] ss:$16 sps:$4 sm:$0xff]  }
 0x7d3   :  { %15698 = vmatprep.subr.bf16.mxu1 %v21258_v34  ;;  %v21322_v50 = vld [vmem:[#allocation5 + $0x3e48] ss:$16 sps:$4 sm:$0xff]   ;;  %v21327_v34 = vld [vmem:[#allocation5 + $0x3c2c] ss:$16 sps:$4 sm:$0xff]  }
 0x7d5   :  { %15658 = vmatpush2.bf16.msra.mxu0 %v21253_v35  ;;  %v21330_v35 = vld [vmem:[#allocation5 + $0x3e2c] ss:$16 sps:$4 sm:$0xff]  }
 0x7d6   :  { %15699 = vmatpush2.bf16.msra.mxu1 %v21256_v36  ;;  %15659 = vmatprep.subr.bf16.mxu0 %v21261_v44  ;;  %v21325_v36 = vld [vmem:[#allocation5 + $0x3c28] ss:$16 sps:$4 sm:$0xff]  }
 0x7d7   :  { %15700 = vmatprep.subr.bf16.mxu1 %v21264_v15  ;;  %v21328_v44 = vld [vmem:[#allocation5 + $0x3e28] ss:$16 sps:$4 sm:$0xff]   ;;  %v21333_v15 = vld [vmem:[#allocation5 + $0x3c0c] ss:$16 sps:$4 sm:$0xff]  }
 0x7d9   :  { %15660 = vmatpush2.bf16.msra.mxu0 %v21259_v59  ;;  %v21336_v59 = vld [vmem:[#allocation5 + $0x3e0c] ss:$16 sps:$4 sm:$0xff]  }
 0x7da   :  { %15701 = vmatpush2.bf16.msra.mxu1 %v21262_v24  ;;  %15661 = vmatprep.subr.bf16.mxu0 %v21267_v63  ;;  %v21331_v24 = vld [vmem:[#allocation5 + $0x3c08] ss:$16 sps:$4 sm:$0xff]  }
 0x7db   :  { %15702 = vmatprep.subr.bf16.mxu1 %v21270_v0  ;;  %v21334_v63 = vld [vmem:[#allocation5 + $0x3e08] ss:$16 sps:$4 sm:$0xff]   ;;  %v21339_v0 = vld [vmem:[#allocation5 + $0x3dec] ss:$16 sps:$4 sm:$0xff]  }
 0x7dd   :  { %15662 = vmatpush2.bf16.msra.mxu0 %v21265_v5  ;;  %v21342_v5 = vld [vmem:[#allocation5 + $0x3fec] ss:$16 sps:$4 sm:$0xff]  }
 0x7de   :  { %15703 = vmatpush2.bf16.msra.mxu1 %v21268_v51  ;;  %15663 = vmatprep.subr.bf16.mxu0 %v21273_v3  ;;  %v21337_v51 = vld [vmem:[#allocation5 + $0x3de8] ss:$16 sps:$4 sm:$0xff]  }
 0x7df   :  { %15704 = vmatprep.subr.bf16.mxu1 %v21276_v56  ;;  %v21340_v3 = vld [vmem:[#allocation5 + $0x3fe8] ss:$16 sps:$4 sm:$0xff]   ;;  %v21345_v56 = vld [vmem:[#allocation5 + $0x3dcc] ss:$16 sps:$4 sm:$0xff]  }
 0x7e1   :  { %15664 = vmatpush2.bf16.msra.mxu0 %v21271_v57  ;;  %v21348_v57 = vld [vmem:[#allocation5 + $0x3fcc] ss:$16 sps:$4 sm:$0xff]  }
 0x7e2   :  { %15705 = vmatpush2.bf16.msra.mxu1 %v21274_v52  ;;  %15665 = vmatprep.subr.bf16.mxu0 %v21279_v32  ;;  %v21343_v52 = vld [vmem:[#allocation5 + $0x3dc8] ss:$16 sps:$4 sm:$0xff]  }
 0x7e3   :  { %15706 = vmatprep.subr.bf16.mxu1 %v21282_v48  ;;  %v21346_v32 = vld [vmem:[#allocation5 + $0x3fc8] ss:$16 sps:$4 sm:$0xff]   ;;  %v21351_v48 = vld [vmem:[#allocation5 + $0x3dac] ss:$16 sps:$4 sm:$0xff]  }
 0x7e5   :  { %15666 = vmatpush2.bf16.msra.mxu0 %v21277_v62  ;;  %v21354_v62 = vld [vmem:[#allocation5 + $0x3fac] ss:$16 sps:$4 sm:$0xff]  }
 0x7e6   :  { %15707 = vmatpush2.bf16.msra.mxu1 %v21280_v37  ;;  %15667 = vmatprep.subr.bf16.mxu0 %v21285_v47  ;;  %v21349_v37 = vld [vmem:[#allocation5 + $0x3da8] ss:$16 sps:$4 sm:$0xff]  }
 0x7e7   :  { %15708 = vmatprep.subr.bf16.mxu1 %v21288_v10  ;;  %v21352_v47 = vld [vmem:[#allocation5 + $0x3fa8] ss:$16 sps:$4 sm:$0xff]   ;;  %v21357_v10 = vld [vmem:[#allocation5 + $0x3d8c] ss:$16 sps:$4 sm:$0xff]  }
 0x7e9   :  { %15668 = vmatpush2.bf16.msra.mxu0 %v21283_v39  ;;  %v21360_v39 = vld [vmem:[#allocation5 + $0x3f8c] ss:$16 sps:$4 sm:$0xff]  }
 0x7ea   :  { %15709 = vmatpush2.bf16.msra.mxu1 %v21286_v18  ;;  %15719 = vmatprep.subr.bf16.mxu0 %v21291_v31  ;;  %v21355_v18 = vld [vmem:[#allocation5 + $0x3d88] ss:$16 sps:$4 sm:$0xff]  }
 0x7eb   :  { %15760 = vmatprep.subr.bf16.mxu1 %v21294_v54  ;;  %v21358_v31 = vld [vmem:[#allocation5 + $0x3f88] ss:$16 sps:$4 sm:$0xff]   ;;  %v21363_v54 = vld [vmem:[#allocation5 + $0x3d6c] ss:$16 sps:$4 sm:$0xff]  }
 0x7ec   :  { %v15425_v49 = vpop.f32.mrf.mxu0  ;;  %15670 = vmatmul.mubr.bf16.vlgmr.msra.gmra.mxu0 %v22087_v53 }
 0x7ed   :  { %v15466_v25 = vpop.f32.mrf.mxu1  ;;  %15711 = vmatmul.mubr.bf16.vlgmr.msra.gmra.mxu1 %v22363_v28  ;;  %v15426_v14 = vadd.f32 %v15425_v49, %v22254_v41  ;;  %15720 = vmatpush1.bf16.msra.mxu0 %v21289_v20  ;;  %v21366_v20 = vld [vmem:[#allocation5 + $0x3f6c] ss:$16 sps:$4 sm:$0xff]   ;;  %v21370_v28 = vld [vmem:[#allocation5 + $0x3f48] ss:$16 sps:$4 sm:$0xff]  }
 0x7ee   :  { %15761 = vmatpush1.bf16.msra.mxu1 %v21292_v23  ;;  %v15427_v29 = vpop.f32.mrf.mxu0  ;;  %15721 = vmatprep.subr.bf16.mxu0 %v21297_v27  ;;  %v21361_v23 = vld [vmem:[#allocation5 + $0x3d68] ss:$16 sps:$4 sm:$0xff]   ;;  %v21372_v49 = vld [vmem:[#allocation5 + $0x3f4c] ss:$16 sps:$4 sm:$0xff]  }
 0x7ef   :  { %v15468_v2 = vpop.f32.mrf.mxu1  ;;  %15762 = vmatprep.subr.bf16.mxu1 %v21300_v12  ;;  %v22264_v11 = vadd.f32 %v15466_v25, %v15426_v14  ;;  %v15428_v61 = vadd.f32 %v15427_v29, %v22259_v30  ;;  %15751 = vmatprep.mubr.bf16.mxu0 %v22091_v17  ;;  %v21307_v30 = vld [vmem:[#allocation5 + $0x3c88] ss:$16 sps:$4 sm:$0xff]   ;;  %v21369_v12 = vld [vmem:[#allocation5 + $0x3d4c] ss:$16 sps:$4 sm:$0xff]  }
 0x7f0   :  { %15792 = vmatprep.mubr.bf16.mxu1 %v22093_v33  ;;  %v15429_v53 = vpop.f32.mrf.mxu0  ;;  %v21310_v17 = vld [vmem:[#allocation5 + $0x3e88] ss:$16 sps:$4 sm:$0xff]   ;;  %v21315_v33 = vld [vmem:[#allocation5 + $0x3c6c] ss:$16 sps:$4 sm:$0xff]  }
 0x7f1   :  { %v15470_v41 = vpop.f32.mrf.mxu1  ;;  %v22269_v21 = vadd.f32 %v15468_v2, %v15428_v61  ;;  %15722 = vmatpush1.bf16.msra.mxu0 %v21295_v19  ;;  %v21364_v27 = vld [vmem:[#allocation5 + $0x3f68] ss:$16 sps:$4 sm:$0xff]   ;;  %v21375_v14 = vld [vmem:[#allocation5 + $0x3d2c] ss:$16 sps:$4 sm:$0xff]  }
 0x7f2   :  { %15763 = vmatpush1.bf16.msra.mxu1 %v21298_v42  ;;  %v15430_v9 = vpop.f32.mrf.mxu0  ;;  %15723 = vmatprep.subr.bf16.mxu0 %v21303_v16  ;;  %v21367_v25 = vld [vmem:[#allocation5 + $0x3d48] ss:$16 sps:$4 sm:$0xff]   ;;  %v21378_v19 = vld [vmem:[#allocation5 + $0x3f2c] ss:$16 sps:$4 sm:$0xff]  }
 0x7f3   :  { %v15471_v58 = vpop.f32.mrf.mxu1  ;;  %15764 = vmatprep.subr.bf16.mxu1 %v21306_v13  ;;  %v21373_v42 = vld [vmem:[#allocation5 + $0x3d28] ss:$16 sps:$4 sm:$0xff]   ;;  %v21381_v2 = vld [vmem:[#allocation5 + $0x3d0c] ss:$16 sps:$4 sm:$0xff]  }
 0x7f4   :  { %v21376_v29 = vld [vmem:[#allocation5 + $0x3f28] ss:$16 sps:$4 sm:$0xff]   ;;  %v21384_v16 = vld [vmem:[#allocation5 + $0x3f0c] ss:$16 sps:$4 sm:$0xff]  }
 0x7f5   :  { %15724 = vmatpush1.bf16.msra.mxu0 %v21301_v8  ;;  %v21379_v13 = vld [vmem:[#allocation5 + $0x3d08] ss:$16 sps:$4 sm:$0xff]  }
 0x7f6   :  { %15765 = vmatpush1.bf16.msra.mxu1 %v21304_v22  ;;  %15725 = vmatprep.subr.bf16.mxu0 %v21309_v1  ;;  %v21382_v61 = vld [vmem:[#allocation5 + $0x3f08] ss:$16 sps:$4 sm:$0xff]  }
 0x7f7   :  { %15766 = vmatprep.subr.bf16.mxu1 %v21312_v45 }
 0x7f9   :  { %15726 = vmatpush1.bf16.msra.mxu0 %v21307_v30 }
 0x7fa   :  { %15767 = vmatpush1.bf16.msra.mxu1 %v21310_v17  ;;  %15727 = vmatprep.subr.bf16.mxu0 %v21315_v33 }
 0x7fb   :  { %15768 = vmatprep.subr.bf16.mxu1 %v21318_v43 }
 0x7fd   :  { %15728 = vmatpush1.bf16.msra.mxu0 %v21313_v40 }
 0x7fe   :  { %15769 = vmatpush1.bf16.msra.mxu1 %v21316_v46  ;;  %15729 = vmatprep.subr.bf16.mxu0 %v21321_v55 }
 0x7ff   :  { %15770 = vmatprep.subr.bf16.mxu1 %v21324_v38 }
 0x801   :  { %15730 = vmatpush1.bf16.msra.mxu0 %v21319_v26 }
 0x802   :  { %15771 = vmatpush1.bf16.msra.mxu1 %v21322_v50  ;;  %15731 = vmatprep.subr.bf16.mxu0 %v21327_v34 }
 0x803   :  { %15772 = vmatprep.subr.bf16.mxu1 %v21330_v35 }
 0x805   :  { %15732 = vmatpush1.bf16.msra.mxu0 %v21325_v36 }
 0x806   :  { %15773 = vmatpush1.bf16.msra.mxu1 %v21328_v44  ;;  %15733 = vmatprep.subr.bf16.mxu0 %v21333_v15  ;;  %v21385_v44 = vld [vmem:[#allocation7 + $0x78] sm:$0xff]  }
 0x807   :  { %15774 = vmatprep.subr.bf16.mxu1 %v21336_v59  ;;  %v21386_v15 = vld [vmem:[#allocation7 + $0xf8] sm:$0xff]  }
 0x808   :  { %v21388_v59 = vld [vmem:[#allocation7 + $0xb8] sm:$0xff]  }
 0x809   :  { %15734 = vmatpush1.bf16.msra.mxu0 %v21331_v24  ;;  %v21389_v24 = vld [vmem:[#allocation7 + $0x70] sm:$0xff]  }
 0x80a   :  { %15775 = vmatpush1.bf16.msra.mxu1 %v21334_v63  ;;  %15735 = vmatprep.subr.bf16.mxu0 %v21339_v0  ;;  %v21390_v63 = vld [vmem:[#allocation7 + $0xf0] sm:$0xff]  }
 0x80b   :  { %15776 = vmatprep.subr.bf16.mxu1 %v21342_v5  ;;  %v21391_v0 = vld [vmem:[#allocation7 + $0x30] sm:$0xff]  }
 0x80c   :  { %v21392_v5 = vld [vmem:[#allocation7 + $0xb0] sm:$0xff]  }
 0x80d   :  { %15736 = vmatpush2.bf16.msra.mxu0 %v21337_v51 }
 0x80e   :  { %15777 = vmatpush2.bf16.msra.mxu1 %v21340_v3  ;;  %15737 = vmatprep.subr.bf16.mxu0 %v21345_v56 }
 0x80f   :  { %15778 = vmatprep.subr.bf16.mxu1 %v21348_v57 }
 0x811   :  { %15738 = vmatpush2.bf16.msra.mxu0 %v21343_v52 }
 0x812   :  { %15779 = vmatpush2.bf16.msra.mxu1 %v21346_v32  ;;  %15739 = vmatprep.subr.bf16.mxu0 %v21351_v48 }
 0x813   :  { %15780 = vmatprep.subr.bf16.mxu1 %v21354_v62 }
 0x815   :  { %15740 = vmatpush2.bf16.msra.mxu0 %v21349_v37 }
 0x816   :  { %15781 = vmatpush2.bf16.msra.mxu1 %v21352_v47  ;;  %15741 = vmatprep.subr.bf16.mxu0 %v21357_v10 }
 0x817   :  { %15782 = vmatprep.subr.bf16.mxu1 %v21360_v39 }
 0x819   :  { %15742 = vmatpush2.bf16.msra.mxu0 %v21355_v18 }
 0x81a   :  { %15783 = vmatpush2.bf16.msra.mxu1 %v21358_v31  ;;  %15743 = vmatprep.subr.bf16.mxu0 %v21363_v54  ;;  %v15802_v31 = vmul.f32 %v22151_v4, %v22151_v4 }
 0x81b   :  { %15784 = vmatprep.subr.bf16.mxu1 %v21366_v20 }
 0x81d   :  { %15744 = vmatpush2.bf16.msra.mxu0 %v21361_v23 }
 0x81e   :  { %15785 = vmatpush2.bf16.msra.mxu1 %v21364_v27  ;;  %15745 = vmatprep.subr.bf16.mxu0 %v21369_v12  ;;  %v15801_v12 = vmul.f32 %v22146_v6, %v22146_v6 }
 0x81f   :  { %15786 = vmatprep.subr.bf16.mxu1 %v21372_v49 }
 0x821   :  { %15746 = vmatpush2.bf16.msra.mxu0 %v21367_v25 }
 0x822   :  { %15787 = vmatpush2.bf16.msra.mxu1 %v21370_v28  ;;  %15747 = vmatprep.subr.bf16.mxu0 %v21375_v14 }
 0x823   :  { %15788 = vmatprep.subr.bf16.mxu1 %v21378_v19 }
 0x825   :  { %15748 = vmatpush2.bf16.msra.mxu0 %v21373_v42 }
 0x826   :  { %15789 = vmatpush2.bf16.msra.mxu1 %v21376_v29  ;;  %15749 = vmatprep.subr.bf16.mxu0 %v21381_v2  ;;  %v15805_v29 = vadd.f32 %v15802_v31, %v15801_v12 }
 0x827   :  { %15790 = vmatprep.subr.bf16.mxu1 %v21384_v16 }
 0x829   :  { %15750 = vmatpush2.bf16.msra.mxu0 %v21379_v13 }
 0x82a   :  { %15791 = vmatpush2.bf16.msra.mxu1 %v21382_v61  ;;  %18256 = vmatprep.subr.bf16.mxu0 %v21385_v44  ;;  %v21416_v44 = vld [vmem:[#allocation7 + $0x80] sm:$0xff]  }
 0x82b   :  { %18278 = vmatprep.subr.bf16.mxu1 %v21386_v15 }
 0x82c   :  { %v15507_v53 = vpop.f32.mrf.mxu0  ;;  %15752 = vmatmul.mubr.bf16.vlgmr.msra.gmra.mxu0 %v22109_v7 }
 0x82d   :  { %v15548_v41 = vpop.f32.mrf.mxu1  ;;  %15793 = vmatmul.mubr.bf16.vlgmr.msra.gmra.mxu1 %v22111_v60  ;;  %v15508_v8 = vadd.f32 %v15507_v53, %v22264_v11 }
 0x82e   :  { %v15509_v22 = vpop.f32.mrf.mxu0  ;;  %18279 = vmatpush3.bf16.msra.mxu1 %v21388_v59 }
 0x82f   :  { %v15550_v9 = vpop.f32.mrf.mxu1  ;;  %v15549_v58 = vadd.f32 %v15548_v41, %v15508_v8  ;;  %v15510_v1 = vadd.f32 %v15509_v22, %v22269_v21  ;;  %v21387_v21 = vld [vmem:[#allocation7 + $0x38] sm:$0xff]   ;;  %18280 = vmatprep.subr.bf16.mxu1 %v21390_v63  ;;  %v21393_v41 = vld [vmem:[#allocation7 + $0x68] sm:$0xff]  }
 0x830   :  { %v15511_v45 = vpop.f32.mrf.mxu0  ;;  %18257 = vmatpush3.bf16.msra.mxu0 %v21387_v21  ;;  %v21394_v8 = vld [vmem:[#allocation7 + $0xe8] sm:$0xff]  }
 0x831   :  { %v15552_v30 = vpop.f32.mrf.mxu1  ;;  %v15551_v17 = vadd.f32 %v15550_v9, %v15510_v1  ;;  %18258 = vmatprep.subr.bf16.mxu0 %v21389_v24  ;;  %v21395_v22 = vld [vmem:[#allocation7 + $0x28] sm:$0xff]   ;;  %v21398_v1 = vld [vmem:[#allocation7 + $0xe0] sm:$0xff]  }
 0x832   :  { %v15512_v33 = vpop.f32.mrf.mxu0  ;;  %18281 = vmatpush3.bf16.msra.mxu1 %v21392_v5  ;;  %v21396_v9 = vld [vmem:[#allocation7 + $0xa8] sm:$0xff]   ;;  %v21399_v45 = vld [vmem:[#allocation7 + $0x20] sm:$0xff]  }
 0x833   :  { %v15553_v43 = vpop.f32.mrf.mxu1  ;;  %18282 = vmatprep.subr.bf16.mxu1 %v21394_v8  ;;  %v21400_v30 = vld [vmem:[#allocation7 + $0xa0] sm:$0xff]   ;;  %v21402_v33 = vld [vmem:[#allocation7 + $0xd8] sm:$0xff]  }
 0x834   :  { %18259 = vmatpush3.bf16.msra.mxu0 %v21391_v0  ;;  %v21403_v43 = vld [vmem:[#allocation7 + $0x18] sm:$0xff]  }
 0x835   :  { %18260 = vmatprep.subr.bf16.mxu0 %v21393_v41 }
 0x836   :  { %18283 = vmatpush3.bf16.msra.mxu1 %v21396_v9 }
 0x837   :  { %18284 = vmatprep.subr.bf16.mxu1 %v21398_v1 }
 0x838   :  { %18261 = vmatpush3.bf16.msra.mxu0 %v21395_v22 }
 0x83a   :  { %18285 = vmatpush3.bf16.msra.mxu1 %v21400_v30 }
 0x83b   :  { %18286 = vmatprep.subr.bf16.mxu1 %v21402_v33 }
 0x86c   :  { %v15589_v40 = vpop.f32.mrf.mxu0 }
 0x86d   :  { %v15630_v46 = vpop.f32.mrf.mxu1  ;;  %v15590_v55 = vadd.f32 %v15589_v40, %v15549_v58  ;;  %v21397_v58 = vld [vmem:[#allocation7 + $0x60] sm:$0xff]   ;;  %v21404_v40 = vld [vmem:[#allocation7 + $0x98] sm:$0xff]  }
 0x86e   :  { %v15591_v38 = vpop.f32.mrf.mxu0  ;;  %18262 = vmatprep.subr.bf16.mxu0 %v21397_v58  ;;  %18287 = vmatpush3.bf16.msra.mxu1 %v21404_v40 }
 0x86f   :  { %v15632_v26 = vpop.f32.mrf.mxu1  ;;  %v15631_v7 = vadd.f32 %v15630_v46, %v15590_v55  ;;  %v15592_v50 = vadd.f32 %v15591_v38, %v15551_v17  ;;  %18263 = vmatpush3.bf16.msra.mxu0 %v21399_v45  ;;  %v21401_v17 = vld [vmem:[#allocation7 + $0x58] sm:$0xff]   ;;  %v21405_v46 = vld [vmem:[#allocation7 + $0x50] sm:$0xff]  }
 0x870   :  { %v15593_v60 = vpop.f32.mrf.mxu0  ;;  %18264 = vmatprep.subr.bf16.mxu0 %v21401_v17  ;;  %v21406_v55 = vld [vmem:[#allocation7 + $0xd0] sm:$0xff]  }
 0x871   :  { %v15634_v34 = vpop.f32.mrf.mxu1  ;;  %v15633_v11 = vadd.f32 %v15632_v26, %v15592_v50  ;;  %v21407_v38 = vld [vmem:[#allocation7 + $0x10] sm:$0xff]   ;;  %18288 = vmatprep.subr.bf16.mxu1 %v21406_v55  ;;  %v21410_v50 = vld [vmem:[#allocation7 + $0xc8] sm:$0xff]  }
 0x872   :  { %v15594_v35 = vpop.f32.mrf.mxu0  ;;  %v21408_v26 = vld [vmem:[#allocation7 + $0x90] sm:$0xff]   ;;  %v21411_v60 = vld [vmem:[#allocation7 + $0x8] sm:$0xff]  }
 0x873   :  { %v15635_v36 = vpop.f32.mrf.mxu1  ;;  %18265 = vmatpush3.bf16.msra.mxu0 %v21403_v43  ;;  %18289 = vmatpush3.bf16.msra.mxu1 %v21408_v26  ;;  %v21412_v34 = vld [vmem:[#allocation7 + $0x88] sm:$0xff]   ;;  %v21414_v35 = vld [vmem:[#allocation7 + $0xc0] sm:$0xff]  }
 0x874   :  { %18266 = vmatprep.subr.bf16.mxu0 %v21405_v46  ;;  %18290 = vmatprep.subr.bf16.mxu1 %v21410_v50  ;;  %v21415_v36 = vld [vmem:[#allocation7] sm:$0xff]  }
 0x877   :  { %18267 = vmatpush3.bf16.msra.mxu0 %v21407_v38  ;;  %18291 = vmatpush3.bf16.msra.mxu1 %v21412_v34 }
 0x878   :  { %18292 = vmatprep.subr.bf16.mxu1 %v21414_v35 }
 0x87b   :  { %18293 = vmatpush3.bf16.msra.mxu1 %v21416_v44 }
 0x8ac   :  { %v15671_v51 = vpop.f32.mrf.mxu0 }
 0x8ad   :  { %v15712_v3 = vpop.f32.mrf.mxu1  ;;  %v15672_v37 = vadd.f32 %v15671_v51, %v15631_v7  ;;  %v21409_v7 = vld [vmem:[#allocation7 + $0x48] sm:$0xff]  }
 0x8ae   :  { %v15673_v56 = vpop.f32.mrf.mxu0  ;;  %18268 = vmatprep.subr.bf16.mxu0 %v21409_v7 }
 0x8af   :  { %v15714_v57 = vpop.f32.mrf.mxu1  ;;  %v15674_v47 = vadd.f32 %v15673_v56, %v15633_v11  ;;  %v15713_v10 = vadd.f32 %v15712_v3, %v15672_v37  ;;  %18269 = vmatpush3.bf16.msra.mxu0 %v21411_v60  ;;  %v21413_v11 = vld [vmem:[#allocation7 + $0x40] sm:$0xff]  }
 0x8b0   :  { %v15675_v52 = vpop.f32.mrf.mxu0  ;;  %18270 = vmatprep.subr.bf16.mxu0 %v21413_v11 }
 0x8b1   :  { %v15716_v32 = vpop.f32.mrf.mxu1  ;;  %v15715_v54 = vadd.f32 %v15714_v57, %v15674_v47 }
 0x8b2   :  { %v15676_v48 = vpop.f32.mrf.mxu0 }
 0x8b3   :  { %v15717_v62 = vpop.f32.mrf.mxu1  ;;  %18271 = vmatpush3.bf16.msra.mxu0 %v21415_v36 }
 0x8ec   :  { %v15753_v39 = vpop.f32.mrf.mxu0 }
 0x8ed   :  { %v15794_v18 = vpop.f32.mrf.mxu1  ;;  %v15754_v20 = vadd.f32 %v15753_v39, %v15713_v10 }
 0x8ee   :  { %v15755_v23 = vpop.f32.mrf.mxu0 }
 0x8ef   :  { %v15796_v27 = vpop.f32.mrf.mxu1  ;;  %v22279_v49 = vadd.f32 %v15794_v18, %v15754_v20  ;;  %v15756_v25 = vadd.f32 %v15755_v23, %v15715_v54 }
 0x8f0   :  { %v15757_v28 = vpop.f32.mrf.mxu0 }
 0x8f1   :  { %v15798_v14 = vpop.f32.mrf.mxu1  ;;  %v15803_v19 = vmul.f32 %v22279_v49, %v22279_v49  ;;  %v22283_v42 = vadd.f32 %v15796_v27, %v15756_v25 }
 0x8f2   :  { %v15758_v2 = vpop.f32.mrf.mxu0 }
 0x8f3   :  { %v15799_v16 = vpop.f32.mrf.mxu1  ;;  %v15804_v13 = vmul.f32 %v22283_v42, %v22283_v42  ;;  %v15806_v61 = vadd.f32 %v15805_v29, %v15803_v19 }
 0x8f5   :  { %v15807_v53 = vadd.f32 %v15806_v61, %v15804_v13 }
 0x8f7   :  { %15808 = vadd.xlane.f32.xlu0 %v15807_v53 }
 0x980   :  { %v15809_v15 = vpop.xlane.xlu0 %15808 }
 0x981   :  { %v15810_v21 = vmax.f32 %v15809_v15, 1e-24 }
 0x983   :  { %21417 = vrsqrt.f32 %v15810_v21 }
 0x990   :  { %v21418_v59 = vpop.eup %21417 }
 0x991   :  { %v15812_v24 = vmul.f32 16.0, %v21418_v59 }
 0x993   :  { %v15813_v63 = vmul.f32 %v15812_v24, %v22146_v6  ;;  %v15815_v0 = vmul.f32 %v15812_v24, %v22279_v49  ;;  %v15814_v5 = vmul.f32 %v15812_v24, %v22151_v4  ;;  %v15816_v51 = vmul.f32 %v15812_v24, %v22283_v42 }
 0x995   :  { %v15818_v3 = vpack.c.bf16 %v15814_v5, %v15814_v5  ;;  %v15820_v56 = vpack.c.bf16 %v15816_v51, %v15816_v51  ;;  %v15817_v57 = vpack.c.bf16 %v15813_v63, %v15813_v63  ;;  %v15819_v52 = vpack.c.bf16 %v15815_v0, %v15815_v0 }
 0x997   :  { %16109 = vmatprep.mubr.bf16.mxu0 %v15818_v3  ;;  %16149 = vmatprep.mubr.bf16.mxu1 %v15820_v56 }
 0x998   :  { %16110 = vmatmul.mubr.bf16.vlgmr.msra.gmra.mxu0 %v15817_v57  ;;  %16150 = vmatmul.mubr.bf16.vlgmr.msra.gmra.mxu1 %v15819_v52 }
 0xa58   :  { %v18272_v32 = vpop.f32.mrf.mxu0  ;;  %v18294_v48 = vpop.f32.mrf.mxu1 }
 0xa5a   :  { %v18273_v62 = vpop.f32.mrf.mxu0  ;;  %v18295_v37 = vpop.f32.mrf.mxu1 }
 0xa5b   :  { %v18274_v47 = vadd.f32 %v18273_v62, %v18272_v32  ;;  %v18296_v6 = vadd.f32 %v18295_v37, %v18294_v48 }
 0xa5c   :  { %v18275_v10 = vpop.f32.mrf.mxu0  ;;  %v18297_v39 = vpop.f32.mrf.mxu1 }
 0xa5d   :  { %v16152_v18 = vadd.f32 %v18296_v6, %v18274_v47 }
 0xa5e   :  { %v18276_v4 = vpop.f32.mrf.mxu0  ;;  %v18298_v31 = vpop.f32.mrf.mxu1 }
 0xa5f   :  { %16157 = vst [vmem:[#allocation8] sm:$0xff] %v16152_v18 }
 0xa60   :  { %16162 = vsyncadd [#allocation4], 96  ;;  %s21515_s0 = smov [#allocation8]  }
 0xa61   :  { %s16163_s2 = sshll.u32 %s21515_s0, 4  ;;  %s16164_s2 = int_to_ptr.vmem [resolvable:$true] %s16163_s2 }
 0xa62   :  { %s21479_s6 = scalar_lea.vmem %s16164_s2, 32  ;;  %s21483_s7 = scalar_lea.vmem %s16164_s2, 128 }
 0xa63   :  { %p21480_p1 = scmp.ne.s32.totalorder %s16164_s2, %s21479_s6  ;;  %p21484_p2 = scmp.lt.s32.totalorder %s16164_s2, %s16164_s2 }
 0xa64   :  { %p21485_p3 = scmp.lt.s32.totalorder %s21483_s7, %s21479_s6 }
 0xa66   :  { %p21486_p4 = por %p21485_p3, %p21484_p2 }
 0xa68   :  { %p21487_p5 = pnand %p21486_p4, %p21480_p1 }
 0xa6a   :  { %21490 = shalt.err (!%p21487_p5)
}
 0xa6b   :  { %s21516_s8 = smov 32   ;;  %s21517_s9 = smov 2  }
 0xa6c   :  { %16169 = dma.vmem_to_hbm [thread:$0]  %s16164_s2, 32, %s22297_s3, [#allocation4], %s21516_s8, %s21516_s8, %s21517_s9  }
 0xa6d   :  { %21503 = dma.done.wait [#allocation4], 128  }
 0xa6e   :  { %21504 = vsyncadd [#allocation4], 4294967168 }
 0xa6f   :  { %16173 = vsyncpa [#allocation3], 1 }
 0xa70   :  { %16174 = vsyncpa [#allocation6], 1 }
 0xa71   :  { %16175 = vsyncpa [#allocation4], 1 }

</bundles_post_ra>
